<compile_context>
chip_gen: v6e
topology: v6e:2x2x1
jax: 0.10.0
libtpu: 0.0.40
codegen_flags: <defaults>
</compile_context>

<pallas_src>
import math
import functools

import jax
import jax.numpy as jnp
from jax.experimental import pallas as pl
from jax.experimental.pallas import tpu as pltpu

F32 = jnp.float32


def _bcast_spec(arr):
    """Full-array block, same block index for every grid step (stays resident in VMEM)."""
    nd = arr.ndim
    return pl.BlockSpec(arr.shape, lambda i, _nd=nd: (0,) * _nd)


def _pick_groups_per_tile(bn, s, cap=128):
    """Largest divisor TB of bn such that the (TB*S, .) and (TB, .) blocks are legal
    (second-minor multiple of 8, or full array) and there are >= 2 grid steps;
    falls back to a single full-array tile."""
    best = None
    for d in range(1, bn + 1):
        if bn % d:
            continue
        ok_out = (d % 8 == 0) or (d == bn)
        ok_in = ((d * s) % 8 == 0) or (d == bn)
        if ok_out and ok_in and d <= cap and bn // d >= 2:
            best = d
    return best if best is not None else bn


# --------------------------------------------------------------------------------------
# Fused FeaExtraction kernel: one grid step = TB (b, n) groups = TB * S tokens.
# Token-major layout: tokens on the sublane axis, channels on the lane axis.
# --------------------------------------------------------------------------------------
def _fea_kernel(xyz_ref, feat_ref,
                fdiv_ref, phase_ref, wp_ref, bp_ref, wt_ref, bt_ref,
                wb1_ref, bb1_ref, wb2_ref, bb2_ref,
                wn1_ref, bn1_ref, g1_ref, be1_ref, g2_ref, be2_ref,
                wn2_ref, bn2_ref,
                o_ref, *, n_blocks, tb, s):
    C = wt_ref.shape[1]            # out_channels
    Cr = g1_ref.shape[-1]          # int(out_channels * 0.25)

    # ---- PositionalEncodingFourier + token_projection --------------------------------
    # p[:, j] = xyz[:, j // H] * scale / dim_t[j % H]   (fdiv is the block-diagonal map)
    # cos(x) = sin(x + pi/2): `phase` holds 0 / pi/2 per column so a single sin suffices.
    xyz = xyz_ref[...]                                               # (TM, 3)
    p = (xyz[:, 0:1] * fdiv_ref[0:1, :]
         + xyz[:, 1:2] * fdiv_ref[1:2, :]
         + xyz[:, 2:3] * fdiv_ref[2:3, :]) + phase_ref[...]          # (TM, 3H)
    pe = jnp.dot(jnp.sin(p), wp_ref[...], preferred_element_type=F32) + bp_ref[...]

    # ---- features + pe, then `trans` (1x1 conv + folded BN + ReLU) --------------------
    x = feat_ref[...] + pe                                           # (TM, channels)
    ori = jnp.maximum(
        jnp.dot(x, wt_ref[...], preferred_element_type=F32) + bt_ref[...], 0.0)  # (TM, C)

    # ---- ConvResModule blocks ---------------------------------------------------------
    fea = ori
    for blk in range(n_blocks):
        h = jnp.maximum(
            jnp.dot(fea, wb1_ref[blk], preferred_element_type=F32) + bb1_ref[blk], 0.0)
        y = jnp.dot(h, wb2_ref[blk], preferred_element_type=F32) + bb2_ref[blk]
        fea = jnp.maximum(y + fea, 0.0)

    # ---- adaptive_max_pool1d over S per (b, n) group ----------------------------------
    pooled = jnp.max(fea.reshape(tb, s, C), axis=1)                  # (TB, C)

    # ---- DynamicInteraction.net1 (lane-dense 2*C*Cr wide matmul) ----------------------
    dyn = jnp.maximum(
        jnp.dot(pooled, wn1_ref[...], preferred_element_type=F32) + bn1_ref[...], 0.0)

    # ---- dynamic 2-layer MLP on the pre-block features (VPU path, Cr is tiny) ---------
    pre3 = ori.reshape(tb, s, C)                                     # (TB, S, C)

    # first layer: t[g, s, r] = sum_c pre3[g, s, c] * p1[g, c, r]
    # (host permutation stores p1[., c, r] at kernel column r*C + c -> contiguous slices)
    cols = []
    for r in range(Cr):
        p1r = dyn[:, r * C:(r + 1) * C]                              # (TB, C)
        cols.append(jnp.sum(pre3 * p1r[:, None, :], axis=-1, keepdims=True))  # (TB, S, 1)

    # LayerNorm(Cr) across the Cr columns (kept as separate (TB, S, 1) slabs)
    inv_cr = 1.0 / Cr
    mu = cols[0]
    for ccol in cols[1:]:
        mu = mu + ccol
    mu = mu * inv_cr
    var = jnp.square(cols[0] - mu)
    for ccol in cols[1:]:
        var = var + jnp.square(ccol - mu)
    var = var * inv_cr
    rstd = jax.lax.rsqrt(var + 1e-5)

    # second layer fused with the first-layer LN/ReLU:
    # t2[g, s, c] = sum_r relu(LN(t)[g, s, r]) * p2[g, r, c]
    off = C * Cr
    t2 = jnp.zeros((tb, s, C), F32)
    for r in range(Cr):
        tr = jnp.maximum(
            (cols[r] - mu) * rstd * g1_ref[:, :, r:r + 1] + be1_ref[:, :, r:r + 1], 0.0)
        p2r = dyn[:, off + r * C: off + (r + 1) * C]                 # (TB, C)
        t2 = t2 + tr * p2r[:, None, :]

    # LayerNorm(C) + ReLU
    mu2 = jnp.mean(t2, axis=-1, keepdims=True)
    var2 = jnp.mean(jnp.square(t2 - mu2), axis=-1, keepdims=True)
    t2 = jnp.maximum(
        (t2 - mu2) * jax.lax.rsqrt(var2 + 1e-5) * g2_ref[...] + be2_ref[...], 0.0)

    # ---- DynamicInteraction.net2 (contract over flattened (s, c)) + residual ----------
    acc = jnp.zeros((tb, C), F32)
    for ss in range(s):
        acc = acc + jnp.dot(t2[:, ss, :], wn2_ref[ss], preferred_element_type=F32)
    y2 = jnp.maximum(acc + bn2_ref[...], 0.0)                        # net2: conv+BN+ReLU
    o_ref[...] = jnp.maximum(y2 + pooled, 0.0)                       # relu3(net2 + features)


# --------------------------------------------------------------------------------------
# Host-side parameter preparation (BN already folded; here: stacking / permutation /
# reshape into the layouts the fused kernel consumes).
# --------------------------------------------------------------------------------------
def prepare_kernel_params(params, *, out_channels, num_sample):
    C = out_channels
    Cr = C // 4
    kp = {}
    kp['wp'] = params['wp']
    kp['bp'] = params['bp'].reshape(1, -1)
    kp['wt'] = params['wt']
    kp['bt'] = params['bt'].reshape(1, -1)

    w1s, b1s, w2s, b2s = [], [], [], []
    for (w1, b1, w2, b2) in params['blocks']:
        w1s.append(w1); b1s.append(b1.reshape(1, -1))
        w2s.append(w2); b2s.append(b2.reshape(1, -1))
    kp['wb1'] = jnp.stack(w1s); kp['bb1'] = jnp.stack(b1s)
    kp['wb2'] = jnp.stack(w2s); kp['bb2'] = jnp.stack(b2s)

    # Canonical net1 layout: column c*Cr + r  -> p1[c, r];  column C*Cr + r*C + c -> p2[r, c].
    # Kernel layout: column r*C + c -> p1[c, r] (p2 half unchanged), so that each r-slice of
    # p1 is a contiguous lane block.  Apply the same permutation when loading a checkpoint.
    k = jnp.arange(C * Cr)
    perm = jnp.concatenate([(k % C) * Cr + (k // C), C * Cr + k])
    kp['wn1'] = params['w_n1'][:, perm]
    kp['bn1'] = params['b_n1'].reshape(1, -1)[:, perm]

    kp['g1'] = params['g1'].reshape(1, 1, Cr)
    kp['be1'] = params['be1'].reshape(1, 1, Cr)
    kp['g2'] = params['g2'].reshape(1, 1, C)
    kp['be2'] = params['be2'].reshape(1, 1, C)
    kp['wn2'] = params['w_n2'].reshape(num_sample, C, C)   # [s, c, out] = w[s*C + c, out]
    kp['bn2'] = params['b_n2'].reshape(1, -1)
    return kp


# --------------------------------------------------------------------------------------
# Full FeaExtraction forward (use_pos_emb=True path): thin glue + one fused pallas_call.
# --------------------------------------------------------------------------------------
def fea_extraction_forward(x, params, *, out_channels, temperature=10000.0,
                           groups_per_tile=None):
    B, ctot, N, S = x.shape
    channels = ctot - 3
    H = channels // 2
    C = out_channels
    BN = B * N
    M = BN * S

    TB = groups_per_tile if groups_per_tile is not None else _pick_groups_per_tile(BN, S)
    assert BN % TB == 0
    TM = TB * S
    grid = (BN // TB,)

    # token-major activations: tokens ordered (b, n, s) on rows, channels on lanes
    xyz = jnp.transpose(x[:, :3], (0, 2, 3, 1)).reshape(M, 3)
    feat = jnp.transpose(x[:, 3:], (0, 2, 3, 1)).reshape(M, channels)

    # Fourier constants: fdiv[c, j] = scale / dim_t[j % H] if j // H == c else 0
    # phase[j] = 0 (-> sin) for even j % H, pi/2 (-> cos) for odd j % H.
    scale = 2.0 * math.pi / (1.0 + 1e-6)                  # max_len = (1, 1, 1)
    t_idx = jnp.arange(H, dtype=F32)
    dim_t = temperature ** (2.0 * jnp.floor(t_idx / 2.0) / H)
    fdiv = jnp.kron(jnp.eye(3, dtype=F32), (scale / dim_t)[None, :])          # (3, 3H)
    phase = jnp.tile(jnp.where(jnp.arange(H) % 2 == 0,
                               jnp.float32(0.0), jnp.float32(0.5 * math.pi)), 3)[None, :]

    kp = prepare_kernel_params(params, out_channels=C, num_sample=S)
    n_blocks = len(params['blocks'])

    kernel = functools.partial(_fea_kernel, n_blocks=n_blocks, tb=TB, s=S)

    weight_args = (fdiv, phase, kp['wp'], kp['bp'], kp['wt'], kp['bt'],
                   kp['wb1'], kp['bb1'], kp['wb2'], kp['bb2'],
                   kp['wn1'], kp['bn1'], kp['g1'], kp['be1'], kp['g2'], kp['be2'],
                   kp['wn2'], kp['bn2'])

    out = pl.pallas_call(
        kernel,
        out_shape=jax.ShapeDtypeStruct((BN, C), F32),
        grid=grid,
        in_specs=[pl.BlockSpec((TM, 3), lambda i: (i, 0)),
                  pl.BlockSpec((TM, channels), lambda i: (i, 0))]
                 + [_bcast_spec(w) for w in weight_args],
        out_specs=pl.BlockSpec((TB, C), lambda i: (i, 0)),
        compiler_params=pltpu.CompilerParams(dimension_semantics=("parallel",)),
    )(xyz, feat, *weight_args)

    return jnp.transpose(out.reshape(B, N, C), (0, 2, 1))             # (B, C, N)


# --------------------------------------------------------------------------------------
# Pure-JAX (XLA) reference with the canonical math — used as a correctness check.
# --------------------------------------------------------------------------------------
def fea_extraction_reference(x, params, *, out_channels, temperature=10000.0):
    B, ctot, N, S = x.shape
    channels = ctot - 3
    H = channels // 2
    C = out_channels
    Cr = C // 4
    M = B * N * S

    xyz = jnp.transpose(x[:, :3], (0, 2, 3, 1)).reshape(M, 3)
    feat = jnp.transpose(x[:, 3:], (0, 2, 3, 1)).reshape(M, channels)

    scale = 2.0 * math.pi / (1.0 + 1e-6)
    t_idx = jnp.arange(H, dtype=F32)
    dim_t = temperature ** (2.0 * jnp.floor(t_idx / 2.0) / H)

    def enc(col):                                        # (M, 1) -> (M, H)
        pp = col * scale / dim_t[None, :]
        ev = jnp.sin(pp[:, 0::2])
        od = jnp.cos(pp[:, 1::2])
        return jnp.stack([ev, od], axis=2).reshape(M, H)

    pos = jnp.concatenate([enc(xyz[:, 0:1]), enc(xyz[:, 1:2]), enc(xyz[:, 2:3])], axis=1)
    pe = pos @ params['wp'] + params['bp']
    h = feat + pe
    ori = jnp.maximum(h @ params['wt'] + params['bt'], 0.0)

    fea = ori
    for (w1, b1, w2, b2) in params['blocks']:
        t = jnp.maximum(fea @ w1 + b1, 0.0)
        fea = jnp.maximum(t @ w2 + b2 + fea, 0.0)

    pooled = jnp.max(fea.reshape(B * N, S, C), axis=1)

    dyn = jnp.maximum(pooled @ params['w_n1'] + params['b_n1'], 0.0)
    p1 = dyn[:, :C * Cr].reshape(B * N, C, Cr)
    p2 = dyn[:, C * Cr:].reshape(B * N, Cr, C)
    pre = ori.reshape(B * N, S, C)

    def layer_norm(v, g, b):
        mu = jnp.mean(v, axis=-1, keepdims=True)
        var = jnp.mean(jnp.square(v - mu), axis=-1, keepdims=True)
        return (v - mu) * jax.lax.rsqrt(var + 1e-5) * g + b

    t = jnp.einsum('gsc,gcr->gsr', pre, p1)
    t = jnp.maximum(layer_norm(t, params['g1'].reshape(1, 1, Cr),
                               params['be1'].reshape(1, 1, Cr)), 0.0)
    t2 = jnp.einsum('gsr,grc->gsc', t, p2)
    t2 = jnp.maximum(layer_norm(t2, params['g2'].reshape(1, 1, C),
                                params['be2'].reshape(1, 1, C)), 0.0)

    out = jnp.maximum(t2.reshape(B * N, S * C) @ params['w_n2'] + params['b_n2'], 0.0)
    out = jnp.maximum(out + pooled, 0.0)
    return jnp.transpose(out.reshape(B, N, C), (0, 2, 1))


# --------------------------------------------------------------------------------------
# Deterministic parameter init (canonical PyTorch-style layout, BNs folded, inference)
# --------------------------------------------------------------------------------------
def init_params(key, channels, out_c, num_sample, blocks, res_expansion=1.0):
    H = channels // 2
    C = out_c
    Cr = C // 4
    keys = iter(jax.random.split(key, 64))

    def nrm(shape, s=0.2):
        return s * jax.random.normal(next(keys), shape, dtype=F32)

    def bn(cout):
        gamma = 1.0 + nrm((cout,), 0.1)
        beta = nrm((cout,), 0.1)
        mean = nrm((cout,), 0.1)
        var = 1.0 + 0.1 * jnp.abs(jax.random.normal(next(keys), (cout,), dtype=F32))
        return gamma, beta, mean, var

    def fold(w, bn_p, eps=1e-5):
        gamma, beta, mean, var = bn_p
        sc = gamma / jnp.sqrt(var + eps)
        return w * sc[None, :], (beta - mean * sc)[None, :]

    p = {}
    # PositionalEncodingFourier.token_projection: Linear(3H -> channels)
    p['wp'] = nrm((3 * H, channels))
    p['bp'] = nrm((1, channels), 0.1)
    # trans: Conv2d(channels -> C, 1) + BN2d (folded)
    p['wt'], p['bt'] = fold(nrm((channels, C)), bn(C))
    # ConvResModule blocks
    ch_mid = int(C * res_expansion)
    blks = []
    for _ in range(blocks):
        w1, b1 = fold(nrm((C, ch_mid)), bn(ch_mid))
        w2, b2 = fold(nrm((ch_mid, C)), bn(C))
        blks.append((w1, b1, w2, b2))
    p['blocks'] = blks
    # DynamicInteraction
    p['w_n1'], p['b_n1'] = fold(nrm((C, 2 * C * Cr)), bn(2 * C * Cr))   # net1
    p['g1'] = 1.0 + nrm((1, Cr), 0.1)
    p['be1'] = nrm((1, Cr), 0.1)
    p['g2'] = 1.0 + nrm((1, C), 0.1)
    p['be2'] = nrm((1, C), 0.1)
    p['w_n2'], p['b_n2'] = fold(nrm((C * num_sample, C)), bn(C))        # net2
    return p


if __name__ == "__main__":
    # FeaExtraction(channels=8, out_channels=16, num_sample=8, blocks=2, res_espension=1.0)
    B, channels, N, S = 2, 8, 16, 8
    out_c = 16
    blocks = 2

    key = jax.random.PRNGKey(0)
    kx, kp_key = jax.random.split(key)
    x = jax.random.normal(kx, (B, 3 + channels, N, S), dtype=F32)   # (B, 3+channels, N, S)
    params = init_params(kp_key, channels, out_c, S, blocks)

    fwd = jax.jit(functools.partial(fea_extraction_forward, out_channels=out_c))
    out = jax.block_until_ready(fwd(x, params))
    assert out.shape == (B, out_c, N), out.shape
    assert bool(jnp.all(jnp.isfinite(out)))

    # pure-JAX reference check (canonical math, full-precision matmuls)
    with jax.default_matmul_precision("highest"):
        ref = fea_extraction_reference(x, params, out_channels=out_c)
    err = float(jnp.max(jnp.abs(out - ref)))
    assert err < 3e-2, f"kernel/reference mismatch: max abs err = {err}"

    print("KERNEL_OK")
</pallas_src>

<mosaic_0001>
module attributes {stable_mosaic.version = 11 : i64} {
  func.func @_fea_kernel(%arg0: i32, %arg1: memref<128x3xf32, #tpu.memory_space<vmem>>, %arg2: memref<128x8xf32, #tpu.memory_space<vmem>>, %arg3: memref<3x12xf32, #tpu.memory_space<vmem>>, %arg4: memref<1x12xf32, #tpu.memory_space<vmem>>, %arg5: memref<12x8xf32, #tpu.memory_space<vmem>>, %arg6: memref<1x8xf32, #tpu.memory_space<vmem>>, %arg7: memref<8x16xf32, #tpu.memory_space<vmem>>, %arg8: memref<1x16xf32, #tpu.memory_space<vmem>>, %arg9: memref<2x16x16xf32, #tpu.memory_space<vmem>>, %arg10: memref<2x1x16xf32, #tpu.memory_space<vmem>>, %arg11: memref<2x16x16xf32, #tpu.memory_space<vmem>>, %arg12: memref<2x1x16xf32, #tpu.memory_space<vmem>>, %arg13: memref<16x128xf32, #tpu.memory_space<vmem>>, %arg14: memref<1x128xf32, #tpu.memory_space<vmem>>, %arg15: memref<1x1x4xf32, #tpu.memory_space<vmem>>, %arg16: memref<1x1x4xf32, #tpu.memory_space<vmem>>, %arg17: memref<1x1x16xf32, #tpu.memory_space<vmem>>, %arg18: memref<1x1x16xf32, #tpu.memory_space<vmem>>, %arg19: memref<8x16x16xf32, #tpu.memory_space<vmem>>, %arg20: memref<1x16xf32, #tpu.memory_space<vmem>>, %arg21: memref<16x16xf32, #tpu.memory_space<vmem>>) attributes {dimension_semantics = [#tpu.dimension_semantics<parallel>], iteration_bounds = array<i64: 2>, scalar_prefetch = 0 : i64, scratch_operands = 0 : i64, tpu.core_type = #tpu.core_type<tc>, window_params = [{transform_indices = @transform_0, window_bounds = array<i64: 128, 3>}, {transform_indices = @transform_1, window_bounds = array<i64: 128, 8>}, {pipeline_mode = #tpu.pipeline_mode<synchronous>, transform_indices = @transform_2, window_bounds = array<i64: 3, 12>}, {pipeline_mode = #tpu.pipeline_mode<synchronous>, transform_indices = @transform_3, window_bounds = array<i64: 1, 12>}, {pipeline_mode = #tpu.pipeline_mode<synchronous>, transform_indices = @transform_4, window_bounds = array<i64: 12, 8>}, {pipeline_mode = #tpu.pipeline_mode<synchronous>, transform_indices = @transform_5, window_bounds = array<i64: 1, 8>}, {pipeline_mode = #tpu.pipeline_mode<synchronous>, transform_indices = @transform_6, window_bounds = array<i64: 8, 16>}, {pipeline_mode = #tpu.pipeline_mode<synchronous>, transform_indices = @transform_7, window_bounds = array<i64: 1, 16>}, {pipeline_mode = #tpu.pipeline_mode<synchronous>, transform_indices = @transform_8, window_bounds = array<i64: 2, 16, 16>}, {pipeline_mode = #tpu.pipeline_mode<synchronous>, transform_indices = @transform_9, window_bounds = array<i64: 2, 1, 16>}, {pipeline_mode = #tpu.pipeline_mode<synchronous>, transform_indices = @transform_10, window_bounds = array<i64: 2, 16, 16>}, {pipeline_mode = #tpu.pipeline_mode<synchronous>, transform_indices = @transform_11, window_bounds = array<i64: 2, 1, 16>}, {pipeline_mode = #tpu.pipeline_mode<synchronous>, transform_indices = @transform_12, window_bounds = array<i64: 16, 128>}, {pipeline_mode = #tpu.pipeline_mode<synchronous>, transform_indices = @transform_13, window_bounds = array<i64: 1, 128>}, {pipeline_mode = #tpu.pipeline_mode<synchronous>, transform_indices = @transform_14, window_bounds = array<i64: 1, 1, 4>}, {pipeline_mode = #tpu.pipeline_mode<synchronous>, transform_indices = @transform_15, window_bounds = array<i64: 1, 1, 4>}, {pipeline_mode = #tpu.pipeline_mode<synchronous>, transform_indices = @transform_16, window_bounds = array<i64: 1, 1, 16>}, {pipeline_mode = #tpu.pipeline_mode<synchronous>, transform_indices = @transform_17, window_bounds = array<i64: 1, 1, 16>}, {pipeline_mode = #tpu.pipeline_mode<synchronous>, transform_indices = @transform_18, window_bounds = array<i64: 8, 16, 16>}, {pipeline_mode = #tpu.pipeline_mode<synchronous>, transform_indices = @transform_19, window_bounds = array<i64: 1, 16>}, {transform_indices = @transform_20, window_bounds = array<i64: 16, 16>}]} {
    %c0 = arith.constant 0 : index
    %c0_0 = arith.constant 0 : index
    %0 = vector.load %arg1[%c0, %c0_0] : memref<128x3xf32, #tpu.memory_space<vmem>>, vector<128x3xf32>
    %1 = vector.extract_strided_slice %0 {offsets = [0, 0], sizes = [128, 1], strides = [1, 1]} : vector<128x3xf32> to vector<128x1xf32>
    %c0_1 = arith.constant 0 : index
    %c0_2 = arith.constant 0 : index
    %2 = vector.load %arg3[%c0_1, %c0_2] : memref<3x12xf32, #tpu.memory_space<vmem>>, vector<1x12xf32>
    %3 = vector.broadcast %1 : vector<128x1xf32> to vector<128x12xf32>
    %4 = vector.broadcast %2 : vector<1x12xf32> to vector<128x12xf32>
    %5 = arith.mulf %3, %4 : vector<128x12xf32>
    %6 = vector.extract_strided_slice %0 {offsets = [0, 1], sizes = [128, 1], strides = [1, 1]} : vector<128x3xf32> to vector<128x1xf32>
    %c1 = arith.constant 1 : index
    %c0_3 = arith.constant 0 : index
    %7 = vector.load %arg3[%c1, %c0_3] : memref<3x12xf32, #tpu.memory_space<vmem>>, vector<1x12xf32>
    %8 = vector.broadcast %6 : vector<128x1xf32> to vector<128x12xf32>
    %9 = vector.broadcast %7 : vector<1x12xf32> to vector<128x12xf32>
    %10 = arith.mulf %8, %9 : vector<128x12xf32>
    %11 = arith.addf %5, %10 : vector<128x12xf32>
    %12 = vector.extract_strided_slice %0 {offsets = [0, 2], sizes = [128, 1], strides = [1, 1]} : vector<128x3xf32> to vector<128x1xf32>
    %c2 = arith.constant 2 : index
    %c0_4 = arith.constant 0 : index
    %13 = vector.load %arg3[%c2, %c0_4] : memref<3x12xf32, #tpu.memory_space<vmem>>, vector<1x12xf32>
    %14 = vector.broadcast %12 : vector<128x1xf32> to vector<128x12xf32>
    %15 = vector.broadcast %13 : vector<1x12xf32> to vector<128x12xf32>
    %16 = arith.mulf %14, %15 : vector<128x12xf32>
    %17 = arith.addf %11, %16 : vector<128x12xf32>
    %c0_5 = arith.constant 0 : index
    %c0_6 = arith.constant 0 : index
    %18 = vector.load %arg4[%c0_5, %c0_6] : memref<1x12xf32, #tpu.memory_space<vmem>>, vector<1x12xf32>
    %19 = vector.broadcast %18 : vector<1x12xf32> to vector<128x12xf32>
    %20 = arith.addf %17, %19 : vector<128x12xf32>
    %21 = math.sin %20 : vector<128x12xf32>
    %c0_7 = arith.constant 0 : index
    %c0_8 = arith.constant 0 : index
    %22 = vector.load %arg5[%c0_7, %c0_8] : memref<12x8xf32, #tpu.memory_space<vmem>>, vector<12x8xf32>
    %cst = arith.constant dense<0.000000e+00> : vector<128x8xf32>
    %23 = tpu.matmul %21, %22, %cst {dimension_numbers = #tpu.dot_dimension_numbers<[1], [0], [0], [1], [0, 0, 1, 1], [], []>} : vector<128x12xf32>, vector<12x8xf32>, vector<128x8xf32> -> vector<128x8xf32>
    %c0_9 = arith.constant 0 : index
    %c0_10 = arith.constant 0 : index
    %24 = vector.load %arg6[%c0_9, %c0_10] : memref<1x8xf32, #tpu.memory_space<vmem>>, vector<1x8xf32>
    %25 = vector.broadcast %24 : vector<1x8xf32> to vector<128x8xf32>
    %26 = arith.addf %23, %25 : vector<128x8xf32>
    %c0_11 = arith.constant 0 : index
    %c0_12 = arith.constant 0 : index
    %27 = vector.load %arg2[%c0_11, %c0_12] : memref<128x8xf32, #tpu.memory_space<vmem>>, vector<128x8xf32>
    %28 = arith.addf %27, %26 : vector<128x8xf32>
    %c0_13 = arith.constant 0 : index
    %c0_14 = arith.constant 0 : index
    %29 = vector.load %arg7[%c0_13, %c0_14] : memref<8x16xf32, #tpu.memory_space<vmem>>, vector<8x16xf32>
    %cst_15 = arith.constant dense<0.000000e+00> : vector<128x16xf32>
    %30 = tpu.matmul %28, %29, %cst_15 {dimension_numbers = #tpu.dot_dimension_numbers<[1], [0], [0], [1], [0, 0, 1, 1], [], []>} : vector<128x8xf32>, vector<8x16xf32>, vector<128x16xf32> -> vector<128x16xf32>
    %c0_16 = arith.constant 0 : index
    %c0_17 = arith.constant 0 : index
    %31 = vector.load %arg8[%c0_16, %c0_17] : memref<1x16xf32, #tpu.memory_space<vmem>>, vector<1x16xf32>
    %32 = vector.broadcast %31 : vector<1x16xf32> to vector<128x16xf32>
    %33 = arith.addf %30, %32 : vector<128x16xf32>
    %cst_18 = arith.constant 0.000000e+00 : f32
    %34 = vector.broadcast %cst_18 : f32 to vector<128x16xf32>
    %35 = arith.maximumf %33, %34 : vector<128x16xf32>
    %c0_19 = arith.constant 0 : index
    %c0_20 = arith.constant 0 : index
    %c0_21 = arith.constant 0 : index
    %36 = vector.load %arg9[%c0_19, %c0_20, %c0_21] : memref<2x16x16xf32, #tpu.memory_space<vmem>>, vector<1x16x16xf32>
    %37 = vector.shape_cast %36 : vector<1x16x16xf32> to vector<16x16xf32>
    %cst_22 = arith.constant dense<0.000000e+00> : vector<128x16xf32>
    %38 = tpu.matmul %35, %37, %cst_22 {dimension_numbers = #tpu.dot_dimension_numbers<[1], [0], [0], [1], [0, 0, 1, 1], [], []>} : vector<128x16xf32>, vector<16x16xf32>, vector<128x16xf32> -> vector<128x16xf32>
    %c0_23 = arith.constant 0 : index
    %c0_24 = arith.constant 0 : index
    %c0_25 = arith.constant 0 : index
    %39 = vector.load %arg10[%c0_23, %c0_24, %c0_25] : memref<2x1x16xf32, #tpu.memory_space<vmem>>, vector<1x1x16xf32>
    %40 = vector.shape_cast %39 : vector<1x1x16xf32> to vector<1x16xf32>
    %41 = vector.broadcast %40 : vector<1x16xf32> to vector<128x16xf32>
    %42 = arith.addf %38, %41 : vector<128x16xf32>
    %cst_26 = arith.constant 0.000000e+00 : f32
    %43 = vector.broadcast %cst_26 : f32 to vector<128x16xf32>
    %44 = arith.maximumf %42, %43 : vector<128x16xf32>
    %c0_27 = arith.constant 0 : index
    %c0_28 = arith.constant 0 : index
    %c0_29 = arith.constant 0 : index
    %45 = vector.load %arg11[%c0_27, %c0_28, %c0_29] : memref<2x16x16xf32, #tpu.memory_space<vmem>>, vector<1x16x16xf32>
    %46 = vector.shape_cast %45 : vector<1x16x16xf32> to vector<16x16xf32>
    %cst_30 = arith.constant dense<0.000000e+00> : vector<128x16xf32>
    %47 = tpu.matmul %44, %46, %cst_30 {dimension_numbers = #tpu.dot_dimension_numbers<[1], [0], [0], [1], [0, 0, 1, 1], [], []>} : vector<128x16xf32>, vector<16x16xf32>, vector<128x16xf32> -> vector<128x16xf32>
    %c0_31 = arith.constant 0 : index
    %c0_32 = arith.constant 0 : index
    %c0_33 = arith.constant 0 : index
    %48 = vector.load %arg12[%c0_31, %c0_32, %c0_33] : memref<2x1x16xf32, #tpu.memory_space<vmem>>, vector<1x1x16xf32>
    %49 = vector.shape_cast %48 : vector<1x1x16xf32> to vector<1x16xf32>
    %50 = vector.broadcast %49 : vector<1x16xf32> to vector<128x16xf32>
    %51 = arith.addf %47, %50 : vector<128x16xf32>
    %52 = arith.addf %51, %35 : vector<128x16xf32>
    %cst_34 = arith.constant 0.000000e+00 : f32
    %53 = vector.broadcast %cst_34 : f32 to vector<128x16xf32>
    %54 = arith.maximumf %52, %53 : vector<128x16xf32>
    %c1_35 = arith.constant 1 : index
    %c0_36 = arith.constant 0 : index
    %c0_37 = arith.constant 0 : index
    %55 = vector.load %arg9[%c1_35, %c0_36, %c0_37] : memref<2x16x16xf32, #tpu.memory_space<vmem>>, vector<1x16x16xf32>
    %56 = vector.shape_cast %55 : vector<1x16x16xf32> to vector<16x16xf32>
    %cst_38 = arith.constant dense<0.000000e+00> : vector<128x16xf32>
    %57 = tpu.matmul %54, %56, %cst_38 {dimension_numbers = #tpu.dot_dimension_numbers<[1], [0], [0], [1], [0, 0, 1, 1], [], []>} : vector<128x16xf32>, vector<16x16xf32>, vector<128x16xf32> -> vector<128x16xf32>
    %c1_39 = arith.constant 1 : index
    %c0_40 = arith.constant 0 : index
    %c0_41 = arith.constant 0 : index
    %58 = vector.load %arg10[%c1_39, %c0_40, %c0_41] : memref<2x1x16xf32, #tpu.memory_space<vmem>>, vector<1x1x16xf32>
    %59 = vector.shape_cast %58 : vector<1x1x16xf32> to vector<1x16xf32>
    %60 = vector.broadcast %59 : vector<1x16xf32> to vector<128x16xf32>
    %61 = arith.addf %57, %60 : vector<128x16xf32>
    %cst_42 = arith.constant 0.000000e+00 : f32
    %62 = vector.broadcast %cst_42 : f32 to vector<128x16xf32>
    %63 = arith.maximumf %61, %62 : vector<128x16xf32>
    %c1_43 = arith.constant 1 : index
    %c0_44 = arith.constant 0 : index
    %c0_45 = arith.constant 0 : index
    %64 = vector.load %arg11[%c1_43, %c0_44, %c0_45] : memref<2x16x16xf32, #tpu.memory_space<vmem>>, vector<1x16x16xf32>
    %65 = vector.shape_cast %64 : vector<1x16x16xf32> to vector<16x16xf32>
    %cst_46 = arith.constant dense<0.000000e+00> : vector<128x16xf32>
    %66 = tpu.matmul %63, %65, %cst_46 {dimension_numbers = #tpu.dot_dimension_numbers<[1], [0], [0], [1], [0, 0, 1, 1], [], []>} : vector<128x16xf32>, vector<16x16xf32>, vector<128x16xf32> -> vector<128x16xf32>
    %c1_47 = arith.constant 1 : index
    %c0_48 = arith.constant 0 : index
    %c0_49 = arith.constant 0 : index
    %67 = vector.load %arg12[%c1_47, %c0_48, %c0_49] : memref<2x1x16xf32, #tpu.memory_space<vmem>>, vector<1x1x16xf32>
    %68 = vector.shape_cast %67 : vector<1x1x16xf32> to vector<1x16xf32>
    %69 = vector.broadcast %68 : vector<1x16xf32> to vector<128x16xf32>
    %70 = arith.addf %66, %69 : vector<128x16xf32>
    %71 = arith.addf %70, %54 : vector<128x16xf32>
    %cst_50 = arith.constant 0.000000e+00 : f32
    %72 = vector.broadcast %cst_50 : f32 to vector<128x16xf32>
    %73 = arith.maximumf %71, %72 : vector<128x16xf32>
    %74 = vector.shape_cast %73 : vector<128x16xf32> to vector<16x8x16xf32>
    %cst_51 = arith.constant dense<0xFF800000> : vector<16x16xf32>
    %75 = vector.multi_reduction <maximumf>, %74, %cst_51 [1] : vector<16x8x16xf32> to vector<16x16xf32>
    %c0_52 = arith.constant 0 : index
    %c0_53 = arith.constant 0 : index
    %76 = vector.load %arg13[%c0_52, %c0_53] : memref<16x128xf32, #tpu.memory_space<vmem>>, vector<16x128xf32>
    %cst_54 = arith.constant dense<0.000000e+00> : vector<16x128xf32>
    %77 = tpu.matmul %75, %76, %cst_54 {dimension_numbers = #tpu.dot_dimension_numbers<[1], [0], [0], [1], [0, 0, 1, 1], [], []>} : vector<16x16xf32>, vector<16x128xf32>, vector<16x128xf32> -> vector<16x128xf32>
    %c0_55 = arith.constant 0 : index
    %c0_56 = arith.constant 0 : index
    %78 = vector.load %arg14[%c0_55, %c0_56] : memref<1x128xf32, #tpu.memory_space<vmem>>, vector<1x128xf32>
    %79 = vector.broadcast %78 : vector<1x128xf32> to vector<16x128xf32>
    %80 = arith.addf %77, %79 : vector<16x128xf32>
    %cst_57 = arith.constant 0.000000e+00 : f32
    %81 = vector.broadcast %cst_57 : f32 to vector<16x128xf32>
    %82 = arith.maximumf %80, %81 : vector<16x128xf32>
    %83 = vector.shape_cast %35 : vector<128x16xf32> to vector<16x8x16xf32>
    %84 = vector.extract_strided_slice %82 {offsets = [0, 0], sizes = [16, 16], strides = [1, 1]} : vector<16x128xf32> to vector<16x16xf32>
    %85 = vector.shape_cast %84 : vector<16x16xf32> to vector<16x1x16xf32>
    %86 = vector.broadcast %85 : vector<16x1x16xf32> to vector<16x8x16xf32>
    %87 = arith.mulf %83, %86 : vector<16x8x16xf32>
    %cst_58 = arith.constant dense<0.000000e+00> : vector<16x8xf32>
    %88 = vector.multi_reduction <add>, %87, %cst_58 [2] : vector<16x8x16xf32> to vector<16x8xf32>
    %89 = vector.shape_cast %88 : vector<16x8xf32> to vector<16x8x1xf32>
    %90 = vector.extract_strided_slice %82 {offsets = [0, 16], sizes = [16, 16], strides = [1, 1]} : vector<16x128xf32> to vector<16x16xf32>
    %91 = vector.shape_cast %90 : vector<16x16xf32> to vector<16x1x16xf32>
    %92 = vector.broadcast %91 : vector<16x1x16xf32> to vector<16x8x16xf32>
    %93 = arith.mulf %83, %92 : vector<16x8x16xf32>
    %cst_59 = arith.constant dense<0.000000e+00> : vector<16x8xf32>
    %94 = vector.multi_reduction <add>, %93, %cst_59 [2] : vector<16x8x16xf32> to vector<16x8xf32>
    %95 = vector.shape_cast %94 : vector<16x8xf32> to vector<16x8x1xf32>
    %96 = vector.extract_strided_slice %82 {offsets = [0, 32], sizes = [16, 16], strides = [1, 1]} : vector<16x128xf32> to vector<16x16xf32>
    %97 = vector.shape_cast %96 : vector<16x16xf32> to vector<16x1x16xf32>
    %98 = vector.broadcast %97 : vector<16x1x16xf32> to vector<16x8x16xf32>
    %99 = arith.mulf %83, %98 : vector<16x8x16xf32>
    %cst_60 = arith.constant dense<0.000000e+00> : vector<16x8xf32>
    %100 = vector.multi_reduction <add>, %99, %cst_60 [2] : vector<16x8x16xf32> to vector<16x8xf32>
    %101 = vector.shape_cast %100 : vector<16x8xf32> to vector<16x8x1xf32>
    %102 = vector.extract_strided_slice %82 {offsets = [0, 48], sizes = [16, 16], strides = [1, 1]} : vector<16x128xf32> to vector<16x16xf32>
    %103 = vector.shape_cast %102 : vector<16x16xf32> to vector<16x1x16xf32>
    %104 = vector.broadcast %103 : vector<16x1x16xf32> to vector<16x8x16xf32>
    %105 = arith.mulf %83, %104 : vector<16x8x16xf32>
    %cst_61 = arith.constant dense<0.000000e+00> : vector<16x8xf32>
    %106 = vector.multi_reduction <add>, %105, %cst_61 [2] : vector<16x8x16xf32> to vector<16x8xf32>
    %107 = vector.shape_cast %106 : vector<16x8xf32> to vector<16x8x1xf32>
    %108 = arith.addf %89, %95 : vector<16x8x1xf32>
    %109 = arith.addf %108, %101 : vector<16x8x1xf32>
    %110 = arith.addf %109, %107 : vector<16x8x1xf32>
    %cst_62 = arith.constant 2.500000e-01 : f32
    %111 = vector.broadcast %cst_62 : f32 to vector<16x8x1xf32>
    %112 = arith.mulf %110, %111 : vector<16x8x1xf32>
    %113 = arith.subf %89, %112 : vector<16x8x1xf32>
    %114 = arith.mulf %113, %113 : vector<16x8x1xf32>
    %115 = arith.subf %95, %112 : vector<16x8x1xf32>
    %116 = arith.mulf %115, %115 : vector<16x8x1xf32>
    %117 = arith.addf %114, %116 : vector<16x8x1xf32>
    %118 = arith.subf %101, %112 : vector<16x8x1xf32>
    %119 = arith.mulf %118, %118 : vector<16x8x1xf32>
    %120 = arith.addf %117, %119 : vector<16x8x1xf32>
    %121 = arith.subf %107, %112 : vector<16x8x1xf32>
    %122 = arith.mulf %121, %121 : vector<16x8x1xf32>
    %123 = arith.addf %120, %122 : vector<16x8x1xf32>
    %cst_63 = arith.constant 2.500000e-01 : f32
    %124 = vector.broadcast %cst_63 : f32 to vector<16x8x1xf32>
    %125 = arith.mulf %123, %124 : vector<16x8x1xf32>
    %cst_64 = arith.constant 9.99999974E-6 : f32
    %126 = vector.broadcast %cst_64 : f32 to vector<16x8x1xf32>
    %127 = arith.addf %125, %126 : vector<16x8x1xf32>
    %128 = math.rsqrt %127 : vector<16x8x1xf32>
    %cst_65 = arith.constant 0.000000e+00 : f32
    %129 = vector.broadcast %cst_65 : f32 to vector<16x8x16xf32>
    %130 = arith.subf %89, %112 : vector<16x8x1xf32>
    %131 = arith.mulf %130, %128 : vector<16x8x1xf32>
    %c0_66 = arith.constant 0 : index
    %c0_67 = arith.constant 0 : index
    %c0_68 = arith.constant 0 : index
    %132 = vector.load %arg15[%c0_66, %c0_67, %c0_68] : memref<1x1x4xf32, #tpu.memory_space<vmem>>, vector<1x1x1xf32>
    %133 = vector.broadcast %132 : vector<1x1x1xf32> to vector<16x8x1xf32>
    %134 = arith.mulf %131, %133 : vector<16x8x1xf32>
    %c0_69 = arith.constant 0 : index
    %c0_70 = arith.constant 0 : index
    %c0_71 = arith.constant 0 : index
    %135 = vector.load %arg16[%c0_69, %c0_70, %c0_71] : memref<1x1x4xf32, #tpu.memory_space<vmem>>, vector<1x1x1xf32>
    %136 = vector.broadcast %135 : vector<1x1x1xf32> to vector<16x8x1xf32>
    %137 = arith.addf %134, %136 : vector<16x8x1xf32>
    %cst_72 = arith.constant 0.000000e+00 : f32
    %138 = vector.broadcast %cst_72 : f32 to vector<16x8x1xf32>
    %139 = arith.maximumf %137, %138 : vector<16x8x1xf32>
    %140 = vector.extract_strided_slice %82 {offsets = [0, 64], sizes = [16, 16], strides = [1, 1]} : vector<16x128xf32> to vector<16x16xf32>
    %141 = vector.shape_cast %140 : vector<16x16xf32> to vector<16x1x16xf32>
    %142 = vector.broadcast %139 : vector<16x8x1xf32> to vector<16x8x16xf32>
    %143 = vector.broadcast %141 : vector<16x1x16xf32> to vector<16x8x16xf32>
    %144 = arith.mulf %142, %143 : vector<16x8x16xf32>
    %145 = arith.addf %129, %144 : vector<16x8x16xf32>
    %146 = arith.subf %95, %112 : vector<16x8x1xf32>
    %147 = arith.mulf %146, %128 : vector<16x8x1xf32>
    %c0_73 = arith.constant 0 : index
    %c0_74 = arith.constant 0 : index
    %c1_75 = arith.constant 1 : index
    %148 = vector.load %arg15[%c0_73, %c0_74, %c1_75] : memref<1x1x4xf32, #tpu.memory_space<vmem>>, vector<1x1x1xf32>
    %149 = vector.broadcast %148 : vector<1x1x1xf32> to vector<16x8x1xf32>
    %150 = arith.mulf %147, %149 : vector<16x8x1xf32>
    %c0_76 = arith.constant 0 : index
    %c0_77 = arith.constant 0 : index
    %c1_78 = arith.constant 1 : index
    %151 = vector.load %arg16[%c0_76, %c0_77, %c1_78] : memref<1x1x4xf32, #tpu.memory_space<vmem>>, vector<1x1x1xf32>
    %152 = vector.broadcast %151 : vector<1x1x1xf32> to vector<16x8x1xf32>
    %153 = arith.addf %150, %152 : vector<16x8x1xf32>
    %cst_79 = arith.constant 0.000000e+00 : f32
    %154 = vector.broadcast %cst_79 : f32 to vector<16x8x1xf32>
    %155 = arith.maximumf %153, %154 : vector<16x8x1xf32>
    %156 = vector.extract_strided_slice %82 {offsets = [0, 80], sizes = [16, 16], strides = [1, 1]} : vector<16x128xf32> to vector<16x16xf32>
    %157 = vector.shape_cast %156 : vector<16x16xf32> to vector<16x1x16xf32>
    %158 = vector.broadcast %155 : vector<16x8x1xf32> to vector<16x8x16xf32>
    %159 = vector.broadcast %157 : vector<16x1x16xf32> to vector<16x8x16xf32>
    %160 = arith.mulf %158, %159 : vector<16x8x16xf32>
    %161 = arith.addf %145, %160 : vector<16x8x16xf32>
    %162 = arith.subf %101, %112 : vector<16x8x1xf32>
    %163 = arith.mulf %162, %128 : vector<16x8x1xf32>
    %c0_80 = arith.constant 0 : index
    %c0_81 = arith.constant 0 : index
    %c2_82 = arith.constant 2 : index
    %164 = vector.load %arg15[%c0_80, %c0_81, %c2_82] : memref<1x1x4xf32, #tpu.memory_space<vmem>>, vector<1x1x1xf32>
    %165 = vector.broadcast %164 : vector<1x1x1xf32> to vector<16x8x1xf32>
    %166 = arith.mulf %163, %165 : vector<16x8x1xf32>
    %c0_83 = arith.constant 0 : index
    %c0_84 = arith.constant 0 : index
    %c2_85 = arith.constant 2 : index
    %167 = vector.load %arg16[%c0_83, %c0_84, %c2_85] : memref<1x1x4xf32, #tpu.memory_space<vmem>>, vector<1x1x1xf32>
    %168 = vector.broadcast %167 : vector<1x1x1xf32> to vector<16x8x1xf32>
    %169 = arith.addf %166, %168 : vector<16x8x1xf32>
    %cst_86 = arith.constant 0.000000e+00 : f32
    %170 = vector.broadcast %cst_86 : f32 to vector<16x8x1xf32>
    %171 = arith.maximumf %169, %170 : vector<16x8x1xf32>
    %172 = vector.extract_strided_slice %82 {offsets = [0, 96], sizes = [16, 16], strides = [1, 1]} : vector<16x128xf32> to vector<16x16xf32>
    %173 = vector.shape_cast %172 : vector<16x16xf32> to vector<16x1x16xf32>
    %174 = vector.broadcast %171 : vector<16x8x1xf32> to vector<16x8x16xf32>
    %175 = vector.broadcast %173 : vector<16x1x16xf32> to vector<16x8x16xf32>
    %176 = arith.mulf %174, %175 : vector<16x8x16xf32>
    %177 = arith.addf %161, %176 : vector<16x8x16xf32>
    %178 = arith.subf %107, %112 : vector<16x8x1xf32>
    %179 = arith.mulf %178, %128 : vector<16x8x1xf32>
    %c0_87 = arith.constant 0 : index
    %c0_88 = arith.constant 0 : index
    %c3 = arith.constant 3 : index
    %180 = vector.load %arg15[%c0_87, %c0_88, %c3] : memref<1x1x4xf32, #tpu.memory_space<vmem>>, vector<1x1x1xf32>
    %181 = vector.broadcast %180 : vector<1x1x1xf32> to vector<16x8x1xf32>
    %182 = arith.mulf %179, %181 : vector<16x8x1xf32>
    %c0_89 = arith.constant 0 : index
    %c0_90 = arith.constant 0 : index
    %c3_91 = arith.constant 3 : index
    %183 = vector.load %arg16[%c0_89, %c0_90, %c3_91] : memref<1x1x4xf32, #tpu.memory_space<vmem>>, vector<1x1x1xf32>
    %184 = vector.broadcast %183 : vector<1x1x1xf32> to vector<16x8x1xf32>
    %185 = arith.addf %182, %184 : vector<16x8x1xf32>
    %cst_92 = arith.constant 0.000000e+00 : f32
    %186 = vector.broadcast %cst_92 : f32 to vector<16x8x1xf32>
    %187 = arith.maximumf %185, %186 : vector<16x8x1xf32>
    %188 = vector.extract_strided_slice %82 {offsets = [0, 112], sizes = [16, 16], strides = [1, 1]} : vector<16x128xf32> to vector<16x16xf32>
    %189 = vector.shape_cast %188 : vector<16x16xf32> to vector<16x1x16xf32>
    %190 = vector.broadcast %187 : vector<16x8x1xf32> to vector<16x8x16xf32>
    %191 = vector.broadcast %189 : vector<16x1x16xf32> to vector<16x8x16xf32>
    %192 = arith.mulf %190, %191 : vector<16x8x16xf32>
    %193 = arith.addf %177, %192 : vector<16x8x16xf32>
    %cst_93 = arith.constant dense<0.000000e+00> : vector<16x8xf32>
    %194 = vector.multi_reduction <add>, %193, %cst_93 [2] : vector<16x8x16xf32> to vector<16x8xf32>
    %195 = vector.shape_cast %194 : vector<16x8xf32> to vector<16x8x1xf32>
    %cst_94 = arith.constant 1.600000e+01 : f32
    %196 = vector.broadcast %cst_94 : f32 to vector<16x8x1xf32>
    %197 = arith.divf %195, %196 : vector<16x8x1xf32>
    %198 = vector.broadcast %197 : vector<16x8x1xf32> to vector<16x8x16xf32>
    %199 = arith.subf %193, %198 : vector<16x8x16xf32>
    %200 = arith.mulf %199, %199 : vector<16x8x16xf32>
    %cst_95 = arith.constant dense<0.000000e+00> : vector<16x8xf32>
    %201 = vector.multi_reduction <add>, %200, %cst_95 [2] : vector<16x8x16xf32> to vector<16x8xf32>
    %202 = vector.shape_cast %201 : vector<16x8xf32> to vector<16x8x1xf32>
    %cst_96 = arith.constant 1.600000e+01 : f32
    %203 = vector.broadcast %cst_96 : f32 to vector<16x8x1xf32>
    %204 = arith.divf %202, %203 : vector<16x8x1xf32>
    %205 = vector.broadcast %197 : vector<16x8x1xf32> to vector<16x8x16xf32>
    %206 = arith.subf %193, %205 : vector<16x8x16xf32>
    %cst_97 = arith.constant 9.99999974E-6 : f32
    %207 = vector.broadcast %cst_97 : f32 to vector<16x8x1xf32>
    %208 = arith.addf %204, %207 : vector<16x8x1xf32>
    %209 = math.rsqrt %208 : vector<16x8x1xf32>
    %210 = vector.broadcast %209 : vector<16x8x1xf32> to vector<16x8x16xf32>
    %211 = arith.mulf %206, %210 : vector<16x8x16xf32>
    %c0_98 = arith.constant 0 : index
    %c0_99 = arith.constant 0 : index
    %c0_100 = arith.constant 0 : index
    %212 = vector.load %arg17[%c0_98, %c0_99, %c0_100] : memref<1x1x16xf32, #tpu.memory_space<vmem>>, vector<1x1x16xf32>
    %213 = vector.broadcast %212 : vector<1x1x16xf32> to vector<16x8x16xf32>
    %214 = arith.mulf %211, %213 : vector<16x8x16xf32>
    %c0_101 = arith.constant 0 : index
    %c0_102 = arith.constant 0 : index
    %c0_103 = arith.constant 0 : index
    %215 = vector.load %arg18[%c0_101, %c0_102, %c0_103] : memref<1x1x16xf32, #tpu.memory_space<vmem>>, vector<1x1x16xf32>
    %216 = vector.broadcast %215 : vector<1x1x16xf32> to vector<16x8x16xf32>
    %217 = arith.addf %214, %216 : vector<16x8x16xf32>
    %cst_104 = arith.constant 0.000000e+00 : f32
    %218 = vector.broadcast %cst_104 : f32 to vector<16x8x16xf32>
    %219 = arith.maximumf %217, %218 : vector<16x8x16xf32>
    %cst_105 = arith.constant 0.000000e+00 : f32
    %220 = vector.broadcast %cst_105 : f32 to vector<16x16xf32>
    %221 = vector.extract_strided_slice %219 {offsets = [0, 0, 0], sizes = [16, 1, 16], strides = [1, 1, 1]} : vector<16x8x16xf32> to vector<16x1x16xf32>
    %222 = vector.shape_cast %221 : vector<16x1x16xf32> to vector<16x16xf32>
    %c0_106 = arith.constant 0 : index
    %c0_107 = arith.constant 0 : index
    %c0_108 = arith.constant 0 : index
    %223 = vector.load %arg19[%c0_106, %c0_107, %c0_108] : memref<8x16x16xf32, #tpu.memory_space<vmem>>, vector<1x16x16xf32>
    %224 = vector.shape_cast %223 : vector<1x16x16xf32> to vector<16x16xf32>
    %cst_109 = arith.constant dense<0.000000e+00> : vector<16x16xf32>
    %225 = tpu.matmul %222, %224, %cst_109 {dimension_numbers = #tpu.dot_dimension_numbers<[1], [0], [0], [1], [0, 0, 1, 1], [], []>} : vector<16x16xf32>, vector<16x16xf32>, vector<16x16xf32> -> vector<16x16xf32>
    %226 = arith.addf %220, %225 : vector<16x16xf32>
    %227 = vector.extract_strided_slice %219 {offsets = [0, 1, 0], sizes = [16, 1, 16], strides = [1, 1, 1]} : vector<16x8x16xf32> to vector<16x1x16xf32>
    %228 = vector.shape_cast %227 : vector<16x1x16xf32> to vector<16x16xf32>
    %c1_110 = arith.constant 1 : index
    %c0_111 = arith.constant 0 : index
    %c0_112 = arith.constant 0 : index
    %229 = vector.load %arg19[%c1_110, %c0_111, %c0_112] : memref<8x16x16xf32, #tpu.memory_space<vmem>>, vector<1x16x16xf32>
    %230 = vector.shape_cast %229 : vector<1x16x16xf32> to vector<16x16xf32>
    %cst_113 = arith.constant dense<0.000000e+00> : vector<16x16xf32>
    %231 = tpu.matmul %228, %230, %cst_113 {dimension_numbers = #tpu.dot_dimension_numbers<[1], [0], [0], [1], [0, 0, 1, 1], [], []>} : vector<16x16xf32>, vector<16x16xf32>, vector<16x16xf32> -> vector<16x16xf32>
    %232 = arith.addf %226, %231 : vector<16x16xf32>
    %233 = vector.extract_strided_slice %219 {offsets = [0, 2, 0], sizes = [16, 1, 16], strides = [1, 1, 1]} : vector<16x8x16xf32> to vector<16x1x16xf32>
    %234 = vector.shape_cast %233 : vector<16x1x16xf32> to vector<16x16xf32>
    %c2_114 = arith.constant 2 : index
    %c0_115 = arith.constant 0 : index
    %c0_116 = arith.constant 0 : index
    %235 = vector.load %arg19[%c2_114, %c0_115, %c0_116] : memref<8x16x16xf32, #tpu.memory_space<vmem>>, vector<1x16x16xf32>
    %236 = vector.shape_cast %235 : vector<1x16x16xf32> to vector<16x16xf32>
    %cst_117 = arith.constant dense<0.000000e+00> : vector<16x16xf32>
    %237 = tpu.matmul %234, %236, %cst_117 {dimension_numbers = #tpu.dot_dimension_numbers<[1], [0], [0], [1], [0, 0, 1, 1], [], []>} : vector<16x16xf32>, vector<16x16xf32>, vector<16x16xf32> -> vector<16x16xf32>
    %238 = arith.addf %232, %237 : vector<16x16xf32>
    %239 = vector.extract_strided_slice %219 {offsets = [0, 3, 0], sizes = [16, 1, 16], strides = [1, 1, 1]} : vector<16x8x16xf32> to vector<16x1x16xf32>
    %240 = vector.shape_cast %239 : vector<16x1x16xf32> to vector<16x16xf32>
    %c3_118 = arith.constant 3 : index
    %c0_119 = arith.constant 0 : index
    %c0_120 = arith.constant 0 : index
    %241 = vector.load %arg19[%c3_118, %c0_119, %c0_120] : memref<8x16x16xf32, #tpu.memory_space<vmem>>, vector<1x16x16xf32>
    %242 = vector.shape_cast %241 : vector<1x16x16xf32> to vector<16x16xf32>
    %cst_121 = arith.constant dense<0.000000e+00> : vector<16x16xf32>
    %243 = tpu.matmul %240, %242, %cst_121 {dimension_numbers = #tpu.dot_dimension_numbers<[1], [0], [0], [1], [0, 0, 1, 1], [], []>} : vector<16x16xf32>, vector<16x16xf32>, vector<16x16xf32> -> vector<16x16xf32>
    %244 = arith.addf %238, %243 : vector<16x16xf32>
    %245 = vector.extract_strided_slice %219 {offsets = [0, 4, 0], sizes = [16, 1, 16], strides = [1, 1, 1]} : vector<16x8x16xf32> to vector<16x1x16xf32>
    %246 = vector.shape_cast %245 : vector<16x1x16xf32> to vector<16x16xf32>
    %c4 = arith.constant 4 : index
    %c0_122 = arith.constant 0 : index
    %c0_123 = arith.constant 0 : index
    %247 = vector.load %arg19[%c4, %c0_122, %c0_123] : memref<8x16x16xf32, #tpu.memory_space<vmem>>, vector<1x16x16xf32>
    %248 = vector.shape_cast %247 : vector<1x16x16xf32> to vector<16x16xf32>
    %cst_124 = arith.constant dense<0.000000e+00> : vector<16x16xf32>
    %249 = tpu.matmul %246, %248, %cst_124 {dimension_numbers = #tpu.dot_dimension_numbers<[1], [0], [0], [1], [0, 0, 1, 1], [], []>} : vector<16x16xf32>, vector<16x16xf32>, vector<16x16xf32> -> vector<16x16xf32>
    %250 = arith.addf %244, %249 : vector<16x16xf32>
    %251 = vector.extract_strided_slice %219 {offsets = [0, 5, 0], sizes = [16, 1, 16], strides = [1, 1, 1]} : vector<16x8x16xf32> to vector<16x1x16xf32>
    %252 = vector.shape_cast %251 : vector<16x1x16xf32> to vector<16x16xf32>
    %c5 = arith.constant 5 : index
    %c0_125 = arith.constant 0 : index
    %c0_126 = arith.constant 0 : index
    %253 = vector.load %arg19[%c5, %c0_125, %c0_126] : memref<8x16x16xf32, #tpu.memory_space<vmem>>, vector<1x16x16xf32>
    %254 = vector.shape_cast %253 : vector<1x16x16xf32> to vector<16x16xf32>
    %cst_127 = arith.constant dense<0.000000e+00> : vector<16x16xf32>
    %255 = tpu.matmul %252, %254, %cst_127 {dimension_numbers = #tpu.dot_dimension_numbers<[1], [0], [0], [1], [0, 0, 1, 1], [], []>} : vector<16x16xf32>, vector<16x16xf32>, vector<16x16xf32> -> vector<16x16xf32>
    %256 = arith.addf %250, %255 : vector<16x16xf32>
    %257 = vector.extract_strided_slice %219 {offsets = [0, 6, 0], sizes = [16, 1, 16], strides = [1, 1, 1]} : vector<16x8x16xf32> to vector<16x1x16xf32>
    %258 = vector.shape_cast %257 : vector<16x1x16xf32> to vector<16x16xf32>
    %c6 = arith.constant 6 : index
    %c0_128 = arith.constant 0 : index
    %c0_129 = arith.constant 0 : index
    %259 = vector.load %arg19[%c6, %c0_128, %c0_129] : memref<8x16x16xf32, #tpu.memory_space<vmem>>, vector<1x16x16xf32>
    %260 = vector.shape_cast %259 : vector<1x16x16xf32> to vector<16x16xf32>
    %cst_130 = arith.constant dense<0.000000e+00> : vector<16x16xf32>
    %261 = tpu.matmul %258, %260, %cst_130 {dimension_numbers = #tpu.dot_dimension_numbers<[1], [0], [0], [1], [0, 0, 1, 1], [], []>} : vector<16x16xf32>, vector<16x16xf32>, vector<16x16xf32> -> vector<16x16xf32>
    %262 = arith.addf %256, %261 : vector<16x16xf32>
    %263 = vector.extract_strided_slice %219 {offsets = [0, 7, 0], sizes = [16, 1, 16], strides = [1, 1, 1]} : vector<16x8x16xf32> to vector<16x1x16xf32>
    %264 = vector.shape_cast %263 : vector<16x1x16xf32> to vector<16x16xf32>
    %c7 = arith.constant 7 : index
    %c0_131 = arith.constant 0 : index
    %c0_132 = arith.constant 0 : index
    %265 = vector.load %arg19[%c7, %c0_131, %c0_132] : memref<8x16x16xf32, #tpu.memory_space<vmem>>, vector<1x16x16xf32>
    %266 = vector.shape_cast %265 : vector<1x16x16xf32> to vector<16x16xf32>
    %cst_133 = arith.constant dense<0.000000e+00> : vector<16x16xf32>
    %267 = tpu.matmul %264, %266, %cst_133 {dimension_numbers = #tpu.dot_dimension_numbers<[1], [0], [0], [1], [0, 0, 1, 1], [], []>} : vector<16x16xf32>, vector<16x16xf32>, vector<16x16xf32> -> vector<16x16xf32>
    %268 = arith.addf %262, %267 : vector<16x16xf32>
    %c0_134 = arith.constant 0 : index
    %c0_135 = arith.constant 0 : index
    %269 = vector.load %arg20[%c0_134, %c0_135] : memref<1x16xf32, #tpu.memory_space<vmem>>, vector<1x16xf32>
    %270 = vector.broadcast %269 : vector<1x16xf32> to vector<16x16xf32>
    %271 = arith.addf %268, %270 : vector<16x16xf32>
    %cst_136 = arith.constant 0.000000e+00 : f32
    %272 = vector.broadcast %cst_136 : f32 to vector<16x16xf32>
    %273 = arith.maximumf %271, %272 : vector<16x16xf32>
    %274 = arith.addf %273, %75 : vector<16x16xf32>
    %cst_137 = arith.constant 0.000000e+00 : f32
    %275 = vector.broadcast %cst_137 : f32 to vector<16x16xf32>
    %276 = arith.maximumf %274, %275 : vector<16x16xf32>
    %c0_138 = arith.constant 0 : index
    %c0_139 = arith.constant 0 : index
    %277 = vector.load %arg21[%c0_138, %c0_139] : memref<16x16xf32, #tpu.memory_space<vmem>>, vector<16x16xf32>
    tpu.vector_store %arg21[%c0_138, %c0_139], %276 {strides = array<i32>} : memref<16x16xf32, #tpu.memory_space<vmem>>, vector<16x16xf32>,
    return
  }
  func.func @transform_0(%arg0: i32) -> (i32, i32) {
    %c0_i32 = arith.constant 0 : i32
    %c0_i32_0 = arith.constant 0 : i32
    return %arg0, %c0_i32 : i32, i32
  }
  func.func @transform_1(%arg0: i32) -> (i32, i32) {
    %c0_i32 = arith.constant 0 : i32
    %c0_i32_0 = arith.constant 0 : i32
    return %arg0, %c0_i32 : i32, i32
  }
  func.func @transform_2(%arg0: i32) -> (i32, i32) {
    %c0_i32 = arith.constant 0 : i32
    %c0_i32_0 = arith.constant 0 : i32
    %c0_i32_1 = arith.constant 0 : i32
    return %c0_i32, %c0_i32_0 : i32, i32
  }
  func.func @transform_3(%arg0: i32) -> (i32, i32) {
    %c0_i32 = arith.constant 0 : i32
    %c0_i32_0 = arith.constant 0 : i32
    %c0_i32_1 = arith.constant 0 : i32
    return %c0_i32, %c0_i32_0 : i32, i32
  }
  func.func @transform_4(%arg0: i32) -> (i32, i32) {
    %c0_i32 = arith.constant 0 : i32
    %c0_i32_0 = arith.constant 0 : i32
    %c0_i32_1 = arith.constant 0 : i32
    return %c0_i32, %c0_i32_0 : i32, i32
  }
  func.func @transform_5(%arg0: i32) -> (i32, i32) {
    %c0_i32 = arith.constant 0 : i32
    %c0_i32_0 = arith.constant 0 : i32
    %c0_i32_1 = arith.constant 0 : i32
    return %c0_i32, %c0_i32_0 : i32, i32
  }
  func.func @transform_6(%arg0: i32) -> (i32, i32) {
    %c0_i32 = arith.constant 0 : i32
    %c0_i32_0 = arith.constant 0 : i32
    %c0_i32_1 = arith.constant 0 : i32
    return %c0_i32, %c0_i32_0 : i32, i32
  }
  func.func @transform_7(%arg0: i32) -> (i32, i32) {
    %c0_i32 = arith.constant 0 : i32
    %c0_i32_0 = arith.constant 0 : i32
    %c0_i32_1 = arith.constant 0 : i32
    return %c0_i32, %c0_i32_0 : i32, i32
  }
  func.func @transform_8(%arg0: i32) -> (i32, i32, i32) {
    %c0_i32 = arith.constant 0 : i32
    %c0_i32_0 = arith.constant 0 : i32
    %c0_i32_1 = arith.constant 0 : i32
    %c0_i32_2 = arith.constant 0 : i32
    return %c0_i32, %c0_i32_0, %c0_i32_1 : i32, i32, i32
  }
  func.func @transform_9(%arg0: i32) -> (i32, i32, i32) {
    %c0_i32 = arith.constant 0 : i32
    %c0_i32_0 = arith.constant 0 : i32
    %c0_i32_1 = arith.constant 0 : i32
    %c0_i32_2 = arith.constant 0 : i32
    return %c0_i32, %c0_i32_0, %c0_i32_1 : i32, i32, i32
  }
  func.func @transform_10(%arg0: i32) -> (i32, i32, i32) {
    %c0_i32 = arith.constant 0 : i32
    %c0_i32_0 = arith.constant 0 : i32
    %c0_i32_1 = arith.constant 0 : i32
    %c0_i32_2 = arith.constant 0 : i32
    return %c0_i32, %c0_i32_0, %c0_i32_1 : i32, i32, i32
  }
  func.func @transform_11(%arg0: i32) -> (i32, i32, i32) {
    %c0_i32 = arith.constant 0 : i32
    %c0_i32_0 = arith.constant 0 : i32
    %c0_i32_1 = arith.constant 0 : i32
    %c0_i32_2 = arith.constant 0 : i32
    return %c0_i32, %c0_i32_0, %c0_i32_1 : i32, i32, i32
  }
  func.func @transform_12(%arg0: i32) -> (i32, i32) {
    %c0_i32 = arith.constant 0 : i32
    %c0_i32_0 = arith.constant 0 : i32
    %c0_i32_1 = arith.constant 0 : i32
    return %c0_i32, %c0_i32_0 : i32, i32
  }
  func.func @transform_13(%arg0: i32) -> (i32, i32) {
    %c0_i32 = arith.constant 0 : i32
    %c0_i32_0 = arith.constant 0 : i32
    %c0_i32_1 = arith.constant 0 : i32
    return %c0_i32, %c0_i32_0 : i32, i32
  }
  func.func @transform_14(%arg0: i32) -> (i32, i32, i32) {
    %c0_i32 = arith.constant 0 : i32
    %c0_i32_0 = arith.constant 0 : i32
    %c0_i32_1 = arith.constant 0 : i32
    %c0_i32_2 = arith.constant 0 : i32
    return %c0_i32, %c0_i32_0, %c0_i32_1 : i32, i32, i32
  }
  func.func @transform_15(%arg0: i32) -> (i32, i32, i32) {
    %c0_i32 = arith.constant 0 : i32
    %c0_i32_0 = arith.constant 0 : i32
    %c0_i32_1 = arith.constant 0 : i32
    %c0_i32_2 = arith.constant 0 : i32
    return %c0_i32, %c0_i32_0, %c0_i32_1 : i32, i32, i32
  }
  func.func @transform_16(%arg0: i32) -> (i32, i32, i32) {
    %c0_i32 = arith.constant 0 : i32
    %c0_i32_0 = arith.constant 0 : i32
    %c0_i32_1 = arith.constant 0 : i32
    %c0_i32_2 = arith.constant 0 : i32
    return %c0_i32, %c0_i32_0, %c0_i32_1 : i32, i32, i32
  }
  func.func @transform_17(%arg0: i32) -> (i32, i32, i32) {
    %c0_i32 = arith.constant 0 : i32
    %c0_i32_0 = arith.constant 0 : i32
    %c0_i32_1 = arith.constant 0 : i32
    %c0_i32_2 = arith.constant 0 : i32
    return %c0_i32, %c0_i32_0, %c0_i32_1 : i32, i32, i32
  }
  func.func @transform_18(%arg0: i32) -> (i32, i32, i32) {
    %c0_i32 = arith.constant 0 : i32
    %c0_i32_0 = arith.constant 0 : i32
    %c0_i32_1 = arith.constant 0 : i32
    %c0_i32_2 = arith.constant 0 : i32
    return %c0_i32, %c0_i32_0, %c0_i32_1 : i32, i32, i32
  }
  func.func @transform_19(%arg0: i32) -> (i32, i32) {
    %c0_i32 = arith.constant 0 : i32
    %c0_i32_0 = arith.constant 0 : i32
    %c0_i32_1 = arith.constant 0 : i32
    return %c0_i32, %c0_i32_0 : i32, i32
  }
  func.func @transform_20(%arg0: i32) -> (i32, i32) {
    %c0_i32 = arith.constant 0 : i32
    %c0_i32_0 = arith.constant 0 : i32
    return %arg0, %c0_i32 : i32, i32
  }
}

</mosaic_0001>

<bundles_post_ra>
// kernel: tile.9
= control target key start
LH: loop header
LB: loop body
LE: loop exit
PB: predicated region body
PF: predicated region fallthrough
CT: control target
= control target key end

     0   :  { %vm8_vm0 = vcmask 31744   ;;  %s33_s8 = smov 4   ;;  %vm14_vm1 = vcmask 97344   ;;  %vm20_vm2 = vcmask 64544   ;;  %s50_s0 = inlined_call_operand.vmem [shape: f32[3,4], index: 0, kind: input, shape index: {}]   ;;  %s51_s1 = inlined_call_operand.vmem [shape: f32[1,12], index: 1, kind: output, shape index: {}]  }
   0x1   :  { %v5_v0 = vld [vmem:[%s50_s0] sm:$0xf]  ;;  %s32_s0 = smov 8  }
   0x2   :  { %6 = vst [vmem:[#allocation1] sm:$0xf] %v5_v0 }
   0x9   :  { %v11_v1 = vld [vmem:[#allocation1 + $0x2] sm:$0x1]   ;;  %v7_v2 = vld [vmem:[#allocation1] sm:$0x1]   ;;  %v17_v3 = vld [vmem:[#allocation1 + $0x1] sm:$0x1]  }
   0xa   :  { %12 = vrot.lane.b32.xlu0 %v11_v1, %s32_s0  ;;  %9 = vst.msk [vmem:[#allocation0] sm:$0x1] %vm8_vm0, %v7_v2  }
   0xe   :  { %18 = vrot.lane.b32.xlu0 %v17_v3, %s33_s8 }
  0x7c   :  { %v13_v4 = vpop.permute.xlu0 %12  }
  0x7d   :  { %15 = vst.msk [vmem:[#allocation0] sm:$0x1] %vm14_vm1, %v13_v4  }
  0x80   :  { %v19_v5 = vpop.permute.xlu0 %18  }
  0x81   :  { %21 = vst.msk [vmem:[#allocation0] sm:$0x1] %vm20_vm2, %v19_v5  }
  0x88   :  { %v26_v6 = vld [vmem:[#allocation0] sm:$0x1] }
  0x89   :  { %29 = vst [vmem:[%s51_s1] sm:$0x1] %v26_v6 }

// kernel: fea_extraction_forward.1
= control target key start
LH: loop header
LB: loop body
LE: loop exit
PB: predicated region body
PF: predicated region fallthrough
CT: control target
= control target key end

     0   :  { %s13077_s0 = inlined_call_operand.vmem [shape: f32[256,3], index: 0, kind: input, shape index: {}]   ;;  %s13078_s1 = inlined_call_operand.vmem [shape: f32[256,8], index: 1, kind: input, shape index: {}]   ;;  %s13079_s2 = inlined_call_operand.vmem [shape: f32[3,12], index: 2, kind: input, shape index: {}]   ;;  %s13080_s3 = inlined_call_operand.vmem [shape: f32[1,12], index: 3, kind: input, shape index: {}]   ;;  %s13081_s4 = inlined_call_operand.vmem [shape: f32[12,8], index: 4, kind: input, shape index: {}]   ;;  %s13082_s5 = inlined_call_operand.vmem [shape: f32[1,8], index: 5, kind: input, shape index: {}]   ;;  %s13083_s6 = inlined_call_operand.vmem [shape: f32[8,16], index: 6, kind: input, shape index: {}]   ;;  %s13084_s7 = inlined_call_operand.vmem [shape: f32[1,16], index: 7, kind: input, shape index: {}]   ;;  %s13085_s8 = inlined_call_operand.vmem [shape: f32[2,16,16], index: 8, kind: input, shape index: {}]   ;;  %s13086_s9 = inlined_call_operand.vmem [shape: f32[2,1,16], index: 9, kind: input, shape index: {}]   ;;  %s13087_s10 = inlined_call_operand.vmem [shape: f32[2,16,16], index: 10, kind: input, shape index: {}]   ;;  %s13088_s11 = inlined_call_operand.vmem [shape: f32[2,1,16], index: 11, kind: input, shape index: {}]   ;;  %s13089_s12 = inlined_call_operand.vmem [shape: f32[16,128], index: 12, kind: input, shape index: {}]   ;;  %s13090_s13 = inlined_call_operand.vmem [shape: f32[1,128], index: 13, kind: input, shape index: {}]   ;;  %s13091_s14 = inlined_call_operand.vmem [shape: f32[1,1,4], index: 14, kind: input, shape index: {}]   ;;  %s13092_s15 = inlined_call_operand.vmem [shape: f32[1,1,4], index: 15, kind: input, shape index: {}]   ;;  %s13093_s16 = inlined_call_operand.vmem [shape: f32[1,1,16], index: 16, kind: input, shape index: {}]   ;;  %s13094_s17 = inlined_call_operand.vmem [shape: f32[1,1,16], index: 17, kind: input, shape index: {}]   ;;  %s13095_s18 = inlined_call_operand.vmem [shape: f32[8,16,16], index: 18, kind: input, shape index: {}]   ;;  %s13096_s19 = inlined_call_operand.vmem [shape: f32[1,16], index: 19, kind: input, shape index: {}]   ;;  %s13097_s20 = inlined_call_operand.vmem [shape: f32[32,16], index: 20, kind: output, shape index: {}]  }
   0x1   :  { %13202 = sst [smem:[#allocation40_spill]] %s13077_s0 }
   0x2   :  { %13203 = sst [smem:[#allocation41_spill]] %s13078_s1  ;;  %s8542_s1 = smov 0  }
   0x3   :  { %13204 = sst [smem:[#allocation42_spill]] %s13079_s2 }
   0x4   :  { %13205 = sst [smem:[#allocation43_spill]] %s13080_s3 }
   0x5   :  { %13206 = sst [smem:[#allocation44_spill]] %s13081_s4 }
   0x6 LB: > { %s7515_s22 = sadd.s32 4294967295, %s8420_s1   ;;  %p7519_p0 = scmp.ge.s32.totalorder %s8420_s1, 1  ;;  %s8420_s1 = sphi %s8542_s1, %s30_s1  }
   0x7   : > { %p574_p1 = scmp.lt.s32.totalorder %s8420_s1, 3 }
   0x9   : > { %p575_p2 = pnand %p7519_p0, %p574_p1 }
   0xb   : > { %578 = sbr.rel (%p575_p2) target bundleno = 3906 (0xf42), region = 100 }
  0x10   : > { %s7520_s23 = sshll.u32 %s7515_s22, 4  ;;  %v13105_v0 = vmov 0   ;;  %s13207_s3 = sld [smem:[#allocation40_spill]]  ;;  %v13103_v3 = vmov 1   ;;  %v13101_v5 = vmov 2   ;;  %vm2719_vm0 = vcmask 1043456  }
  0x11   : > { %8210 = vset.pattern.permute.xlu1 %v13105_v0  ;;  %8208 = vset.pattern.permute.xlu0 %v13105_v0  ;;  %p638_p3 = scmp.lt.s32.totalorder %s7520_s23, 31  ;;  %s13208_s4 = sld [smem:[#allocation44_spill]]  ;;  %v13108_v59 = vmov 683565275   ;;  %v13120_v61 = vmov 2475754826  }
  0x12   : > { %s13209_s0 = sld [smem:[#allocation42_spill]]  ;;  %v13118_v63 = vmov 2131351028   ;;  %s8432_s21 = smov 112  }
  0x13   : > { %s13361_s23 = smov (!%p638_p3, %s7520_s23), 31  ;;  %s13210_s30 = sld [smem:[#allocation43_spill]] }
  0x14   : > { %s7521_s24 = sshll.u32 %s13361_s23, 3  ;;  %s13279_s28 = sld [smem:[#allocation41_spill]] }
  0x15   : > { %s8433_s2 = smov 96   ;;  %s8434_s25 = smov 80  }
  0x16   : > { %s8562_s26 = scalar_lea.vmem %s13207_s3, %s7521_s24 }
  0x17   : > { %v656_v1 = vld [vmem:[%s8562_s26 + $0x8] sm:$0xff]  ;;  %v655_v2 = vld [vmem:[%s8562_s26] sm:$0xff]  ;;  %v658_v4 = vld [vmem:[%s8562_s26 + $0x18] sm:$0xff] }
  0x18   : > { %679 = vperm.xlu1 %8210, %v656_v1   ;;  %674 = vperm.xlu0 %8208, %v655_v2   ;;  %v660_v6 = vld [vmem:[%s8562_s26 + $0x28] sm:$0xff]  ;;  %v657_v7 = vld [vmem:[%s8562_s26 + $0x10] sm:$0xff]  ;;  %v662_v8 = vld [vmem:[%s8562_s26 + $0x38] sm:$0xff] }
  0x19   : > { %v664_v9 = vld [vmem:[%s8562_s26 + $0x48] sm:$0xff]  ;;  %v666_v10 = vld [vmem:[%s8562_s26 + $0x58] sm:$0xff]  ;;  %v659_v12 = vld [vmem:[%s8562_s26 + $0x20] sm:$0xff] }
  0x1a   : > { %v668_v11 = vld [vmem:[%s8562_s26 + $0x68] sm:$0xff]  ;;  %v8582_v13 = vld [vmem:[%s8562_s26 + $0x78] sm:$0xff]  ;;  %v661_v14 = vld [vmem:[%s8562_s26 + $0x30] sm:$0xff]  ;;  %s10615_s29 = scalar_lea.vmem %s13279_s28, %s7521_s24  ;;  %s7524_s24 = sshll.u32 %s7515_s22, 1 }
  0x1b   : > { %v663_v15 = vld [vmem:[%s8562_s26 + $0x40] sm:$0xff]  ;;  %v665_v16 = vld [vmem:[%s8562_s26 + $0x50] sm:$0xff]  ;;  %v2662_v21 = vld [vmem:[%s13208_s4 + $0x8] sm:$0xf]  ;;  %p650_p4 = scmp.lt.s32.totalorder %s7524_s24, 3 }
  0x1c   : > { %8211 = vset.pattern.permute.xlu1 %v13103_v3  ;;  %8209 = vset.pattern.permute.xlu0 %v13103_v3  ;;  %v667_v17 = vld [vmem:[%s8562_s26 + $0x60] sm:$0xff]  ;;  %v669_v20 = vld [vmem:[%s8562_s26 + $0x70] sm:$0xff] }
  0x1d   : > { %778 = vperm.xlu1 %8211, %v656_v1   ;;  %774 = vperm.xlu0 %8209, %v655_v2   ;;  %v8615_v22 = vld [vmem:[%s13209_s0] ss:$0 sm:$0xff]  ;;  %v8621_v24 = vld [vmem:[%s13209_s0 + $0x1] ss:$0 sm:$0xff]  ;;  %v8633_v29 = vld [vmem:[%s13209_s0 + $0x2] ss:$0 sm:$0xff] }
  0x1e   : > { %7892 = vmatprep.subr.msk.mxu0 %vm2719_vm0, %v2662_v21  ;;  %v2661_v27 = vld [vmem:[%s13208_s4] sm:$0xff]  ;;  %s13363_s24 = smov (!%p650_p4, %s7524_s24), 3 }
  0x1f   : > { %7893 = vmatpush3.msk.msra.mxu0 %vm2719_vm0, %v2662_v21  ;;  %v8642_v34 = vld [vmem:[%s13210_s30] ss:$0 sm:$0xff] }
  0x20   : > { %7894 = vmatprep.subr.mxu0 %v2661_v27 }
  0x21   : > { %8212 = vset.pattern.permute.xlu1 %v13101_v5  ;;  %8215 = vset.pattern.permute.xlu0 %v13105_v0 }
  0x22   : > { %875 = vperm.xlu1 %8212, %v655_v2   ;;  %689 = vperm.xlu0 %8215, %v658_v4  }
  0x23   : > { %7895 = vmatpush3.msra.mxu0 %v2661_v27 }
  0x26   : > { %8213 = vset.pattern.permute.xlu1 %v13105_v0  ;;  %699 = vperm.xlu0 %8215, %v660_v6  }
  0x27   : > { %684 = vperm.xlu1 %8213, %v657_v7  }
  0x2a   : > { %709 = vperm.xlu0 %8215, %v662_v8  }
  0x2b   : > { %8214 = vset.pattern.permute.xlu1 %v13103_v3 }
  0x2c   : > { %782 = vperm.xlu1 %8214, %v657_v7  }
  0x2e   : > { %719 = vperm.xlu0 %8215, %v664_v9  }
  0x30   : > { %786 = vperm.xlu1 %8214, %v658_v4  }
  0x32   : > { %729 = vperm.xlu0 %8215, %v666_v10  }
  0x34   : > { %8216 = vset.pattern.permute.xlu1 %v13101_v5 }
  0x35   : > { %883 = vperm.xlu1 %8216, %v657_v7   ;;  %v13110_v7 = vmov 2102212464  }
  0x36   : > { %739 = vperm.xlu0 %8215, %v668_v11  }
  0x39   : > { %8217 = vset.pattern.permute.xlu1 %v13105_v0 }
  0x3a   : > { %694 = vperm.xlu1 %8217, %v659_v12   ;;  %749 = vperm.xlu0 %8215, %v8582_v13  }
  0x3e   : > { %8218 = vset.pattern.permute.xlu1 %v13103_v3  ;;  %8234 = vset.pattern.permute.xlu0 %v13101_v5 }
  0x3f   : > { %790 = vperm.xlu1 %8218, %v659_v12   ;;  %879 = vperm.xlu0 %8234, %v656_v1  }
  0x43   : > { %794 = vperm.xlu1 %8218, %v660_v6   ;;  %887 = vperm.xlu0 %8234, %v658_v4  }
  0x47   : > { %8219 = vset.pattern.permute.xlu1 %v13101_v5  ;;  %895 = vperm.xlu0 %8234, %v660_v6  }
  0x48   : > { %891 = vperm.xlu1 %8219, %v659_v12  }
  0x4b   : > { %903 = vperm.xlu0 %8234, %v662_v8  }
  0x4c   : > { %8220 = vset.pattern.permute.xlu1 %v13105_v0 }
  0x4d   : > { %704 = vperm.xlu1 %8220, %v661_v14  }
  0x4f   : > { %911 = vperm.xlu0 %8234, %v664_v9  }
  0x51   : > { %8221 = vset.pattern.permute.xlu1 %v13103_v3 }
  0x52   : > { %798 = vperm.xlu1 %8221, %v661_v14  }
  0x53   : > { %919 = vperm.xlu0 %8234, %v666_v10  }
  0x56   : > { %802 = vperm.xlu1 %8221, %v662_v8  }
  0x57   : > { %927 = vperm.xlu0 %8234, %v668_v11  }
  0x5a   : > { %8222 = vset.pattern.permute.xlu1 %v13101_v5 }
  0x5b   : > { %899 = vperm.xlu1 %8222, %v661_v14   ;;  %935 = vperm.xlu0 %8234, %v8582_v13  }
  0x5f   : > { %8223 = vset.pattern.permute.xlu1 %v13105_v0 }
  0x60   : > { %714 = vperm.xlu1 %8223, %v663_v15  }
  0x64   : > { %8224 = vset.pattern.permute.xlu1 %v13103_v3 }
  0x65   : > { %806 = vperm.xlu1 %8224, %v663_v15  }
  0x69   : > { %810 = vperm.xlu1 %8224, %v664_v9  }
  0x6d   : > { %8225 = vset.pattern.permute.xlu1 %v13101_v5 }
  0x6e   : > { %907 = vperm.xlu1 %8225, %v663_v15  }
  0x72   : > { %8226 = vset.pattern.permute.xlu1 %v13105_v0 }
  0x73   : > { %724 = vperm.xlu1 %8226, %v665_v16  }
  0x77   : > { %8227 = vset.pattern.permute.xlu1 %v13103_v3 }
  0x78   : > { %814 = vperm.xlu1 %8227, %v665_v16  }
  0x7c   : > { %818 = vperm.xlu1 %8227, %v666_v10   ;;  %v13122_v10 = vmov 920167782  }
  0x80   : > { %8228 = vset.pattern.permute.xlu1 %v13101_v5 }
  0x81   : > { %915 = vperm.xlu1 %8228, %v665_v16  }
  0x85   : > { %8229 = vset.pattern.permute.xlu1 %v13105_v0 }
  0x86   : > { %734 = vperm.xlu1 %8229, %v667_v17  }
  0x8a   : > { %8230 = vset.pattern.permute.xlu1 %v13103_v3 }
  0x8b   : > { %822 = vperm.xlu1 %8230, %v667_v17  }
  0x8f   : > { %826 = vperm.xlu1 %8230, %v668_v11  }
  0x93   : > { %v8605_v18 = vpop.permute.xlu1 %679  ;;  %8231 = vset.pattern.permute.xlu1 %v13101_v5  ;;  %v675_v19 = vpop.permute.xlu0 %674 }
  0x94   : > { %923 = vperm.xlu1 %8231, %v667_v17   ;;  %v756_v23 = vmul.f32 %v8615_v22, %v675_v19 }
  0x98   : > { %v8623_v25 = vpop.permute.xlu1 %778  ;;  %8232 = vset.pattern.permute.xlu1 %v13105_v0  ;;  %v775_v26 = vpop.permute.xlu0 %774 }
  0x99   : > { %744 = vperm.xlu1 %8232, %v669_v20   ;;  %v841_v28 = vmul.f32 %v8621_v24, %v775_v26  ;;  %v842_v19 = vmul.f32 %v8621_v24, %v8623_v25 }
  0x9b   : > { %v857_v30 = vadd.f32 %v841_v28, %v756_v23 }
  0x9d   : > { %8233 = vset.pattern.permute.xlu1 %v13103_v3  ;;  %v876_v31 = vpop.permute.xlu1 %875  ;;  %v8636_v32 = vpop.permute.xlu0 %689 }
  0x9e   : > { %v942_v33 = vmul.f32 %v8633_v29, %v876_v31  ;;  %830 = vperm.xlu1 %8233, %v669_v20  }
  0xa0   : > { %v958_v35 = vadd.f32 %v942_v33, %v857_v30 }
  0xa1   : > { %v8644_v36 = vpop.permute.xlu0 %699 }
  0xa2   : > { %v8647_v37 = vadd.f32 %v8642_v34, %v958_v35  ;;  %834 = vperm.xlu1 %8233, %v8582_v13   ;;  %v685_v38 = vpop.permute.xlu1 %684  ;;  %v13112_v13 = vmov 1326507024  }
  0xa3   : > { %v758_v53 = vmul.f32 %v8615_v22, %v685_v38 }
  0xa4   : > { %v1000_v39 = vand.u32 2139095040, %v8647_v37  ;;  %v997_v44 = vand.u32 2147483647, %v8647_v37  ;;  %vm999_vm10 = vcmp.lt.s32.totalorder %v8647_v37, 0 }
  0xa5   : > { %v8651_v40 = vpop.permute.xlu0 %709 }
  0xa6   : > { %v1001_v41 = vshrl.u32 %v1000_v39, 23  ;;  %8235 = vset.pattern.permute.xlu1 %v13101_v5  ;;  %v1004_v48 = vand.u32 8388607, %v997_v44  ;;  %vm8789_vm11 = vcmp.le.f32.partialorder %v997_v44, 0.7853982 }
  0xa7   : > { %931 = vperm.xlu1 %8235, %v669_v20   ;;  %v783_v42 = vpop.permute.xlu1 %782 }
  0xa8   : > { %v7530_v43 = vadd.s32 4294967169, %v1001_v41  ;;  %v843_v54 = vmul.f32 %v8621_v24, %v783_v42  ;;  %v1005_v56 = vor.u32 8388608, %v1004_v48  ;;  %v757_v41 = vmul.f32 %v8615_v22, %v8605_v18 }
  0xa9   : > { %v8655_v45 = vpop.permute.xlu0 %719 }
  0xaa   : > { %v1007_v46 = vadd.s32 1, %v7530_v43  ;;  %v859_v15 = vadd.f32 %v843_v54, %v758_v53  ;;  %v1045_v30 = vshll.u32 %v1005_v56, 8  ;;  %v858_v56 = vadd.f32 %v842_v19, %v757_v41 }
  0xab   : > { %v8657_v47 = vpop.permute.xlu1 %786  ;;  %8236 = vset.pattern.permute.xlu1 %v13103_v3 }
  0xac   : > { %vm1008_vm1 = vcmp.gt.s32.totalorder %v1007_v46, 0 }
  0xad   : > { %v1009_v49 = vsel %vm1008_vm1, %v1007_v46, 0  ;;  %v8662_v50 = vpop.permute.xlu0 %729 }
  0xae   : > { %v1011_v51 = vand.u32 31, %v1009_v49  ;;  %v1010_v57 = vshrl.u32 %v1009_v49, 5 }
  0xb0   : > { %v1012_v52 = vsub.s32 32, %v1011_v51  ;;  %v884_v55 = vpop.permute.xlu1 %883  ;;  %v1014_v60 = vshll.u32 %v13108_v59, %v1011_v51  ;;  %v1017_v62 = vshll.u32 %v13120_v61, %v1011_v51  ;;  %v1020_v1 = vshll.u32 %v13118_v63, %v1011_v51 }
  0xb1   : > { %v8666_v58 = vpop.permute.xlu0 %739  ;;  %v944_v2 = vmul.f32 %v8633_v29, %v884_v55  ;;  %v1023_v8 = vshll.u32 %v13110_v7, %v1011_v51  ;;  %v1026_v12 = vshll.u32 %v13122_v10, %v1011_v51  ;;  %vm1029_vm2 = vcmp.lt.s32.totalorder %v1010_v57, 1 }
  0xb2   : > { %v1015_v4 = vshrl.u32 %v13120_v61, %v1012_v52  ;;  %v1018_v6 = vshrl.u32 %v13118_v63, %v1012_v52  ;;  %v1021_v9 = vshrl.u32 %v13110_v7, %v1012_v52  ;;  %v1024_v11 = vshrl.u32 %v13122_v10, %v1012_v52 }
  0xb3   : > { %v1027_v14 = vshrl.u32 %v13112_v13, %v1012_v52  ;;  %v960_v28 = vadd.f32 %v944_v2, %v859_v15  ;;  %vm1032_vm3 = vcmp.lt.s32.totalorder %v1010_v57, 4  ;;  %vm1030_vm4 = vcmp.lt.s32.totalorder %v1010_v57, 2 }
  0xb4   : > { %v1016_v16 = vor.u32 %v1015_v4, %v1014_v60  ;;  %v1019_v17 = vor.u32 %v1018_v6, %v1017_v62  ;;  %v1022_v23 = vor.u32 %v1021_v9, %v1020_v1  ;;  %v1025_v26 = vor.u32 %v1024_v11, %v1023_v8 }
  0xb5   : > { %v8681_v20 = vpop.permute.xlu1 %694  ;;  %v8683_v21 = vpop.permute.xlu0 %749  ;;  %v1028_v27 = vor.u32 %v1027_v14, %v1026_v12  ;;  %vm1031_vm5 = vcmp.lt.s32.totalorder %v1010_v57, 3  ;;  %v1013_v42 = vshrl.u32 %v13108_v59, %v1012_v52  ;;  %v8694_v48 = vadd.f32 %v8642_v34, %v960_v28 }
  0xb6   : > { %v1037_v31 = vsel %vm1029_vm2, %v1016_v16, %v1019_v17  ;;  %v1038_v33 = vsel %vm1032_vm3, %v1025_v26, 920167782  ;;  %v1034_v35 = vsel %vm1032_vm3, %v1022_v23, 2102212464  ;;  %v1041_v25 = vsel %vm1029_vm2, %v1019_v17, %v1022_v23 }
  0xb7   : > { %v1039_v38 = vsel %vm1031_vm5, %v1022_v23, %v1038_v33  ;;  %v1042_v39 = vsel %vm1032_vm3, %v1028_v27, 1326507024  ;;  %v1033_v52 = vsel %vm1029_vm2, %v1013_v42, %v1016_v16  ;;  %v1035_v60 = vsel %vm1031_vm5, %v1019_v17, %v1034_v35 }
  0xb8   : > { %v1040_v43 = vsel %vm1030_vm4, %v1037_v31, %v1039_v38  ;;  %v1043_v46 = vsel %vm1031_vm5, %v1025_v26, %v1042_v39  ;;  %v1208_v4 = vand.u32 2139095040, %v8694_v48  ;;  %v1036_v8 = vsel %vm1030_vm4, %v1033_v52, %v1035_v60 }
  0xb9   : > { %v1044_v53 = vsel %vm1030_vm4, %v1041_v25, %v1043_v46  ;;  %v8697_v54 = vmul.u32.u64.low %v1045_v30, %v1040_v43  ;;  %v8698_v55 = vmul.u32.u64.high %v1045_v30, %v1040_v43, %v8697_v54  ;;  %v1052_v14 = vmul.u32 %v1045_v30, %v1036_v8 }
  0xba   : > { %v791_v49 = vpop.permute.xlu1 %790  ;;  %v880_v51 = vpop.permute.xlu0 %879  ;;  %v8704_v62 = vmul.u32.u64.low %v1045_v30, %v1044_v53  ;;  %v8705_v1 = vmul.u32.u64.high %v1045_v30, %v1044_v53, %v8704_v62  ;;  %v1209_v15 = vshrl.u32 %v1208_v4, 23  ;;  %v759_v33 = vmul.f32 %v8615_v22, %v8636_v32 }
  0xbb   : > { %v943_v18 = vmul.f32 %v8633_v29, %v880_v51  ;;  %v1055_v9 = vadd.s32 1, %v8698_v55  ;;  %v844_v35 = vmul.f32 %v8621_v24, %v8657_v47  ;;  %v761_v47 = vmul.f32 %v8615_v22, %v8644_v36 }
  0xbc   : > { %vm1054_vm6 = vc.u32 %v8705_v1, %v8697_v54  ;;  %v7538_v27 = vadd.s32 4294967169, %v1209_v15  ;;  %v760_v60 = vmul.f32 %v8615_v22, %v8681_v20  ;;  %v13107_v15 = vand.u32 2147483647, %v8694_v48 }
  0xbd   : > { %v959_v2 = vadd.f32 %v943_v18, %v858_v56  ;;  %v1056_v16 = vsel %vm1054_vm6, %v1055_v9, %v8698_v55  ;;  %v860_v42 = vadd.f32 %v844_v35, %v759_v33  ;;  %v845_v56 = vmul.f32 %v8621_v24, %v791_v49 }
  0xbe   : > { %v795_v6 = vpop.permute.xlu1 %794  ;;  %v1057_v23 = vadd.s32 %v1056_v16, %v1052_v14  ;;  %v888_v28 = vpop.permute.xlu0 %887  ;;  %v1215_v39 = vadd.s32 1, %v7538_v27  ;;  %v763_v27 = vmul.f32 %v8615_v22, %v8651_v40  ;;  %v1053_v33 = vadd.s32 %v8697_v54, %v8705_v1 }
  0xbf   : > { %v8711_v11 = vadd.f32 %v8642_v34, %v959_v2  ;;  %v945_v41 = vmul.f32 %v8633_v29, %v888_v28  ;;  %v846_v18 = vmul.f32 %v8621_v24, %v795_v6  ;;  %v861_v6 = vadd.f32 %v845_v56, %v760_v60 }
  0xc0   : > { %v1058_v57 = vadd.s32 536870912, %v1057_v23  ;;  %vm1216_vm8 = vcmp.gt.s32.totalorder %v1215_v39, 0  ;;  %vm2670_vm2 = vcmask 97280   ;;  %vm1089_vm4 = vweird.f32 %v8647_v37 }
  0xc1   : > { %v1104_v12 = vand.u32 2139095040, %v8711_v11  ;;  %v961_v51 = vadd.f32 %v945_v41, %v860_v42  ;;  %v8733_v52 = vsel %vm1216_vm8, %v1215_v39, 0  ;;  %v13114_v2 = vand.u32 2147483647, %v8711_v11 }
  0xc2   : > { %v8717_v31 = vshrl.u32 %v1058_v57, 30  ;;  %v896_v55 = vpop.permute.xlu0 %895  ;;  %v862_v14 = vadd.f32 %v846_v18, %v761_v47  ;;  %v8747_v20 = vand.u32 31, %v8733_v52 }
  0xc3   : > { %v1105_v17 = vshrl.u32 %v1104_v12, 23  ;;  %v892_v19 = vpop.permute.xlu1 %891  ;;  %v8741_v8 = vadd.f32 %v8642_v34, %v961_v51  ;;  %v947_v9 = vmul.f32 %v8633_v29, %v896_v55 }
  0xc4   : > { %v1060_v25 = vshll.u32 %v8717_v31, 30  ;;  %v946_v36 = vmul.f32 %v8633_v29, %v892_v19  ;;  %v1228_v0 = vshll.u32 %v13118_v63, %v8747_v20 }
  0xc5   : > { %v7534_v26 = vadd.s32 4294967169, %v1105_v17  ;;  %v1108_v17 = vand.u32 8388607, %v13114_v2  ;;  %v963_v57 = vadd.f32 %v947_v9, %v862_v14 }
  0xc6   : > { %v1061_v43 = vsub.s32 %v1057_v23, %v1060_v25  ;;  %v962_v19 = vadd.f32 %v946_v36, %v861_v6  ;;  %v8766_v25 = vsub.s32 32, %v8747_v20  ;;  %v904_v1 = vpop.permute.xlu0 %903 }
  0xc7   : > { %v1111_v38 = vadd.s32 1, %v7534_v26  ;;  %v1312_v26 = vand.u32 2139095040, %v8741_v8  ;;  %v1109_v42 = vor.u32 8388608, %v1108_v17 }
  0xc8   : > { %v8723_v30 = vpop.permute.xlu1 %704  ;;  %v1063_v53 = vsub.s32 0, %v1061_v43  ;;  %v8772_v40 = vadd.f32 %v8642_v34, %v962_v19 }
  0xc9   : > { %vm1112_vm7 = vcmp.gt.s32.totalorder %v1111_v38, 0  ;;  %v1313_v51 = vshrl.u32 %v1312_v26, 23  ;;  %v8802_v44 = vshll.u32 %v1109_v42, 8 }
  0xca   : > { %v1113_v32 = vsel %vm1112_vm7, %v1111_v38, 0  ;;  %v7531_v62 = vmin.u32 %v1063_v53, %v1061_v43  ;;  %v8763_v38 = vand.u32 8388607, %v13107_v15  ;;  %v8769_v53 = vadd.f32 %v8642_v34, %v963_v57 }
  0xcb   : > { %v8738_v4 = vand.u32 31, %v1113_v32  ;;  %v8779_v60 = vshrl.u32 %v1113_v32, 5  ;;  %v1234_v15 = vshll.u32 %v13122_v10, %v8747_v20 }
  0xcc   : > { %v1065_v12 = vclz %v7531_v62 }
  0xcd   : > { %v8727_v46 = vpop.permute.xlu1 %798  ;;  %v8752_v23 = vsub.s32 32, %v8738_v4  ;;  %v1127_v9 = vshll.u32 %v13110_v7, %v8738_v4  ;;  %v1118_v32 = vshll.u32 %v13108_v59, %v8738_v4  ;;  %v1121_v14 = vshll.u32 %v13120_v61, %v8738_v4 }
  0xce   : > { %v7532_v16 = vadd.s32 4294967294, %v1065_v12  ;;  %v1124_v26 = vshll.u32 %v13118_v63, %v8738_v4  ;;  %vm1136_vm12 = vcmp.lt.s32.totalorder %v8779_v60, 4  ;;  %vm1133_vm13 = vcmp.lt.s32.totalorder %v8779_v60, 1 }
  0xcf   : > { %v1119_v54 = vshrl.u32 %v13120_v61, %v8752_v23  ;;  %v1122_v18 = vshrl.u32 %v13118_v63, %v8752_v23  ;;  %v1125_v62 = vshrl.u32 %v13110_v7, %v8752_v23  ;;  %v1128_v36 = vshrl.u32 %v13122_v10, %v8752_v23 }
  0xd0   : > { %vm7533_vm9 = vcmp.lt.s32.totalorder %v7532_v16, 0  ;;  %vm1135_vm14 = vcmp.lt.s32.totalorder %v8779_v60, 3  ;;  %vm1134_vm15 = vcmp.lt.s32.totalorder %v8779_v60, 2 }
  0xd1   : > { %v803_v49 = vpop.permute.xlu1 %802  ;;  %v1068_v35 = vsel %vm7533_vm9, 0, %v7532_v16  ;;  %v949_v16 = vmul.f32 %v8633_v29, %v904_v1  ;;  %v1129_v57 = vor.u32 %v1128_v36, %v1127_v9  ;;  %v1131_v1 = vshrl.u32 %v13112_v13, %v8752_v23 }
  0xd2   : > { %v1069_v39 = vsub.s32 32, %v1068_v35  ;;  %v1073_v41 = vsub.s32 4294967266, %v1068_v35  ;;  %v1070_v55 = vshll.u32 %v1061_v43, %v1068_v35  ;;  %v1120_v35 = vor.u32 %v1119_v54, %v1118_v32 }
  0xd3   : > { %v848_v42 = vmul.f32 %v8621_v24, %v803_v49  ;;  %v1130_v9 = vshll.u32 %v13122_v10, %v8738_v4  ;;  %v762_v49 = vmul.f32 %v8615_v22, %v8723_v30 }
  0xd4   : > { %v1071_v47 = vshrl.u32 %v1053_v33, %v1069_v39  ;;  %v1074_v56 = vadd.s32 127, %v1073_v41  ;;  %v1083_v33 = vsub.s32 4, %v8717_v31  ;;  %v1123_v39 = vor.u32 %v1122_v18, %v1121_v14 }
  0xd5   : > { %v7542_v41 = vadd.s32 4294967169, %v1313_v51  ;;  %v1142_v51 = vsel %vm1136_vm12, %v1129_v57, 920167782 }
  0xd6   : > { %v8757_v28 = vpop.permute.xlu1 %899  ;;  %v1072_v12 = vor.u32 %v1071_v47, %v1070_v55  ;;  %v1075_v6 = vshll.u32 %v1074_v56, 23  ;;  %v1520_v55 = vand.u32 2139095040, %v8769_v53  ;;  %v1126_v47 = vor.u32 %v1125_v62, %v1124_v26 }
  0xd7   : > { %v1416_v56 = vand.u32 2139095040, %v8772_v40  ;;  %v1084_v18 = vsel %vm999_vm10, %v1083_v33, %v8717_v31  ;;  %v1141_v62 = vsel %vm1133_vm13, %v1120_v35, %v1123_v39  ;;  %v864_v31 = vadd.f32 %v848_v42, %v763_v27 }
  0xd8   : > { %v1076_v19 = vor.u32 4788187, %v1075_v6  ;;  %v1079_v3 = vcvt.s32.f32 %v1072_v12  ;;  %v1521_v36 = vshrl.u32 %v1520_v55, 23  ;;  %v1132_v12 = vor.u32 %v1131_v1, %v1130_v9 }
  0xd9   : > { %v1143_v6 = vsel %vm1135_vm14, %v1126_v47, %v1142_v51  ;;  %v1086_v14 = vsel %vm8789_vm11, 0, %v1084_v18  ;;  %v1138_v26 = vsel %vm1136_vm12, %v1126_v47, 2102212464  ;;  %v1145_v27 = vsel %vm1133_vm13, %v1123_v39, %v1126_v47 }
  0xda   : > { %v1077_v5 = vand.u32 2147483647, %v1076_v19  ;;  %v1144_v30 = vsel %vm1134_vm15, %v1141_v62, %v1143_v6  ;;  %v847_v19 = vmul.f32 %v8621_v24, %v8727_v46  ;;  %v1146_v1 = vsel %vm1136_vm12, %v1132_v12, 1326507024 }
  0xdb   : > { %v8798_v17 = vpop.permute.xlu1 %714  ;;  %v1147_v47 = vsel %vm1135_vm14, %v1129_v57, %v1146_v1  ;;  %v965_v43 = vadd.f32 %v949_v16, %v864_v31  ;;  %v948_v9 = vmul.f32 %v8633_v29, %v8757_v28  ;;  %v7550_v62 = vadd.s32 4294967169, %v1521_v36 }
  0xdc   : > { %v1080_v54 = vmul.f32 %v1079_v3, %v1077_v5  ;;  %v1319_v3 = vadd.s32 1, %v7542_v41  ;;  %v1417_v5 = vshrl.u32 %v1416_v56, 23  ;;  %v1117_v41 = vshrl.u32 %v13108_v59, %v8752_v23 }
  0xdd   : > { %v8849_v56 = vmul.u32.u64.low %v8802_v44, %v1144_v30  ;;  %v8850_v42 = vmul.u32.u64.high %v8802_v44, %v1144_v30, %v8849_v56  ;;  %v1139_v23 = vsel %vm1135_vm14, %v1123_v39, %v1138_v26  ;;  %v1148_v18 = vsel %vm1134_vm15, %v1145_v27, %v1147_v47 }
  0xde   : > { %v1081_v32 = vxor.u32 2147483648, %v1080_v54  ;;  %v1137_v46 = vsel %vm1133_vm13, %v1117_v41, %v1120_v35  ;;  %vm1320_vm0 = vcmp.gt.s32.totalorder %v1319_v3, 0  ;;  %v863_v39 = vadd.f32 %v847_v19, %v762_v49 }
  0xdf   : > { %v8864_v35 = vmul.u32.u64.low %v8802_v44, %v1148_v18  ;;  %v8865_v12 = vmul.u32.u64.high %v8802_v44, %v1148_v18, %v8864_v35  ;;  %v1090_v6 = vadd.s32 3, %v1086_v14  ;;  %v1140_v16 = vsel %vm1134_vm15, %v1137_v46, %v1139_v23 }
  0xe0   : > { %v8824_v4 = vpop.permute.xlu1 %806  ;;  %v1082_v33 = vsel %vm999_vm10, %v1081_v32, %v1080_v54  ;;  %v912_v54 = vpop.permute.xlu0 %911  ;;  %v1159_v57 = vadd.s32 1, %v8850_v42  ;;  %v765_v28 = vmul.f32 %v8615_v22, %v8655_v45  ;;  %v8874_v32 = vmul.f32 %v8615_v22, %v8662_v50 }
  0xe1   : > { %v1085_v55 = vsel %vm8789_vm11, %v8647_v37, %v1082_v33  ;;  %v8878_v36 = vmul.f32 %v8615_v22, %v8666_v58  ;;  %v8882_v49 = vmul.f32 %v8615_v22, %v8683_v21  ;;  %v7546_v31 = vadd.s32 4294967169, %v1417_v5 }
  0xe2   : > { %8280 = vcosq.f32 %v1085_v55  ;;  %v8885_v60 = vadd.f32 %v8642_v34, %v965_v43  ;;  %v964_v14 = vadd.f32 %v948_v9, %v863_v39  ;;  %v1321_v30 = vsel %vm1320_vm0, %v1319_v3, 0 }
  0xe3   : > { %8282 = vsinq.f32 %v1085_v55  ;;  %v1527_v50 = vadd.s32 1, %v7550_v62  ;;  %v1156_v19 = vmul.u32 %v8802_v44, %v1140_v16  ;;  %vm1158_vm1 = vc.u32 %v8865_v12, %v8849_v56 }
  0xe4   : > { %v811_v51 = vpop.permute.xlu1 %810  ;;  %13213 = vst [vmem:[#allocation2_spill] sm:$0xff] %v8885_v60  ;;  %v920_v26 = vpop.permute.xlu0 %919  ;;  %v8893_v58 = vshrl.u32 %v8733_v52, 5  ;;  %v1091_v5 = vand.u32 3, %v1090_v6  ;;  %v1160_v33 = vsel %vm1158_vm1, %v1159_v57, %v8850_v42  ;;  %v8900_v41 = vshrl.u32 %v13108_v59, %v8766_v25 }
  0xe5   : > { %v951_v3 = vmul.f32 %v8633_v29, %v912_v54  ;;  %v8904_v27 = vmul.f32 %v8633_v29, %v920_v26  ;;  %v1161_v44 = vadd.s32 %v1160_v33, %v1156_v19  ;;  %v1222_v55 = vshll.u32 %v13108_v59, %v8747_v20 }
  0xe6   : > { %v8908_v52 = vshrl.u32 %v1321_v30, 5  ;;  %v8910_v1 = vand.u32 31, %v1321_v30  ;;  %v1728_v46 = vand.u32 2139095040, %v8885_v60  ;;  %v8914_v42 = vadd.f32 %v8642_v34, %v964_v14 }
  0xe7   : > { %vm1528_vm3 = vcmp.gt.s32.totalorder %v1527_v50, 0  ;;  %v8916_v23 = vadd.s32 1, %v7546_v31  ;;  %v1162_v47 = vadd.s32 536870912, %v1161_v44  ;;  %v1232_v43 = vshrl.u32 %v13122_v10, %v8766_v25 }
  0xe8   : > { %v850_v9 = vmul.f32 %v8621_v24, %v811_v51  ;;  %vm1092_vm5 = vcmp.lt.s32.totalorder %v1091_v5, 2  ;;  %vm1093_vm6 = vcmp.eq.s32.totalorder %v1091_v5, 0  ;;  %vm1096_vm7 = vcmp.eq.s32.totalorder %v1091_v5, 2 }
  0xe9   : > { %v8895_v21 = vpop.permute.xlu1 %907  ;;  %v8922_v54 = vshrl.u32 %v1162_v47, 30  ;;  %v1223_v18 = vshrl.u32 %v13120_v61, %v8766_v25  ;;  %v1226_v62 = vshrl.u32 %v13118_v63, %v8766_v25  ;;  %v1231_v35 = vshll.u32 %v13110_v7, %v8747_v20 }
  0xea   : > { %v1729_v6 = vshrl.u32 %v1728_v46, 23  ;;  %v1624_v16 = vand.u32 2139095040, %v8914_v42  ;;  %v1229_v51 = vshrl.u32 %v13110_v7, %v8766_v25  ;;  %v1235_v31 = vshrl.u32 %v13112_v13, %v8766_v25 }
  0xeb   : > { %v1164_v30 = vshll.u32 %v8922_v54, 30  ;;  %v1225_v19 = vshll.u32 %v13120_v61, %v8747_v20  ;;  %v1233_v33 = vor.u32 %v1232_v43, %v1231_v35  ;;  %v866_v47 = vadd.f32 %v850_v9, %v765_v28 }
  0xec   : > { %v1224_v25 = vor.u32 %v1223_v18, %v1222_v55  ;;  %v1230_v45 = vor.u32 %v1229_v51, %v1228_v0  ;;  %v1236_v60 = vor.u32 %v1235_v31, %v1234_v15  ;;  %vm1240_vm8 = vcmp.lt.s32.totalorder %v8893_v58, 4 }
  0xed   : > { %v8945_v7 = vsub.s32 %v1161_v44, %v1164_v30  ;;  %v1227_v13 = vor.u32 %v1226_v62, %v1225_v19  ;;  %v8950_v28 = vsel %vm1528_vm3, %v1527_v50, 0  ;;  %v1246_v20 = vsel %vm1240_vm8, %v1233_v33, 920167782 }
  0xee   : > { %v8931_v57 = vpop.permute.xlu1 %724  ;;  %v7558_v44 = vadd.s32 4294967169, %v1729_v6  ;;  %v1625_v35 = vshrl.u32 %v1624_v16, 23  ;;  %v967_v55 = vadd.f32 %v951_v3, %v866_v47  ;;  %v849_v15 = vmul.f32 %v8621_v24, %v8824_v4 }
  0xef   : > { %v8281_v39 = vpop.eup %8280  ;;  %v1167_v9 = vsub.s32 0, %v8945_v7  ;;  %vm1237_vm9 = vcmp.lt.s32.totalorder %v8893_v58, 1  ;;  %vm1239_vm10 = vcmp.lt.s32.totalorder %v8893_v58, 3  ;;  %v1250_v4 = vsel %vm1240_vm8, %v1236_v60, 1326507024 }
  0xf0   : > { %v8283_v14 = vpop.eup %8282  ;;  %v1097_v26 = vxor.u32 2147483648, %v8281_v39  ;;  %v1247_v50 = vsel %vm1239_vm10, %v1230_v45, %v1246_v20  ;;  %v1249_v37 = vsel %vm1237_vm9, %v1227_v13, %v1230_v45  ;;  %vm1424_vm11 = vcmp.gt.s32.totalorder %v8916_v23, 0 }
  0xf1   : > { %v1094_v46 = vxor.u32 2147483648, %v8283_v14  ;;  %vm1238_vm12 = vcmp.lt.s32.totalorder %v8893_v58, 2  ;;  %v1251_v3 = vsel %vm1239_vm10, %v1233_v33, %v1250_v4  ;;  %v764_v62 = vmul.f32 %v8615_v22, %v8798_v17 }
  0xf2   : > { %v1098_v59 = vsel %vm1096_vm7, %v1097_v26, %v8283_v14  ;;  %v1242_v6 = vsel %vm1240_vm8, %v1230_v45, 2102212464  ;;  %v1252_v60 = vsel %vm1238_vm12, %v1249_v37, %v1251_v3  ;;  %v1735_v16 = vadd.s32 1, %v7558_v44 }
  0xf3   : > { %v1095_v2 = vsel %vm1093_vm6, %v8281_v39, %v1094_v46  ;;  %v8956_v18 = vpop.permute.xlu1 %814  ;;  %v8981_v39 = vadd.f32 %v8642_v34, %v967_v55  ;;  %v13215_v14 = vor.u32 8388608, %v8763_v38  ;;  %v7554_v30 = vadd.s32 4294967169, %v1625_v35 }
  0xf4   : > { %v1099_v43 = vsel %vm1092_vm5, %v1095_v2, %v1098_v59  ;;  %v7535_v59 = vmin.u32 %v1167_v9, %v8945_v7  ;;  %v1245_v2 = vsel %vm1237_vm9, %v1224_v25, %v1227_v13  ;;  %v865_v19 = vadd.f32 %v849_v15, %v764_v62 }
  0xf5   : > { %v1100_v0 = vsel %vm1089_vm4, nan, %v1099_v43  ;;  %13214 = vst [vmem:[#allocation3_spill] sm:$0xff] %v8981_v39  ;;  %v1248_v31 = vsel %vm1238_vm12, %v1245_v2, %v1247_v50  ;;  %v1253_v26 = vshll.u32 %v13215_v14, 8  ;;  %v950_v17 = vmul.f32 %v8633_v29, %v8895_v21 }
  0xf6   : > { %7896 = vmatprep.mubr.msk.f32.mxu0 %vm2670_vm2, %v1100_v0  ;;  %v1169_v5 = vclz %v7535_v59  ;;  %v1241_v45 = vsel %vm1237_vm9, %v8900_v41, %v1224_v25  ;;  %v1243_v47 = vsel %vm1239_vm10, %v1227_v13, %v1242_v6  ;;  %v1936_v38 = vand.u32 2139095040, %v8981_v39 }
  0xf7   : > { %v819_v33 = vpop.permute.xlu1 %818  ;;  %v8998_v46 = vmul.u32.u64.low %v1253_v26, %v1252_v60  ;;  %v8999_v43 = vmul.u32.u64.high %v1253_v26, %v1252_v60, %v8998_v46  ;;  %vm1103_vm14 = vcmp.lt.s32.totalorder %v8711_v11, 0  ;;  %v1157_v41 = vadd.s32 %v8849_v56, %v8865_v12  ;;  %v928_v60 = vpop.permute.xlu0 %927 }
  0xf8   : > { %v7536_v51 = vadd.s32 4294967294, %v1169_v5  ;;  %v9003_v20 = vmul.u32.u64.low %v1253_v26, %v1248_v31  ;;  %v9004_v44 = vmul.u32.u64.high %v1253_v26, %v1248_v31, %v9003_v20  ;;  %v852_v21 = vmul.f32 %v8621_v24, %v819_v33 }
  0xf9   : > { %v9011_v13 = vsub.s32 32, %v8910_v1  ;;  %v9014_v55 = vand.u32 31, %v8950_v28  ;;  %v966_v0 = vadd.f32 %v950_v17, %v865_v19  ;;  %v1244_v15 = vsel %vm1238_vm12, %v1241_v45, %v1243_v47 }
  0xfa   : > { %vm7537_vm13 = vcmp.lt.s32.totalorder %v7536_v51, 0  ;;  %v1425_v59 = vsel %vm1424_vm11, %v8916_v23, 0  ;;  %v1631_v2 = vadd.s32 1, %v7554_v30  ;;  %v13216_v50 = vand.u32 2147483647, %v8711_v11 }
  0xfb   : > { %v1172_v9 = vsel %vm7537_vm13, 0, %v7536_v51  ;;  %v1937_v4 = vshrl.u32 %v1936_v38, 23  ;;  %vm1262_vm0 = vc.u32 %v8999_v43, %v9003_v20  ;;  %v1263_v58 = vadd.s32 1, %v9004_v44 }
  0xfc   : > { %v1173_v25 = vsub.s32 32, %v1172_v9  ;;  %v1177_v35 = vsub.s32 4294967266, %v1172_v9  ;;  %vm9023_vm15 = vcmp.le.f32.partialorder %v13216_v50, 0.7853982  ;;  %v1174_v5 = vshll.u32 %v8945_v7, %v1172_v9  ;;  %v916_v46 = vpop.permute.xlu1 %915 }
  0xfd   : > { %vm1736_vm1 = vcmp.gt.s32.totalorder %v1735_v16, 0  ;;  %v868_v23 = vadd.f32 %v852_v21, %v8874_v32  ;;  %v1187_v3 = vsub.s32 4, %v8922_v54  ;;  %v1260_v62 = vmul.u32 %v1253_v26, %v1244_v15 }
  0xfe   : > { %v1175_v12 = vshrl.u32 %v1157_v41, %v1173_v25  ;;  %v1178_v37 = vadd.s32 127, %v1177_v35  ;;  %v9034_v6 = vadd.f32 %v8642_v34, %v966_v0  ;;  %v1264_v14 = vsel %vm1262_vm0, %v1263_v58, %v9004_v44 }
  0xff   : > { %v9038_v7 = vshrl.u32 %v8950_v28, 5  ;;  %v9040_v30 = vshrl.u32 %v1425_v59, 5  ;;  %v9042_v19 = vand.u32 31, %v1425_v59  ;;  %v1265_v17 = vadd.s32 %v1264_v14, %v1260_v62 }
 0x100   : > { %v1176_v51 = vor.u32 %v1175_v12, %v1174_v5  ;;  %v1179_v31 = vshll.u32 %v1178_v37, 23  ;;  %v1737_v32 = vsel %vm1736_vm1, %v1735_v16, 0  ;;  %vm1632_vm3 = vcmp.gt.s32.totalorder %v1631_v2, 0 }
 0x101   : > { %v7566_v33 = vadd.s32 4294967169, %v1937_v4  ;;  %v9045_v45 = vsub.s32 32, %v9014_v55  ;;  %v969_v47 = vadd.f32 %v8904_v27, %v868_v23  ;;  %v1188_v28 = vsel %vm1103_vm14, %v1187_v3, %v8922_v54  ;;  %v936_v54 = vpop.permute.xlu0 %935 }
 0x102   : > { %v1180_v26 = vor.u32 4788187, %v1179_v31  ;;  %v1266_v38 = vadd.s32 536870912, %v1265_v17  ;;  %v1832_v9 = vand.u32 2139095040, %v9034_v6  ;;  %v851_v44 = vmul.f32 %v8621_v24, %v8956_v18 }
 0x103   : > { %v1183_v21 = vcvt.s32.f32 %v1176_v51  ;;  %v9054_v41 = vand.u32 31, %v1737_v32  ;;  %v1633_v25 = vsel %vm1632_vm3, %v1631_v2, 0  ;;  %v766_v35 = vmul.f32 %v8615_v22, %v8931_v57 }
 0x104   : > { %v1181_v16 = vand.u32 2147483647, %v1180_v26  ;;  %v9058_v27 = vshrl.u32 %v1266_v38, 30  ;;  %v1943_v0 = vadd.s32 1, %v7566_v33  ;;  %v952_v15 = vmul.f32 %v8633_v29, %v916_v46 }
 0x105   : > { %v1190_v50 = vsel %vm9023_vm15, 0, %v1188_v28  ;;  %v9064_v24 = vsub.s32 32, %v9042_v19  ;;  %v9067_v18 = vadd.f32 %v8642_v34, %v969_v47  ;;  %v9070_v2 = vmul.f32 %v8633_v29, %v928_v60 }
 0x106   : > { %v1184_v59 = vmul.f32 %v1183_v21, %v1181_v16  ;;  %v1268_v22 = vshll.u32 %v9058_v27, 30  ;;  %v9073_v57 = vand.u32 31, %v1633_v25  ;;  %v1833_v12 = vshrl.u32 %v1832_v9, 23 }
 0x107   : > { %13219 = vst [vmem:[#allocation4_spill] sm:$0xff] %v9067_v18  ;;  %v867_v37 = vadd.f32 %v851_v44, %v766_v35  ;;  %v9075_v5 = vshrl.u32 %v1737_v32, 5  ;;  %v9078_v58 = vmul.f32 %v8633_v29, %v936_v54  ;;  %v1194_v23 = vadd.s32 3, %v1190_v50  ;;  %v9116_v54 = vpop.permute.xlu1 %734 }
 0x108   : > { %v1185_v4 = vxor.u32 2147483648, %v1184_v59  ;;  %v9080_v3 = vsub.s32 %v1265_v17, %v1268_v22  ;;  %v9083_v62 = vsub.s32 32, %v9054_v41  ;;  %vm1944_vm4 = vcmp.gt.s32.totalorder %v1943_v0, 0 }
 0x109   : > { %v968_v60 = vadd.f32 %v952_v15, %v867_v37  ;;  %v9087_v31 = vshrl.u32 %v1633_v25, 5  ;;  %v2144_v14 = vand.u32 2139095040, %v9067_v18  ;;  %v9095_v17 = vsub.s32 32, %v9073_v57 }
 0x10a   : > { %v1186_v51 = vsel %vm1103_vm14, %v1185_v4, %v1184_v59  ;;  %v1271_v32 = vsub.s32 0, %v9080_v3  ;;  %v7562_v33 = vadd.s32 4294967169, %v1833_v12  ;;  %v13117_v26 = vand.u32 2147483647, %v8741_v8 }
 0x10b   : > { %v1189_v29 = vsel %vm9023_vm15, %v8711_v11, %v1186_v51  ;;  %v9098_v47 = vsel %vm1944_vm4, %v1943_v0, 0  ;;  %v9100_v46 = vand.u32 3, %v1194_v23  ;;  %v9104_v38 = vadd.f32 %v8642_v34, %v968_v60 }
 0x10c   : > { %8284 = vcosq.f32 %v1189_v29  ;;  %v7539_v28 = vmin.u32 %v1271_v32, %v9080_v3  ;;  %v1327_v56 = vshrl.u32 %v13120_v61, %v9011_v13  ;;  %v1330_v9 = vshrl.u32 %v13118_v63, %v9011_v13 }
 0x10d   : > { %8286 = vsinq.f32 %v1189_v29  ;;  %13220 = vst [vmem:[#allocation5_spill] sm:$0xff] %v9104_v38  ;;  %v13221_v44 = vmov 2102212464   ;;  %v2145_v21 = vshrl.u32 %v2144_v14, 23  ;;  %v1336_v35 = vshrl.u32 %v13122_v10, %v9011_v13 }
 0x10e   : > { %v1333_v16 = vshrl.u32 %v13221_v44, %v9011_v13  ;;  %v1273_v25 = vclz %v7539_v28  ;;  %v13222_v0 = vmov 1326507024   ;;  %v1316_v34 = vand.u32 8388607, %v13117_v26 }
 0x10f   : > { %v1339_v15 = vshrl.u32 %v13222_v0, %v9011_v13  ;;  %v13223_v59 = vmov 683565275   ;;  %v1329_v22 = vshll.u32 %v13120_v61, %v8910_v1  ;;  %v1332_v12 = vshll.u32 %v13118_v63, %v8910_v1 }
 0x110   : > { %v1326_v50 = vshll.u32 %v13223_v59, %v8910_v1  ;;  %v9126_v37 = vadd.s32 1, %v7562_v33  ;;  %v7540_v4 = vadd.s32 4294967294, %v1273_v25  ;;  %v1335_v23 = vshll.u32 %v13221_v44, %v8910_v1 }
 0x111   : > { %v1338_v60 = vshll.u32 %v13122_v10, %v8910_v1  ;;  %v2040_v51 = vand.u32 2139095040, %v9104_v38  ;;  %v1331_v29 = vor.u32 %v1330_v9, %v1329_v22  ;;  %v1334_v32 = vor.u32 %v1333_v16, %v1332_v12 }
 0x112   : > { %v1328_v14 = vor.u32 %v1327_v56, %v1326_v50  ;;  %v7574_v28 = vadd.s32 4294967169, %v2145_v21  ;;  %vm1200_vm5 = vcmp.eq.s32.totalorder %v9100_v46, 2  ;;  %vm7541_vm6 = vcmp.lt.s32.totalorder %v7540_v4, 0  ;;  %v823_v56 = vpop.permute.xlu1 %822 }
 0x113   : > { %v1337_v26 = vor.u32 %v1336_v35, %v1335_v23  ;;  %v1340_v63 = vor.u32 %v1339_v15, %v1338_v60  ;;  %vm1197_vm7 = vcmp.eq.s32.totalorder %v9100_v46, 0  ;;  %v1261_v33 = vadd.s32 %v9003_v20, %v8999_v43 }
 0x114   : > { %v1276_v25 = vsel %vm7541_vm6, 0, %v7540_v4  ;;  %v1317_v61 = vor.u32 8388608, %v1316_v34  ;;  %v1325_v1 = vshrl.u32 %v13223_v59, %v9011_v13  ;;  %vm1341_vm8 = vcmp.lt.s32.totalorder %v8908_v52, 1 }
 0x115   : > { %v1277_v10 = vsub.s32 32, %v1276_v25  ;;  %vm1342_vm9 = vcmp.lt.s32.totalorder %v8908_v52, 2  ;;  %vm1344_vm10 = vcmp.lt.s32.totalorder %v8908_v52, 4  ;;  %vm1840_vm11 = vcmp.gt.s32.totalorder %v9126_v37, 0 }
 0x116   : > { %vm1193_vm12 = vweird.f32 %v8711_v11  ;;  %v1281_v9 = vsub.s32 4294967266, %v1276_v25  ;;  %vm1343_vm13 = vcmp.lt.s32.totalorder %v8908_v52, 3  ;;  %v1346_v43 = vsel %vm1344_vm10, %v1334_v32, 2102212464 }
 0x117   : > { %v1349_v20 = vsel %vm1341_vm8, %v1328_v14, %v1331_v29  ;;  %v1279_v13 = vshrl.u32 %v1261_v33, %v1277_v10  ;;  %v1350_v16 = vsel %vm1344_vm10, %v1337_v26, 920167782  ;;  %v1353_v21 = vsel %vm1341_vm8, %v1331_v29, %v1334_v32 }
 0x118   : > { %v1354_v35 = vsel %vm1344_vm10, %v1340_v63, 1326507024  ;;  %v1278_v15 = vshll.u32 %v9080_v3, %v1276_v25  ;;  %v1282_v34 = vadd.s32 127, %v1281_v9  ;;  %v1351_v50 = vsel %vm1343_vm13, %v1334_v32, %v1350_v16 }
 0x119   : > { %v1355_v22 = vsel %vm1343_vm13, %v1337_v26, %v1354_v35  ;;  %v8285_v12 = vpop.eup %8284  ;;  %v2041_v4 = vshrl.u32 %v2040_v51, 23  ;;  %v1352_v23 = vsel %vm1342_vm9, %v1349_v20, %v1351_v50  ;;  %v1357_v60 = vshll.u32 %v1317_v61, 8  ;;  %v827_v20 = vpop.permute.xlu1 %826 }
 0x11a   : > { %v1356_v10 = vsel %vm1342_vm9, %v1353_v21, %v1355_v22  ;;  %v8287_v33 = vpop.eup %8286  ;;  %v1201_v63 = vxor.u32 2147483648, %v8285_v12  ;;  %vm1207_vm14 = vcmp.lt.s32.totalorder %v8694_v48, 0  ;;  %v1280_v3 = vor.u32 %v1279_v13, %v1278_v15 }
 0x11b   : > { %v1283_v25 = vshll.u32 %v1282_v34, 23  ;;  %v1345_v32 = vsel %vm1341_vm8, %v1325_v1, %v1328_v14  ;;  %v1198_v9 = vxor.u32 2147483648, %v8287_v33  ;;  %v1347_v26 = vsel %vm1343_vm13, %v1331_v29, %v1346_v43 }
 0x11c   : > { %v9163_v51 = vmul.u32.u64.low %v1357_v60, %v1356_v10  ;;  %v9164_v16 = vmul.u32.u64.high %v1357_v60, %v1356_v10, %v9163_v51  ;;  %v1202_v61 = vsel %vm1200_vm5, %v1201_v63, %v8287_v33  ;;  %v13224_v21 = vand.u32 2147483647, %v8694_v48  ;;  %v9186_v33 = vld [vmem:[%s13209_s0 + $0x1] ss:$0 sm:$0xff] }
 0x11d   : > { %v1284_v13 = vor.u32 4788187, %v1283_v25  ;;  %v9174_v15 = vmul.u32.u64.low %v1357_v60, %v1352_v23  ;;  %v9175_v14 = vmul.u32.u64.high %v1357_v60, %v1352_v23, %v9174_v15  ;;  %v2151_v1 = vadd.s32 1, %v7574_v28 }
 0x11e   : > { %vm9170_vm15 = vcmp.le.f32.partialorder %v13224_v21, 0.7853982  ;;  %v7570_v29 = vadd.s32 4294967169, %v2041_v4  ;;  %vm1196_vm0 = vcmp.lt.s32.totalorder %v9100_v46, 2  ;;  %v1199_v43 = vsel %vm1197_vm7, %v8285_v12, %v1198_v9 }
 0x11f   : > { %v1203_v34 = vsel %vm1196_vm0, %v1199_v43, %v1202_v61  ;;  %v1285_v50 = vand.u32 2147483647, %v1284_v13  ;;  %v1287_v22 = vcvt.s32.f32 %v1280_v3  ;;  %v1348_v10 = vsel %vm1342_vm9, %v1345_v32, %v1347_v26  ;;  %v9210_v3 = vld [vmem:[%s13209_s0] ss:$0 sm:$0xff] }
 0x120   : > { %v854_v23 = vmul.f32 %v9186_v33, %v827_v20  ;;  %v1204_v28 = vsel %vm1193_vm12, nan, %v1203_v34  ;;  %v1291_v4 = vsub.s32 4, %v9058_v27  ;;  %vm1366_vm1 = vc.u32 %v9164_v16, %v9174_v15 }
 0x121   : > { %v9195_v46 = vshrl.u32 %v9098_v47, 5  ;;  %v9198_v52 = vand.u32 31, %v9098_v47  ;;  %7897 = vmatmul.mubr.msk.f32.vlgmr.msra.gmra.mxu0 %vm2670_vm2, %v1204_v28  ;;  %v1288_v12 = vmul.f32 %v1287_v22, %v1285_v50  ;;  %v1367_v63 = vadd.s32 1, %v9175_v14 }
 0x122   : > { %v9205_v11 = vsel %vm1840_vm11, %v9126_v37, 0  ;;  %v768_v25 = vmul.f32 %v9210_v3, %v9116_v54  ;;  %v853_v47 = vmul.f32 %v9186_v33, %v823_v56  ;;  %v1364_v32 = vmul.u32 %v1357_v60, %v1348_v10 }
 0x123   : > { %13227 = vst [vmem:[#allocation6_spill] sm:$0xff] %v9195_v46  ;;  %13228 = vst [vmem:[#allocation7_spill] sm:$0xff] %v9198_v52  ;;  %vm2152_vm3 = vcmp.gt.s32.totalorder %v2151_v1, 0  ;;  %v2047_v9 = vadd.s32 1, %v7570_v29  ;;  %v1289_v26 = vxor.u32 2147483648, %v1288_v12  ;;  %v1368_v51 = vsel %vm1366_vm1, %v1367_v63, %v9175_v14 }
 0x124   : > { %v870_v20 = vadd.f32 %v854_v23, %v8878_v36  ;;  %v1292_v37 = vsel %vm1207_vm14, %v1291_v4, %v9058_v27  ;;  %v1369_v61 = vadd.s32 %v1368_v51, %v1364_v32  ;;  %v13129_v21 = vand.u32 2147483647, %v8772_v40 }
 0x125   : > { %v1290_v54 = vsel %vm1207_vm14, %v1289_v26, %v1288_v12  ;;  %v1430_v56 = vshll.u32 %v13223_v59, %v9042_v19  ;;  %v13229_v60 = vmov 2475754826   ;;  %v13230_v29 = vmov 2131351028  }
 0x126   : > { %v1431_v13 = vshrl.u32 %v13229_v60, %v9064_v24  ;;  %v1433_v14 = vshll.u32 %v13229_v60, %v9042_v19  ;;  %v1293_v36 = vsel %vm9170_vm15, %v8694_v48, %v1290_v54  ;;  %v1370_v27 = vadd.s32 536870912, %v1369_v61 }
 0x127   : > { %v1434_v43 = vshrl.u32 %v13230_v29, %v9064_v24  ;;  %v1437_v34 = vshrl.u32 %v13221_v44, %v9064_v24  ;;  %8288 = vcosq.f32 %v1293_v36  ;;  %v1436_v50 = vshll.u32 %v13230_v29, %v9042_v19 }
 0x128   : > { %v1439_v22 = vshll.u32 %v13221_v44, %v9042_v19  ;;  %v13231_v10 = vmov 920167782   ;;  %8290 = vsinq.f32 %v1293_v36  ;;  %v9242_v28 = vshrl.u32 %v1370_v27, 30 }
 0x129   : > { %v1440_v23 = vshrl.u32 %v13231_v10, %v9064_v24  ;;  %v1442_v4 = vshll.u32 %v13231_v10, %v9042_v19  ;;  %v1443_v12 = vshrl.u32 %v13222_v0, %v9064_v24  ;;  %v1294_v63 = vsel %vm9170_vm15, 0, %v1292_v37 }
 0x12a   : > { %v1420_v32 = vand.u32 8388607, %v13129_v21  ;;  %v1432_v26 = vor.u32 %v1431_v13, %v1430_v56  ;;  %v1372_v54 = vshll.u32 %v9242_v28, 30  ;;  %v1435_v18 = vor.u32 %v1434_v43, %v1433_v14 }
 0x12b   : > { %v1441_v51 = vor.u32 %v1440_v23, %v1439_v22  ;;  %v1438_v36 = vor.u32 %v1437_v34, %v1436_v50  ;;  %v1444_v27 = vor.u32 %v1443_v12, %v1442_v4  ;;  %v9254_v38 = vand.u32 31, %v9205_v11 }
 0x12c   : > { %v9257_v19 = vsel %vm2152_vm3, %v2151_v1, 0  ;;  %vm2048_vm4 = vcmp.gt.s32.totalorder %v2047_v9, 0  ;;  %v9259_v46 = vadd.f32 %v853_v47, %v768_v25  ;;  %v971_v35 = vadd.f32 %v9070_v2, %v870_v20 }
 0x12d   : > { %13232 = vst [vmem:[#allocation8_spill] sm:$0xff] %v9257_v19  ;;  %v1298_v37 = vadd.s32 3, %v1294_v63  ;;  %v9262_v21 = vsub.s32 %v1369_v61, %v1372_v54  ;;  %vm1448_vm5 = vcmp.lt.s32.totalorder %v9040_v30, 4  ;;  %v1421_v56 = vor.u32 8388608, %v1420_v32  ;;  %v924_v61 = vpop.permute.xlu1 %923 }
 0x12e   : > { %vm1445_vm6 = vcmp.lt.s32.totalorder %v9040_v30, 1  ;;  %v1454_v13 = vsel %vm1448_vm5, %v1441_v51, 920167782  ;;  %v1458_v1 = vsel %vm1448_vm5, %v1444_v27, 1326507024  ;;  %vm1447_vm7 = vcmp.lt.s32.totalorder %v9040_v30, 3 }
 0x12f   : > { %v1375_v14 = vsub.s32 0, %v9262_v21  ;;  %v1453_v2 = vsel %vm1445_vm6, %v1432_v26, %v1435_v18  ;;  %v1457_v25 = vsel %vm1445_vm6, %v1435_v18, %v1438_v36  ;;  %v9277_v47 = vand.u32 31, %v9257_v19 }
 0x130   : > { %v9279_v20 = vsel %vm2048_vm4, %v2047_v9, 0  ;;  %v1455_v43 = vsel %vm1447_vm7, %v1438_v36, %v1454_v13  ;;  %v1459_v34 = vsel %vm1447_vm7, %v1441_v51, %v1458_v1  ;;  %v1299_v50 = vand.u32 3, %v1298_v37  ;;  %v9302_v51 = vld [vmem:[%s13210_s30] ss:$0 sm:$0xff] }
 0x131   : > { %13233 = vst [vmem:[#allocation9_spill] sm:$0xff] %v9277_v47  ;;  %v7543_v22 = vmin.u32 %v1375_v14, %v9262_v21  ;;  %vm1446_vm8 = vcmp.lt.s32.totalorder %v9040_v30, 2  ;;  %v1450_v23 = vsel %vm1448_vm5, %v1438_v36, 2102212464  ;;  %vm1297_vm9 = vweird.f32 %v8694_v48 }
 0x132   : > { %v1429_v9 = vshrl.u32 %v13223_v59, %v9064_v24  ;;  %v1456_v4 = vsel %vm1446_vm8, %v1453_v2, %v1455_v43  ;;  %v1460_v12 = vsel %vm1446_vm8, %v1457_v25, %v1459_v34  ;;  %v1461_v63 = vshll.u32 %v1421_v56, 8  ;;  %v9310_v24 = vld [vmem:[%s13209_s0 + $0x2] ss:$0 sm:$0xff] }
 0x133   : > { %v9297_v32 = vand.u32 31, %v9279_v20  ;;  %v9305_v54 = vadd.f32 %v9302_v51, %v971_v35  ;;  %v9313_v36 = vmul.f32 %v9310_v24, %v924_v61  ;;  %v1377_v27 = vclz %v7543_v22 }
 0x134   : > { %v1449_v37 = vsel %vm1445_vm6, %v1429_v9, %v1432_v26  ;;  %v1451_v56 = vsel %vm1447_vm7, %v1435_v18, %v1450_v23  ;;  %v9319_v13 = vmul.u32.u64.low %v1461_v63, %v1460_v12  ;;  %v9320_v1 = vmul.u32.u64.high %v1461_v63, %v1460_v12, %v9319_v13  ;;  %v8289_v35 = vpop.eup %8288 }
 0x135   : > { %13234 = vst [vmem:[#allocation10_spill] sm:$0xff] %v9297_v32  ;;  %13235 = vst [vmem:[#allocation11_spill] sm:$0xff] %v9305_v54  ;;  %vm1300_vm10 = vcmp.lt.s32.totalorder %v1299_v50, 2  ;;  %v7544_v14 = vadd.s32 4294967294, %v1377_v27  ;;  %v9322_v2 = vmul.u32.u64.low %v1461_v63, %v1456_v4  ;;  %v9323_v25 = vmul.u32.u64.high %v1461_v63, %v1456_v4, %v9322_v2  ;;  %v8291_v43 = vpop.eup %8290 }
 0x136   : > { %vm1301_vm11 = vcmp.eq.s32.totalorder %v1299_v50, 0  ;;  %vm1304_vm12 = vcmp.eq.s32.totalorder %v1299_v50, 2  ;;  %v1305_v61 = vxor.u32 2147483648, %v8289_v35  ;;  %v1365_v26 = vadd.s32 %v9174_v15, %v9164_v16 }
 0x137   : > { %v1302_v34 = vxor.u32 2147483648, %v8291_v43  ;;  %vm7545_vm13 = vcmp.lt.s32.totalorder %v7544_v14, 0  ;;  %v1395_v18 = vsub.s32 4, %v9242_v28  ;;  %v1452_v22 = vsel %vm1446_vm8, %v1449_v37, %v1451_v56 }
 0x138   : > { %v1306_v23 = vsel %vm1304_vm12, %v1305_v61, %v8291_v43  ;;  %v1380_v9 = vsel %vm7545_vm13, 0, %v7544_v14  ;;  %v13131_v4 = vand.u32 2147483647, %v8769_v53  ;;  %v1535_v12 = vshrl.u32 %v13229_v60, %v9045_v45 }
 0x139   : > { %v1303_v27 = vsel %vm1301_vm11, %v8289_v35, %v1302_v34  ;;  %vm1311_vm14 = vcmp.lt.s32.totalorder %v8741_v8, 0  ;;  %v1381_v13 = vsub.s32 32, %v1380_v9  ;;  %v1385_v19 = vsub.s32 4294967266, %v1380_v9 }
 0x13a   : > { %vm1470_vm15 = vc.u32 %v9320_v1, %v9322_v2  ;;  %v1307_v16 = vsel %vm1300_vm10, %v1303_v27, %v1306_v23  ;;  %v1468_v15 = vmul.u32 %v1461_v63, %v1452_v22  ;;  %v1471_v30 = vadd.s32 1, %v9323_v25 }
 0x13b   : > { %v1534_v37 = vshll.u32 %v13223_v59, %v9014_v55  ;;  %v1308_v56 = vsel %vm1297_vm9, nan, %v1307_v16  ;;  %v1382_v35 = vshll.u32 %v9262_v21, %v1380_v9  ;;  %v1383_v14 = vshrl.u32 %v1365_v26, %v1381_v13  ;;  %v9366_v16 = vpop.permute.xlu1 %744 }
 0x13c   : > { %v1386_v43 = vadd.s32 127, %v1385_v19  ;;  %7899 = vmatprep.mubr.msk.f32.mxu0 %vm2670_vm2, %v1308_v56  ;;  %v13236_v61 = vand.u32 2147483647, %v8741_v8  ;;  %v1472_v63 = vsel %vm1470_vm15, %v1471_v30, %v9323_v25  ;;  %v1524_v34 = vand.u32 8388607, %v13131_v4 }
 0x13d   : > { %v1538_v48 = vshrl.u32 %v13230_v29, %v9045_v45  ;;  %v1541_v21 = vshrl.u32 %v13221_v44, %v9045_v45  ;;  %v1384_v19 = vor.u32 %v1383_v14, %v1382_v35  ;;  %v1473_v22 = vadd.s32 %v1472_v63, %v1468_v15 }
 0x13e   : > { %vm9347_vm0 = vcmp.le.f32.partialorder %v13236_v61, 0.7853982  ;;  %v1387_v26 = vshll.u32 %v1386_v43, 23  ;;  %v1536_v23 = vor.u32 %v1535_v12, %v1534_v37  ;;  %v1537_v9 = vshll.u32 %v13229_v60, %v9014_v55 }
 0x13f   : > { %v1540_v27 = vshll.u32 %v13230_v29, %v9014_v55  ;;  %v1543_v25 = vshll.u32 %v13221_v44, %v9014_v55  ;;  %v1544_v13 = vshrl.u32 %v13231_v10, %v9045_v45  ;;  %v1474_v56 = vadd.s32 536870912, %v1473_v22 }
 0x140   : > { %v1388_v30 = vor.u32 4788187, %v1387_v26  ;;  %v1546_v15 = vshll.u32 %v13231_v10, %v9014_v55  ;;  %v1547_v12 = vshrl.u32 %v13222_v0, %v9045_v45  ;;  %v1391_v37 = vcvt.s32.f32 %v1384_v19 }
 0x141   : > { %v1539_v35 = vor.u32 %v1538_v48, %v1537_v9  ;;  %v1542_v14 = vor.u32 %v1541_v21, %v1540_v27  ;;  %v1545_v43 = vor.u32 %v1544_v13, %v1543_v25  ;;  %v9372_v63 = vshrl.u32 %v1474_v56, 30  ;;  %v9395_v27 = vpop.permute.xlu1 %830 }
 0x142   : > { %v1389_v61 = vand.u32 2147483647, %v1388_v30  ;;  %v1548_v4 = vor.u32 %v1547_v12, %v1546_v15  ;;  %vm1552_vm1 = vcmp.lt.s32.totalorder %v9038_v7, 4  ;;  %v970_v26 = vadd.f32 %v9313_v36, %v9259_v46 }
 0x143   : > { %v1396_v55 = vsel %vm1311_vm14, %v1395_v18, %v9242_v28  ;;  %v1525_v39 = vor.u32 8388608, %v1524_v34  ;;  %v1558_v19 = vsel %vm1552_vm1, %v1545_v43, 920167782  ;;  %v1476_v21 = vshll.u32 %v9372_v63, 30 }
 0x144   : > { %v1392_v48 = vmul.f32 %v1391_v37, %v1389_v61  ;;  %vm1549_vm3 = vcmp.lt.s32.totalorder %v9038_v7, 1  ;;  %vm1551_vm4 = vcmp.lt.s32.totalorder %v9038_v7, 3  ;;  %v1562_v36 = vsel %vm1552_vm1, %v1548_v4, 1326507024 }
 0x145   : > { %v1557_v9 = vsel %vm1549_vm3, %v1536_v23, %v1539_v35  ;;  %v1559_v46 = vsel %vm1551_vm4, %v1542_v14, %v1558_v19  ;;  %v1561_v28 = vsel %vm1549_vm3, %v1539_v35, %v1542_v14  ;;  %v1398_v34 = vsel %vm9347_vm0, 0, %v1396_v55 }
 0x146   : > { %v1393_v18 = vxor.u32 2147483648, %v1392_v48  ;;  %v9397_v25 = vsub.s32 %v1473_v22, %v1476_v21  ;;  %v1533_v13 = vshrl.u32 %v13223_v59, %v9045_v45  ;;  %vm1550_vm5 = vcmp.lt.s32.totalorder %v9038_v7, 2 }
 0x147   : > { %v1554_v30 = vsel %vm1552_vm1, %v1542_v14, 2102212464  ;;  %v1563_v56 = vsel %vm1551_vm4, %v1545_v43, %v1562_v36  ;;  %v1565_v4 = vshll.u32 %v1525_v39, 8  ;;  %v1560_v22 = vsel %vm1550_vm5, %v1557_v9, %v1559_v46  ;;  %v835_v36 = vpop.permute.xlu1 %834 }
 0x148   : > { %v1394_v15 = vsel %vm1311_vm14, %v1393_v18, %v1392_v48  ;;  %v1479_v12 = vsub.s32 0, %v9397_v25  ;;  %v1564_v45 = vsel %vm1550_vm5, %v1561_v28, %v1563_v56  ;;  %v2352_v37 = vand.u32 2139095040, %v9305_v54 }
 0x149   : > { %v1397_v14 = vsel %vm9347_vm0, %v8741_v8, %v1394_v15  ;;  %v9417_v61 = vmul.u32.u64.low %v1565_v4, %v1564_v45  ;;  %v9418_v43 = vmul.u32.u64.high %v1565_v4, %v1564_v45, %v9417_v61  ;;  %v1553_v55 = vsel %vm1549_vm3, %v1533_v13, %v1536_v23 }
 0x14a   : > { %8292 = vcosq.f32 %v1397_v14  ;;  %v7547_v39 = vmin.u32 %v1479_v12, %v9397_v25  ;;  %v1555_v19 = vsel %vm1551_vm4, %v1539_v35, %v1554_v30  ;;  %v1402_v48 = vadd.s32 3, %v1398_v34 }
 0x14b   : > { %8294 = vsinq.f32 %v1397_v14  ;;  %v9425_v21 = vmul.u32.u64.low %v1565_v4, %v1560_v22  ;;  %v9426_v9 = vmul.u32.u64.high %v1565_v4, %v1560_v22, %v9425_v21  ;;  %v9430_v50 = vsub.s32 32, %v9198_v52 }
 0x14c   : > { %v9433_v46 = vshrl.u32 %v9205_v11, 5  ;;  %v9436_v28 = vsub.s32 32, %v9254_v38  ;;  %v1481_v23 = vclz %v7547_v39  ;;  %v9439_v18 = vsub.s32 32, %v9277_v47 }
 0x14d   : > { %v9442_v35 = vshrl.u32 %v9279_v20, 5  ;;  %v1499_v34 = vsub.s32 4, %v9372_v63  ;;  %v1556_v13 = vsel %vm1550_vm5, %v1553_v55, %v1555_v19  ;;  %v9448_v30 = vsub.s32 32, %v9297_v32 }
 0x14e   : > { %13239 = vst [vmem:[#allocation12_spill] sm:$0xff] %v9439_v18  ;;  %v9451_v11 = vadd.f32 %v9302_v51, %v970_v26  ;;  %v7548_v56 = vadd.s32 4294967294, %v1481_v23  ;;  %vm1574_vm6 = vc.u32 %v9418_v43, %v9425_v21  ;;  %v9455_v15 = vshrl.u32 %v2352_v37, 23 }
 0x14f   : > { %13240 = vst [vmem:[#allocation13_spill] sm:$0xff] %v9442_v35  ;;  %13241 = vst [vmem:[#allocation14_spill] sm:$0xff] %v9448_v30  ;;  %v1403_v12 = vand.u32 3, %v1402_v48  ;;  %v856_v20 = vmul.f32 %v9186_v33, %v835_v36  ;;  %v1575_v22 = vadd.s32 1, %v9426_v9  ;;  %v9461_v7 = vmul.f32 %v9210_v3, %v9366_v16 }
 0x150   : > { %vm1415_vm7 = vcmp.lt.s32.totalorder %v8772_v40, 0  ;;  %vm7549_vm8 = vcmp.lt.s32.totalorder %v7548_v56, 0  ;;  %v1572_v26 = vmul.u32 %v1565_v4, %v1556_v13  ;;  %v1469_v45 = vadd.s32 %v9322_v2, %v9320_v1 }
 0x151   : > { %v1484_v14 = vsel %vm7549_vm8, 0, %v7548_v56  ;;  %v9469_v37 = vsel %vm1415_vm7, %v1499_v34, %v9372_v63  ;;  %v1576_v61 = vsel %vm1574_vm6, %v1575_v22, %v9426_v9  ;;  %v13134_v3 = vand.u32 2147483647, %v8914_v42 }
 0x152   : > { %v1485_v39 = vsub.s32 32, %v1484_v14  ;;  %v1489_v55 = vsub.s32 4294967266, %v1484_v14  ;;  %v1577_v19 = vadd.s32 %v1576_v61, %v1572_v26  ;;  %vm1404_vm9 = vcmp.lt.s32.totalorder %v1403_v12, 2 }
 0x153   : > { %v9475_v4 = vadd.f32 %v856_v20, %v8882_v49  ;;  %v13242_v1 = vand.u32 2147483647, %v8772_v40  ;;  %vm1401_vm11 = vweird.f32 %v8741_v8  ;;  %v1486_v63 = vshll.u32 %v9397_v25, %v1484_v14 }
 0x154   : > { %v1487_v48 = vshrl.u32 %v1469_v45, %v1485_v39  ;;  %v1490_v9 = vadd.s32 127, %v1489_v55  ;;  %v1578_v36 = vadd.s32 536870912, %v1577_v19  ;;  %vm1405_vm12 = vcmp.eq.s32.totalorder %v1403_v12, 0 }
 0x155   : > { %vm9479_vm10 = vcmp.le.f32.partialorder %v13242_v1, 0.7853982  ;;  %vm1408_vm13 = vcmp.eq.s32.totalorder %v1403_v12, 2  ;;  %v1639_v23 = vshrl.u32 %v13229_v60, %v9095_v17  ;;  %v1628_v20 = vand.u32 8388607, %v13134_v3 }
 0x156   : > { %v1502_v49 = vsel %vm9479_vm10, 0, %v9469_v37  ;;  %v1488_v34 = vor.u32 %v1487_v48, %v1486_v63  ;;  %v1491_v13 = vshll.u32 %v1490_v9, 23  ;;  %v1579_v56 = vshrl.u32 %v1578_v36, 30 }
 0x157   : > { %v8293_v22 = vpop.eup %8292  ;;  %v1638_v25 = vshll.u32 %v13223_v59, %v9073_v57  ;;  %v1641_v26 = vshll.u32 %v13229_v60, %v9073_v57  ;;  %v1642_v45 = vshrl.u32 %v13230_v29, %v9095_v17  ;;  %v1648_v14 = vshrl.u32 %v13231_v10, %v9095_v17 }
 0x158   : > { %v8295_v37 = vpop.eup %8294  ;;  %v1409_v61 = vxor.u32 2147483648, %v8293_v22  ;;  %v1492_v39 = vor.u32 4788187, %v1491_v13  ;;  %v1580_v55 = vshll.u32 %v1579_v56, 30  ;;  %v1645_v1 = vshrl.u32 %v13221_v44, %v9095_v17 }
 0x159   : > { %v1406_v63 = vxor.u32 2147483648, %v8295_v37  ;;  %vm1519_vm14 = vcmp.lt.s32.totalorder %v8769_v53, 0  ;;  %v1640_v48 = vor.u32 %v1639_v23, %v1638_v25  ;;  %v1644_v9 = vshll.u32 %v13230_v29, %v9073_v57 }
 0x15a   : > { %v1647_v36 = vshll.u32 %v13221_v44, %v9073_v57  ;;  %v1410_v3 = vsel %vm1408_vm13, %v1409_v61, %v8295_v37  ;;  %v1493_v16 = vand.u32 2147483647, %v1492_v39  ;;  %v1495_v54 = vcvt.s32.f32 %v1488_v34 }
 0x15b   : > { %v9508_v47 = vsub.s32 %v1577_v19, %v1580_v55  ;;  %v1407_v13 = vsel %vm1405_vm12, %v8293_v22, %v1406_v63  ;;  %v1643_v18 = vor.u32 %v1642_v45, %v1641_v26  ;;  %v1651_v32 = vshrl.u32 %v13222_v0, %v9095_v17 }
 0x15c   : > { %v1649_v35 = vor.u32 %v1648_v14, %v1647_v36  ;;  %v1411_v23 = vsel %vm1404_vm9, %v1407_v13, %v1410_v3  ;;  %v1496_v25 = vmul.f32 %v1495_v54, %v1493_v16  ;;  %v1646_v52 = vor.u32 %v1645_v1, %v1644_v9 }
 0x15d   : > { %v1583_v30 = vsub.s32 0, %v9508_v47  ;;  %v1412_v37 = vsel %vm1401_vm11, nan, %v1411_v23  ;;  %v1629_v61 = vor.u32 8388608, %v1628_v20  ;;  %v1650_v19 = vshll.u32 %v13231_v10, %v9073_v57 }
 0x15e   : > { %vm1653_vm15 = vcmp.lt.s32.totalorder %v9087_v31, 1  ;;  %7900 = vmatmul.mubr.msk.f32.gmra.mxu0 %vm2670_vm2, %v1412_v37  ;;  %v1497_v34 = vxor.u32 2147483648, %v1496_v25  ;;  %v13245_v22 = vand.u32 2147483647, %v8769_v53  ;;  %v1603_v3 = vsub.s32 4, %v1579_v56 }
 0x15f   : > { %v7551_v54 = vmin.u32 %v1583_v30, %v9508_v47  ;;  %vm1656_vm1 = vcmp.lt.s32.totalorder %v9087_v31, 4  ;;  %v1652_v8 = vor.u32 %v1651_v32, %v1650_v19  ;;  %vm1655_vm3 = vcmp.lt.s32.totalorder %v9087_v31, 3 }
 0x160   : > { %vm9523_vm0 = vcmp.le.f32.partialorder %v13245_v22, 0.7853982  ;;  %v1661_v57 = vsel %vm1653_vm15, %v1640_v48, %v1643_v18  ;;  %v1662_v16 = vsel %vm1656_vm1, %v1649_v35, 920167782  ;;  %v1498_v20 = vsel %vm1415_vm7, %v1497_v34, %v1496_v25  ;;  %v13248_v22 = vld [vmem:[#allocation2_spill] sm:$0xff] }
 0x161   : > { %v1506_v26 = vadd.s32 3, %v1502_v49  ;;  %v1585_v45 = vclz %v7551_v54  ;;  %v1663_v30 = vsel %vm1655_vm3, %v1646_v52, %v1662_v16  ;;  %v1501_v32 = vsel %vm9479_vm10, %v8772_v40, %v1498_v20 }
 0x162   : > { %v1637_v14 = vshrl.u32 %v13223_v59, %v9095_v17  ;;  %vm1654_vm4 = vcmp.lt.s32.totalorder %v9087_v31, 2  ;;  %v1658_v39 = vsel %vm1656_vm1, %v1646_v52, 2102212464  ;;  %8296 = vcosq.f32 %v1501_v32 }
 0x163   : > { %v7552_v55 = vadd.s32 4294967294, %v1585_v45  ;;  %v1604_v49 = vsel %vm1519_vm14, %v1603_v3, %v1579_v56  ;;  %v1664_v1 = vsel %vm1654_vm4, %v1661_v57, %v1663_v30  ;;  %8298 = vsinq.f32 %v1501_v32 }
 0x164   : > { %v1665_v2 = vsel %vm1653_vm15, %v1643_v18, %v1646_v52  ;;  %v1666_v17 = vsel %vm1656_vm1, %v1652_v8, 1326507024  ;;  %v1669_v63 = vshll.u32 %v1629_v61, 8  ;;  %v1657_v9 = vsel %vm1653_vm15, %v1637_v14, %v1640_v48 }
 0x165   : > { %vm7553_vm5 = vcmp.lt.s32.totalorder %v7552_v55, 0  ;;  %v1659_v36 = vsel %vm1655_vm3, %v1643_v18, %v1658_v39  ;;  %v1667_v56 = vsel %vm1655_vm3, %v1649_v35, %v1666_v17  ;;  %v9566_v37 = vand.u32 3, %v1506_v26 }
 0x166   : > { %v1588_v13 = vsel %vm7553_vm5, 0, %v7552_v55  ;;  %v1668_v23 = vsel %vm1654_vm4, %v1665_v2, %v1667_v56  ;;  %v9562_v25 = vmul.u32.u64.low %v1669_v63, %v1664_v1  ;;  %v9563_v52 = vmul.u32.u64.high %v1669_v63, %v1664_v1, %v9562_v25 }
 0x167   : > { %v1573_v61 = vadd.s32 %v9425_v21, %v9418_v43  ;;  %v1589_v48 = vsub.s32 32, %v1588_v13  ;;  %v1593_v19 = vsub.s32 4294967266, %v1588_v13  ;;  %v1606_v18 = vsel %vm9523_vm0, 0, %v1604_v49 }
 0x168   : > { %v9572_v34 = vmul.u32.u64.low %v1669_v63, %v1668_v23  ;;  %v9573_v35 = vmul.u32.u64.high %v1669_v63, %v1668_v23, %v9572_v34  ;;  %v1725_v54 = vand.u32 2147483647, %v13248_v22  ;;  %v1590_v3 = vshll.u32 %v9508_v47, %v1588_v13 }
 0x169   : > { %v1591_v8 = vshrl.u32 %v1573_v61, %v1589_v48  ;;  %v1594_v57 = vadd.s32 127, %v1593_v19  ;;  %v1660_v16 = vsel %vm1654_vm4, %v1657_v9, %v1659_v36  ;;  %v9580_v20 = vadd.s32 4294967169, %v9455_v15 }
 0x16a   : > { %v9584_v43 = vmul.f32 %v9186_v33, %v9395_v27  ;;  %v9588_v21 = vadd.f32 %v9078_v58, %v9475_v4  ;;  %v1679_v26 = vadd.s32 1, %v9563_v52  ;;  %vm1509_vm6 = vcmp.eq.s32.totalorder %v9566_v37, 0 }
 0x16b   : > { %vm1512_vm7 = vcmp.eq.s32.totalorder %v9566_v37, 2  ;;  %v1592_v47 = vor.u32 %v1591_v8, %v1590_v3  ;;  %v1595_v31 = vshll.u32 %v1594_v57, 23  ;;  %v1610_v45 = vadd.s32 3, %v1606_v18 }
 0x16c   : > { %vm1508_vm8 = vcmp.lt.s32.totalorder %v9566_v37, 2  ;;  %v1676_v15 = vmul.u32 %v1669_v63, %v1660_v16  ;;  %vm1678_vm9 = vc.u32 %v9573_v35, %v9562_v25  ;;  %v1732_v33 = vand.u32 8388607, %v1725_v54 }
 0x16d   : > { %v1743_v58 = vshrl.u32 %v13229_v60, %v9083_v62  ;;  %vm1505_vm10 = vweird.f32 %v8772_v40  ;;  %v1596_v27 = vor.u32 4788187, %v1595_v31  ;;  %v1680_v4 = vsel %vm1678_vm9, %v1679_v26, %v9563_v52 }
 0x16e   : > { %v1741_v30 = vshrl.u32 %v13223_v59, %v9083_v62  ;;  %v1746_v32 = vshrl.u32 %v13230_v29, %v9083_v62  ;;  %v1681_v14 = vadd.s32 %v1680_v4, %v1676_v15  ;;  %v1742_v39 = vshll.u32 %v13223_v59, %v9054_v41 }
 0x16f   : > { %v1745_v55 = vshll.u32 %v13229_v60, %v9054_v41  ;;  %v1752_v49 = vshrl.u32 %v13231_v10, %v9083_v62  ;;  %v1597_v1 = vand.u32 2147483647, %v1596_v27  ;;  %v1599_v2 = vcvt.s32.f32 %v1592_v47  ;;  %v8297_v9 = vpop.eup %8296 }
 0x170   : > { %v1749_v17 = vshrl.u32 %v13221_v44, %v9083_v62  ;;  %v1751_v63 = vshll.u32 %v13221_v44, %v9054_v41  ;;  %v1682_v36 = vadd.s32 536870912, %v1681_v14  ;;  %v1744_v56 = vor.u32 %v1743_v58, %v1742_v39  ;;  %v8299_v52 = vpop.eup %8298 }
 0x171   : > { %v1748_v13 = vshll.u32 %v13230_v29, %v9054_v41  ;;  %v1755_v23 = vshrl.u32 %v13222_v0, %v9083_v62  ;;  %v1513_v61 = vxor.u32 2147483648, %v8297_v9  ;;  %v1600_v48 = vmul.f32 %v1599_v2, %v1597_v1 }
 0x172   : > { %v1747_v19 = vor.u32 %v1746_v32, %v1745_v55  ;;  %v1753_v18 = vor.u32 %v1752_v49, %v1751_v63  ;;  %v1510_v34 = vxor.u32 2147483648, %v8299_v52  ;;  %v1683_v3 = vshrl.u32 %v1682_v36, 30 }
 0x173   : > { %v1733_v8 = vor.u32 8388608, %v1732_v33  ;;  %v1754_v57 = vshll.u32 %v13231_v10, %v9054_v41  ;;  %v1514_v16 = vsel %vm1512_vm7, %v1513_v61, %v8299_v52  ;;  %v1601_v26 = vxor.u32 2147483648, %v1600_v48 }
 0x174   : > { %v1750_v47 = vor.u32 %v1749_v17, %v1748_v13  ;;  %vm1757_vm11 = vcmp.lt.s32.totalorder %v9075_v5, 1  ;;  %v1511_v62 = vsel %vm1509_vm6, %v8297_v9, %v1510_v34  ;;  %v1684_v31 = vshll.u32 %v1683_v3, 30 }
 0x175   : > { %v1756_v15 = vor.u32 %v1755_v23, %v1754_v57  ;;  %vm1760_vm12 = vcmp.lt.s32.totalorder %v9075_v5, 4  ;;  %v1515_v33 = vsel %vm1508_vm8, %v1511_v62, %v1514_v16  ;;  %v1602_v41 = vsel %vm1519_vm14, %v1601_v26, %v1600_v48  ;;  %v932_v23 = vpop.permute.xlu1 %931 }
 0x176   : > { %v1765_v58 = vsel %vm1757_vm11, %v1744_v56, %v1747_v19  ;;  %v1766_v27 = vsel %vm1760_vm12, %v1753_v18, 920167782  ;;  %v1516_v4 = vsel %vm1505_vm10, nan, %v1515_v33  ;;  %v1605_v32 = vsel %vm9523_vm0, %v8769_v53, %v1602_v41 }
 0x177   : > { %v9641_v39 = vsub.s32 %v1681_v14, %v1684_v31  ;;  %vm1759_vm13 = vcmp.lt.s32.totalorder %v9075_v5, 3  ;;  %7902 = vmatprep.mubr.msk.f32.mxu0 %vm2670_vm2, %v1516_v4  ;;  %8300 = vcosq.f32 %v1605_v32  ;;  %vm1758_vm14 = vcmp.lt.s32.totalorder %v9075_v5, 2 }
 0x178   : > { %v1762_v37 = vsel %vm1760_vm12, %v1750_v47, 2102212464  ;;  %v1767_v40 = vsel %vm1759_vm13, %v1750_v47, %v1766_v27  ;;  %8302 = vsinq.f32 %v1605_v32  ;;  %v1769_v14 = vsel %vm1757_vm11, %v1747_v19, %v1750_v47 }
 0x179   : > { %v1687_v55 = vsub.s32 0, %v9641_v39  ;;  %v1768_v12 = vsel %vm1758_vm14, %v1765_v58, %v1767_v40  ;;  %v9655_v49 = vand.u32 3, %v1610_v45  ;;  %v1770_v1 = vsel %vm1760_vm12, %v1756_v15, 1326507024 }
 0x17a   : > { %v1773_v2 = vshll.u32 %v1733_v8, 8  ;;  %v1829_v17 = vand.u32 2147483647, %v9034_v6  ;;  %v1761_v9 = vsel %vm1757_vm11, %v1741_v30, %v1744_v56  ;;  %v1763_v36 = vsel %vm1759_vm13, %v1747_v19, %v1762_v37 }
 0x17b   : > { %v7555_v63 = vmin.u32 %v1687_v55, %v9641_v39  ;;  %v1771_v13 = vsel %vm1759_vm13, %v1753_v18, %v1770_v1  ;;  %v1707_v45 = vsub.s32 4, %v1683_v3  ;;  %v13249_v34 = vand.u32 2139095040, %v9451_v11 }
 0x17c   : > { %v1772_v52 = vsel %vm1758_vm14, %v1769_v14, %v1771_v13  ;;  %v9669_v61 = vmul.u32.u64.low %v1773_v2, %v1768_v12  ;;  %v9670_v48 = vmul.u32.u64.high %v1773_v2, %v1768_v12, %v9669_v61  ;;  %v9679_v30 = vadd.f32 %v9584_v43, %v9461_v7 }
 0x17d   : > { %v9675_v8 = vshrl.u32 %v13249_v34, 23  ;;  %v9683_v56 = vadd.f32 %v9302_v51, %v9588_v21  ;;  %v1689_v19 = vclz %v7555_v63  ;;  %v1764_v18 = vsel %vm1758_vm14, %v1761_v9, %v1763_v36 }
 0x17e   : > { %v9687_v57 = vmul.u32.u64.low %v1773_v2, %v1772_v52  ;;  %v9688_v16 = vmul.u32.u64.high %v1773_v2, %v1772_v52, %v9687_v57  ;;  %v9692_v26 = vand.u32 8388607, %v1829_v17  ;;  %vm1616_vm15 = vcmp.eq.s32.totalorder %v9655_v49, 2 }
 0x17f   : > { %v9696_v7 = vmul.f32 %v9310_v24, %v932_v23  ;;  %vm1623_vm0 = vcmp.lt.s32.totalorder %v8914_v42, 0  ;;  %v7556_v43 = vadd.s32 4294967294, %v1689_v19  ;;  %vm1613_vm1 = vcmp.eq.s32.totalorder %v9655_v49, 0 }
 0x180   : > { %v1677_v5 = vadd.s32 %v9562_v25, %v9573_v35  ;;  %v9704_v21 = vsel %vm1623_vm0, %v1707_v45, %v1683_v3  ;;  %v1783_v47 = vadd.s32 1, %v9670_v48  ;;  %v1847_v62 = vshrl.u32 %v13229_v60, %v9436_v28 }
 0x181   : > { %vm1612_vm3 = vcmp.lt.s32.totalorder %v9655_v49, 2  ;;  %vm7557_vm4 = vcmp.lt.s32.totalorder %v7556_v43, 0  ;;  %v1780_v24 = vmul.u32 %v1773_v2, %v1764_v18  ;;  %v1845_v31 = vshrl.u32 %v13223_v59, %v9436_v28 }
 0x182   : > { %v1846_v15 = vshll.u32 %v13223_v59, %v9254_v38  ;;  %vm1609_vm5 = vweird.f32 %v8769_v53  ;;  %v1692_v25 = vsel %vm7557_vm4, 0, %v7556_v43  ;;  %vm1782_vm6 = vc.u32 %v9688_v16, %v9669_v61 }
 0x183   : > { %v1837_v35 = vor.u32 8388608, %v9692_v26  ;;  %v1849_v3 = vshll.u32 %v13229_v60, %v9254_v38  ;;  %v1693_v33 = vsub.s32 32, %v1692_v25  ;;  %v1697_v41 = vsub.s32 4294967266, %v1692_v25 }
 0x184   : > { %v1784_v58 = vsel %vm1782_vm6, %v1783_v47, %v9670_v48  ;;  %v1850_v27 = vshrl.u32 %v13230_v29, %v9436_v28  ;;  %v1848_v32 = vor.u32 %v1847_v62, %v1846_v15  ;;  %v1852_v37 = vshll.u32 %v13230_v29, %v9254_v38  ;;  %v8301_v55 = vpop.eup %8300 }
 0x185   : > { %v1785_v4 = vadd.s32 %v1784_v58, %v1780_v24  ;;  %v1856_v40 = vshrl.u32 %v13231_v10, %v9436_v28  ;;  %v13250_v12 = vand.u32 2147483647, %v8914_v42  ;;  %v1694_v1 = vshll.u32 %v9641_v39, %v1692_v25  ;;  %v8303_v36 = vpop.eup %8302 }
 0x186   : > { %v1695_v2 = vshrl.u32 %v1677_v5, %v1693_v33  ;;  %v1698_v63 = vadd.s32 127, %v1697_v41  ;;  %v1853_v9 = vshrl.u32 %v13221_v44, %v9436_v28  ;;  %v1617_v13 = vxor.u32 2147483648, %v8301_v55 }
 0x187   : > { %vm9729_vm7 = vcmp.le.f32.partialorder %v13250_v12, 0.7853982  ;;  %v1786_v23 = vadd.s32 536870912, %v1785_v4  ;;  %v1855_v45 = vshll.u32 %v13221_v44, %v9254_v38  ;;  %v1859_v52 = vshrl.u32 %v13222_v0, %v9436_v28 }
 0x188   : > { %v1614_v48 = vxor.u32 2147483648, %v8303_v36  ;;  %v1696_v34 = vor.u32 %v1695_v2, %v1694_v1  ;;  %v1699_v19 = vshll.u32 %v1698_v63, 23  ;;  %vm1727_vm8 = vcmp.lt.s32.totalorder %v13248_v22, 0 }
 0x189   : > { %v1851_v39 = vor.u32 %v1850_v27, %v1849_v3  ;;  %v1618_v18 = vsel %vm1616_vm15, %v1617_v13, %v8303_v36  ;;  %v1787_v57 = vshrl.u32 %v1786_v23, 30  ;;  %v1857_v26 = vor.u32 %v1856_v40, %v1855_v45 }
 0x18a   : > { %v1858_v43 = vshll.u32 %v13231_v10, %v9254_v38  ;;  %v1615_v5 = vsel %vm1613_vm1, %v8301_v55, %v1614_v48  ;;  %v1700_v47 = vor.u32 4788187, %v1699_v19  ;;  %v1854_v62 = vor.u32 %v1853_v9, %v1852_v37 }
 0x18b   : > { %vm1861_vm9 = vcmp.lt.s32.totalorder %v9433_v46, 1  ;;  %v1619_v28 = vsel %vm1612_vm3, %v1615_v5, %v1618_v18  ;;  %v1703_v24 = vcvt.s32.f32 %v1696_v34  ;;  %v1788_v15 = vshll.u32 %v1787_v57, 30 }
 0x18c   : > { %v1860_v25 = vor.u32 %v1859_v52, %v1858_v43  ;;  %v1620_v3 = vsel %vm1609_vm5, nan, %v1619_v28  ;;  %v1701_v33 = vand.u32 2147483647, %v1700_v47  ;;  %vm1864_vm10 = vcmp.lt.s32.totalorder %v9433_v46, 4  ;;  %v13255_v43 = vld [vmem:[#allocation3_spill] sm:$0xff] }
 0x18d   : > { %v1869_v38 = vsel %vm1861_vm9, %v1848_v32, %v1851_v39  ;;  %7903 = vmatmul.mubr.msk.f32.gmra.mxu0 %vm2670_vm2, %v1620_v3  ;;  %v9756_v41 = vsub.s32 %v1785_v4, %v1788_v15  ;;  %v1811_v58 = vsub.s32 4, %v1787_v57  ;;  %vm1863_vm11 = vcmp.lt.s32.totalorder %v9433_v46, 3 }
 0x18e   : > { %v1870_v49 = vsel %vm1864_vm10, %v1857_v26, 920167782  ;;  %v1704_v27 = vmul.f32 %v1703_v24, %v1701_v33  ;;  %vm1862_vm12 = vcmp.lt.s32.totalorder %v9433_v46, 2  ;;  %v1866_v53 = vsel %vm1864_vm10, %v1854_v62, 2102212464 }
 0x18f   : > { %v1871_v37 = vsel %vm1863_vm11, %v1854_v62, %v1870_v49  ;;  %v1710_v4 = vsel %vm9729_vm7, 0, %v9704_v21  ;;  %v1791_v40 = vsub.s32 0, %v9756_v41  ;;  %v1873_v12 = vsel %vm1861_vm9, %v1851_v39, %v1854_v62 }
 0x190   : > { %v1872_v55 = vsel %vm1862_vm12, %v1869_v38, %v1871_v37  ;;  %v1705_v1 = vxor.u32 2147483648, %v1704_v27  ;;  %v1865_v2 = vsel %vm1861_vm9, %v1845_v31, %v1848_v32  ;;  %v1874_v63 = vsel %vm1864_vm10, %v1860_v25, 1326507024 }
 0x191   : > { %v1877_v9 = vshll.u32 %v1837_v35, 8  ;;  %v7559_v36 = vmin.u32 %v1791_v40, %v9756_v41  ;;  %v1812_v21 = vsel %vm1727_vm8, %v1811_v58, %v1787_v57  ;;  %v1867_v13 = vsel %vm1863_vm11, %v1851_v39, %v1866_v53 }
 0x192   : > { %v1875_v23 = vsel %vm1863_vm11, %v1857_v26, %v1874_v63  ;;  %v1706_v45 = vsel %vm1623_vm0, %v1705_v1, %v1704_v27  ;;  %v1714_v48 = vadd.s32 3, %v1710_v4  ;;  %vm9798_vm13 = vcmp.le.f32.partialorder %v1725_v54, 0.7853982 }
 0x193   : > { %v1876_v31 = vsel %vm1862_vm12, %v1873_v12, %v1875_v23  ;;  %v9789_v32 = vmul.u32.u64.low %v1877_v9, %v1872_v55  ;;  %v9790_v52 = vmul.u32.u64.high %v1877_v9, %v1872_v55, %v9789_v32  ;;  %v1709_v35 = vsel %vm9729_vm7, %v8914_v42, %v1706_v45 }
 0x194   : > { %v1793_v19 = vclz %v7559_v36  ;;  %8304 = vcosq.f32 %v1709_v35  ;;  %v1814_v39 = vsel %vm9798_vm13, 0, %v1812_v21  ;;  %v1868_v14 = vsel %vm1862_vm12, %v1865_v2, %v1867_v13 }
 0x195   : > { %v9804_v18 = vmul.u32.u64.low %v1877_v9, %v1876_v31  ;;  %v9805_v57 = vmul.u32.u64.high %v1877_v9, %v1876_v31, %v9804_v18  ;;  %8306 = vsinq.f32 %v1709_v35  ;;  %v1933_v5 = vand.u32 2147483647, %v13255_v43 }
 0x196   : > { %v7560_v26 = vadd.s32 4294967294, %v1793_v19  ;;  %v9811_v54 = vadd.s32 1, %v9580_v20  ;;  %v9814_v47 = vadd.s32 4294967169, %v9675_v8  ;;  %v2560_v62 = vand.u32 2139095040, %v9683_v56  ;;  %v13259_v18 = vld [vmem:[#allocation6_spill] sm:$0xff] }
 0x197   : > { %v1887_v28 = vadd.s32 1, %v9790_v52  ;;  %v9820_v24 = vadd.f32 %v9696_v7, %v9679_v30  ;;  %v9822_v15 = vand.u32 3, %v1714_v48  ;;  %v1781_v46 = vadd.s32 %v9669_v61, %v9688_v16  ;;  %v13256_v16 = vld [vmem:[#allocation7_spill] sm:$0xff] }
 0x198   : > { %vm7561_vm14 = vcmp.lt.s32.totalorder %v7560_v26, 0  ;;  %v9826_v20 = vadd.s32 3, %v1814_v39  ;;  %v1884_v3 = vmul.u32 %v1877_v9, %v1868_v14  ;;  %vm1886_vm15 = vc.u32 %v9805_v57, %v9789_v32 }
 0x199   : > { %v1796_v25 = vsel %vm7561_vm14, 0, %v7560_v26  ;;  %v1888_v38 = vsel %vm1886_vm15, %v1887_v28, %v9790_v52  ;;  %v9833_v30 = vand.u32 8388607, %v1933_v5  ;;  %v1949_v61 = vshrl.u32 %v13223_v59, %v9430_v50 }
 0x19a   : > { %v1797_v8 = vsub.s32 32, %v1796_v25  ;;  %v1801_v33 = vsub.s32 4294967266, %v1796_v25  ;;  %v1889_v7 = vadd.s32 %v1888_v38, %v1884_v3  ;;  %v1950_v58 = vshll.u32 %v13223_v59, %v13256_v16 }
 0x19b   : > { %v1951_v49 = vshrl.u32 %v13229_v60, %v9430_v50  ;;  %vm1720_vm0 = vcmp.eq.s32.totalorder %v9822_v15, 2  ;;  %v1798_v27 = vshll.u32 %v9756_v41, %v1796_v25  ;;  %v1954_v4 = vshrl.u32 %v13230_v29, %v9430_v50 }
 0x19c   : > { %v1799_v53 = vshrl.u32 %v1781_v46, %v1797_v8  ;;  %v1802_v37 = vadd.s32 127, %v1801_v33  ;;  %vm1717_vm1 = vcmp.eq.s32.totalorder %v9822_v15, 0  ;;  %vm1831_vm3 = vcmp.lt.s32.totalorder %v9034_v6, 0 }
 0x19d   : > { %v1890_v40 = vadd.s32 536870912, %v1889_v7  ;;  %v1957_v55 = vshrl.u32 %v13221_v44, %v9430_v50  ;;  %v1959_v12 = vshll.u32 %v13221_v44, %v13256_v16  ;;  %v1960_v1 = vshrl.u32 %v13231_v10, %v9430_v50 }
 0x19e   : > { %vm1716_vm4 = vcmp.lt.s32.totalorder %v9822_v15, 2  ;;  %v1800_v41 = vor.u32 %v1799_v53, %v1798_v27  ;;  %v1803_v2 = vshll.u32 %v1802_v37, 23  ;;  %v1941_v63 = vor.u32 8388608, %v9833_v30 }
 0x19f   : > { %v1953_v9 = vshll.u32 %v13229_v60, %v13256_v16  ;;  %vm1713_vm5 = vweird.f32 %v8914_v42  ;;  %v1891_v36 = vshrl.u32 %v1890_v40, 30  ;;  %v1956_v21 = vshll.u32 %v13230_v29, %v13256_v16 }
 0x1a0   : > { %v1961_v13 = vor.u32 %v1960_v1, %v1959_v12  ;;  %v1963_v23 = vshrl.u32 %v13222_v0, %v9430_v50  ;;  %v1804_v45 = vor.u32 4788187, %v1803_v2  ;;  %v1952_v31 = vor.u32 %v1951_v49, %v1950_v58 }
 0x1a1   : > { %v1955_v52 = vor.u32 %v1954_v4, %v1953_v9  ;;  %v1962_v35 = vshll.u32 %v13231_v10, %v13256_v16  ;;  %vm9866_vm6 = vcmp.le.f32.partialorder %v1829_v17, 0.7853982  ;;  %v1892_v19 = vshll.u32 %v1891_v36, 30  ;;  %v8305_v26 = vpop.eup %8304 }
 0x1a2   : > { %v1958_v39 = vor.u32 %v1957_v55, %v1956_v21  ;;  %vm1965_vm7 = vcmp.lt.s32.totalorder %v13259_v18, 1  ;;  %vm1966_vm9 = vcmp.lt.s32.totalorder %v13259_v18, 2  ;;  %vm2360_vm10 = vcmp.gt.s32.totalorder %v9811_v54, 0  ;;  %v8307_v46 = vpop.eup %8306 }
 0x1a3   : > { %v1805_v50 = vand.u32 2147483647, %v1804_v45  ;;  %v1807_v14 = vcvt.s32.f32 %v1800_v41  ;;  %v1915_v28 = vsub.s32 4, %v1891_v36  ;;  %vm1968_vm11 = vcmp.lt.s32.totalorder %v13259_v18, 4 }
 0x1a4   : > { %v1721_v25 = vxor.u32 2147483648, %v8305_v26  ;;  %v9874_v17 = vsub.s32 %v1889_v7, %v1892_v19  ;;  %v1964_v3 = vor.u32 %v1963_v23, %v1962_v35  ;;  %v1974_v8 = vsel %vm1968_vm11, %v1961_v13, 920167782 }
 0x1a5   : > { %v1718_v33 = vxor.u32 2147483648, %v8307_v46  ;;  %v1808_v38 = vmul.f32 %v1807_v14, %v1805_v50  ;;  %vm1967_vm12 = vcmp.lt.s32.totalorder %v13259_v18, 3  ;;  %v1969_v30 = vsel %vm1965_vm7, %v1949_v61, %v1952_v31 }
 0x1a6   : > { %v1722_v16 = vsel %vm1720_vm0, %v1721_v25, %v8307_v46  ;;  %v1895_v58 = vsub.s32 0, %v9874_v17  ;;  %v1970_v7 = vsel %vm1968_vm11, %v1958_v39, 2102212464  ;;  %v1973_v49 = vsel %vm1965_vm7, %v1952_v31, %v1955_v52 }
 0x1a7   : > { %v1719_v27 = vsel %vm1717_vm1, %v8305_v26, %v1718_v33  ;;  %v1809_v53 = vxor.u32 2147483648, %v1808_v38  ;;  %v1916_v37 = vsel %vm1831_vm3, %v1915_v28, %v1891_v36  ;;  %v1975_v61 = vsel %vm1967_vm12, %v1958_v39, %v1974_v8  ;;  %v13261_v8 = vld [vmem:[#allocation14_spill] sm:$0xff] }
 0x1a8   : > { %v1723_v4 = vsel %vm1716_vm4, %v1719_v27, %v1722_v16  ;;  %v7563_v40 = vmin.u32 %v1895_v58, %v9874_v17  ;;  %v1977_v55 = vsel %vm1965_vm7, %v1955_v52, %v1958_v39  ;;  %v1978_v12 = vsel %vm1968_vm11, %v1964_v3, 1326507024  ;;  %v13262_v58 = vld [vmem:[#allocation10_spill] sm:$0xff] }
 0x1a9   : > { %v1724_v1 = vsel %vm1713_vm5, nan, %v1723_v4  ;;  %v1810_v41 = vsel %vm1727_vm8, %v1809_v53, %v1808_v38  ;;  %v1971_v2 = vsel %vm1967_vm12, %v1955_v52, %v1970_v7  ;;  %v1979_v15 = vsel %vm1967_vm12, %v1961_v13, %v1978_v12 }
 0x1aa   : > { %7905 = vmatprep.mubr.msk.f32.mxu0 %vm2670_vm2, %v1724_v1  ;;  %v1813_v9 = vsel %vm9798_vm13, %v13248_v22, %v1810_v41  ;;  %v1897_v36 = vclz %v7563_v40  ;;  %v1976_v42 = vsel %vm1966_vm9, %v1973_v49, %v1975_v61  ;;  %v1981_v21 = vshll.u32 %v1941_v63, 8 }
 0x1ab   : > { %v9917_v23 = vadd.f32 %v9302_v51, %v9820_v24  ;;  %8308 = vcosq.f32 %v1813_v9  ;;  %v1918_v45 = vsel %vm9866_vm6, 0, %v1916_v37  ;;  %v1980_v13 = vsel %vm1966_vm9, %v1977_v55, %v1979_v15  ;;  %v13260_v51 = vld [vmem:[#allocation5_spill] sm:$0xff] }
 0x1ac   : > { %8310 = vsinq.f32 %v1813_v9  ;;  %v7564_v31 = vadd.s32 4294967294, %v1897_v36  ;;  %v9923_v34 = vmul.u32.u64.low %v1981_v21, %v1980_v13  ;;  %v9924_v52 = vmul.u32.u64.high %v1981_v21, %v1980_v13, %v9923_v34 }
 0x1ad   : > { %v1972_v35 = vsel %vm1966_vm9, %v1969_v30, %v1971_v2  ;;  %v9928_v63 = vmul.u32.u64.low %v1981_v21, %v1976_v42  ;;  %v9929_v19 = vmul.u32.u64.high %v1981_v21, %v1976_v42, %v9928_v63  ;;  %v2037_v24 = vand.u32 2147483647, %v13260_v51 }
 0x1ae   : > { %v9936_v39 = vsel %vm2360_vm10, %v9811_v54, 0  ;;  %v9939_v26 = vadd.s32 1, %v9814_v47  ;;  %v9942_v50 = vand.u32 3, %v9826_v20  ;;  %vm7565_vm8 = vcmp.lt.s32.totalorder %v7564_v31, 0 }
 0x1af   : > { %v9946_v18 = vshrl.u32 %v2560_v62, 23  ;;  %v2456_v14 = vand.u32 2139095040, %v9917_v23  ;;  %v1885_v28 = vadd.s32 %v9789_v32, %v9805_v57  ;;  %v1900_v46 = vsel %vm7565_vm8, 0, %v7564_v31 }
 0x1b0   : > { %v1901_v25 = vsub.s32 32, %v1900_v46  ;;  %v1905_v54 = vsub.s32 4294967266, %v1900_v46  ;;  %v9951_v3 = vadd.s32 3, %v1918_v45  ;;  %v1988_v47 = vmul.u32 %v1981_v21, %v1972_v35  ;;  %v13263_v35 = vld [vmem:[#allocation13_spill] sm:$0xff] }
 0x1b1   : > { %vm1990_vm13 = vc.u32 %v9924_v52, %v9928_v63  ;;  %v1991_v20 = vadd.s32 1, %v9929_v19  ;;  %v9958_v62 = vand.u32 8388607, %v2037_v24  ;;  %v2053_v33 = vshrl.u32 %v13223_v59, %v13261_v8 }
 0x1b2   : > { %vm1824_vm14 = vcmp.eq.s32.totalorder %v9942_v50, 2  ;;  %v1902_v32 = vshll.u32 %v9874_v17, %v1900_v46  ;;  %v1903_v57 = vshrl.u32 %v1885_v28, %v1901_v25  ;;  %v1906_v38 = vadd.s32 127, %v1905_v54 }
 0x1b3   : > { %v2055_v30 = vshrl.u32 %v13229_v60, %v13261_v8  ;;  %vm1821_vm15 = vcmp.eq.s32.totalorder %v9942_v50, 0  ;;  %v1992_v16 = vsel %vm1990_vm13, %v1991_v20, %v9929_v19  ;;  %v2054_v7 = vshll.u32 %v13223_v59, %v13262_v58 }
 0x1b4   : > { %v2058_v49 = vshrl.u32 %v13230_v29, %v13261_v8  ;;  %v2061_v27 = vshrl.u32 %v13221_v44, %v13261_v8  ;;  %vm1820_vm0 = vcmp.lt.s32.totalorder %v9942_v50, 2  ;;  %v1904_v17 = vor.u32 %v1903_v57, %v1902_v32 }
 0x1b5   : > { %v1907_v53 = vshll.u32 %v1906_v38, 23  ;;  %v1993_v37 = vadd.s32 %v1992_v16, %v1988_v47  ;;  %v2057_v61 = vshll.u32 %v13229_v60, %v13262_v58  ;;  %vm1817_vm1 = vweird.f32 %v13248_v22 }
 0x1b6   : > { %v2060_v4 = vshll.u32 %v13230_v29, %v13262_v58  ;;  %v2063_v40 = vshll.u32 %v13221_v44, %v13262_v58  ;;  %v2064_v55 = vshrl.u32 %v13231_v10, %v13261_v8  ;;  %v2067_v12 = vshrl.u32 %v13222_v0, %v13261_v8 }
 0x1b7   : > { %v1908_v1 = vor.u32 4788187, %v1907_v53  ;;  %v1994_v41 = vadd.s32 536870912, %v1993_v37  ;;  %v2045_v2 = vor.u32 8388608, %v9958_v62  ;;  %v2056_v15 = vor.u32 %v2055_v30, %v2054_v7 }
 0x1b8   : > { %vm2256_vm4 = vcmp.gt.s32.totalorder %v9939_v26, 0  ;;  %vm1935_vm5 = vcmp.lt.s32.totalorder %v13255_v43, 0  ;;  %v2059_v9 = vor.u32 %v2058_v49, %v2057_v61  ;;  %v2062_v36 = vor.u32 %v2061_v27, %v2060_v4  ;;  %v8309_v45 = vpop.eup %8308 }
 0x1b9   : > { %v2065_v42 = vor.u32 %v2064_v55, %v2063_v40  ;;  %v2066_v21 = vshll.u32 %v13231_v10, %v13262_v58  ;;  %v1909_v13 = vand.u32 2147483647, %v1908_v1  ;;  %v1911_v31 = vcvt.s32.f32 %v1904_v17  ;;  %v8311_v19 = vpop.eup %8310 }
 0x1ba   : > { %v1995_v34 = vshrl.u32 %v1994_v41, 30  ;;  %vm2072_vm7 = vcmp.lt.s32.totalorder %v13263_v35, 4  ;;  %v1825_v28 = vxor.u32 2147483648, %v8309_v45  ;;  %vm2069_vm9 = vcmp.lt.s32.totalorder %v13263_v35, 1 }
 0x1bb   : > { %v2068_v46 = vor.u32 %v2067_v12, %v2066_v21  ;;  %v2078_v25 = vsel %vm2072_vm7, %v2065_v42, 920167782  ;;  %v1822_v54 = vxor.u32 2147483648, %v8311_v19  ;;  %v1912_v47 = vmul.f32 %v1911_v31, %v1909_v13 }
 0x1bc   : > { %v1996_v20 = vshll.u32 %v1995_v34, 30  ;;  %vm2071_vm10 = vcmp.lt.s32.totalorder %v13263_v35, 3  ;;  %v1826_v62 = vsel %vm1824_vm14, %v1825_v28, %v8311_v19  ;;  %v2074_v8 = vsel %vm2072_vm7, %v2062_v36, 2102212464 }
 0x1bd   : > { %v2077_v32 = vsel %vm2069_vm9, %v2056_v15, %v2059_v9  ;;  %v2079_v57 = vsel %vm2071_vm10, %v2062_v36, %v2078_v25  ;;  %v1823_v38 = vsel %vm1821_vm15, %v8309_v45, %v1822_v54  ;;  %v1913_v30 = vxor.u32 2147483648, %v1912_v47 }
 0x1be   : > { %v10006_v16 = vsub.s32 %v1993_v37, %v1996_v20  ;;  %v2019_v58 = vsub.s32 4, %v1995_v34  ;;  %v1827_v7 = vsel %vm1820_vm0, %v1823_v38, %v1826_v62  ;;  %vm2070_vm11 = vcmp.lt.s32.totalorder %v13263_v35, 2 }
 0x1bf   : > { %v2073_v49 = vsel %vm2069_vm9, %v2053_v33, %v2056_v15  ;;  %v2081_v27 = vsel %vm2069_vm9, %v2059_v9, %v2062_v36  ;;  %v1828_v17 = vsel %vm1817_vm1, nan, %v1827_v7  ;;  %v1914_v53 = vsel %vm1831_vm3, %v1913_v30, %v1912_v47  ;;  %v13269_v30 = vld [vmem:[#allocation9_spill] sm:$0xff] }
 0x1c0   : > { %v1999_v37 = vsub.s32 0, %v10006_v16  ;;  %v2080_v50 = vsel %vm2070_vm11, %v2077_v32, %v2079_v57  ;;  %7906 = vmatmul.mubr.msk.f32.gmra.mxu0 %vm2670_vm2, %v1828_v17  ;;  %v1917_v33 = vsel %vm9866_vm6, %v9034_v6, %v1914_v53  ;;  %v2075_v61 = vsel %vm2071_vm10, %v2059_v9, %v2074_v8  ;;  %v13268_v8 = vld [vmem:[#allocation12_spill] sm:$0xff] }
 0x1c1   : > { %v2082_v22 = vsel %vm2072_vm7, %v2068_v46, 1326507024  ;;  %v2085_v4 = vshll.u32 %v2045_v2, 8  ;;  %8312 = vcosq.f32 %v1917_v33  ;;  %v2020_v55 = vsel %vm1935_vm5, %v2019_v58, %v1995_v34  ;;  %v13267_v34 = vld [vmem:[#allocation4_spill] sm:$0xff] }
 0x1c2   : > { %v7567_v40 = vmin.u32 %v1999_v37, %v10006_v16  ;;  %v2083_v12 = vsel %vm2071_vm10, %v2065_v42, %v2082_v22  ;;  %8314 = vsinq.f32 %v1917_v33  ;;  %v10044_v2 = vsel %vm2256_vm4, %v9939_v26, 0  ;;  %v13266_v26 = vld [vmem:[#allocation8_spill] sm:$0xff] }
 0x1c3   : > { %v2084_v48 = vsel %vm2070_vm11, %v2081_v27, %v2083_v12  ;;  %v10037_v1 = vmul.u32.u64.low %v2085_v4, %v2080_v50  ;;  %v10038_v41 = vmul.u32.u64.high %v2085_v4, %v2080_v50, %v10037_v1  ;;  %v2457_v15 = vshrl.u32 %v2456_v14, 23 }
 0x1c4   : > { %vm10050_vm3 = vcmp.le.f32.partialorder %v1933_v5, 0.7853982  ;;  %v2001_v36 = vclz %v7567_v40  ;;  %v10055_v42 = vand.u32 3, %v9951_v3  ;;  %v10063_v31 = vshrl.u32 %v13266_v26, 5 }
 0x1c5   : > { %v2022_v21 = vsel %vm10050_vm3, 0, %v2020_v55  ;;  %v10059_v45 = vmul.u32.u64.low %v2085_v4, %v2084_v48  ;;  %v10060_v13 = vmul.u32.u64.high %v2085_v4, %v2084_v48, %v10059_v45  ;;  %v2076_v5 = vsel %vm2070_vm11, %v2073_v49, %v2075_v61 }
 0x1c6   : > { %v7568_v14 = vadd.s32 4294967294, %v2001_v36  ;;  %v2141_v19 = vand.u32 2147483647, %v13267_v34  ;;  %v10069_v28 = vand.u32 31, %v9936_v39  ;;  %v10072_v3 = vand.u32 31, %v10044_v2 }
 0x1c7   : > { %v10075_v46 = vadd.s32 4294967169, %v9946_v18  ;;  %v2095_v25 = vadd.s32 1, %v10038_v41  ;;  %v10078_v54 = vadd.s32 4294967169, %v2457_v15  ;;  %v1989_v47 = vadd.s32 %v9928_v63, %v9924_v52 }
 0x1c8   : > { %vm7569_vm6 = vcmp.lt.s32.totalorder %v7568_v14, 0  ;;  %v10082_v35 = vadd.s32 3, %v2022_v21  ;;  %vm1928_vm12 = vcmp.eq.s32.totalorder %v10055_v42, 2  ;;  %v2092_v62 = vmul.u32 %v2085_v4, %v2076_v5 }
 0x1c9   : > { %v2004_v20 = vsel %vm7569_vm6, 0, %v7568_v14  ;;  %vm2094_vm8 = vc.u32 %v10060_v13, %v10037_v1  ;;  %v10089_v18 = vshrl.u32 %v13223_v59, %v13268_v8  ;;  %vm1925_vm13 = vcmp.eq.s32.totalorder %v10055_v42, 0 }
 0x1ca   : > { %v2005_v32 = vsub.s32 32, %v2004_v20  ;;  %v2009_v57 = vsub.s32 4294967266, %v2004_v20  ;;  %v2096_v52 = vsel %vm2094_vm8, %v2095_v25, %v10038_v41  ;;  %v10095_v63 = vand.u32 8388607, %v2141_v19 }
 0x1cb   : > { %vm1924_vm14 = vcmp.lt.s32.totalorder %v10055_v42, 2  ;;  %v2097_v38 = vadd.s32 %v2096_v52, %v2092_v62  ;;  %v2158_v58 = vshll.u32 %v13223_v59, %v13269_v30  ;;  %v2159_v7 = vshrl.u32 %v13229_v60, %v13268_v8 }
 0x1cc   : > { %v2162_v49 = vshrl.u32 %v13230_v29, %v13268_v8  ;;  %vm1921_vm15 = vweird.f32 %v9034_v6  ;;  %v2006_v27 = vshll.u32 %v10006_v16, %v2004_v20  ;;  %v2007_v17 = vshrl.u32 %v1989_v47, %v2005_v32 }
 0x1cd   : > { %v2010_v53 = vadd.s32 127, %v2009_v57  ;;  %v2165_v37 = vshrl.u32 %v13221_v44, %v13268_v8  ;;  %v2098_v50 = vadd.s32 536870912, %v2097_v38  ;;  %v2161_v33 = vshll.u32 %v13229_v60, %v13269_v30 }
 0x1ce   : > { %v2164_v61 = vshll.u32 %v13230_v29, %v13269_v30  ;;  %v2168_v22 = vshrl.u32 %v13231_v10, %v13268_v8  ;;  %v2008_v4 = vor.u32 %v2007_v17, %v2006_v27  ;;  %vm2039_vm0 = vcmp.lt.s32.totalorder %v13260_v51, 0  ;;  %v8313_v12 = vpop.eup %8312 }
 0x1cf   : > { %v2011_v40 = vshll.u32 %v2010_v53, 23  ;;  %v2149_v16 = vor.u32 8388608, %v10095_v63  ;;  %v2171_v55 = vshrl.u32 %v13222_v0, %v13268_v8  ;;  %v2099_v48 = vshrl.u32 %v2098_v50, 30  ;;  %v8315_v21 = vpop.eup %8314 }
 0x1d0   : > { %v2160_v41 = vor.u32 %v2159_v7, %v2158_v58  ;;  %v2163_v15 = vor.u32 %v2162_v49, %v2161_v33  ;;  %v2167_v36 = vshll.u32 %v13221_v44, %v13269_v30  ;;  %v1929_v45 = vxor.u32 2147483648, %v8313_v12 }
 0x1d1   : > { %v2012_v26 = vor.u32 4788187, %v2011_v40  ;;  %v2166_v14 = vor.u32 %v2165_v37, %v2164_v61  ;;  %v2170_v5 = vshll.u32 %v13231_v10, %v13269_v30  ;;  %v1926_v25 = vxor.u32 2147483648, %v8315_v21 }
 0x1d2   : > { %vm10124_vm1 = vcmp.le.f32.partialorder %v2037_v24, 0.7853982  ;;  %v2100_v20 = vshll.u32 %v2099_v48, 30  ;;  %v2169_v62 = vor.u32 %v2168_v22, %v2167_v36  ;;  %vm2173_vm4 = vcmp.lt.s32.totalorder %v10063_v31, 1 }
 0x1d3   : > { %v1930_v8 = vsel %vm1928_vm12, %v1929_v45, %v8315_v21  ;;  %v2013_v32 = vand.u32 2147483647, %v2012_v26  ;;  %v2015_v57 = vcvt.s32.f32 %v2008_v4  ;;  %v2172_v52 = vor.u32 %v2171_v55, %v2170_v5 }
 0x1d4   : > { %v1927_v63 = vsel %vm1925_vm13, %v8313_v12, %v1926_v25  ;;  %v10133_v30 = vsub.s32 %v2097_v38, %v2100_v20  ;;  %v2123_v58 = vsub.s32 4, %v2099_v48  ;;  %vm2176_vm7 = vcmp.lt.s32.totalorder %v10063_v31, 4 }
 0x1d5   : > { %v1931_v24 = vsel %vm1924_vm14, %v1927_v63, %v1930_v8  ;;  %v2016_v7 = vmul.f32 %v2015_v57, %v2013_v32  ;;  %vm2175_vm9 = vcmp.lt.s32.totalorder %v10063_v31, 3  ;;  %v2178_v49 = vsel %vm2176_vm7, %v2166_v14, 2102212464 }
 0x1d6   : > { %v1932_v27 = vsel %vm1921_vm15, nan, %v1931_v24  ;;  %v2103_v17 = vsub.s32 0, %v10133_v30  ;;  %v2181_v53 = vsel %vm2173_vm4, %v2160_v41, %v2163_v15  ;;  %v2182_v38 = vsel %vm2176_vm7, %v2169_v62, 920167782 }
 0x1d7   : > { %7908 = vmatprep.mubr.msk.f32.mxu0 %vm2670_vm2, %v1932_v27  ;;  %v2017_v37 = vxor.u32 2147483648, %v2016_v7  ;;  %v2183_v42 = vsel %vm2175_vm9, %v2166_v14, %v2182_v38  ;;  %v2185_v50 = vsel %vm2173_vm4, %v2163_v15, %v2166_v14  ;;  %v2186_v33 = vsel %vm2176_vm7, %v2172_v52, 1326507024 }
 0x1d8   : > { %v7571_v61 = vmin.u32 %v2103_v17, %v10133_v30  ;;  %v2124_v6 = vsel %vm2039_vm0, %v2123_v58, %v2099_v48  ;;  %vm2174_vm10 = vcmp.lt.s32.totalorder %v10063_v31, 2  ;;  %v2187_v22 = vsel %vm2175_vm9, %v2169_v62, %v2186_v33 }
 0x1d9   : > { %v2018_v4 = vsel %vm1935_vm5, %v2017_v37, %v2016_v7  ;;  %v2184_v40 = vsel %vm2174_vm10, %v2181_v53, %v2183_v42  ;;  %v2188_v55 = vsel %vm2174_vm10, %v2185_v50, %v2187_v22  ;;  %v2189_v12 = vshll.u32 %v2149_v16, 8 }
 0x1da   : > { %v2021_v36 = vsel %vm10050_vm3, %v13255_v43, %v2018_v4  ;;  %v2105_v48 = vclz %v7571_v61  ;;  %v2177_v21 = vsel %vm2173_vm4, %v10089_v18, %v2160_v41  ;;  %v2179_v45 = vsel %vm2175_vm9, %v2163_v15, %v2178_v49 }
 0x1db   : > { %8316 = vcosq.f32 %v2021_v36  ;;  %v2126_v26 = vsel %vm10124_vm1, 0, %v2124_v6  ;;  %v10171_v14 = vmul.u32.u64.low %v2189_v12, %v2188_v55  ;;  %v10172_v5 = vmul.u32.u64.high %v2189_v12, %v2188_v55, %v10171_v14 }
 0x1dc   : > { %8318 = vsinq.f32 %v2021_v36  ;;  %v7572_v16 = vadd.s32 4294967294, %v2105_v48  ;;  %v10174_v25 = vmul.u32.u64.low %v2189_v12, %v2184_v40  ;;  %v10175_v9 = vmul.u32.u64.high %v2189_v12, %v2184_v40, %v10174_v25 }
 0x1dd   : > { %v10179_v20 = vshrl.u32 %v10044_v2, 5  ;;  %v2260_v18 = vsub.s32 32, %v10072_v3  ;;  %v10183_v41 = vadd.s32 1, %v10075_v46  ;;  %v2180_v15 = vsel %vm2174_vm10, %v2177_v21, %v2179_v45 }
 0x1de   : > { %v10188_v62 = vadd.s32 1, %v10078_v54  ;;  %v10191_v8 = vand.u32 3, %v10082_v35  ;;  %v2093_v32 = vadd.s32 %v10037_v1, %v10060_v13  ;;  %vm7573_vm5 = vcmp.lt.s32.totalorder %v7572_v16, 0 }
 0x1df   : > { %v2108_v2 = vsel %vm7573_vm5, 0, %v7572_v16  ;;  %v10195_v57 = vadd.s32 3, %v2126_v26  ;;  %vm2198_vm11 = vc.u32 %v10172_v5, %v10174_v25  ;;  %v2245_v46 = vand.u32 2147483647, %v9451_v11 }
 0x1e0   : > { %v2109_v31 = vsub.s32 32, %v2108_v2  ;;  %v2113_v52 = vsub.s32 4294967266, %v2108_v2  ;;  %v2196_v63 = vmul.u32 %v2189_v12, %v2180_v15  ;;  %v2199_v54 = vadd.s32 1, %v10175_v9 }
 0x1e1   : > { %v2110_v35 = vshll.u32 %v10133_v30, %v2108_v2  ;;  %v2261_v58 = vshrl.u32 %v13223_v59, %v2260_v18  ;;  %v2262_v1 = vshll.u32 %v13223_v59, %v10072_v3  ;;  %v2263_v13 = vshrl.u32 %v13229_v60, %v2260_v18 }
 0x1e2   : > { %vm2032_vm3 = vcmp.eq.s32.totalorder %v10191_v8, 2  ;;  %v2111_v24 = vshrl.u32 %v2093_v32, %v2109_v31  ;;  %v2114_v7 = vadd.s32 127, %v2113_v52  ;;  %v2200_v49 = vsel %vm2198_vm11, %v2199_v54, %v10175_v9 }
 0x1e3   : > { %v2266_v27 = vshrl.u32 %v13230_v29, %v2260_v18  ;;  %vm2029_vm6 = vcmp.eq.s32.totalorder %v10191_v8, 0  ;;  %v2201_v17 = vadd.s32 %v2200_v49, %v2196_v63  ;;  %v2252_v30 = vand.u32 8388607, %v2245_v46 }
 0x1e4   : > { %v2265_v53 = vshll.u32 %v13229_v60, %v10072_v3  ;;  %v2269_v38 = vshrl.u32 %v13221_v44, %v2260_v18  ;;  %vm2028_vm12 = vcmp.lt.s32.totalorder %v10191_v8, 2  ;;  %v2112_v37 = vor.u32 %v2111_v24, %v2110_v35 }
 0x1e5   : > { %v2115_v42 = vshll.u32 %v2114_v7, 23  ;;  %v2271_v50 = vshll.u32 %v13221_v44, %v10072_v3  ;;  %v2272_v33 = vshrl.u32 %v13231_v10, %v2260_v18  ;;  %vm2025_vm8 = vweird.f32 %v13255_v43 }
 0x1e6   : > { %v2202_v61 = vadd.s32 536870912, %v2201_v17  ;;  %v2264_v6 = vor.u32 %v2263_v13, %v2262_v1  ;;  %v2268_v22 = vshll.u32 %v13230_v29, %v10072_v3  ;;  %v2275_v4 = vshrl.u32 %v13222_v0, %v2260_v18 }
 0x1e7   : > { %v2116_v40 = vor.u32 4788187, %v2115_v42  ;;  %v2267_v55 = vor.u32 %v2266_v27, %v2265_v53  ;;  %v2273_v12 = vor.u32 %v2272_v33, %v2271_v50  ;;  %v2274_v36 = vshll.u32 %v13231_v10, %v10072_v3 }
 0x1e8   : > { %v2203_v48 = vshrl.u32 %v2202_v61, 30  ;;  %v2253_v21 = vor.u32 8388608, %v2252_v30  ;;  %v2270_v45 = vor.u32 %v2269_v38, %v2268_v22  ;;  %vm2277_vm13 = vcmp.lt.s32.totalorder %v10179_v20, 1  ;;  %v8317_v26 = vpop.eup %8316 }
 0x1e9   : > { %vm2464_vm14 = vcmp.gt.s32.totalorder %v10188_v62, 0  ;;  %v2117_v14 = vand.u32 2147483647, %v2116_v40  ;;  %v2119_v16 = vcvt.s32.f32 %v2112_v37  ;;  %v2276_v9 = vor.u32 %v2275_v4, %v2274_v36  ;;  %v8319_v18 = vpop.eup %8318 }
 0x1ea   : > { %vm2278_vm15 = vcmp.lt.s32.totalorder %v10179_v20, 2  ;;  %v2033_v15 = vxor.u32 2147483648, %v8317_v26  ;;  %v2204_v32 = vshll.u32 %v2203_v48, 30  ;;  %vm2279_vm4 = vcmp.lt.s32.totalorder %v10179_v20, 3 }
 0x1eb   : > { %vm2280_vm7 = vcmp.lt.s32.totalorder %v10179_v20, 4  ;;  %v2030_v3 = vxor.u32 2147483648, %v8319_v18  ;;  %v2120_v2 = vmul.f32 %v2119_v16, %v2117_v14  ;;  %v2285_v31 = vsel %vm2277_vm13, %v2264_v6, %v2267_v55 }
 0x1ec   : > { %v2286_v52 = vsel %vm2280_vm7, %v2273_v12, 920167782  ;;  %v2034_v63 = vsel %vm2032_vm3, %v2033_v15, %v8319_v18  ;;  %v10236_v54 = vsub.s32 %v2201_v17, %v2204_v32  ;;  %v2281_v35 = vsel %vm2277_vm13, %v2261_v58, %v2264_v6 }
 0x1ed   : > { %v2287_v1 = vsel %vm2279_vm4, %v2270_v45, %v2286_v52  ;;  %v2031_v13 = vsel %vm2029_vm6, %v8317_v26, %v2030_v3  ;;  %v2121_v24 = vxor.u32 2147483648, %v2120_v2  ;;  %v2227_v7 = vsub.s32 4, %v2203_v48 }
 0x1ee   : > { %v2282_v49 = vsel %vm2280_vm7, %v2270_v45, 2102212464  ;;  %v2035_v27 = vsel %vm2028_vm12, %v2031_v13, %v2034_v63  ;;  %v2207_v17 = vsub.s32 0, %v10236_v54  ;;  %v2288_v30 = vsel %vm2278_vm15, %v2285_v31, %v2287_v1  ;;  %v13274_v31 = vld [vmem:[#allocation11_spill] sm:$0xff] }
 0x1ef   : > { %v2289_v58 = vsel %vm2277_vm13, %v2267_v55, %v2270_v45  ;;  %v2036_v53 = vsel %vm2025_vm8, nan, %v2035_v27  ;;  %v2122_v38 = vsel %vm2039_vm0, %v2121_v24, %v2120_v2  ;;  %v2290_v37 = vsel %vm2280_vm7, %v2276_v9, 1326507024 }
 0x1f0   : > { %v2293_v42 = vshll.u32 %v2253_v21, 8  ;;  %7909 = vmatmul.mubr.msk.f32.gmra.mxu0 %vm2670_vm2, %v2036_v53  ;;  %v2125_v8 = vsel %vm10124_vm1, %v13260_v51, %v2122_v38  ;;  %v7575_v50 = vmin.u32 %v2207_v17, %v10236_v54  ;;  %v2283_v33 = vsel %vm2279_vm4, %v2267_v55, %v2282_v49 }
 0x1f1   : > { %v2291_v43 = vsel %vm2279_vm4, %v2273_v12, %v2290_v37  ;;  %8320 = vcosq.f32 %v2125_v8  ;;  %vm2143_vm0 = vcmp.lt.s32.totalorder %v13267_v34, 0  ;;  %vm2568_vm1 = vcmp.gt.s32.totalorder %v10183_v41, 0 }
 0x1f2   : > { %v2292_v61 = vsel %vm2278_vm15, %v2289_v58, %v2291_v43  ;;  %v10270_v6 = vmul.u32.u64.low %v2293_v42, %v2288_v30  ;;  %v10271_v22 = vmul.u32.u64.high %v2293_v42, %v2288_v30, %v10270_v6  ;;  %8322 = vsinq.f32 %v2125_v8 }
 0x1f3   : > { %v2209_v47 = vclz %v7575_v50  ;;  %v2228_v4 = vsel %vm2143_vm0, %v2227_v7, %v2203_v48  ;;  %v10278_v40 = vmul.u32.u64.low %v2293_v42, %v2292_v61  ;;  %v10279_v55 = vmul.u32.u64.high %v2293_v42, %v2292_v61, %v10278_v40 }
 0x1f4   : > { %v10284_v12 = vsel %vm2464_vm14, %v10188_v62, 0  ;;  %v10287_v36 = vand.u32 3, %v10195_v57  ;;  %v2284_v45 = vsel %vm2278_vm15, %v2281_v35, %v2283_v33  ;;  %v2364_v26 = vsub.s32 32, %v10069_v28  ;;  %v2900_v62 = vld [vmem:[%s13083_s6] sm:$0xff] }
 0x1f5   : > { %v7576_v21 = vadd.s32 4294967294, %v2209_v47  ;;  %vm10294_vm9 = vcmp.le.f32.partialorder %v2141_v19, 0.7853982  ;;  %v2303_v14 = vadd.s32 1, %v10271_v22  ;;  %v10303_v57 = vshrl.u32 %v9936_v39, 5  ;;  %7920 = vmatprep.subr.mxu1 %v2900_v62 }
 0x1f6   : > { %v10306_v20 = vsel %vm2568_vm1, %v10183_v41, 0  ;;  %v2230_v16 = vsel %vm10294_vm9, 0, %v2228_v4  ;;  %v10311_v19 = vand.u32 31, %v10284_v12  ;;  %v2300_v18 = vmul.u32 %v2293_v42, %v2284_v45  ;;  %7921 = vmatpush3.msra.mxu1 %v2900_v62 }
 0x1f7   : > { %vm7577_vm10 = vcmp.lt.s32.totalorder %v7576_v21, 0  ;;  %vm2302_vm5 = vc.u32 %v10279_v55, %v10270_v6  ;;  %vm2136_vm11 = vcmp.eq.s32.totalorder %v10287_v36, 2  ;;  %v2197_v39 = vadd.s32 %v10174_v25, %v10172_v5 }
 0x1f8   : > { %v2212_v9 = vsel %vm7577_vm10, 0, %v7576_v21  ;;  %v2304_v32 = vsel %vm2302_vm5, %v2303_v14, %v10271_v22  ;;  %vm2133_vm3 = vcmp.eq.s32.totalorder %v10287_v36, 0  ;;  %v10320_v3 = vadd.s32 3, %v2230_v16 }
 0x1f9   : > { %v2213_v41 = vsub.s32 32, %v2212_v9  ;;  %v2217_v15 = vsub.s32 4294967266, %v2212_v9  ;;  %v2305_v2 = vadd.s32 %v2304_v32, %v2300_v18  ;;  %v2349_v52 = vand.u32 2147483647, %v13274_v31 }
 0x1fa   : > { %v2367_v63 = vshrl.u32 %v13229_v60, %v2364_v26  ;;  %vm2132_vm6 = vcmp.lt.s32.totalorder %v10287_v36, 2  ;;  %v2214_v35 = vshll.u32 %v10236_v54, %v2212_v9  ;;  %v2370_v5 = vshrl.u32 %v13230_v29, %v2364_v26 }
 0x1fb   : > { %v2215_v1 = vshrl.u32 %v2197_v39, %v2213_v41  ;;  %v2218_v13 = vadd.s32 127, %v2217_v15  ;;  %vm2129_vm12 = vweird.f32 %v13260_v51  ;;  %v2306_v25 = vadd.s32 536870912, %v2305_v2 }
 0x1fc   : > { %v2365_v24 = vshrl.u32 %v13223_v59, %v2364_v26  ;;  %v2366_v7 = vshll.u32 %v13223_v59, %v10069_v28  ;;  %v2373_v49 = vshrl.u32 %v13221_v44, %v2364_v26  ;;  %v2369_v30 = vshll.u32 %v13229_v60, %v10069_v28 }
 0x1fd   : > { %v2216_v27 = vor.u32 %v2215_v1, %v2214_v35  ;;  %v2219_v17 = vshll.u32 %v2218_v13, 23  ;;  %v2376_v54 = vshrl.u32 %v13231_v10, %v2364_v26  ;;  %v2307_v58 = vshrl.u32 %v2306_v25, 30 }
 0x1fe   : > { %v2356_v53 = vand.u32 8388607, %v2349_v52  ;;  %v2372_v38 = vshll.u32 %v13230_v29, %v10069_v28  ;;  %v2379_v37 = vshrl.u32 %v13222_v0, %v2364_v26  ;;  %v8321_v42 = vpop.eup %8320  ;;  %v2368_v50 = vor.u32 %v2367_v63, %v2366_v7 }
 0x1ff   : > { %v2220_v8 = vor.u32 4788187, %v2219_v17  ;;  %v2371_v33 = vor.u32 %v2370_v5, %v2369_v30  ;;  %v2375_v43 = vshll.u32 %v13221_v44, %v10069_v28  ;;  %v8323_v61 = vpop.eup %8322  ;;  %v2137_v22 = vxor.u32 2147483648, %v8321_v42 }
 0x200   : > { %v2308_v47 = vshll.u32 %v2307_v58, 30  ;;  %v2374_v4 = vor.u32 %v2373_v49, %v2372_v38  ;;  %v2378_v40 = vshll.u32 %v13231_v10, %v10069_v28  ;;  %v2134_v21 = vxor.u32 2147483648, %v8323_v61 }
 0x201   : > { %v2221_v45 = vand.u32 2147483647, %v2220_v8  ;;  %v2223_v14 = vcvt.s32.f32 %v2216_v27  ;;  %v2377_v62 = vor.u32 %v2376_v54, %v2375_v43  ;;  %v2138_v26 = vsel %vm2136_vm11, %v2137_v22, %v8323_v61 }
 0x202   : > { %vm2247_vm8 = vcmp.lt.s32.totalorder %v9451_v11, 0  ;;  %v10347_v16 = vsub.s32 %v2305_v2, %v2308_v47  ;;  %v2357_v9 = vor.u32 8388608, %v2356_v53  ;;  %v2380_v18 = vor.u32 %v2379_v37, %v2378_v40 }
 0x203   : > { %v2135_v39 = vsel %vm2133_vm3, %v8321_v42, %v2134_v21  ;;  %v2224_v41 = vmul.f32 %v2223_v14, %v2221_v45  ;;  %vm2381_vm13 = vcmp.lt.s32.totalorder %v10303_v57, 1  ;;  %vm2384_vm14 = vcmp.lt.s32.totalorder %v10303_v57, 4 }
 0x204   : > { %v2139_v28 = vsel %vm2132_vm6, %v2135_v39, %v2138_v26  ;;  %v2311_v15 = vsub.s32 0, %v10347_v16  ;;  %vm2383_vm15 = vcmp.lt.s32.totalorder %v10303_v57, 3  ;;  %v2386_v32 = vsel %vm2384_vm14, %v2374_v4, 2102212464 }
 0x205   : > { %v2140_v2 = vsel %vm2129_vm12, nan, %v2139_v28  ;;  %v2225_v63 = vxor.u32 2147483648, %v2224_v41  ;;  %v2389_v35 = vsel %vm2381_vm13, %v2368_v50, %v2371_v33  ;;  %v2390_v1 = vsel %vm2384_vm14, %v2377_v62, 920167782 }
 0x206   : > { %7911 = vmatprep.mubr.msk.f32.mxu0 %vm2670_vm2, %v2140_v2  ;;  %v7579_v13 = vmin.u32 %v2311_v15, %v10347_v16  ;;  %v2391_v36 = vsel %vm2383_vm15, %v2374_v4, %v2390_v1  ;;  %v2393_v5 = vsel %vm2381_vm13, %v2371_v33, %v2374_v4  ;;  %v2394_v25 = vsel %vm2384_vm14, %v2380_v18, 1326507024 }
 0x207   : > { %v2226_v51 = vsel %vm2143_vm0, %v2225_v63, %v2224_v41  ;;  %v2331_v7 = vsub.s32 4, %v2307_v58  ;;  %vm2382_vm4 = vcmp.lt.s32.totalorder %v10303_v57, 2  ;;  %v2395_v49 = vsel %vm2383_vm15, %v2377_v62, %v2394_v25 }
 0x208   : > { %v2229_v27 = vsel %vm10294_vm9, %v13267_v34, %v2226_v51  ;;  %v2313_v17 = vclz %v7579_v13  ;;  %v2392_v30 = vsel %vm2382_vm4, %v2389_v35, %v2391_v36  ;;  %v2397_v54 = vshll.u32 %v2357_v9, 8 }
 0x209   : > { %8324 = vcosq.f32 %v2229_v27  ;;  %v2385_v53 = vsel %vm2381_vm13, %v2365_v24, %v2368_v50  ;;  %v2387_v38 = vsel %vm2383_vm15, %v2371_v33, %v2386_v32  ;;  %v2396_v37 = vsel %vm2382_vm4, %v2393_v5, %v2395_v49 }
 0x20a   : > { %8326 = vsinq.f32 %v2229_v27  ;;  %v7580_v42 = vadd.s32 4294967294, %v2313_v17  ;;  %v10383_v8 = vmul.u32.u64.low %v2397_v54, %v2396_v37  ;;  %v10384_v48 = vmul.u32.u64.high %v2397_v54, %v2396_v37, %v10383_v8 }
 0x20b   : > { %v2332_v43 = vsel %vm2247_vm8, %v2331_v7, %v2307_v58  ;;  %v10388_v61 = vmul.u32.u64.low %v2397_v54, %v2392_v30  ;;  %v10389_v22 = vmul.u32.u64.high %v2397_v54, %v2392_v30, %v10388_v61  ;;  %v2453_v24 = vand.u32 2147483647, %v9917_v23 }
 0x20c   : > { %v10394_v50 = vsub.s32 32, %v10311_v19  ;;  %v10397_v33 = vand.u32 3, %v10320_v3  ;;  %vm7581_vm7 = vcmp.lt.s32.totalorder %v7580_v42, 0  ;;  %v2388_v47 = vsel %vm2382_vm4, %v2385_v53, %v2387_v38 }
 0x20d   : > { %v10402_v4 = vand.u32 31, %v10306_v20  ;;  %v10405_v58 = vshrl.u32 %v10284_v12, 5  ;;  %vm10409_vm0 = vcmp.le.f32.partialorder %v2245_v46, 0.7853982  ;;  %v2316_v21 = vsel %vm7581_vm7, 0, %v7580_v42 }
 0x20e   : > { %v2301_v3 = vadd.s32 %v10270_v6, %v10279_v55  ;;  %v2317_v45 = vsub.s32 32, %v2316_v21  ;;  %v2321_v14 = vsub.s32 4294967266, %v2316_v21  ;;  %v2334_v57 = vsel %vm10409_vm0, 0, %v2332_v43 }
 0x20f   : > { %v2404_v62 = vmul.u32 %v2397_v54, %v2388_v47  ;;  %vm2406_vm1 = vc.u32 %v10384_v48, %v10388_v61  ;;  %v2407_v12 = vadd.s32 1, %v10389_v22  ;;  %v10422_v46 = vand.u32 8388607, %v2453_v24 }
 0x210   : > { %vm2240_vm9 = vcmp.eq.s32.totalorder %v10397_v33, 2  ;;  %v2318_v26 = vshll.u32 %v10347_v16, %v2316_v21  ;;  %v2319_v6 = vshrl.u32 %v2301_v3, %v2317_v45  ;;  %v2322_v55 = vadd.s32 127, %v2321_v14 }
 0x211   : > { %v2471_v9 = vshrl.u32 %v13229_v60, %v10394_v50  ;;  %vm2237_vm10 = vcmp.eq.s32.totalorder %v10397_v33, 0  ;;  %v10429_v18 = vadd.s32 3, %v2334_v57  ;;  %v2408_v39 = vsel %vm2406_vm1, %v2407_v12, %v10389_v22 }
 0x212   : > { %v2474_v41 = vshrl.u32 %v13230_v29, %v10394_v50  ;;  %v2477_v28 = vshrl.u32 %v13221_v44, %v10394_v50  ;;  %vm2236_vm5 = vcmp.lt.s32.totalorder %v10397_v33, 2  ;;  %v2320_v16 = vor.u32 %v2319_v6, %v2318_v26 }
 0x213   : > { %v2323_v15 = vshll.u32 %v2322_v55, 23  ;;  %v2409_v32 = vadd.s32 %v2408_v39, %v2404_v62  ;;  %v2470_v2 = vshll.u32 %v13223_v59, %v10311_v19  ;;  %vm2233_vm11 = vweird.f32 %v13267_v34 }
 0x214   : > { %v2473_v63 = vshll.u32 %v13229_v60, %v10311_v19  ;;  %v2476_v35 = vshll.u32 %v13230_v29, %v10311_v19  ;;  %v2479_v1 = vshll.u32 %v13221_v44, %v10311_v19  ;;  %v2480_v13 = vshrl.u32 %v13231_v10, %v10394_v50 }
 0x215   : > { %v2324_v36 = vor.u32 4788187, %v2323_v15  ;;  %v2410_v5 = vadd.s32 536870912, %v2409_v32  ;;  %v2461_v25 = vor.u32 8388608, %v10422_v46  ;;  %v2472_v51 = vor.u32 %v2471_v9, %v2470_v2 }
 0x216   : > { %v2475_v7 = vor.u32 %v2474_v41, %v2473_v63  ;;  %v2478_v49 = vor.u32 %v2477_v28, %v2476_v35  ;;  %v2481_v27 = vor.u32 %v2480_v13, %v2479_v1  ;;  %v2483_v17 = vshrl.u32 %v13222_v0, %v10394_v50  ;;  %v8325_v30 = vpop.eup %8324 }
 0x217   : > { %v2325_v54 = vand.u32 2147483647, %v2324_v36  ;;  %v2327_v53 = vcvt.s32.f32 %v2320_v16  ;;  %v2411_v38 = vshrl.u32 %v2410_v5, 30  ;;  %vm2488_vm3 = vcmp.lt.s32.totalorder %v10405_v58, 4  ;;  %v8327_v37 = vpop.eup %8326 }
 0x218   : > { %v2241_v42 = vxor.u32 2147483648, %v8325_v30  ;;  %v2482_v8 = vshll.u32 %v13231_v10, %v10311_v19  ;;  %vm2485_vm6 = vcmp.lt.s32.totalorder %v10405_v58, 1  ;;  %v2494_v43 = vsel %vm2488_vm3, %v2481_v27, 920167782 }
 0x219   : > { %v2238_v22 = vxor.u32 2147483648, %v8327_v37  ;;  %v2328_v47 = vmul.f32 %v2327_v53, %v2325_v54  ;;  %v2412_v21 = vshll.u32 %v2411_v38, 30  ;;  %vm2487_vm12 = vcmp.lt.s32.totalorder %v10405_v58, 3 }
 0x21a   : > { %v2242_v3 = vsel %vm2240_vm9, %v2241_v42, %v8327_v37  ;;  %v2484_v45 = vor.u32 %v2483_v17, %v2482_v8  ;;  %v2493_v14 = vsel %vm2485_vm6, %v2472_v51, %v2475_v7  ;;  %v2495_v19 = vsel %vm2487_vm12, %v2478_v49, %v2494_v43 }
 0x21b   : > { %v2239_v57 = vsel %vm2237_vm10, %v8325_v30, %v2238_v22  ;;  %v2329_v62 = vxor.u32 2147483648, %v2328_v47  ;;  %v10466_v12 = vsub.s32 %v2409_v32, %v2412_v21  ;;  %v2469_v46 = vshrl.u32 %v13223_v59, %v10394_v50 }
 0x21c   : > { %v2243_v26 = vsel %vm2236_vm5, %v2239_v57, %v2242_v3  ;;  %vm2486_vm13 = vcmp.lt.s32.totalorder %v10405_v58, 2  ;;  %v2490_v6 = vsel %vm2488_vm3, %v2478_v49, 2102212464  ;;  %v2497_v55 = vsel %vm2485_vm6, %v2475_v7, %v2478_v49 }
 0x21d   : > { %v2244_v9 = vsel %vm2233_vm11, nan, %v2243_v26  ;;  %v2330_v39 = vsel %vm2247_vm8, %v2329_v62, %v2328_v47  ;;  %v2415_v41 = vsub.s32 0, %v10466_v12  ;;  %v2496_v50 = vsel %vm2486_vm13, %v2493_v14, %v2495_v19 }
 0x21e   : > { %7912 = vmatmul.mubr.msk.f32.gmra.mxu0 %vm2670_vm2, %v2244_v9  ;;  %v2333_v33 = vsel %vm10409_vm0, %v9451_v11, %v2330_v39  ;;  %v2489_v28 = vsel %vm2485_vm6, %v2469_v46, %v2472_v51  ;;  %v2498_v34 = vsel %vm2488_vm3, %v2484_v45, 1326507024  ;;  %v2501_v16 = vshll.u32 %v2461_v25, 8 }
 0x21f   : > { %8328 = vcosq.f32 %v2333_v33  ;;  %v7583_v15 = vmin.u32 %v2415_v41, %v10466_v12  ;;  %v2491_v32 = vsel %vm2487_vm12, %v2475_v7, %v2490_v6  ;;  %v2499_v2 = vsel %vm2487_vm12, %v2481_v27, %v2498_v34 }
 0x220   : > { %8330 = vsinq.f32 %v2333_v33  ;;  %v2500_v40 = vsel %vm2486_vm13, %v2497_v55, %v2499_v2  ;;  %v10499_v63 = vmul.u32.u64.low %v2501_v16, %v2496_v50  ;;  %v10500_v35 = vmul.u32.u64.high %v2501_v16, %v2496_v50, %v10499_v63 }
 0x221   : > { %v2417_v1 = vclz %v7583_v15  ;;  %v2435_v13 = vsub.s32 4, %v2411_v38  ;;  %v2572_v36 = vsub.s32 32, %v10402_v4  ;;  %v10505_v5 = vand.u32 3, %v10429_v18 }
 0x222   : > { %v10507_v25 = vmul.u32.u64.low %v2501_v16, %v2500_v40  ;;  %v10508_v51 = vmul.u32.u64.high %v2501_v16, %v2500_v40, %v10507_v25  ;;  %v2492_v49 = vsel %vm2486_vm13, %v2489_v28, %v2491_v32  ;;  %v2557_v27 = vand.u32 2147483647, %v9683_v56 }
 0x223   : > { %v7584_v7 = vadd.s32 4294967294, %v2417_v1  ;;  %vm2351_vm8 = vcmp.lt.s32.totalorder %v13274_v31, 0  ;;  %v2511_v17 = vadd.s32 1, %v10500_v35  ;;  %v10516_v30 = vshrl.u32 %v10306_v20, 5 }
 0x224   : > { %v2405_v18 = vadd.s32 %v10388_v61, %v10384_v48  ;;  %v10522_v54 = vsel %vm2351_vm8, %v2435_v13, %v2411_v38  ;;  %vm2344_vm15 = vcmp.eq.s32.totalorder %v10505_v5, 2  ;;  %v2508_v53 = vmul.u32 %v2501_v16, %v2492_v49 }
 0x225   : > { %vm7585_vm14 = vcmp.lt.s32.totalorder %v7584_v7, 0  ;;  %vm2510_vm4 = vc.u32 %v10508_v51, %v10499_v63  ;;  %v10528_v37 = vshrl.u32 %v13223_v59, %v2572_v36  ;;  %vm2341_vm7 = vcmp.eq.s32.totalorder %v10505_v5, 0 }
 0x226   : > { %v2420_v58 = vsel %vm7585_vm14, 0, %v7584_v7  ;;  %v2512_v48 = vsel %vm2510_vm4, %v2511_v17, %v10500_v35  ;;  %v10534_v61 = vand.u32 8388607, %v2557_v27  ;;  %vm2340_vm0 = vcmp.lt.s32.totalorder %v10505_v5, 2 }
 0x227   : > { %v2421_v20 = vsub.s32 32, %v2420_v58  ;;  %v2425_v42 = vsub.s32 4294967266, %v2420_v58  ;;  %v2513_v38 = vadd.s32 %v2512_v48, %v2508_v53  ;;  %v2574_v8 = vshll.u32 %v13223_v59, %v10402_v4 }
 0x228   : > { %v2575_v43 = vshrl.u32 %v13229_v60, %v2572_v36  ;;  %v2578_v22 = vshrl.u32 %v13230_v29, %v2572_v36  ;;  %vm2337_vm1 = vweird.f32 %v9451_v11  ;;  %v2422_v47 = vshll.u32 %v10466_v12, %v2420_v58  ;;  %v7898_v12 = vpop.f32.mrf.mxu0 }
 0x229   : > { %v2423_v21 = vshrl.u32 %v2405_v18, %v2421_v20  ;;  %v2426_v3 = vadd.s32 127, %v2425_v42  ;;  %v2581_v45 = vshrl.u32 %v13221_v44, %v2572_v36  ;;  %v2514_v14 = vadd.s32 536870912, %v2513_v38 }
 0x22a   : > { %v2577_v19 = vshll.u32 %v13229_v60, %v10402_v4  ;;  %v2580_v57 = vshll.u32 %v13230_v29, %v10402_v4  ;;  %v2584_v59 = vshrl.u32 %v13231_v10, %v2572_v36  ;;  %v2565_v26 = vor.u32 8388608, %v10534_v61  ;;  %v2789_v35 = vpop.f32.mrf.mxu0 }
 0x22b   : > { %v2424_v62 = vor.u32 %v2423_v21, %v2422_v47  ;;  %v2427_v46 = vshll.u32 %v2426_v3, 23  ;;  %v2587_v6 = vshrl.u32 %v13222_v0, %v2572_v36  ;;  %v10551_v9 = vshrl.u32 %v2514_v14, 30  ;;  %v10603_v3 = vld [vmem:[%s13082_s5] ss:$0 sm:$0xff] }
 0x22c   : > { %v8329_v55 = vpop.eup %8328  ;;  %v2576_v39 = vor.u32 %v2575_v43, %v2574_v8  ;;  %v2579_v41 = vor.u32 %v2578_v22, %v2577_v19  ;;  %v2583_v60 = vshll.u32 %v13221_v44, %v10402_v4  ;;  %vm10557_vm9 = vcmp.le.f32.partialorder %v2349_v52, 0.7853982  ;;  %v7901_v20 = vpop.f32.mrf.mxu0 }
 0x22d   : > { %v8331_v50 = vpop.eup %8330  ;;  %v2345_v33 = vxor.u32 2147483648, %v8329_v55  ;;  %v2428_v28 = vor.u32 4788187, %v2427_v46  ;;  %v2582_v34 = vor.u32 %v2581_v45, %v2580_v57  ;;  %v2586_v0 = vshll.u32 %v13231_v10, %v10402_v4 }
 0x22e   : > { %v2342_v16 = vxor.u32 2147483648, %v8331_v50  ;;  %v2516_v15 = vshll.u32 %v10551_v9, 30  ;;  %v2585_v32 = vor.u32 %v2584_v59, %v2583_v60  ;;  %vm2589_vm10 = vcmp.lt.s32.totalorder %v10516_v30, 1 }
 0x22f   : > { %v2346_v44 = vsel %vm2344_vm15, %v2345_v33, %v8331_v50  ;;  %v2429_v2 = vand.u32 2147483647, %v2428_v28  ;;  %v2431_v40 = vcvt.s32.f32 %v2424_v62  ;;  %v2588_v52 = vor.u32 %v2587_v6, %v2586_v0  ;;  %v2869_v6 = vld [vmem:[%s10615_s29 + $0x8] sm:$0xff] }
 0x230   : > { %v2343_v1 = vsel %vm2341_vm7, %v8329_v55, %v2342_v16  ;;  %v10569_v13 = vsub.s32 %v2513_v38, %v2516_v15  ;;  %vm2590_vm5 = vcmp.lt.s32.totalorder %v10516_v30, 2  ;;  %vm2592_vm11 = vcmp.lt.s32.totalorder %v10516_v30, 4 }
 0x231   : > { %v2347_v10 = vsel %vm2340_vm0, %v2343_v1, %v2346_v44  ;;  %v2432_v4 = vmul.f32 %v2431_v40, %v2429_v2  ;;  %vm2591_vm3 = vcmp.lt.s32.totalorder %v10516_v30, 3  ;;  %v2594_v36 = vsel %vm2592_vm11, %v2582_v34, 2102212464  ;;  %v2871_v40 = vld [vmem:[%s10615_s29 + $0x18] sm:$0xff] }
 0x232   : > { %v2348_v25 = vsel %vm2337_vm1, nan, %v2347_v10  ;;  %v2519_v7 = vsub.s32 0, %v10569_v13  ;;  %v2597_v49 = vsel %vm2589_vm10, %v2576_v39, %v2579_v41  ;;  %v2598_v17 = vsel %vm2592_vm11, %v2585_v32, 920167782 }
 0x233   : > { %7914 = vmatprep.mubr.msk.f32.mxu0 %vm2670_vm2, %v2348_v25  ;;  %v2433_v18 = vxor.u32 2147483648, %v2432_v4  ;;  %v2599_v58 = vsel %vm2591_vm3, %v2582_v34, %v2598_v17  ;;  %v2601_v5 = vsel %vm2589_vm10, %v2579_v41, %v2582_v34  ;;  %v2602_v53 = vsel %vm2592_vm11, %v2588_v52, 1326507024 }
 0x234   : > { %v7587_v42 = vmin.u32 %v2519_v7, %v10569_v13  ;;  %v2593_v11 = vsel %vm2589_vm10, %v10528_v37, %v2576_v39  ;;  %v2595_v48 = vsel %vm2591_vm3, %v2579_v41, %v2594_v36  ;;  %v2603_v61 = vsel %vm2591_vm3, %v2585_v32, %v2602_v53  ;;  %v2870_v39 = vld [vmem:[%s10615_s29 + $0x10] sm:$0xff]  ;;  %v2868_v41 = vld [vmem:[%s10615_s29] sm:$0xff] }
 0x235   : > { %v2434_v38 = vsel %vm2351_vm8, %v2433_v18, %v2432_v4  ;;  %v2600_v8 = vsel %vm2590_vm5, %v2597_v49, %v2599_v58  ;;  %v2604_v43 = vsel %vm2590_vm5, %v2601_v5, %v2603_v61  ;;  %v2605_v22 = vshll.u32 %v2565_v26, 8 }
 0x236   : > { %v2437_v47 = vsel %vm10557_vm9, %v13274_v31, %v2434_v38  ;;  %v2438_v37 = vsel %vm10557_vm9, 0, %v10522_v54  ;;  %v2521_v21 = vclz %v7587_v42  ;;  %v2596_v45 = vsel %vm2590_vm5, %v2593_v11, %v2595_v48  ;;  %v2799_v54 = vpop.f32.mrf.mxu0 }
 0x237   : > { %8332 = vcosq.f32 %v2437_v47  ;;  %v10607_v14 = vmul.u32.u64.low %v2605_v22, %v2604_v43  ;;  %v10608_v19 = vmul.u32.u64.high %v2605_v22, %v2604_v43, %v10607_v14  ;;  %v2795_v30 = vadd.f32 %v7898_v12, %v10603_v3 }
 0x238   : > { %8334 = vsinq.f32 %v2437_v47  ;;  %v7588_v57 = vadd.s32 4294967294, %v2521_v21  ;;  %v10617_v59 = vmul.u32.u64.low %v2605_v22, %v2600_v8  ;;  %v10618_v62 = vmul.u32.u64.high %v2605_v22, %v2600_v8, %v10617_v59 }
 0x239   : > { %v2790_v46 = vadd.f32 %v10603_v3, %v2789_v35  ;;  %v2442_v26 = vadd.s32 3, %v2438_v37  ;;  %v2800_v55 = vadd.f32 %v10603_v3, %v2799_v54  ;;  %v2509_v60 = vadd.s32 %v10499_v63, %v10508_v51 }
 0x23a   : > { %vm7589_vm6 = vcmp.lt.s32.totalorder %v7588_v57, 0  ;;  %v2612_v33 = vmul.u32 %v2605_v22, %v2596_v45  ;;  %vm2614_vm12 = vc.u32 %v10608_v19, %v10617_v59  ;;  %v2615_v28 = vadd.s32 1, %v10618_v62 }
 0x23b   : > { %v2524_v50 = vsel %vm7589_vm6, 0, %v7588_v57  ;;  %vm2908_vm13 = vcmask 64512   ;;  %v2885_v34 = vadd.f32 %v2869_v6, %v2795_v30  ;;  %v2805_v0 = vadd.f32 %v7901_v20, %v10603_v3 }
 0x23c   : > { %v2525_v29 = vsub.s32 32, %v2524_v50  ;;  %v2529_v12 = vsub.s32 4294967266, %v2524_v50  ;;  %v2886_v16 = vadd.f32 %v2870_v39, %v2800_v55  ;;  %v2884_v15 = vadd.f32 %v2868_v41, %v2790_v46 }
 0x23d   : > { %v2526_v32 = vshll.u32 %v10569_v13, %v2524_v50  ;;  %v2616_v51 = vsel %vm2614_vm12, %v2615_v28, %v10618_v62  ;;  %v2443_v10 = vand.u32 3, %v2442_v26  ;;  %v2887_v36 = vadd.f32 %v2871_v40, %v2805_v0 }
 0x23e   : > { %v2527_v44 = vshrl.u32 %v2509_v60, %v2525_v29  ;;  %v2530_v63 = vadd.s32 127, %v2529_v12  ;;  %v2617_v2 = vadd.s32 %v2616_v51, %v2612_v33  ;;  %7922 = vmatprep.mubr.msk.f32.mxu1 %vm2908_vm13, %v2884_v15  ;;  %v2539_v61 = vsub.s32 4, %v10551_v9  ;;  %v2872_v33 = vld [vmem:[%s10615_s29 + $0x20] sm:$0xff]  ;;  %v2873_v29 = vld [vmem:[%s10615_s29 + $0x28] sm:$0xff] }
 0x23f   : > { %7923 = vmatmul.mubr.msk.f32.vlgmr.msra.gmra.mxu1 %vm2908_vm13, %v2885_v34  ;;  %vm2448_vm8 = vcmp.eq.s32.totalorder %v2443_v10, 2  ;;  %vm2445_vm14 = vcmp.eq.s32.totalorder %v2443_v10, 0  ;;  %vm2444_vm15 = vcmp.lt.s32.totalorder %v2443_v10, 2  ;;  %vm2441_vm4 = vweird.f32 %v13274_v31 }
 0x240   : > { %v2528_v52 = vor.u32 %v2527_v44, %v2526_v32  ;;  %v2531_v35 = vshll.u32 %v2530_v63, 23  ;;  %v2618_v1 = vadd.s32 536870912, %v2617_v2  ;;  %7925 = vmatprep.mubr.msk.f32.mxu1 %vm2908_vm13, %v2886_v16  ;;  %vm2455_vm7 = vcmp.lt.s32.totalorder %v9917_v23, 0 }
 0x241   : > { %vm2454_vm0 = vcmp.le.f32.partialorder %v2453_v24, 0.7853982  ;;  %v2540_v21 = vsel %vm2455_vm7, %v2539_v61, %v10551_v9  ;;  %v2613_v24 = vadd.s32 %v10617_v59, %v10608_v19  ;;  %vm2545_vm11 = vweird.f32 %v9917_v23  ;;  %v2875_v61 = vld [vmem:[%s10615_s29 + $0x38] sm:$0xff] }
 0x242   : > { %v2532_v4 = vor.u32 4788187, %v2531_v35  ;;  %v10639_v25 = vshrl.u32 %v2618_v1, 30  ;;  %v2535_v49 = vcvt.s32.f32 %v2528_v52  ;;  %v2542_v31 = vsel %vm2454_vm0, 0, %v2540_v21  ;;  %v2877_v21 = vld [vmem:[%s10615_s29 + $0x48] sm:$0xff] }
 0x243   : > { %7926 = vmatmul.mubr.msk.f32.gmra.mxu1 %vm2908_vm13, %v2887_v36  ;;  %v2546_v54 = vadd.s32 3, %v2542_v31  ;;  %vm2559_vm3 = vcmp.lt.s32.totalorder %v9683_v56, 0  ;;  %vm2558_vm6 = vcmp.le.f32.partialorder %v2557_v27, 0.7853982 }
 0x244   : > { %v8333_v13 = vpop.eup %8332  ;;  %v2533_v7 = vand.u32 2147483647, %v2532_v4  ;;  %v2620_v58 = vshll.u32 %v10639_v25, 30  ;;  %v2643_v1 = vsub.s32 4, %v10639_v25 }
 0x245   : > { %v8335_v17 = vpop.eup %8334  ;;  %v2449_v18 = vxor.u32 2147483648, %v8333_v13  ;;  %v2547_v9 = vand.u32 3, %v2546_v54  ;;  %v3119_v54 = vld [vmem:[%s13085_s8 + $0x8] sm:$0xff] }
 0x246   : > { %v2446_v5 = vxor.u32 2147483648, %v8335_v17  ;;  %v2536_v53 = vmul.f32 %v2535_v49, %v2533_v7  ;;  %v2621_v42 = vsub.s32 %v2617_v2, %v2620_v58  ;;  %v2644_v36 = vsel %vm2559_vm3, %v2643_v1, %v10639_v25  ;;  %7946 = vmatprep.subr.mxu1 %v3119_v54 }
 0x247   : > { %v2450_v20 = vsel %vm2448_vm8, %v2449_v18, %v8335_v17  ;;  %vm2552_vm9 = vcmp.eq.s32.totalorder %v2547_v9, 2  ;;  %vm2549_vm10 = vcmp.eq.s32.totalorder %v2547_v9, 0  ;;  %vm2548_vm5 = vcmp.lt.s32.totalorder %v2547_v9, 2  ;;  %7947 = vmatpush3.msra.mxu1 %v3119_v54 }
 0x248   : > { %v2447_v11 = vsel %vm2445_vm14, %v8333_v13, %v2446_v5  ;;  %v2537_v48 = vxor.u32 2147483648, %v2536_v53  ;;  %v2623_v8 = vsub.s32 0, %v2621_v42 }
 0x249   : > { %v2451_v38 = vsel %vm2444_vm15, %v2447_v11, %v2450_v20  ;;  %vm2649_vm15 = vweird.f32 %v9683_v56 }
 0x24a   : > { %v2452_v43 = vsel %vm2441_vm4, nan, %v2451_v38  ;;  %v2538_v22 = vsel %vm2455_vm7, %v2537_v48, %v2536_v53  ;;  %v7591_v37 = vmin.u32 %v2623_v8, %v2621_v42  ;;  %v2874_v48 = vld [vmem:[%s10615_s29 + $0x30] sm:$0xff]  ;;  %vm4166_vm4 = vcmask 1042434  }
 0x24b   : > { %7915 = vmatmul.mubr.msk.f32.gmra.mxu0 %vm2670_vm2, %v2452_v43  ;;  %v2541_v47 = vsel %vm2454_vm0, %v9917_v23, %v2538_v22  ;;  %v2646_v23 = vsel %vm2558_vm6, 0, %v2644_v36  ;;  %vm4168_vm7 = vcmask 1043459   ;;  %vm4170_vm0 = vcmask 1044484  }
 0x24c   : > { %8336 = vcosq.f32 %v2541_v47  ;;  %v2625_v45 = vclz %v7591_v37  ;;  %v2650_v13 = vadd.s32 3, %v2646_v23  ;;  %v2876_v37 = vld [vmem:[%s10615_s29 + $0x40] sm:$0xff] }
 0x24d   : > { %8338 = vsinq.f32 %v2541_v47  ;;  %v7904_v55 = vpop.f32.mrf.mxu0 }
 0x24e   : > { %v7592_v14 = vadd.s32 4294967294, %v2625_v45  ;;  %v2815_v60 = vadd.f32 %v7904_v55, %v10603_v3  ;;  %v2651_v7 = vand.u32 3, %v2650_v13 }
 0x24f   : > { %v2809_v50 = vpop.f32.mrf.mxu0 }
 0x250   : > { %vm7593_vm1 = vcmp.lt.s32.totalorder %v7592_v14, 0  ;;  %v2810_v12 = vadd.f32 %v10603_v3, %v2809_v50  ;;  %v2889_v44 = vadd.f32 %v2873_v29, %v2815_v60  ;;  %vm2656_vm12 = vcmp.eq.s32.totalorder %v2651_v7, 2  ;;  %v2880_v50 = vld [vmem:[%s10615_s29 + $0x60] sm:$0xff] }
 0x251   : > { %v2628_v57 = vsel %vm7593_vm1, 0, %v7592_v14  ;;  %vm2653_vm8 = vcmp.eq.s32.totalorder %v2651_v7, 0  ;;  %vm2652_vm14 = vcmp.lt.s32.totalorder %v2651_v7, 2  ;;  %vm4172_vm1 = vcmask 1045509  }
 0x252   : > { %v2629_v62 = vsub.s32 32, %v2628_v57  ;;  %v2633_v30 = vsub.s32 4294967266, %v2628_v57  ;;  %v2630_v46 = vshll.u32 %v2621_v42, %v2628_v57  ;;  %v2888_v59 = vadd.f32 %v2872_v33, %v2810_v12  ;;  %v3118_v57 = vld [vmem:[%s13085_s8] sm:$0xff]  ;;  %v2881_v33 = vld [vmem:[%s10615_s29 + $0x68] sm:$0xff] }
 0x253   : > { %7948 = vmatprep.subr.mxu1 %v3118_v57 }
 0x254   : > { %v2631_v26 = vshrl.u32 %v2613_v24, %v2629_v62  ;;  %v2634_v6 = vadd.s32 127, %v2633_v30  ;;  %7928 = vmatprep.mubr.msk.f32.mxu1 %vm2908_vm13, %v2888_v59  ;;  %7949 = vmatpush3.msra.mxu1 %v3118_v57 }
 0x255   : > { %7929 = vmatmul.mubr.msk.f32.gmra.mxu1 %vm2908_vm13, %v2889_v44 }
 0x256   : > { %v2632_v39 = vor.u32 %v2631_v26, %v2630_v46  ;;  %v2635_v41 = vshll.u32 %v2634_v6, 23  ;;  %v2878_v46 = vld [vmem:[%s10615_s29 + $0x50] sm:$0xff]  ;;  %v2879_v26 = vld [vmem:[%s10615_s29 + $0x58] sm:$0xff] }
 0x258   : > { %v2636_v34 = vor.u32 4788187, %v2635_v41  ;;  %v2639_v32 = vcvt.s32.f32 %v2632_v39 }
 0x259   : > { %v8337_v28 = vpop.eup %8336 }
 0x25a   : > { %v8339_v0 = vpop.eup %8338  ;;  %v2553_v19 = vxor.u32 2147483648, %v8337_v28  ;;  %v2637_v15 = vand.u32 2147483647, %v2636_v34 }
 0x25b   : > { %v2550_v16 = vxor.u32 2147483648, %v8339_v0 }
 0x25c   : > { %v2554_v63 = vsel %vm2552_vm9, %v2553_v19, %v8339_v0  ;;  %v2640_v2 = vmul.f32 %v2639_v32, %v2637_v15  ;;  %vm4174_vm9 = vcmask 1046534  }
 0x25d   : > { %v2551_v51 = vsel %vm2549_vm10, %v8337_v28, %v2550_v16  ;;  %v10702_v16 = vld [vmem:[%s13084_s7] ss:$0 sm:$0xff]  ;;  %vm4176_vm10 = vcmask 1047559  }
 0x25e   : > { %v2555_v40 = vsel %vm2548_vm5, %v2551_v51, %v2554_v63  ;;  %v2641_v35 = vxor.u32 2147483648, %v2640_v2  ;;  %v2882_v51 = vld [vmem:[%s10615_s29 + $0x70] sm:$0xff] }
 0x25f   : > { %v2556_v52 = vsel %vm2545_vm11, nan, %v2555_v40  ;;  %v2883_v40 = vld [vmem:[%s10615_s29 + $0x78] sm:$0xff] }
 0x260   : > { %7917 = vmatprep.mubr.msk.f32.mxu0 %vm2670_vm2, %v2556_v52  ;;  %v2642_v10 = vsel %vm2559_vm3, %v2641_v35, %v2640_v2 }
 0x261   : > { %v2645_v4 = vsel %vm2558_vm6, %v9683_v56, %v2642_v10 }
 0x262   : > { %8340 = vcosq.f32 %v2645_v4 }
 0x263   : > { %8342 = vsinq.f32 %v2645_v4 }
 0x26f   : > { %v8341_v49 = vpop.eup %8340 }
 0x270   : > { %v8343_v17 = vpop.eup %8342  ;;  %v2657_v18 = vxor.u32 2147483648, %v8341_v49 }
 0x271   : > { %v2654_v58 = vxor.u32 2147483648, %v8343_v17 }
 0x272   : > { %v2658_v5 = vsel %vm2656_vm12, %v2657_v18, %v8343_v17 }
 0x273   : > { %v2655_v27 = vsel %vm2653_vm8, %v8341_v49, %v2654_v58 }
 0x274   : > { %v2659_v53 = vsel %vm2652_vm14, %v2655_v27, %v2658_v5 }
 0x275   : > { %v2660_v25 = vsel %vm2649_vm15, nan, %v2659_v53 }
 0x276   : > { %7918 = vmatmul.mubr.msk.f32.gmra.mxu0 %vm2670_vm2, %v2660_v25  ;;  %vm3127_vm2 = vcmask 130048  }
 0x280   : > { %v7907_v20 = vpop.f32.mrf.mxu0 }
 0x281   : > { %v2825_v42 = vadd.f32 %v7907_v20, %v10603_v3 }
 0x282   : > { %v2819_v11 = vpop.f32.mrf.mxu0 }
 0x283   : > { %v2820_v38 = vadd.f32 %v10603_v3, %v2819_v11  ;;  %v2891_v43 = vadd.f32 %v2875_v61, %v2825_v42 }
 0x285   : > { %v2890_v8 = vadd.f32 %v2874_v48, %v2820_v38 }
 0x287   : > { %7931 = vmatprep.mubr.msk.f32.mxu1 %vm2908_vm13, %v2890_v8 }
 0x288   : > { %7932 = vmatmul.mubr.msk.f32.gmra.mxu1 %vm2908_vm13, %v2891_v43 }
 0x2b0   : > { %v7910_v56 = vpop.f32.mrf.mxu0 }
 0x2b1   : > { %v2835_v22 = vadd.f32 %v7910_v56, %v10603_v3 }
 0x2b2   : > { %v2829_v47 = vpop.f32.mrf.mxu0 }
 0x2b3   : > { %v2830_v45 = vadd.f32 %v10603_v3, %v2829_v47  ;;  %v2893_v14 = vadd.f32 %v2877_v21, %v2835_v22  ;;  %v3338_v22 = vld [vmem:[%s13087_s10 + $0x8] sm:$0xff]  ;;  %v3337_v47 = vld [vmem:[%s13087_s10] sm:$0xff] }
 0x2b4   : > { %7974 = vmatprep.subr.mxu0 %v3338_v22 }
 0x2b5   : > { %v2892_v31 = vadd.f32 %v2876_v37, %v2830_v45  ;;  %7975 = vmatpush3.msra.mxu0 %v3338_v22 }
 0x2b6   : > { %7976 = vmatprep.subr.mxu0 %v3337_v47 }
 0x2b7   : > { %7934 = vmatprep.mubr.msk.f32.mxu1 %vm2908_vm13, %v2892_v31  ;;  %7977 = vmatpush3.msra.mxu0 %v3337_v47 }
 0x2b8   : > { %7935 = vmatmul.mubr.msk.f32.gmra.mxu1 %vm2908_vm13, %v2893_v14 }
 0x2de   : > { %v7913_v24 = vpop.f32.mrf.mxu0 }
 0x2df   : > { %v2845_v62 = vadd.f32 %v7913_v24, %v10603_v3 }
 0x2e0   : > { %v2839_v30 = vpop.f32.mrf.mxu0 }
 0x2e1   : > { %v2840_v6 = vadd.f32 %v10603_v3, %v2839_v30  ;;  %v2895_v9 = vadd.f32 %v2879_v26, %v2845_v62 }
 0x2e3   : > { %v2894_v55 = vadd.f32 %v2878_v46, %v2840_v6 }
 0x2e5   : > { %7937 = vmatprep.mubr.msk.f32.mxu1 %vm2908_vm13, %v2894_v55 }
 0x2e6   : > { %7938 = vmatmul.mubr.msk.f32.gmra.mxu1 %vm2908_vm13, %v2895_v9 }
 0x2ff   : > { %v7924_v34 = vpop.f32.mrf.mxu1 }
 0x300   : > { %v3029_v36 = vadd.f32 %v7924_v34, %v10702_v16 }
 0x301   : > { %v3023_v0 = vpop.f32.mrf.mxu1 }
 0x302   : > { %v3024_v32 = vadd.f32 %v10702_v16, %v3023_v0  ;;  %v10720_v7 = vmax.f32 %v3029_v36, 0.0 }
 0x303   : > { %v7927_v19 = vpop.f32.mrf.mxu1 }
 0x304   : > { %v10709_v1 = vmax.f32 %v3024_v32, 0.0  ;;  %v3039_v49 = vadd.f32 %v7927_v19, %v10702_v16 }
 0x305   : > { %v3033_v15 = vpop.f32.mrf.mxu1 }
 0x306   : > { %v3034_v10 = vadd.f32 %v10702_v16, %v3033_v15  ;;  %v10729_v18 = vmax.f32 %v3039_v49, 0.0 }
 0x308   : > { %v10715_v13 = vmax.f32 %v3034_v10, 0.0 }
 0x30b   : > { %v7916_v39 = vpop.f32.mrf.mxu0 }
 0x30c   : > { %v2855_v41 = vadd.f32 %v7916_v39, %v10603_v3 }
 0x30d   : > { %v2849_v60 = vpop.f32.mrf.mxu0 }
 0x30e   : > { %v2850_v29 = vadd.f32 %v10603_v3, %v2849_v60  ;;  %v2897_v28 = vadd.f32 %v2881_v33, %v2855_v41  ;;  %v10791_v41 = vld [vmem:[%s13086_s9] ss:$0 sm:$0xff] }
 0x310   : > { %v2896_v12 = vadd.f32 %v2880_v50, %v2850_v29 }
 0x312   : > { %7940 = vmatprep.mubr.msk.f32.mxu1 %vm2908_vm13, %v2896_v12 }
 0x313   : > { %7941 = vmatmul.mubr.msk.f32.gmra.mxu1 %vm2908_vm13, %v2897_v28 }
 0x315   : > { %v7930_v2 = vpop.f32.mrf.mxu1 }
 0x316   : > { %v3049_v58 = vadd.f32 %v7930_v2, %v10702_v16 }
 0x317   : > { %v3043_v23 = vpop.f32.mrf.mxu1 }
 0x318   : > { %v10736_v5 = vmax.f32 %v3049_v58, 0.0 }
 0x336   : > { %v7919_v59 = vpop.f32.mrf.mxu0 }
 0x337   : > { %v2865_v44 = vadd.f32 %v7919_v59, %v10603_v3 }
 0x338   : > { %v2859_v63 = vpop.f32.mrf.mxu0 }
 0x339   : > { %v2860_v52 = vadd.f32 %v10603_v3, %v2859_v63  ;;  %v2899_v4 = vadd.f32 %v2883_v40, %v2865_v44  ;;  %v3044_v3 = vadd.f32 %v10702_v16, %v3043_v23 }
 0x33b   : > { %v2898_v35 = vadd.f32 %v2882_v51, %v2860_v52  ;;  %v10727_v17 = vmax.f32 %v3044_v3, 0.0 }
 0x33d   : > { %7943 = vmatprep.mubr.msk.f32.mxu1 %vm2908_vm13, %v2898_v35 }
 0x33e   : > { %7944 = vmatmul.mubr.msk.f32.gmra.mxu1 %vm2908_vm13, %v2899_v4  ;;  %vm4164_vm13 = vcmask 1041409  }
 0x33f   : > { %7950 = vmatprep.mubr.msk.f32.mxu1 %vm3127_vm2, %v10709_v1 }
 0x342   : > { %7951 = vmatmul.mubr.msk.f32.vlgmr.msra.gmra.mxu1 %vm3127_vm2, %v10720_v7 }
 0x343   : > { %7953 = vmatprep.mubr.msk.f32.mxu1 %vm3127_vm2, %v10715_v13 }
 0x346   : > { %7954 = vmatmul.mubr.msk.f32.gmra.mxu1 %vm3127_vm2, %v10729_v18 }
 0x347   : > { %7956 = vmatprep.mubr.msk.f32.mxu1 %vm3127_vm2, %v10727_v17 }
 0x348   : > { %v7933_v27 = vpop.f32.mrf.mxu1 }
 0x349   : > { %v3059_v53 = vadd.f32 %v7933_v27, %v10702_v16 }
 0x34a   : > { %7957 = vmatmul.mubr.msk.f32.gmra.mxu1 %vm3127_vm2, %v10736_v5  ;;  %v3053_v25 = vpop.f32.mrf.mxu1 }
 0x34b   : > { %v3054_v20 = vadd.f32 %v10702_v16, %v3053_v25  ;;  %v10744_v11 = vmax.f32 %v3059_v53, 0.0 }
 0x34d   : > { %v10742_v42 = vmax.f32 %v3054_v20, 0.0 }
 0x34f   : > { %7959 = vmatprep.mubr.msk.f32.mxu1 %vm3127_vm2, %v10742_v42 }
 0x350   : > { %7960 = vmatmul.mubr.msk.f32.gmra.mxu1 %vm3127_vm2, %v10744_v11 }
 0x378   : > { %v7936_v48 = vpop.f32.mrf.mxu1 }
 0x379   : > { %v3069_v61 = vadd.f32 %v7936_v48, %v10702_v16 }
 0x37a   : > { %v3063_v38 = vpop.f32.mrf.mxu1 }
 0x37b   : > { %v3064_v8 = vadd.f32 %v10702_v16, %v3063_v38  ;;  %v10754_v56 = vmax.f32 %v3069_v61, 0.0  ;;  %v7664_v61 = vld [vmem:[%s13085_s8 + $0x18] sm:$0xff]  ;;  %v7663_v38 = vld [vmem:[%s13085_s8 + $0x10] sm:$0xff] }
 0x37c   : > { %8002 = vmatprep.subr.mxu1 %v7664_v61 }
 0x37d   : > { %v10752_v43 = vmax.f32 %v3064_v8, 0.0  ;;  %8003 = vmatpush3.msra.mxu1 %v7664_v61 }
 0x37e   : > { %8004 = vmatprep.subr.mxu1 %v7663_v38 }
 0x37f   : > { %7962 = vmatprep.mubr.msk.f32.mxu1 %vm3127_vm2, %v10752_v43  ;;  %8005 = vmatpush3.msra.mxu1 %v7663_v38 }
 0x380   : > { %7963 = vmatmul.mubr.msk.f32.gmra.mxu1 %vm3127_vm2, %v10754_v56 }
 0x3a6   : > { %v7939_v37 = vpop.f32.mrf.mxu1 }
 0x3a7   : > { %v3079_v21 = vadd.f32 %v7939_v37, %v10702_v16 }
 0x3a8   : > { %v3073_v45 = vpop.f32.mrf.mxu1 }
 0x3a9   : > { %v3074_v31 = vadd.f32 %v10702_v16, %v3073_v45  ;;  %v10770_v54 = vmax.f32 %v3079_v21, 0.0 }
 0x3ab   : > { %v10768_v14 = vmax.f32 %v3074_v31, 0.0 }
 0x3ad   : > { %7965 = vmatprep.mubr.msk.f32.mxu1 %vm3127_vm2, %v10768_v14 }
 0x3ae   : > { %7966 = vmatmul.mubr.msk.f32.gmra.mxu1 %vm3127_vm2, %v10770_v54 }
 0x3d3   : > { %v7942_v57 = vpop.f32.mrf.mxu1 }
 0x3d4   : > { %v3089_v24 = vadd.f32 %v7942_v57, %v10702_v16 }
 0x3d5   : > { %v3083_v62 = vpop.f32.mrf.mxu1 }
 0x3d6   : > { %v3084_v30 = vadd.f32 %v10702_v16, %v3083_v62  ;;  %v10780_v26 = vmax.f32 %v3089_v24, 0.0 }
 0x3d8   : > { %v10778_v46 = vmax.f32 %v3084_v30, 0.0 }
 0x3da   : > { %7968 = vmatprep.mubr.msk.f32.mxu1 %vm3127_vm2, %v10778_v46 }
 0x3db   : > { %7969 = vmatmul.mubr.msk.f32.gmra.mxu1 %vm3127_vm2, %v10780_v26 }
 0x3fe   : > { %v7945_v6 = vpop.f32.mrf.mxu1 }
 0x3ff   : > { %v3099_v55 = vadd.f32 %v7945_v6, %v10702_v16 }
 0x400   : > { %v3093_v9 = vpop.f32.mrf.mxu1 }
 0x401   : > { %v3094_v39 = vadd.f32 %v10702_v16, %v3093_v9  ;;  %v10795_v33 = vmax.f32 %v3099_v55, 0.0 }
 0x402   : > { %v7952_v60 = vpop.f32.mrf.mxu1 }
 0x403   : > { %v10793_v50 = vmax.f32 %v3094_v39, 0.0  ;;  %v3248_v29 = vadd.f32 %v7952_v60, %v10791_v41  ;;  %v10839_v60 = vld [vmem:[%s13088_s11] ss:$0 sm:$0xff] }
 0x404   : > { %v3242_v12 = vpop.f32.mrf.mxu1 }
 0x405   : > { %7971 = vmatprep.mubr.msk.f32.mxu1 %vm3127_vm2, %v10793_v50  ;;  %v3243_v28 = vadd.f32 %v10791_v41, %v3242_v12  ;;  %v3322_v19 = vmax.f32 %v3248_v29, 0.0 }
 0x406   : > { %7972 = vmatmul.mubr.msk.f32.gmra.mxu1 %vm3127_vm2, %v10795_v33  ;;  %v7955_v34 = vpop.f32.mrf.mxu1 }
 0x407   : > { %v3321_v0 = vmax.f32 %v3243_v28, 0.0  ;;  %v3258_v59 = vadd.f32 %v7955_v34, %v10791_v41 }
 0x408   : > { %v3252_v16 = vpop.f32.mrf.mxu1 }
 0x409   : > { %v3253_v15 = vadd.f32 %v10791_v41, %v3252_v16  ;;  %7978 = vmatprep.mubr.msk.f32.mxu0 %vm3127_vm2, %v3321_v0  ;;  %v3324_v63 = vmax.f32 %v3258_v59, 0.0 }
 0x40a   : > { %7979 = vmatmul.mubr.msk.f32.vlgmr.msra.gmra.mxu0 %vm3127_vm2, %v3322_v19  ;;  %v7958_v32 = vpop.f32.mrf.mxu1 }
 0x40b   : > { %v3323_v44 = vmax.f32 %v3253_v15, 0.0  ;;  %v3268_v51 = vadd.f32 %v7958_v32, %v10791_v41 }
 0x40c   : > { %v3262_v2 = vpop.f32.mrf.mxu1 }
 0x40d   : > { %7981 = vmatprep.mubr.msk.f32.mxu0 %vm3127_vm2, %v3323_v44  ;;  %v3263_v40 = vadd.f32 %v10791_v41, %v3262_v2  ;;  %v3326_v35 = vmax.f32 %v3268_v51, 0.0 }
 0x40e   : > { %7982 = vmatmul.mubr.msk.f32.gmra.mxu0 %vm3127_vm2, %v3324_v63 }
 0x40f   : > { %v3325_v52 = vmax.f32 %v3263_v40, 0.0 }
 0x410   : > { %v7961_v10 = vpop.f32.mrf.mxu1 }
 0x411   : > { %7984 = vmatprep.mubr.msk.f32.mxu0 %vm3127_vm2, %v3325_v52  ;;  %v3278_v4 = vadd.f32 %v7961_v10, %v10791_v41 }
 0x412   : > { %7985 = vmatmul.mubr.msk.f32.gmra.mxu0 %vm3127_vm2, %v3326_v35  ;;  %v3272_v36 = vpop.f32.mrf.mxu1 }
 0x413   : > { %v3273_v23 = vadd.f32 %v10791_v41, %v3272_v36  ;;  %v3328_v49 = vmax.f32 %v3278_v4, 0.0 }
 0x415   : > { %v3327_v3 = vmax.f32 %v3273_v23, 0.0 }
 0x417   : > { %7987 = vmatprep.mubr.msk.f32.mxu0 %vm3127_vm2, %v3327_v3 }
 0x418   : > { %7988 = vmatmul.mubr.msk.f32.gmra.mxu0 %vm3127_vm2, %v3328_v49 }
 0x440   : > { %v7964_v58 = vpop.f32.mrf.mxu1 }
 0x441   : > { %v3288_v27 = vadd.f32 %v7964_v58, %v10791_v41 }
 0x442   : > { %v3282_v53 = vpop.f32.mrf.mxu1 }
 0x443   : > { %v3283_v25 = vadd.f32 %v10791_v41, %v3282_v53  ;;  %v3330_v48 = vmax.f32 %v3288_v27, 0.0 }
 0x445   : > { %v3329_v20 = vmax.f32 %v3283_v25, 0.0 }
 0x447   : > { %7990 = vmatprep.mubr.msk.f32.mxu0 %vm3127_vm2, %v3329_v20 }
 0x448   : > { %7991 = vmatmul.mubr.msk.f32.gmra.mxu0 %vm3127_vm2, %v3330_v48 }
 0x46e   : > { %v7967_v8 = vpop.f32.mrf.mxu1 }
 0x46f   : > { %v3298_v22 = vadd.f32 %v7967_v8, %v10791_v41 }
 0x470   : > { %v3292_v47 = vpop.f32.mrf.mxu1 }
 0x471   : > { %v3293_v37 = vadd.f32 %v10791_v41, %v3292_v47  ;;  %v3332_v45 = vmax.f32 %v3298_v22, 0.0 }
 0x473   : > { %v3331_v21 = vmax.f32 %v3293_v37, 0.0 }
 0x475   : > { %7993 = vmatprep.mubr.msk.f32.mxu0 %vm3127_vm2, %v3331_v21 }
 0x476   : > { %7994 = vmatmul.mubr.msk.f32.gmra.mxu0 %vm3127_vm2, %v3332_v45 }
 0x49b   : > { %v7970_v31 = vpop.f32.mrf.mxu1 }
 0x49c   : > { %v3308_v57 = vadd.f32 %v7970_v31, %v10791_v41 }
 0x49d   : > { %v3302_v24 = vpop.f32.mrf.mxu1 }
 0x49e   : > { %v3303_v62 = vadd.f32 %v10791_v41, %v3302_v24  ;;  %v3334_v6 = vmax.f32 %v3308_v57, 0.0 }
 0x4a0   : > { %v3333_v30 = vmax.f32 %v3303_v62, 0.0 }
 0x4a2   : > { %7996 = vmatprep.mubr.msk.f32.mxu0 %vm3127_vm2, %v3333_v30 }
 0x4a3   : > { %7997 = vmatmul.mubr.msk.f32.gmra.mxu0 %vm3127_vm2, %v3334_v6  ;;  %v7684_v6 = vld [vmem:[%s13087_s10 + $0x18] sm:$0xff] }
 0x4a4   : > { %8030 = vmatprep.subr.mxu0 %v7684_v6 }
 0x4a5   : > { %8031 = vmatpush3.msra.mxu0 %v7684_v6 }
 0x4c6   : > { %v7973_v55 = vpop.f32.mrf.mxu1 }
 0x4c7   : > { %v3318_v9 = vadd.f32 %v7973_v55, %v10791_v41  ;;  %v7683_v55 = vld [vmem:[%s13087_s10 + $0x10] sm:$0xff] }
 0x4c8   : > { %v3312_v39 = vpop.f32.mrf.mxu1  ;;  %8032 = vmatprep.subr.mxu0 %v7683_v55 }
 0x4c9   : > { %v3313_v29 = vadd.f32 %v10791_v41, %v3312_v39  ;;  %v3336_v0 = vmax.f32 %v3318_v9, 0.0  ;;  %8033 = vmatpush3.msra.mxu0 %v7683_v55 }
 0x4ca   : > { %v7980_v12 = vpop.f32.mrf.mxu0 }
 0x4cb   : > { %v3335_v28 = vmax.f32 %v3313_v29, 0.0  ;;  %v3466_v34 = vadd.f32 %v7980_v12, %v10839_v60 }
 0x4cc   : > { %v3460_v19 = vpop.f32.mrf.mxu0 }
 0x4cd   : > { %7999 = vmatprep.mubr.msk.f32.mxu0 %vm3127_vm2, %v3335_v28  ;;  %v3461_v59 = vadd.f32 %v10839_v60, %v3460_v19  ;;  %v10847_v16 = vadd.f32 %v3466_v34, %v10720_v7 }
 0x4ce   : > { %8000 = vmatmul.mubr.msk.f32.gmra.mxu0 %vm3127_vm2, %v3336_v0  ;;  %v7983_v15 = vpop.f32.mrf.mxu0 }
 0x4cf   : > { %v10850_v32 = vadd.f32 %v3461_v59, %v10709_v1  ;;  %v3476_v41 = vadd.f32 %v7983_v15, %v10839_v60  ;;  %v3556_v2 = vmax.f32 %v10847_v16, 0.0 }
 0x4d0   : > { %v3470_v44 = vpop.f32.mrf.mxu0 }
 0x4d1   : > { %v3555_v63 = vmax.f32 %v10850_v32, 0.0  ;;  %v3471_v51 = vadd.f32 %v10839_v60, %v3470_v44  ;;  %v10857_v40 = vadd.f32 %v3476_v41, %v10729_v18 }
 0x4d2   : > { %v7986_v52 = vpop.f32.mrf.mxu0 }
 0x4d3   : > { %v10860_v35 = vadd.f32 %v3471_v51, %v10715_v13  ;;  %8006 = vmatprep.mubr.msk.f32.mxu1 %vm3127_vm2, %v3555_v63  ;;  %v3486_v10 = vadd.f32 %v7986_v52, %v10839_v60  ;;  %v3558_v3 = vmax.f32 %v10857_v40, 0.0 }
 0x4d4   : > { %8007 = vmatmul.mubr.msk.f32.vlgmr.msra.gmra.mxu1 %vm3127_vm2, %v3556_v2  ;;  %v3480_v4 = vpop.f32.mrf.mxu0 }
 0x4d5   : > { %v3557_v36 = vmax.f32 %v10860_v35, 0.0  ;;  %v3481_v23 = vadd.f32 %v10839_v60, %v3480_v4  ;;  %v10873_v49 = vadd.f32 %v3486_v10, %v10736_v5 }
 0x4d7   : > { %v10876_v58 = vadd.f32 %v3481_v23, %v10727_v17  ;;  %8009 = vmatprep.mubr.msk.f32.mxu1 %vm3127_vm2, %v3557_v36  ;;  %v3560_v53 = vmax.f32 %v10873_v49, 0.0 }
 0x4d8   : > { %8010 = vmatmul.mubr.msk.f32.gmra.mxu1 %vm3127_vm2, %v3558_v3  ;;  %v7989_v25 = vpop.f32.mrf.mxu0 }
 0x4d9   : > { %v3559_v27 = vmax.f32 %v10876_v58, 0.0  ;;  %v3496_v20 = vadd.f32 %v7989_v25, %v10839_v60 }
 0x4da   : > { %v3490_v48 = vpop.f32.mrf.mxu0 }
 0x4db   : > { %8012 = vmatprep.mubr.msk.f32.mxu1 %vm3127_vm2, %v3559_v27  ;;  %v3491_v61 = vadd.f32 %v10839_v60, %v3490_v48  ;;  %v10895_v38 = vadd.f32 %v3496_v20, %v10744_v11 }
 0x4dc   : > { %8013 = vmatmul.mubr.msk.f32.gmra.mxu1 %vm3127_vm2, %v3560_v53 }
 0x4dd   : > { %v10898_v8 = vadd.f32 %v3491_v61, %v10742_v42  ;;  %v3562_v47 = vmax.f32 %v10895_v38, 0.0 }
 0x4df   : > { %v3561_v22 = vmax.f32 %v10898_v8, 0.0 }
 0x4e1   : > { %8015 = vmatprep.mubr.msk.f32.mxu1 %vm3127_vm2, %v3561_v22 }
 0x4e2   : > { %8016 = vmatmul.mubr.msk.f32.gmra.mxu1 %vm3127_vm2, %v3562_v47 }
 0x508   : > { %v7992_v37 = vpop.f32.mrf.mxu0 }
 0x509   : > { %v3506_v21 = vadd.f32 %v7992_v37, %v10839_v60 }
 0x50a   : > { %v3500_v45 = vpop.f32.mrf.mxu0 }
 0x50b   : > { %v3501_v31 = vadd.f32 %v10839_v60, %v3500_v45  ;;  %v10911_v57 = vadd.f32 %v3506_v21, %v10754_v56  ;;  %v10973_v21 = vld [vmem:[%s13086_s9 + $0x1] ss:$0 sm:$0xff] }
 0x50d   : > { %v10914_v24 = vadd.f32 %v3501_v31, %v10752_v43  ;;  %v3564_v30 = vmax.f32 %v10911_v57, 0.0 }
 0x50f   : > { %v3563_v62 = vmax.f32 %v10914_v24, 0.0 }
 0x511   : > { %8018 = vmatprep.mubr.msk.f32.mxu1 %vm3127_vm2, %v3563_v62 }
 0x512   : > { %8019 = vmatmul.mubr.msk.f32.gmra.mxu1 %vm3127_vm2, %v3564_v30 }
 0x536   : > { %v7995_v9 = vpop.f32.mrf.mxu0 }
 0x537   : > { %v3516_v39 = vadd.f32 %v7995_v9, %v10839_v60 }
 0x538   : > { %v3510_v29 = vpop.f32.mrf.mxu0 }
 0x539   : > { %v3511_v12 = vadd.f32 %v10839_v60, %v3510_v29  ;;  %v10933_v28 = vadd.f32 %v3516_v39, %v10770_v54 }
 0x53b   : > { %v10936_v34 = vadd.f32 %v3511_v12, %v10768_v14  ;;  %v3566_v19 = vmax.f32 %v10933_v28, 0.0 }
 0x53d   : > { %v3565_v0 = vmax.f32 %v10936_v34, 0.0 }
 0x53f   : > { %8021 = vmatprep.mubr.msk.f32.mxu1 %vm3127_vm2, %v3565_v0 }
 0x540   : > { %8022 = vmatmul.mubr.msk.f32.gmra.mxu1 %vm3127_vm2, %v3566_v19 }
 0x563   : > { %v7998_v59 = vpop.f32.mrf.mxu0 }
 0x564   : > { %v3526_v15 = vadd.f32 %v7998_v59, %v10839_v60 }
 0x565   : > { %v3520_v41 = vpop.f32.mrf.mxu0 }
 0x566   : > { %v3521_v44 = vadd.f32 %v10839_v60, %v3520_v41  ;;  %v10949_v51 = vadd.f32 %v3526_v15, %v10780_v26 }
 0x568   : > { %v10952_v52 = vadd.f32 %v3521_v44, %v10778_v46  ;;  %v3568_v4 = vmax.f32 %v10949_v51, 0.0 }
 0x56a   : > { %v3567_v10 = vmax.f32 %v10952_v52, 0.0 }
 0x56c   : > { %8024 = vmatprep.mubr.msk.f32.mxu1 %vm3127_vm2, %v3567_v10 }
 0x56d   : > { %8025 = vmatmul.mubr.msk.f32.gmra.mxu1 %vm3127_vm2, %v3568_v4 }
 0x58e   : > { %v8001_v23 = vpop.f32.mrf.mxu0 }
 0x58f   : > { %v3536_v25 = vadd.f32 %v8001_v23, %v10839_v60 }
 0x590   : > { %v3530_v20 = vpop.f32.mrf.mxu0 }
 0x591   : > { %v3531_v48 = vadd.f32 %v10839_v60, %v3530_v20  ;;  %v10965_v61 = vadd.f32 %v3536_v25, %v10795_v33 }
 0x593   : > { %v10968_v37 = vadd.f32 %v3531_v48, %v10793_v50  ;;  %v3570_v6 = vmax.f32 %v10965_v61, 0.0 }
 0x594   : > { %v8008_v45 = vpop.f32.mrf.mxu1 }
 0x595   : > { %v3569_v31 = vmax.f32 %v10968_v37, 0.0  ;;  %v3702_v55 = vadd.f32 %v8008_v45, %v10973_v21 }
 0x596   : > { %v3696_v9 = vpop.f32.mrf.mxu1 }
 0x597   : > { %8027 = vmatprep.mubr.msk.f32.mxu1 %vm3127_vm2, %v3569_v31  ;;  %v3697_v60 = vadd.f32 %v10973_v21, %v3696_v9  ;;  %v3776_v12 = vmax.f32 %v3702_v55, 0.0 }
 0x598   : > { %8028 = vmatmul.mubr.msk.f32.gmra.mxu1 %vm3127_vm2, %v3570_v6  ;;  %v8011_v39 = vpop.f32.mrf.mxu1 }
 0x599   : > { %v3775_v29 = vmax.f32 %v3697_v60, 0.0  ;;  %v3712_v59 = vadd.f32 %v8011_v39, %v10973_v21 }
 0x59a   : > { %v3706_v15 = vpop.f32.mrf.mxu1 }
 0x59b   : > { %v3707_v41 = vadd.f32 %v10973_v21, %v3706_v15  ;;  %8034 = vmatprep.mubr.msk.f32.mxu0 %vm3127_vm2, %v3775_v29  ;;  %v3778_v25 = vmax.f32 %v3712_v59, 0.0 }
 0x59c   : > { %8035 = vmatmul.mubr.msk.f32.vlgmr.msra.gmra.mxu0 %vm3127_vm2, %v3776_v12  ;;  %v8014_v44 = vpop.f32.mrf.mxu1 }
 0x59d   : > { %v3777_v23 = vmax.f32 %v3707_v41, 0.0  ;;  %v3722_v20 = vadd.f32 %v8014_v44, %v10973_v21 }
 0x59e   : > { %v3716_v48 = vpop.f32.mrf.mxu1 }
 0x59f   : > { %8037 = vmatprep.mubr.msk.f32.mxu0 %vm3127_vm2, %v3777_v23  ;;  %v3717_v45 = vadd.f32 %v10973_v21, %v3716_v48  ;;  %v3780_v9 = vmax.f32 %v3722_v20, 0.0 }
 0x5a0   : > { %8038 = vmatmul.mubr.msk.f32.gmra.mxu0 %vm3127_vm2, %v3778_v25 }
 0x5a1   : > { %v3779_v55 = vmax.f32 %v3717_v45, 0.0 }
 0x5a2   : > { %v8017_v60 = vpop.f32.mrf.mxu1 }
 0x5a3   : > { %8040 = vmatprep.mubr.msk.f32.mxu0 %vm3127_vm2, %v3779_v55  ;;  %v3732_v39 = vadd.f32 %v8017_v60, %v10973_v21 }
 0x5a4   : > { %8041 = vmatmul.mubr.msk.f32.gmra.mxu0 %vm3127_vm2, %v3780_v9  ;;  %v3726_v29 = vpop.f32.mrf.mxu1 }
 0x5a5   : > { %v3727_v12 = vadd.f32 %v10973_v21, %v3726_v29  ;;  %v3782_v15 = vmax.f32 %v3732_v39, 0.0 }
 0x5a7   : > { %v3781_v59 = vmax.f32 %v3727_v12, 0.0 }
 0x5a9   : > { %8043 = vmatprep.mubr.msk.f32.mxu0 %vm3127_vm2, %v3781_v59 }
 0x5aa   : > { %8044 = vmatmul.mubr.msk.f32.gmra.mxu0 %vm3127_vm2, %v3782_v15 }
 0x5d2   : > { %v8020_v41 = vpop.f32.mrf.mxu1 }
 0x5d3   : > { %v3742_v44 = vadd.f32 %v8020_v41, %v10973_v21 }
 0x5d4   : > { %v3736_v23 = vpop.f32.mrf.mxu1 }
 0x5d5   : > { %v3737_v25 = vadd.f32 %v10973_v21, %v3736_v23  ;;  %v3784_v48 = vmax.f32 %v3742_v44, 0.0 }
 0x5d7   : > { %v3783_v20 = vmax.f32 %v3737_v25, 0.0 }
 0x5d9   : > { %8046 = vmatprep.mubr.msk.f32.mxu0 %vm3127_vm2, %v3783_v20 }
 0x5da   : > { %8047 = vmatmul.mubr.msk.f32.gmra.mxu0 %vm3127_vm2, %v3784_v48 }
 0x600   : > { %v8023_v45 = vpop.f32.mrf.mxu1 }
 0x601   : > { %v3752_v55 = vadd.f32 %v8023_v45, %v10973_v21  ;;  %v11015_v45 = vld [vmem:[%s13088_s11 + $0x1] ss:$0 sm:$0xff] }
 0x602   : > { %v3746_v9 = vpop.f32.mrf.mxu1 }
 0x603   : > { %v3747_v60 = vadd.f32 %v10973_v21, %v3746_v9  ;;  %v3786_v29 = vmax.f32 %v3752_v55, 0.0 }
 0x605   : > { %v3785_v39 = vmax.f32 %v3747_v60, 0.0 }
 0x607   : > { %8049 = vmatprep.mubr.msk.f32.mxu0 %vm3127_vm2, %v3785_v39 }
 0x608   : > { %8050 = vmatmul.mubr.msk.f32.gmra.mxu0 %vm3127_vm2, %v3786_v29 }
 0x62d   : > { %v8026_v12 = vpop.f32.mrf.mxu1 }
 0x62e   : > { %v3762_v59 = vadd.f32 %v8026_v12, %v10973_v21 }
 0x62f   : > { %v3756_v15 = vpop.f32.mrf.mxu1 }
 0x630   : > { %v3757_v41 = vadd.f32 %v10973_v21, %v3756_v15  ;;  %v3788_v23 = vmax.f32 %v3762_v59, 0.0 }
 0x632   : > { %v3787_v44 = vmax.f32 %v3757_v41, 0.0 }
 0x634   : > { %8052 = vmatprep.mubr.msk.f32.mxu0 %vm3127_vm2, %v3787_v44 }
 0x635   : > { %8053 = vmatmul.mubr.msk.f32.gmra.mxu0 %vm3127_vm2, %v3788_v23 }
 0x658   : > { %v8029_v25 = vpop.f32.mrf.mxu1 }
 0x659   : > { %v3772_v20 = vadd.f32 %v8029_v25, %v10973_v21 }
 0x65a   : > { %v3766_v48 = vpop.f32.mrf.mxu1 }
 0x65b   : > { %v3767_v55 = vadd.f32 %v10973_v21, %v3766_v48  ;;  %v3790_v29 = vmax.f32 %v3772_v20, 0.0 }
 0x65c   : > { %v8036_v9 = vpop.f32.mrf.mxu0 }
 0x65d   : > { %v3789_v60 = vmax.f32 %v3767_v55, 0.0  ;;  %v3922_v39 = vadd.f32 %v8036_v9, %v11015_v45 }
 0x65e   : > { %v3916_v12 = vpop.f32.mrf.mxu0 }
 0x65f   : > { %8055 = vmatprep.mubr.msk.f32.mxu0 %vm3127_vm2, %v3789_v60  ;;  %v3996_v59 = vadd.f32 %v3922_v39, %v3556_v2  ;;  %v3917_v15 = vadd.f32 %v11015_v45, %v3916_v12 }
 0x660   : > { %8056 = vmatmul.mubr.msk.f32.gmra.mxu0 %vm3127_vm2, %v3790_v29  ;;  %v8039_v41 = vpop.f32.mrf.mxu0 }
 0x661   : > { %v4012_v44 = vmax.f32 %v3996_v59, 0.0  ;;  %v3995_v21 = vadd.f32 %v3917_v15, %v3555_v63  ;;  %v3932_v23 = vadd.f32 %v8039_v41, %v11015_v45 }
 0x662   : > { %v3926_v25 = vpop.f32.mrf.mxu0 }
 0x663   : > { %v4034_v20 = vsel %vm3127_vm2, %v4012_v44, -inf  ;;  %v4011_v48 = vmax.f32 %v3995_v21, 0.0  ;;  %v3998_v55 = vadd.f32 %v3932_v23, %v3558_v3  ;;  %v3927_v16 = vadd.f32 %v11015_v45, %v3926_v25 }
 0x664   : > { %v4035_v2 = vrot.slane %v4034_v20, 4  ;;  %v8042_v9 = vpop.f32.mrf.mxu0 }
 0x665   : > { %v4027_v60 = vsel %vm3127_vm2, %v4011_v48, -inf  ;;  %v4014_v39 = vmax.f32 %v3998_v55, 0.0  ;;  %v3997_v32 = vadd.f32 %v3927_v16, %v3557_v36  ;;  %v3942_v63 = vadd.f32 %v8042_v9, %v11015_v45 }
 0x666   : > { %v4028_v29 = vrot.slane %v4027_v60, 4  ;;  %v3936_v12 = vpop.f32.mrf.mxu0  ;;  %v4036_v41 = vmax.f32 %v4034_v20, %v4035_v2 }
 0x667   : > { %v4048_v59 = vsel %vm3127_vm2, %v4014_v39, -inf  ;;  %v4013_v15 = vmax.f32 %v3997_v32, 0.0  ;;  %v4000_v40 = vadd.f32 %v3942_v63, %v3560_v53  ;;  %v3937_v3 = vadd.f32 %v11015_v45, %v3936_v12 }
 0x668   : > { %v4029_v44 = vmax.f32 %v4027_v60, %v4028_v29  ;;  %v4049_v21 = vrot.slane %v4048_v59, 4  ;;  %v4037_v9 = vrot.slane %v4036_v41, 2 }
 0x669   : > { %v4041_v23 = vsel %vm3127_vm2, %v4013_v15, -inf  ;;  %v4016_v25 = vmax.f32 %v4000_v40, 0.0  ;;  %v3999_v35 = vadd.f32 %v3937_v3, %v3559_v27 }
 0x66a   : > { %v4042_v36 = vrot.slane %v4041_v23, 4  ;;  %v4030_v48 = vrot.slane %v4029_v44, 2  ;;  %v4050_v39 = vmax.f32 %v4048_v59, %v4049_v21  ;;  %v8045_v2 = vpop.f32.mrf.mxu0  ;;  %v4038_v12 = vmax.f32 %v4036_v41, %v4037_v9 }
 0x66b   : > { %v4062_v55 = vsel %vm3127_vm2, %v4016_v25, -inf  ;;  %v4015_v16 = vmax.f32 %v3999_v35, 0.0  ;;  %v3952_v29 = vadd.f32 %v8045_v2, %v11015_v45 }
 0x66c   : > { %v4043_v49 = vmax.f32 %v4041_v23, %v4042_v36  ;;  %v4063_v53 = vrot.slane %v4062_v55, 4  ;;  %v4031_v60 = vmax.f32 %v4029_v44, %v4030_v48  ;;  %v4051_v58 = vrot.slane %v4050_v39, 2  ;;  %v3946_v15 = vpop.f32.mrf.mxu0 }
 0x66d   : > { %v4055_v32 = vsel %vm3127_vm2, %v4015_v16, -inf  ;;  %v4002_v25 = vadd.f32 %v3952_v29, %v3562_v47  ;;  %v3947_v59 = vadd.f32 %v11015_v45, %v3946_v15  ;;  %v4039_v36 = vrot.slane %v4038_v12, 1 }
 0x66e   : > { %v4044_v20 = vrot.slane %v4043_v49, 2  ;;  %v4056_v63 = vrot.slane %v4055_v32, 4  ;;  %v4064_v40 = vmax.f32 %v4062_v55, %v4063_v53  ;;  %v4032_v21 = vrot.slane %v4031_v60, 1 }
 0x66f   : > { %v4018_v35 = vmax.f32 %v4002_v25, 0.0  ;;  %v4001_v44 = vadd.f32 %v3947_v59, %v3561_v22  ;;  %v4052_v48 = vmax.f32 %v4050_v39, %v4051_v58  ;;  %v4040_v29 = vmax.f32 %v4038_v12, %v4039_v36 }
 0x670   : > { %v4045_v27 = vmax.f32 %v4043_v49, %v4044_v20  ;;  %v4057_v3 = vmax.f32 %v4055_v32, %v4056_v63  ;;  %v4065_v41 = vrot.slane %v4064_v40, 2  ;;  %v4033_v32 = vmax.f32 %v4031_v60, %v4032_v21 }
 0x671   : > { %v4076_v49 = vsel %vm3127_vm2, %v4018_v35, -inf  ;;  %v4017_v55 = vmax.f32 %v4001_v44, 0.0  ;;  %v4053_v8 = vrot.slane %v4052_v48, 1 }
 0x672   : > { %v4058_v23 = vrot.slane %v4057_v3, 2  ;;  %v4046_v16 = vrot.slane %v4045_v27, 1  ;;  %v4077_v53 = vrot.slane %v4076_v49, 4  ;;  %v4066_v22 = vmax.f32 %v4064_v40, %v4065_v41 }
 0x673   : > { %v4069_v38 = vsel %vm3127_vm2, %v4017_v55, -inf  ;;  %v4165_v15 = vsel %vm4164_vm13, %v4040_v29, %v4033_v32  ;;  %v4054_v21 = vmax.f32 %v4052_v48, %v4053_v8  ;;  %v4140_v55 = vld [vmem:[%s13089_s12 + $0x8] sm:$0xff] }
 0x674   : > { %v4059_v9 = vmax.f32 %v4057_v3, %v4058_v23  ;;  %v4047_v47 = vmax.f32 %v4045_v27, %v4046_v16  ;;  %v4078_v2 = vmax.f32 %v4076_v49, %v4077_v53  ;;  %v4070_v63 = vrot.slane %v4069_v38, 4  ;;  %8058 = vmatprep.subr.mxu1 %v4140_v55  ;;  %v4139_v53 = vld [vmem:[%s13089_s12] sm:$0xff] }
 0x675   : > { %v4067_v23 = vrot.slane %v4066_v22, 1  ;;  %8059 = vmatpush3.msra.mxu1 %v4140_v55 }
 0x676   : > { %v4060_v20 = vrot.slane %v4059_v9, 1  ;;  %v4079_v39 = vrot.slane %v4078_v2, 2  ;;  %v4071_v58 = vmax.f32 %v4069_v38, %v4070_v63  ;;  %v4167_v3 = vsel %vm4166_vm4, %v4047_v47, %v4165_v15  ;;  %8060 = vmatprep.subr.mxu1 %v4139_v53 }
 0x677   : > { %v4169_v12 = vsel %vm4168_vm7, %v4054_v21, %v4167_v3  ;;  %v4068_v36 = vmax.f32 %v4066_v22, %v4067_v23  ;;  %8061 = vmatpush3.msra.mxu1 %v4139_v53 }
 0x678   : > { %v4061_v25 = vmax.f32 %v4059_v9, %v4060_v20  ;;  %v4080_v60 = vmax.f32 %v4078_v2, %v4079_v39  ;;  %v4072_v59 = vrot.slane %v4071_v58, 2 }
 0x67a   : > { %v4073_v27 = vmax.f32 %v4071_v58, %v4072_v59  ;;  %v4081_v35 = vrot.slane %v4080_v60, 1  ;;  %v4171_v40 = vsel %vm4170_vm0, %v4061_v25, %v4169_v12 }
 0x67b   : > { %v4173_v9 = vsel %vm4172_vm1, %v4068_v36, %v4171_v40 }
 0x67c   : > { %v4074_v44 = vrot.slane %v4073_v27, 1  ;;  %v4082_v41 = vmax.f32 %v4080_v60, %v4081_v35 }
 0x67e   : > { %v4075_v16 = vmax.f32 %v4073_v27, %v4074_v44 }
 0x680   : > { %v4175_v49 = vsel %vm4174_vm9, %v4075_v16, %v4173_v9 }
 0x681   : > { %v11059_v48 = vsel %vm4176_vm10, %v4082_v41, %v4175_v49 }
 0x682   : > { %13280 = vst [vmem:[#allocation2_spill] sm:$0xff] %v11059_v48  ;;  %8062 = vmatprep.mubr.msk.f32.mxu1 %vm3127_vm2, %v11059_v48 }
 0x69a   : > { %v8048_v32 = vpop.f32.mrf.mxu0 }
 0x69b   : > { %v3962_v29 = vadd.f32 %v8048_v32, %v11015_v45 }
 0x69c   : > { %v3956_v38 = vpop.f32.mrf.mxu0 }
 0x69d   : > { %v3957_v63 = vadd.f32 %v11015_v45, %v3956_v38  ;;  %v4004_v58 = vadd.f32 %v3962_v29, %v3564_v30 }
 0x69f   : > { %v4003_v39 = vadd.f32 %v3957_v63, %v3563_v62  ;;  %v4020_v59 = vmax.f32 %v4004_v58, 0.0 }
 0x6a1   : > { %v4019_v60 = vmax.f32 %v4003_v39, 0.0  ;;  %v4090_v30 = vsel %vm3127_vm2, %v4020_v59, -inf }
 0x6a2   : > { %v4091_v44 = vrot.slane %v4090_v30, 4 }
 0x6a3   : > { %v4083_v57 = vsel %vm3127_vm2, %v4019_v60, -inf }
 0x6a4   : > { %v4084_v12 = vrot.slane %v4083_v57, 4  ;;  %v4092_v36 = vmax.f32 %v4090_v30, %v4091_v44 }
 0x6a6   : > { %v4085_v40 = vmax.f32 %v4083_v57, %v4084_v12  ;;  %v4093_v53 = vrot.slane %v4092_v36, 2 }
 0x6a8   : > { %v4086_v55 = vrot.slane %v4085_v40, 2  ;;  %v4094_v63 = vmax.f32 %v4092_v36, %v4093_v53 }
 0x6c8   : > { %v8051_v47 = vpop.f32.mrf.mxu0 }
 0x6c9   : > { %v3972_v25 = vadd.f32 %v8051_v47, %v11015_v45 }
 0x6ca   : > { %v3966_v20 = vpop.f32.mrf.mxu0 }
 0x6cb   : > { %v3967_v8 = vadd.f32 %v11015_v45, %v3966_v20  ;;  %v4006_v24 = vadd.f32 %v3972_v25, %v3566_v19  ;;  %v4087_v20 = vmax.f32 %v4085_v40, %v4086_v55 }
 0x6cd   : > { %v4005_v15 = vadd.f32 %v3967_v8, %v3565_v0  ;;  %v4022_v27 = vmax.f32 %v4006_v24, 0.0  ;;  %v4088_v25 = vrot.slane %v4087_v20, 1 }
 0x6cf   : > { %v4021_v21 = vmax.f32 %v4005_v15, 0.0  ;;  %v4104_v28 = vsel %vm3127_vm2, %v4022_v27, -inf  ;;  %v4089_v27 = vmax.f32 %v4087_v20, %v4088_v25 }
 0x6d0   : > { %v4105_v9 = vrot.slane %v4104_v28, 4 }
 0x6d1   : > { %v4097_v34 = vsel %vm3127_vm2, %v4021_v21, -inf  ;;  %v4095_v21 = vrot.slane %v4094_v63, 1 }
 0x6d2   : > { %v4098_v52 = vrot.slane %v4097_v34, 4 }
 0x6d3   : > { %v4096_v44 = vmax.f32 %v4094_v63, %v4095_v21 }
 0x6d4   : > { %v4099_v16 = vmax.f32 %v4097_v34, %v4098_v52 }
 0x6d6   : > { %v4100_v32 = vrot.slane %v4099_v16, 2 }
 0x6d8   : > { %v4101_v29 = vmax.f32 %v4099_v16, %v4100_v32 }
 0x6f5   : > { %v8054_v2 = vpop.f32.mrf.mxu0 }
 0x6f6   : > { %v3982_v62 = vadd.f32 %v8054_v2, %v11015_v45 }
 0x6f7   : > { %v3976_v22 = vpop.f32.mrf.mxu0 }
 0x6f8   : > { %v3977_v3 = vadd.f32 %v11015_v45, %v3976_v22  ;;  %v4008_v35 = vadd.f32 %v3982_v62, %v3568_v4  ;;  %v4106_v4 = vmax.f32 %v4104_v28, %v4105_v9  ;;  %v4178_v28 = vsel %vm4164_vm13, %v4096_v44, %v4089_v27 }
 0x6fa   : > { %v4007_v23 = vadd.f32 %v3977_v3, %v3567_v10  ;;  %v4024_v19 = vmax.f32 %v4008_v35, 0.0  ;;  %v4107_v39 = vrot.slane %v4106_v4, 2 }
 0x6fc   : > { %v4023_v0 = vmax.f32 %v4007_v23, 0.0  ;;  %v4118_v49 = vsel %vm3127_vm2, %v4024_v19, -inf  ;;  %v4102_v23 = vrot.slane %v4101_v29, 1  ;;  %v4108_v62 = vmax.f32 %v4106_v4, %v4107_v39 }
 0x6fd   : > { %v4119_v38 = vrot.slane %v4118_v49, 4 }
 0x6fe   : > { %v4111_v10 = vsel %vm3127_vm2, %v4023_v0, -inf  ;;  %v4109_v52 = vrot.slane %v4108_v62, 1 }
 0x6ff   : > { %v4112_v41 = vrot.slane %v4111_v10, 4  ;;  %v4120_v58 = vmax.f32 %v4118_v49, %v4119_v38 }
 0x701   : > { %v4113_v51 = vmax.f32 %v4111_v10, %v4112_v41  ;;  %v4121_v57 = vrot.slane %v4120_v58, 2  ;;  %v4110_v41 = vmax.f32 %v4108_v62, %v4109_v52 }
 0x703   : > { %v4114_v8 = vrot.slane %v4113_v51, 2  ;;  %v4122_v37 = vmax.f32 %v4120_v58, %v4121_v57 }
 0x705   : > { %v4115_v24 = vmax.f32 %v4113_v51, %v4114_v8  ;;  %v4123_v9 = vrot.slane %v4122_v37, 1 }
 0x707   : > { %v4116_v35 = vrot.slane %v4115_v24, 1  ;;  %v4124_v4 = vmax.f32 %v4122_v37, %v4123_v9 }
 0x709   : > { %v4117_v40 = vmax.f32 %v4115_v24, %v4116_v35 }
 0x720   : > { %v8057_v47 = vpop.f32.mrf.mxu0 }
 0x721   : > { %v3992_v2 = vadd.f32 %v8057_v47, %v11015_v45 }
 0x722   : > { %v3986_v22 = vpop.f32.mrf.mxu0 }
 0x723   : > { %v4010_v15 = vadd.f32 %v3992_v2, %v3570_v6  ;;  %v3987_v3 = vadd.f32 %v11015_v45, %v3986_v22  ;;  %v4103_v6 = vmax.f32 %v4101_v29, %v4102_v23  ;;  %v8431_v29 = vmov 1966171168  }
 0x724   : > { %v4270_v8 = vunpack.c.l.s4 %v8431_v29  ;;  %v4272_v22 = vlaneseq }
 0x725   : > { %v4026_v60 = vmax.f32 %v4010_v15, 0.0  ;;  %v4009_v59 = vadd.f32 %v3987_v3, %v3569_v31  ;;  %v4179_v19 = vsel %vm4166_vm4, %v4103_v6, %v4178_v28  ;;  %v7703_v15 = vld [vmem:[%s13090_s13] ss:$0 sm:$0xff] }
 0x726   : > { %v4180_v55 = vsel %vm4168_vm7, %v4110_v41, %v4179_v19  ;;  %v4271_v39 = vunpack.c.0.s8 %v4270_v8  ;;  %v4273_v58 = vshrl.u32 %v4272_v22, 7 }
 0x727   : > { %v4132_v30 = vsel %vm3127_vm2, %v4026_v60, -inf  ;;  %v4025_v34 = vmax.f32 %v4009_v59, 0.0  ;;  %v4181_v32 = vsel %vm4170_vm0, %v4117_v40, %v4180_v55 }
 0x728   : > { %v4133_v0 = vrot.slane %v4132_v30, 4  ;;  %v4182_v20 = vsel %vm4172_vm1, %v4124_v4, %v4181_v32  ;;  %v4274_v60 = vsub.s32 %v4271_v39, %v4273_v58 }
 0x729   : > { %v4125_v61 = vsel %vm3127_vm2, %v4025_v34, -inf }
 0x72a   : > { %v4134_v45 = vmax.f32 %v4132_v30, %v4133_v0  ;;  %v4126_v12 = vrot.slane %v4125_v61, 4  ;;  %v11115_v30 = vsub.s32 0, %v4273_v58 }
 0x72c   : > { %v4135_v31 = vrot.slane %v4134_v45, 2  ;;  %v4127_v10 = vmax.f32 %v4125_v61, %v4126_v12 }
 0x72e   : > { %v4136_v36 = vmax.f32 %v4134_v45, %v4135_v31  ;;  %v4128_v16 = vrot.slane %v4127_v10, 2 }
 0x730   : > { %v4129_v49 = vmax.f32 %v4127_v10, %v4128_v16  ;;  %v4137_v53 = vrot.slane %v4136_v36, 1 }
 0x732   : > { %v4130_v51 = vrot.slane %v4129_v49, 1  ;;  %v4138_v47 = vmax.f32 %v4136_v36, %v4137_v53 }
 0x734   : > { %v4131_v38 = vmax.f32 %v4129_v49, %v4130_v51 }
 0x736   : > { %v4183_v2 = vsel %vm4174_vm9, %v4131_v38, %v4182_v20 }
 0x737   : > { %v11108_v63 = vsel %vm4176_vm10, %v4138_v47, %v4183_v2 }
 0x738   : > { %13281 = vst [vmem:[#allocation3_spill] sm:$0xff] %v11108_v63  ;;  %8063 = vmatmul.mubr.msk.f32.vlgmr.msra.gmra.mxu1 %vm3127_vm2, %v11108_v63 }
 0x7f8   : > { %v8064_v3 = vpop.f32.mrf.mxu1 }
 0x7f9   : > { %v4261_v25 = vadd.f32 %v8064_v3, %v7703_v15 }
 0x7fa   : > { %v4255_v59 = vpop.f32.mrf.mxu1 }
 0x7fb   : > { %v4265_v21 = vmax.f32 %v4261_v25, 0.0  ;;  %v4256_v23 = vadd.f32 %v7703_v15, %v4255_v59 }
 0x7fd   : > { %v4317_v24 = vcombine.high %v4265_v21, %v4265_v21  ;;  %v4324_v62 = vrot.slane %v4265_v21, %v4274_v60  ;;  %v4264_v57 = vmax.f32 %v4256_v23, 0.0 }
 0x7ff   : > { %v4331_v34 = vrot.slane %v4317_v24, %v4274_v60  ;;  %v4332_v0 = vcombine.high %v4324_v62, %v4324_v62  ;;  %v4340_v27 = vrot.slane %v4324_v62, %v4274_v60  ;;  %v4268_v61 = vcombine.high %v4264_v57, %v4264_v57 }
 0x800   : > { %v4275_v6 = vrot.slane %v4264_v57, %v4274_v60 }
 0x801   : > { %v4333_v35 = vcombine.high %v4331_v34, %v4331_v34  ;;  %v4354_v45 = vrot.slane %v4332_v0, %v4274_v60  ;;  %v11118_v12 = vrot.slane %v4340_v27, %v11115_v30  ;;  %v4282_v44 = vrot.slane %v4268_v61, %v4274_v60 }
 0x802   : > { %v4283_v52 = vcombine.high %v4275_v6, %v4275_v6  ;;  %v4347_v37 = vrot.slane %v4331_v34, %v4274_v60  ;;  %v4291_v55 = vrot.slane %v4275_v6, %v4274_v60  ;;  %v4362_v2 = vcombine.high %v4340_v27, %v4340_v27 }
 0x803   : > { %13282 = vst [vmem:[#allocation7_spill] sm:$0xff] %v11118_v12  ;;  %v4361_v31 = vrot.slane %v4333_v35, %v4274_v60  ;;  %v11121_v10 = vrot.slane %v4354_v45, %v11115_v30  ;;  %v4284_v28 = vcombine.high %v4282_v44, %v4282_v44  ;;  %v4298_v19 = vrot.slane %v4282_v44, %v4274_v60 }
 0x804   : > { %4526 = vrot.lane.b32.xlu0 %v11118_v12, %s8432_s21  ;;  %v4305_v36 = vrot.slane %v4283_v52, %v4274_v60  ;;  %v11128_v9 = vrot.slane %v4347_v37, %v11115_v30  ;;  %v11150_v20 = vrot.slane %v4291_v55, %v11115_v30  ;;  %v11161_v29 = vrot.slane %v4362_v2, %v11115_v30 }
 0x805   : > { %13283 = vst [vmem:[#allocation6_spill] sm:$0xff] %v11121_v10  ;;  %v4365_v40 = vcombine.high %v4361_v31, %v4361_v31  ;;  %4528 = vrot.lane.b32.xlu1 %v11121_v10, %s8432_s21  ;;  %v4312_v16 = vrot.slane %v4284_v28, %v4274_v60  ;;  %v4314_v41 = vcombine.high %v4298_v19, %v4298_v19 }
 0x806   : > { %13284 = vst [vmem:[#allocation5_spill] sm:$0xff] %v11128_v9  ;;  %v4315_v53 = vcombine.high %v4305_v36, %v4305_v36  ;;  %13290 = vst [vmem:[#allocation12_spill] sm:$0xff] %v11150_v20  ;;  %v11172_v8 = vrot.slane %v4361_v31, %v11115_v30  ;;  %v4313_v22 = vcombine.high %v4291_v55, %v4291_v55 }
 0x807   : > { %v11131_v49 = vrot.slane %v4365_v40, %v11115_v30  ;;  %v4316_v32 = vcombine.high %v4312_v16, %v4312_v16  ;;  %v11136_v51 = vrot.slane %v4312_v16, %v11115_v30  ;;  %v11139_v4 = vrot.slane %v4314_v41, %v11115_v30  ;;  %13291 = vst [vmem:[#allocation9_spill] sm:$0xff] %v11161_v29 }
 0x808   : > { %4638 = vrot.lane.b32.xlu0 %v11118_v12, %s8433_s2  ;;  %v11144_v38 = vrot.slane %v4315_v53, %v11115_v30  ;;  %13292 = vst [vmem:[#allocation11_spill] sm:$0xff] %v11172_v8  ;;  %v11179_v39 = vrot.slane %v4313_v22, %v11115_v30  ;;  %v11186_v58 = vrot.slane %v4305_v36, %v11115_v30 }
 0x809   : > { %13285 = vst [vmem:[#allocation14_spill] sm:$0xff] %v11131_v49  ;;  %13286 = vst [vmem:[#allocation10_spill] sm:$0xff] %v11136_v51  ;;  %4534 = vrot.lane.b32.xlu1 %v11128_v9, %s8432_s21  ;;  %v11147_v47 = vrot.slane %v4316_v32, %v11115_v30  ;;  %v4364_v15 = vcombine.high %v4354_v45, %v4354_v45  ;;  %v11193_v3 = vrot.slane %v4298_v19, %v11115_v30 }
 0x80a   : > { %13287 = vst [vmem:[#allocation13_spill] sm:$0xff] %v11139_v4  ;;  %13288 = vst [vmem:[#allocation8_spill] sm:$0xff] %v11144_v38  ;;  %v4363_v25 = vcombine.high %v4347_v37, %v4347_v37  ;;  %v4454_v21 = vmul.f32 %v11118_v12, %v10752_v43  ;;  %v4446_v24 = vmul.f32 %v11150_v20, %v10709_v1 }
 0x80b   : > { %13289 = vst [vmem:[#allocation4_spill] sm:$0xff] %v11147_v47  ;;  %13293 = vst [vmem:[#allocation15_spill] sm:$0xff] %v11179_v39  ;;  %v11198_v60 = vrot.slane %v4364_v15, %v11115_v30  ;;  %v4448_v57 = vmul.f32 %v11179_v39, %v10715_v13  ;;  %v4450_v34 = vmul.f32 %v11193_v3, %v10727_v17 }
 0x80c   : > { %4750 = vrot.lane.b32.xlu0 %v11118_v12, %s8434_s25  ;;  %13294 = vst [vmem:[#allocation16_spill] sm:$0xff] %v11186_v58  ;;  %13295 = vst [vmem:[#allocation17_spill] sm:$0xff] %v11193_v3  ;;  %v11203_v59 = vrot.slane %v4363_v25, %v11115_v30  ;;  %v4486_v23 = vsel %vm3127_vm2, %v4454_v21, 0.0  ;;  %v4462_v62 = vsel %vm3127_vm2, %v4446_v24, 0.0  ;;  %v4456_v61 = vmul.f32 %v11161_v29, %v10768_v14 }
 0x80d   : > { %4734 = vrot.lane.b32.xlu1 %v11150_v20, %s8434_s25  ;;  %13296 = vst [vmem:[#allocation18_spill] sm:$0xff] %v11198_v60  ;;  %v4468_v30 = vsel %vm3127_vm2, %v4448_v57, 0.0  ;;  %v4474_v0 = vsel %vm3127_vm2, %v4450_v34, 0.0  ;;  %v4457_v27 = vmul.f32 %v11198_v60, %v10770_v54  ;;  %v4455_v44 = vmul.f32 %v11121_v10, %v10754_v56 }
 0x80e   : > { %13297 = vst [vmem:[#allocation19_spill] sm:$0xff] %v11203_v59  ;;  %v4460_v35 = vmul.f32 %v11203_v59, %v10793_v50  ;;  %v4492_v45 = vsel %vm3127_vm2, %v4456_v61, 0.0  ;;  %v4458_v31 = vmul.f32 %v11128_v9, %v10778_v46  ;;  %v4449_v25 = vmul.f32 %v11144_v38, %v10729_v18 }
 0x80f   : > { %v4495_v6 = vsel %vm3127_vm2, %v4457_v27, 0.0  ;;  %v4489_v37 = vsel %vm3127_vm2, %v4455_v44, 0.0  ;;  %v4452_v34 = vmul.f32 %v11139_v4, %v10742_v42  ;;  %v4461_v61 = vmul.f32 %v11131_v49, %v10795_v33 }
 0x810   : > { %4510 = vrot.lane.b32.xlu0 %v11150_v20, %s8432_s21  ;;  %v4504_v52 = vsel %vm3127_vm2, %v4460_v35, 0.0  ;;  %v4498_v28 = vsel %vm3127_vm2, %v4458_v31, 0.0  ;;  %v4471_v24 = vsel %vm3127_vm2, %v4449_v25, 0.0 }
 0x811   : > { %4640 = vrot.lane.b32.xlu1 %v11121_v10, %s8433_s2  ;;  %v4480_v27 = vsel %vm3127_vm2, %v4452_v34, 0.0  ;;  %v4507_v44 = vsel %vm3127_vm2, %v4461_v61, 0.0 }
 0x814   : > { %4530 = vrot.lane.b32.xlu0 %v11161_v29, %s8432_s21 }
 0x815   : > { %4754 = vrot.lane.b32.xlu1 %v11161_v29, %s8434_s25 }
 0x818   : > { %4622 = vrot.lane.b32.xlu0 %v11150_v20, %s8433_s2 }
 0x819   : > { %4758 = vrot.lane.b32.xlu1 %v11128_v9, %s8434_s25 }
 0x81c   : > { %4642 = vrot.lane.b32.xlu0 %v11161_v29, %s8433_s2 }
 0x81d   : > { %4536 = vrot.lane.b32.xlu1 %v11172_v8, %s8432_s21 }
 0x820   : > { %4646 = vrot.lane.b32.xlu0 %v11128_v9, %s8433_s2 }
 0x821   : > { %4738 = vrot.lane.b32.xlu1 %v11179_v39, %s8434_s25 }
 0x824   : > { %4752 = vrot.lane.b32.xlu0 %v11121_v10, %s8434_s25 }
 0x825   : > { %4736 = vrot.lane.b32.xlu1 %v11186_v58, %s8434_s25 }
 0x829   : > { %4742 = vrot.lane.b32.xlu1 %v11193_v3, %s8434_s25 }
 0x82d   : > { %4756 = vrot.lane.b32.xlu1 %v11198_v60, %s8434_s25 }
 0x831   : > { %4650 = vrot.lane.b32.xlu1 %v11203_v59, %s8433_s2 }
 0x843   : > { %4487 = vadd.xlane.f32.xlu0 %v4486_v23 }
 0x855   : > { %4463 = vadd.xlane.f32.xlu1 %v4462_v62  ;;  %v4451_v62 = vmul.f32 %v11136_v51, %v10736_v5 }
 0x859   : > { %4514 = vrot.lane.b32.xlu0 %v11179_v39, %s8432_s21 }
 0x85d   : > { %4512 = vrot.lane.b32.xlu0 %v11186_v58, %s8432_s21 }
 0x861   : > { %4518 = vrot.lane.b32.xlu0 %v11193_v3, %s8432_s21 }
 0x865   : > { %4532 = vrot.lane.b32.xlu0 %v11198_v60, %s8432_s21 }
 0x866   : > { %4628 = vrot.lane.b32.xlu1 %v11144_v38, %s8433_s2 }
 0x869   : > { %4626 = vrot.lane.b32.xlu0 %v11179_v39, %s8433_s2 }
 0x86a   : > { %4632 = vrot.lane.b32.xlu1 %v11136_v51, %s8433_s2 }
 0x86d   : > { %4624 = vrot.lane.b32.xlu0 %v11186_v58, %s8433_s2 }
 0x86e   : > { %4634 = vrot.lane.b32.xlu1 %v11139_v4, %s8433_s2 }
 0x871   : > { %4630 = vrot.lane.b32.xlu0 %v11193_v3, %s8433_s2 }
 0x872   : > { %4746 = vrot.lane.b32.xlu1 %v11139_v4, %s8434_s25 }
 0x875   : > { %4644 = vrot.lane.b32.xlu0 %v11198_v60, %s8433_s2 }
 0x876   : > { %4764 = vrot.lane.b32.xlu1 %v11131_v49, %s8434_s25  ;;  %v4527_v19 = vpop.permute.xlu0 %4526 }
 0x877   : > { %v4529_v55 = vpop.permute.xlu1 %4528 }
 0x878   : > { %v4567_v34 = vmul.f32 %v4529_v55, %v10754_v56 }
 0x879   : > { %4538 = vrot.lane.b32.xlu0 %v11203_v59, %s8432_s21 }
 0x87a   : > { %v11268_v40 = vpop.permute.xlu0 %4638 }
 0x87b   : > { %v11286_v32 = vpop.permute.xlu1 %4534 }
 0x87d   : > { %4648 = vrot.lane.b32.xlu0 %v11172_v8, %s8433_s2 }
 0x87e   : > { %v4751_v36 = vpop.permute.xlu0 %4750 }
 0x87f   : > { %v11292_v22 = vpop.permute.xlu1 %4734 }
 0x881   : > { %4760 = vrot.lane.b32.xlu0 %v11172_v8, %s8434_s25 }
 0x882   : > { %v11274_v16 = vpop.permute.xlu0 %4510 }
 0x883   : > { %v11298_v21 = vpop.permute.xlu1 %4640 }
 0x885   : > { %4762 = vrot.lane.b32.xlu0 %v11203_v59, %s8434_s25 }
 0x886   : > { %v4531_v41 = vpop.permute.xlu0 %4530 }
 0x887   : > { %v4568_v25 = vmul.f32 %v4531_v41, %v10768_v14  ;;  %v4459_v41 = vmul.f32 %v11172_v8, %v10780_v26 }
 0x889   : > { %v4501_v55 = vsel %vm3127_vm2, %v4459_v41, 0.0 }
 0x88a   : > { %v11282_v53 = vpop.permute.xlu0 %4622 }
 0x88e   : > { %v4643_v2 = vpop.permute.xlu0 %4642 }
 0x892   : > { %v4647_v15 = vpop.permute.xlu0 %4646 }
 0x896   : > { %v11300_v23 = vpop.permute.xlu0 %4752 }
 0x89a   : > { %4469 = vadd.xlane.f32.xlu1 %v4468_v30  ;;  %v4477_v30 = vsel %vm3127_vm2, %v4451_v62, 0.0 }
 0x89e   : > { %4475 = vadd.xlane.f32.xlu1 %v4474_v0  ;;  %v11310_v0 = vpop.permute.xlu1 %4754 }
 0x8a2   : > { %4496 = vadd.xlane.f32.xlu1 %v4495_v6  ;;  %v4759_v35 = vpop.permute.xlu1 %4758 }
 0x8a4   : > { %4493 = vadd.xlane.f32.xlu0 %v4492_v45  ;;  %v4566_v45 = vmul.f32 %v4527_v19, %v10752_v43  ;;  %v4447_v19 = vmul.f32 %v11186_v58, %v10720_v7 }
 0x8a6   : > { %4505 = vadd.xlane.f32.xlu1 %v4504_v52  ;;  %v4598_v31 = vsel %vm3127_vm2, %v4566_v45, 0.0  ;;  %v4680_v45 = vmul.f32 %v4643_v2, %v10768_v14 }
 0x8a8   : > { %4490 = vadd.xlane.f32.xlu0 %v4489_v37  ;;  %v4790_v37 = vmul.f32 %v4751_v36, %v10752_v43  ;;  %v4604_v36 = vsel %vm3127_vm2, %v4568_v25, 0.0  ;;  %v4716_v25 = vsel %vm3127_vm2, %v4680_v45, 0.0 }
 0x8ac   : > { %4499 = vadd.xlane.f32.xlu0 %v4498_v28  ;;  %v11321_v28 = vpop.permute.xlu1 %4536 }
 0x8b7   : > { %4524 = vrot.lane.b32.xlu1 %v11147_v47, %s8432_s21 }
 0x8bb   : > { %4748 = vrot.lane.b32.xlu1 %v11147_v47, %s8434_s25 }
 0x8c2   : > { %4516 = vrot.lane.b32.xlu0 %v11144_v38, %s8432_s21 }
 0x8c6   : > { %4520 = vrot.lane.b32.xlu0 %v11136_v51, %s8432_s21 }
 0x8ca   : > { %4522 = vrot.lane.b32.xlu0 %v11139_v4, %s8432_s21 }
 0x8cc   : > { %v11305_v57 = vpop.xlane.xlu0 %4487 }
 0x8ce   : > { %4740 = vrot.lane.b32.xlu0 %v11144_v38, %s8434_s25 }
 0x8d0   : > { %v11315_v6 = vpop.permute.xlu0 %4514 }
 0x8d2   : > { %4540 = vrot.lane.b32.xlu0 %v11131_v49, %s8432_s21 }
 0x8d4   : > { %v4513_v52 = vpop.permute.xlu0 %4512 }
 0x8d6   : > { %4744 = vrot.lane.b32.xlu0 %v11136_v51, %s8434_s25 }
 0x8d8   : > { %v11325_v62 = vpop.permute.xlu0 %4518 }
 0x8da   : > { %4652 = vrot.lane.b32.xlu0 %v11131_v49, %s8433_s2 }
 0x8dc   : > { %v11336_v61 = vpop.permute.xlu0 %4532 }
 0x8df   : > { %4472 = vadd.xlane.f32.xlu1 %v4471_v24  ;;  %v4822_v24 = vsel %vm3127_vm2, %v4790_v37, 0.0 }
 0x8e3   : > { %4478 = vadd.xlane.f32.xlu1 %v4477_v30  ;;  %v11329_v30 = vpop.permute.xlu1 %4738 }
 0x8e7   : > { %4481 = vadd.xlane.f32.xlu1 %v4480_v27  ;;  %v4465_v27 = vsel %vm3127_vm2, %v4447_v19, 0.0  ;;  %v11340_v37 = vpop.permute.xlu1 %4736 }
 0x8eb   : > { %4508 = vadd.xlane.f32.xlu1 %v4507_v44  ;;  %v4601_v44 = vsel %vm3127_vm2, %v4567_v34, 0.0  ;;  %v4743_v19 = vpop.permute.xlu1 %4742  ;;  %v4559_v34 = vmul.f32 %v4513_v52, %v10720_v7 }
 0x8ef   : > { %4599 = vadd.xlane.f32.xlu1 %v4598_v31  ;;  %v4682_v31 = vmul.f32 %v4647_v15, %v10778_v46  ;;  %v4757_v48 = vpop.permute.xlu1 %4756  ;;  %v4577_v15 = vsel %vm3127_vm2, %v4559_v34, 0.0 }
 0x8f3   : > { %4823 = vadd.xlane.f32.xlu1 %v4822_v24  ;;  %v4627_v24 = vpop.permute.xlu0 %4626 }
 0x8f4   : > { %v4672_v41 = vmul.f32 %v4627_v24, %v10715_v13 }
 0x8f7   : > { %4605 = vadd.xlane.f32.xlu1 %v4604_v36  ;;  %v4794_v36 = vmul.f32 %v4759_v35, %v10778_v46  ;;  %v4625_v2 = vpop.permute.xlu0 %4624  ;;  %v4692_v35 = vsel %vm3127_vm2, %v4672_v41, 0.0 }
 0x8f9   : > { %4466 = vadd.xlane.f32.xlu0 %v4465_v27  ;;  %v4722_v27 = vsel %vm3127_vm2, %v4682_v31, 0.0 }
 0x8fb   : > { %4602 = vadd.xlane.f32.xlu1 %v4601_v44  ;;  %v4834_v44 = vsel %vm3127_vm2, %v4794_v36, 0.0  ;;  %v4631_v45 = vpop.permute.xlu0 %4630 }
 0x8fc   : > { %v4674_v52 = vmul.f32 %v4631_v45, %v10727_v17 }
 0x8fd   : > { %4502 = vadd.xlane.f32.xlu0 %v4501_v55  ;;  %v4651_v55 = vpop.permute.xlu1 %4650 }
 0x8fe   : > { %v4698_v34 = vsel %vm3127_vm2, %v4674_v52, 0.0 }
 0x8ff   : > { %4717 = vadd.xlane.f32.xlu1 %v4716_v25  ;;  %v4671_v25 = vmul.f32 %v4625_v2, %v10720_v7 }
 0x901   : > { %v11353_v31 = vpop.xlane.xlu1 %4463  ;;  %v4689_v36 = vsel %vm3127_vm2, %v4671_v25, 0.0 }
 0x903   : > { %4723 = vadd.xlane.f32.xlu1 %v4722_v27  ;;  %v4645_v27 = vpop.permute.xlu0 %4644 }
 0x904   : > { %v4681_v24 = vmul.f32 %v4645_v27, %v10770_v54  ;;  %v4793_v27 = vmul.f32 %v4757_v48, %v10770_v54  ;;  %v4453_v48 = vmul.f32 %v11147_v47, %v10744_v11 }
 0x907   : > { %4835 = vadd.xlane.f32.xlu1 %v4834_v44  ;;  %v11361_v44 = vpop.permute.xlu1 %4628  ;;  %v4539_v2 = vpop.permute.xlu0 %4538 }
 0x908   : > { %v4572_v41 = vmul.f32 %v4539_v2, %v10793_v50  ;;  %v4831_v2 = vsel %vm3127_vm2, %v4793_v27, 0.0 }
 0x90b   : > { %4578 = vadd.xlane.f32.xlu1 %v4577_v15  ;;  %v4719_v15 = vsel %vm3127_vm2, %v4681_v24, 0.0  ;;  %v11365_v45 = vpop.permute.xlu1 %4632  ;;  %v11367_v25 = vpop.permute.xlu0 %4648  ;;  %v4684_v24 = vmul.f32 %v4651_v55, %v10793_v50  ;;  %v4483_v55 = vsel %vm3127_vm2, %v4453_v48, 0.0  ;;  %v4570_v48 = vmul.f32 %v11286_v32, %v10778_v46 }
 0x90f   : > { %4693 = vadd.xlane.f32.xlu1 %v4692_v35  ;;  %v4786_v35 = vmul.f32 %v4743_v19, %v10727_v17  ;;  %v4635_v63 = vpop.permute.xlu1 %4634  ;;  %v4728_v19 = vsel %vm3127_vm2, %v4684_v24, 0.0  ;;  %v4558_v24 = vmul.f32 %v11274_v16, %v10709_v1 }
 0x911   : > { %v4810_v52 = vsel %vm3127_vm2, %v4786_v35, 0.0 }
 0x913   : > { %4636 = vrot.lane.b32.xlu0 %v11147_v47, %s8433_s2  ;;  %4690 = vadd.xlane.f32.xlu1 %v4689_v36  ;;  %v4616_v36 = vsel %vm3127_vm2, %v4572_v41, 0.0  ;;  %v4670_v47 = vmul.f32 %v11282_v53, %v10709_v1 }
 0x915   : > { %v4686_v16 = vsel %vm3127_vm2, %v4670_v47, 0.0  ;;  %v4679_v47 = vmul.f32 %v11298_v21, %v10754_v56 }
 0x917   : > { %4699 = vadd.xlane.f32.xlu1 %v4698_v34  ;;  %v11373_v34 = vpop.permute.xlu0 %4760 }
 0x91b   : > { %4720 = vadd.xlane.f32.xlu1 %v4719_v15  ;;  %v4747_v15 = vpop.permute.xlu1 %4746  ;;  %v11377_v49 = vpop.permute.xlu0 %4762 }
 0x91f   : > { %4617 = vadd.xlane.f32.xlu1 %v4616_v36  ;;  %v4765_v35 = vpop.permute.xlu1 %4764  ;;  %v4678_v36 = vmul.f32 %v11268_v40, %v10752_v43  ;;  %v4574_v40 = vsel %vm3127_vm2, %v4558_v24, 0.0  ;;  %v4610_v24 = vsel %vm3127_vm2, %v4570_v48, 0.0 }
 0x923   : > { %4811 = vadd.xlane.f32.xlu1 %v4810_v52  ;;  %v11389_v27 = vpop.xlane.xlu1 %4469 }
 0x927   : > { %4832 = vadd.xlane.f32.xlu1 %v4831_v2  ;;  %v11398_v4 = vpop.xlane.xlu1 %4475 }
 0x92b   : > { %4729 = vadd.xlane.f32.xlu1 %v4728_v19  ;;  %v4710_v19 = vsel %vm3127_vm2, %v4678_v36, 0.0  ;;  %v11407_v36 = vpop.xlane.xlu1 %4496 }
 0x92d   : > { %v11380_v41 = vpop.xlane.xlu0 %4493 }
 0x92f   : > { %v11417_v32 = vpop.xlane.xlu1 %4505 }
 0x931   : > { %v11386_v52 = vpop.xlane.xlu0 %4490 }
 0x932   : > { %4484 = vadd.xlane.f32.xlu0 %v4483_v55 }
 0x933   : > { %v11426_v21 = vpop.permute.xlu1 %4524 }
 0x935   : > { %v11393_v2 = vpop.xlane.xlu0 %4499 }
 0x936   : > { %4711 = vadd.xlane.f32.xlu0 %v4710_v19  ;;  %v4782_v19 = vmul.f32 %v11292_v22, %v10709_v1  ;;  %v4676_v22 = vmul.f32 %v4635_v63, %v10742_v42 }
 0x939   : > { %v11400_v43 = vpop.permute.xlu0 %4516 }
 0x93a   : > { %4575 = vadd.xlane.f32.xlu0 %v4574_v40 }
 0x93d   : > { %v4521_v55 = vpop.permute.xlu0 %4520 }
 0x93e   : > { %v4563_v51 = vmul.f32 %v4521_v55, %v10736_v5  ;;  %4687 = vadd.xlane.f32.xlu0 %v4686_v16  ;;  %v4713_v16 = vsel %vm3127_vm2, %v4679_v47, 0.0 }
 0x940   : > { %v4589_v53 = vsel %vm3127_vm2, %v4563_v51, 0.0  ;;  %v4798_v51 = vsel %vm3127_vm2, %v4782_v19, 0.0  ;;  %v4704_v19 = vsel %vm3127_vm2, %v4676_v22, 0.0  ;;  %v4783_v22 = vmul.f32 %v11340_v37, %v10720_v7 }
 0x941   : > { %v4523_v38 = vpop.permute.xlu0 %4522  ;;  %4590 = vadd.xlane.f32.xlu1 %v4589_v53  ;;  %v4788_v53 = vmul.f32 %v4747_v15, %v10742_v42  ;;  %v4796_v37 = vmul.f32 %v11377_v49, %v10793_v50  ;;  %v4675_v49 = vmul.f32 %v11365_v45, %v10736_v5 }
 0x942   : > { %v4564_v40 = vmul.f32 %v4523_v38, %v10742_v42  ;;  %4611 = vadd.xlane.f32.xlu0 %v4610_v24  ;;  %v4792_v38 = vmul.f32 %v11310_v0, %v10768_v14  ;;  %v4791_v24 = vmul.f32 %v11300_v23, %v10754_v56  ;;  %v4560_v0 = vmul.f32 %v11315_v6, %v10715_v13 }
 0x943   : > { %v4816_v14 = vsel %vm3127_vm2, %v4788_v53, 0.0  ;;  %v4562_v23 = vmul.f32 %v11325_v62, %v10727_v17  ;;  %v4569_v6 = vmul.f32 %v11336_v61, %v10770_v54  ;;  %v4784_v17 = vmul.f32 %v11329_v30, %v10715_v13 }
 0x944   : > { %v4592_v46 = vsel %vm3127_vm2, %v4564_v40, 0.0  ;;  %v4828_v63 = vsel %vm3127_vm2, %v4792_v38, 0.0  ;;  %v4797_v40 = vmul.f32 %v4765_v35, %v10795_v33  ;;  %v4825_v42 = vsel %vm3127_vm2, %v4791_v24, 0.0 }
 0x945   : > { %v4741_v55 = vpop.permute.xlu0 %4740  ;;  %4593 = vadd.xlane.f32.xlu1 %v4592_v46  ;;  %v4749_v46 = vpop.permute.xlu1 %4748  ;;  %v4580_v35 = vsel %vm3127_vm2, %v4560_v0, 0.0  ;;  %v4804_v54 = vsel %vm3127_vm2, %v4784_v17, 0.0  ;;  %v4795_v13 = vmul.f32 %v11373_v34, %v10780_v26  ;;  %v4840_v24 = vsel %vm3127_vm2, %v4796_v37, 0.0 }
 0x946   : > { %v4785_v1 = vmul.f32 %v4741_v55, %v10729_v18  ;;  %4799 = vadd.xlane.f32.xlu0 %v4798_v51  ;;  %v4789_v15 = vmul.f32 %v4749_v46, %v10744_v11  ;;  %v4843_v56 = vsel %vm3127_vm2, %v4797_v40, 0.0  ;;  %v4586_v55 = vsel %vm3127_vm2, %v4562_v23, 0.0 }
 0x947   : > { %v4571_v51 = vmul.f32 %v11321_v28, %v10780_v26  ;;  %v4683_v28 = vmul.f32 %v11367_v25, %v10780_v26 }
 0x948   : > { %v4807_v48 = vsel %vm3127_vm2, %v4785_v1, 0.0  ;;  %v4819_v47 = vsel %vm3127_vm2, %v4789_v15, 0.0  ;;  %v4607_v1 = vsel %vm3127_vm2, %v4569_v6, 0.0 }
 0x949   : > { %4808 = vadd.xlane.f32.xlu1 %v4807_v48  ;;  %v4613_v62 = vsel %vm3127_vm2, %v4571_v51, 0.0  ;;  %v4801_v48 = vsel %vm3127_vm2, %v4783_v22, 0.0  ;;  %v4725_v30 = vsel %vm3127_vm2, %v4683_v28, 0.0  ;;  %v4541_v53 = vpop.permute.xlu0 %4540 }
 0x94a   : > { %4714 = vadd.xlane.f32.xlu0 %v4713_v16  ;;  %v4837_v16 = vsel %vm3127_vm2, %v4795_v13, 0.0  ;;  %v4573_v46 = vmul.f32 %v4541_v53, %v10795_v33 }
 0x94d   : > { %4705 = vadd.xlane.f32.xlu1 %v4704_v19  ;;  %v4561_v19 = vmul.f32 %v11400_v43, %v10729_v18  ;;  %v4745_v26 = vpop.permute.xlu0 %4744 }
 0x94e   : > { %4829 = vadd.xlane.f32.xlu0 %v4828_v63  ;;  %v4673_v63 = vmul.f32 %v11361_v44, %v10729_v18  ;;  %v4787_v44 = vmul.f32 %v4745_v26, %v10736_v5 }
 0x94f   : > { %v4583_v40 = vsel %vm3127_vm2, %v4561_v19, 0.0 }
 0x951   : > { %4817 = vadd.xlane.f32.xlu1 %v4816_v14  ;;  %v4695_v14 = vsel %vm3127_vm2, %v4673_v63, 0.0  ;;  %v4653_v0 = vpop.permute.xlu0 %4652 }
 0x952   : > { %4826 = vadd.xlane.f32.xlu0 %v4825_v42  ;;  %v4701_v42 = vsel %vm3127_vm2, %v4675_v49, 0.0 }
 0x955   : > { %4844 = vadd.xlane.f32.xlu1 %v4843_v56  ;;  %v4619_v56 = vsel %vm3127_vm2, %v4573_v46, 0.0 }
 0x956   : > { %4581 = vadd.xlane.f32.xlu0 %v4580_v35  ;;  %v4685_v35 = vmul.f32 %v4653_v0, %v10795_v33 }
 0x958   : > { %v4731_v51 = vsel %vm3127_vm2, %v4685_v35, 0.0 }
 0x959   : > { %4820 = vadd.xlane.f32.xlu1 %v4819_v47  ;;  %v4813_v47 = vsel %vm3127_vm2, %v4787_v44, 0.0 }
 0x95a   : > { %4587 = vadd.xlane.f32.xlu0 %v4586_v55  ;;  %v4565_v55 = vmul.f32 %v11426_v21, %v10744_v11 }
 0x95e   : > { %4608 = vadd.xlane.f32.xlu0 %v4607_v1 }
 0x962   : > { %4614 = vadd.xlane.f32.xlu0 %v4613_v62  ;;  %v4595_v62 = vsel %vm3127_vm2, %v4565_v55, 0.0 }
 0x966   : > { %4805 = vadd.xlane.f32.xlu0 %v4804_v54 }
 0x968   : > { %v11456_v61 = vpop.xlane.xlu1 %4472 }
 0x96a   : > { %4802 = vadd.xlane.f32.xlu0 %v4801_v48 }
 0x96c   : > { %v11461_v38 = vpop.xlane.xlu1 %4478 }
 0x96e   : > { %4726 = vadd.xlane.f32.xlu0 %v4725_v30 }
 0x970   : > { %v11466_v7 = vpop.xlane.xlu1 %4481 }
 0x972   : > { %4838 = vadd.xlane.f32.xlu0 %v4837_v16 }
 0x974   : > { %v11471_v25 = vpop.xlane.xlu1 %4508 }
 0x976   : > { %4841 = vadd.xlane.f32.xlu0 %v4840_v24 }
 0x978   : > { %v4600_v34 = vpop.xlane.xlu1 %4599 }
 0x979   : > { %v4854_v37 = vadd.f32 %v4600_v34, %v11305_v57 }
 0x97a   : > { %4584 = vadd.xlane.f32.xlu0 %v4583_v40 }
 0x97c   : > { %v4824_v50 = vpop.xlane.xlu1 %4823 }
 0x97e   : > { %4696 = vadd.xlane.f32.xlu0 %v4695_v14 }
 0x980   : > { %v11482_v43 = vpop.xlane.xlu1 %4605 }
 0x982   : > { %v11486_v15 = vpop.xlane.xlu0 %4466  ;;  %4702 = vadd.xlane.f32.xlu0 %v4701_v42 }
 0x984   : > { %v11488_v18 = vpop.xlane.xlu1 %4602 }
 0x986   : > { %4620 = vadd.xlane.f32.xlu0 %v4619_v56  ;;  %v11492_v45 = vpop.xlane.xlu0 %4502 }
 0x988   : > { %v11494_v23 = vpop.xlane.xlu1 %4717 }
 0x98a   : > { %4814 = vadd.xlane.f32.xlu0 %v4813_v47  ;;  %v4637_v1 = vpop.permute.xlu0 %4636 }
 0x98b   : > { %v4677_v17 = vmul.f32 %v4637_v1, %v10744_v11 }
 0x98c   : > { %v4724_v6 = vpop.xlane.xlu1 %4723 }
 0x98d   : > { %v4707_v22 = vsel %vm3127_vm2, %v4677_v17, 0.0 }
 0x98e   : > { %4732 = vadd.xlane.f32.xlu0 %v4731_v51 }
 0x990   : > { %v4836_v5 = vpop.xlane.xlu1 %4835 }
 0x992   : > { %4596 = vadd.xlane.f32.xlu0 %v4595_v62 }
 0x994   : > { %v11504_v33 = vpop.xlane.xlu1 %4578 }
 0x996   : > { %4708 = vadd.xlane.f32.xlu0 %v4707_v22 }
 0x998   : > { %v11506_v54 = vpop.xlane.xlu1 %4693 }
 0x99c   : > { %v11508_v28 = vpop.xlane.xlu1 %4690 }
 0x9a0   : > { %v11510_v21 = vpop.xlane.xlu1 %4699 }
 0x9a4   : > { %v11512_v48 = vpop.xlane.xlu1 %4720 }
 0x9a8   : > { %v11514_v13 = vpop.xlane.xlu1 %4617 }
 0x9ac   : > { %v11516_v30 = vpop.xlane.xlu1 %4811 }
 0x9b0   : > { %v11521_v53 = vpop.xlane.xlu1 %4832 }
 0x9b4   : > { %v11523_v40 = vpop.xlane.xlu1 %4729 }
 0x9bb   : > { %v11518_v11 = vpop.xlane.xlu0 %4484 }
 0x9bc   : > { %13298 = vst [vmem:[#allocation20_spill] sm:$0xff] %v11518_v11 }
 0x9bf   : > { %v4712_v16 = vpop.xlane.xlu0 %4711 }
 0x9c0   : > { %v4870_v19 = vadd.f32 %v4854_v37, %v4712_v16 }
 0x9c2   : > { %v4886_v24 = vadd.f32 %v4870_v19, %v4824_v50 }
 0x9c3   : > { %v4576_v26 = vpop.xlane.xlu0 %4575 }
 0x9c4   : > { %v4902_v63 = vmul.f32 0.25, %v4886_v24  ;;  %v4846_v1 = vadd.f32 %v4576_v26, %v11353_v31 }
 0x9c6   : > { %v11526_v49 = vsub.f32 %v11305_v57, %v4902_v63  ;;  %v11528_v14 = vsub.f32 %v4600_v34, %v4902_v63  ;;  %v11530_v0 = vsub.f32 %v4712_v16, %v4902_v63  ;;  %v11536_v56 = vsub.f32 %v4824_v50, %v4902_v63 }
 0x9c7   : > { %v4688_v46 = vpop.xlane.xlu0 %4687 }
 0x9c8   : > { %v4934_v42 = vmul.f32 %v11526_v49, %v11526_v49  ;;  %v4966_v44 = vmul.f32 %v11528_v14, %v11528_v14  ;;  %v5014_v47 = vmul.f32 %v11530_v0, %v11530_v0  ;;  %v5062_v51 = vmul.f32 %v11536_v56, %v11536_v56 }
 0x9c9   : > { %v4862_v22 = vadd.f32 %v4846_v1, %v4688_v46  ;;  %v4856_v1 = vadd.f32 %v11482_v43, %v11380_v41 }
 0x9ca   : > { %v4982_v35 = vadd.f32 %v4966_v44, %v4934_v42  ;;  %v11540_v55 = vpop.xlane.xlu1 %4590 }
 0x9cb   : > { %v4612_v57 = vpop.xlane.xlu0 %4611 }
 0x9cc   : > { %v5030_v34 = vadd.f32 %v5014_v47, %v4982_v35  ;;  %v4858_v17 = vadd.f32 %v4612_v57, %v11393_v2 }
 0x9ce   : > { %v5078_v62 = vadd.f32 %v5062_v51, %v5030_v34  ;;  %v4874_v37 = vadd.f32 %v4858_v17, %v4724_v6  ;;  %v11546_v50 = vpop.xlane.xlu1 %4593 }
 0x9cf   : > { %v4800_v16 = vpop.xlane.xlu0 %4799 }
 0x9d0   : > { %v5094_v19 = vmul.f32 0.25, %v5078_v62  ;;  %v4890_v24 = vadd.f32 %v4874_v37, %v4836_v5  ;;  %v4878_v63 = vadd.f32 %v4862_v22, %v4800_v16  ;;  %v4872_v37 = vadd.f32 %v4856_v1, %v11494_v23 }
 0x9d2   : > { %v5110_v42 = vadd.f32 1e-05, %v5094_v19  ;;  %v4906_v44 = vmul.f32 0.25, %v4890_v24  ;;  %v4894_v8 = vmul.f32 0.25, %v4878_v63  ;;  %v11557_v51 = vpop.xlane.xlu1 %4808  ;;  %v4855_v24 = vadd.f32 %v11488_v18, %v11386_v52 }
 0x9d3   : > { %v11548_v35 = vpop.xlane.xlu0 %4714 }
 0x9d4   : > { %8344 = vrsqrt.f32 %v5110_v42  ;;  %v11551_v47 = vsub.f32 %v11393_v2, %v4906_v44  ;;  %v11553_v59 = vsub.f32 %v4612_v57, %v4906_v44  ;;  %v11555_v34 = vsub.f32 %v4724_v6, %v4906_v44 }
 0x9d5   : > { %v11562_v17 = vsub.f32 %v11353_v31, %v4894_v8  ;;  %v11564_v62 = vsub.f32 %v4576_v26, %v4894_v8  ;;  %v11566_v22 = vsub.f32 %v4688_v46, %v4894_v8  ;;  %v11572_v6 = vsub.f32 %v4836_v5, %v4906_v44 }
 0x9d6   : > { %v4938_v2 = vmul.f32 %v11551_v47, %v11551_v47  ;;  %v4970_v57 = vmul.f32 %v11553_v59, %v11553_v59  ;;  %v11579_v26 = vsub.f32 %v4800_v16, %v4894_v8  ;;  %v5018_v42 = vmul.f32 %v11555_v34, %v11555_v34  ;;  %v11590_v16 = vpop.xlane.xlu1 %4705 }
 0x9d7   : > { %13299 = vst [vmem:[#allocation21_spill] sm:$0xff] %v11562_v17  ;;  %13300 = vst [vmem:[#allocation22_spill] sm:$0xff] %v11572_v6  ;;  %v4926_v19 = vmul.f32 %v11562_v17, %v11562_v17  ;;  %v4958_v31 = vmul.f32 %v11564_v62, %v11564_v62  ;;  %v4830_v46 = vpop.xlane.xlu0 %4829  ;;  %v5006_v44 = vmul.f32 %v11566_v22, %v11566_v22 }
 0x9d8   : > { %v4986_v63 = vadd.f32 %v4970_v57, %v4938_v2  ;;  %v4888_v1 = vadd.f32 %v4872_v37, %v4830_v46  ;;  %v5066_v3 = vmul.f32 %v11572_v6, %v11572_v6  ;;  %v4871_v8 = vadd.f32 %v4855_v24, %v11548_v35 }
 0x9d9   : > { %v4974_v5 = vadd.f32 %v4958_v31, %v4926_v19  ;;  %v5054_v2 = vmul.f32 %v11579_v26, %v11579_v26 }
 0x9da   : > { %v5034_v60 = vadd.f32 %v5018_v42, %v4986_v63  ;;  %v4904_v57 = vmul.f32 0.25, %v4888_v1  ;;  %v4852_v42 = vadd.f32 %v11546_v50, %v11466_v7 }
 0x9db   : > { %v5022_v58 = vadd.f32 %v5006_v44, %v4974_v5  ;;  %v4827_v39 = vpop.xlane.xlu0 %4826 }
 0x9dc   : > { %v5082_v9 = vadd.f32 %v5066_v3, %v5034_v60  ;;  %v4887_v19 = vadd.f32 %v4871_v8, %v4827_v39  ;;  %v11595_v29 = vsub.f32 %v11380_v41, %v4904_v57  ;;  %v11598_v37 = vsub.f32 %v11482_v43, %v4904_v57  ;;  %v11613_v41 = vpop.xlane.xlu1 %4817 }
 0x9dd   : > { %v5070_v31 = vadd.f32 %v5054_v2, %v5022_v58  ;;  %v11601_v63 = vsub.f32 %v11494_v23, %v4904_v57  ;;  %v11609_v3 = vsub.f32 %v4830_v46, %v4904_v57  ;;  %v4868_v8 = vadd.f32 %v4852_v42, %v11590_v16 }
 0x9de   : > { %13301 = vst [vmem:[#allocation23_spill] sm:$0xff] %v11595_v29  ;;  %v5098_v24 = vmul.f32 0.25, %v5082_v9  ;;  %v4936_v44 = vmul.f32 %v11595_v29, %v11595_v29  ;;  %v4968_v58 = vmul.f32 %v11598_v37, %v11598_v37  ;;  %v4903_v43 = vmul.f32 0.25, %v4887_v19  ;;  %v11618_v9 = vld [vmem:[%s13091_s14] ss:$0 sm:$0xff] }
 0x9df   : > { %v5086_v5 = vmul.f32 0.25, %v5070_v31  ;;  %13302 = vst [vmem:[#allocation24_spill] sm:$0xff] %v11609_v3  ;;  %v11611_v60 = vpop.xlane.xlu0 %4581  ;;  %v5016_v31 = vmul.f32 %v11601_v63, %v11601_v63  ;;  %v5064_v19 = vmul.f32 %v11609_v3, %v11609_v3  ;;  %v4884_v20 = vadd.f32 %v4868_v8, %v11613_v41 }
 0x9e0   : > { %v5114_v1 = vadd.f32 1e-05, %v5098_v24  ;;  %v4984_v2 = vadd.f32 %v4968_v58, %v4936_v44  ;;  %v11629_v24 = vsub.f32 %v11386_v52, %v4903_v43  ;;  %v11632_v42 = vsub.f32 %v11488_v18, %v4903_v43 }
 0x9e1   : > { %v8345_v23 = vpop.eup %8344  ;;  %v5102_v57 = vadd.f32 1e-05, %v5086_v5  ;;  %v11640_v44 = vsub.f32 %v11548_v35, %v4903_v43  ;;  %v11646_v8 = vsub.f32 %v4827_v39, %v4903_v43 }
 0x9e2   : > { %v5586_v46 = vmul.f32 %v8345_v23, %v11530_v0  ;;  %v5032_v10 = vadd.f32 %v5016_v31, %v4984_v2  ;;  %13303 = vst [vmem:[#allocation25_spill] sm:$0xff] %v11629_v24  ;;  %v11637_v0 = vld [vmem:[%s13092_s15] ss:$0 sm:$0xff]  ;;  %8346 = vrsqrt.f32 %v5114_v1  ;;  %v4935_v58 = vmul.f32 %v11629_v24, %v11629_v24 }
 0x9e3   : > { %v4588_v12 = vpop.xlane.xlu0 %4587  ;;  %v4967_v52 = vmul.f32 %v11632_v42, %v11632_v42  ;;  %8348 = vrsqrt.f32 %v5102_v57  ;;  %v4900_v2 = vmul.f32 0.25, %v4884_v20  ;;  %v5332_v39 = vmul.f32 %v8345_v23, %v11528_v14 }
 0x9e4   : > { %v5609_v11 = vmul.f32 %v11618_v9, %v5586_v46  ;;  %v5080_v5 = vadd.f32 %v5064_v19, %v5032_v10  ;;  %v4850_v18 = vadd.f32 %v4588_v12, %v11398_v4  ;;  %v5015_v10 = vmul.f32 %v11640_v44, %v11640_v44 }
 0x9e5   : > { %v4983_v1 = vadd.f32 %v4967_v52, %v4935_v58  ;;  %v5840_v43 = vmul.f32 %v8345_v23, %v11536_v56  ;;  %v5063_v20 = vmul.f32 %v11646_v8, %v11646_v8  ;;  %v4847_v58 = vadd.f32 %v11504_v33, %v11486_v15 }
 0x9e6   : > { %v5632_v46 = vadd.f32 %v11637_v0, %v5609_v11  ;;  %v4866_v35 = vadd.f32 %v4850_v18, %v11510_v21  ;;  %v5096_v24 = vmul.f32 0.25, %v5080_v5  ;;  %v4860_v52 = vadd.f32 %v11514_v13, %v11417_v32 }
 0x9e7   : > { %v4609_v31 = vpop.xlane.xlu0 %4608  ;;  %v5031_v17 = vadd.f32 %v5015_v10, %v4983_v1  ;;  %v5355_v5 = vmul.f32 %v11618_v9, %v5332_v39  ;;  %v5863_v56 = vmul.f32 %v11618_v9, %v5840_v43  ;;  %v5142_v10 = vmul.f32 %v8345_v23, %v11526_v49 }
 0x9e8   : > { %v4857_v19 = vadd.f32 %v4609_v31, %v11407_v36  ;;  %v5648_v29 = vmax.f32 %v5632_v46, 0.0  ;;  %v4882_v11 = vadd.f32 %v4866_v35, %v11516_v30  ;;  %v4863_v35 = vadd.f32 %v4847_v58, %v11508_v28 }
 0x9e9   : > { %v5079_v18 = vadd.f32 %v5063_v20, %v5031_v17  ;;  %v5378_v6 = vadd.f32 %v11637_v0, %v5355_v5  ;;  %v11673_v3 = vadd.f32 %v4860_v52, %v11523_v40  ;;  %v11683_v17 = vadd.f32 %v11540_v55, %v11461_v38 }
 0x9ea   : > { %v4873_v57 = vadd.f32 %v4857_v19, %v11512_v48  ;;  %5698 = vperm.xlu0 %8234, %v5648_v29   ;;  %v4898_v46 = vmul.f32 0.25, %v4882_v11  ;;  %v5112_v19 = vadd.f32 1e-05, %v5096_v24  ;;  %v11676_v29 = vsub.f32 %v11466_v7, %v4900_v2 }
 0x9eb   : > { %v11665_v14 = vpop.xlane.xlu0 %4614  ;;  %v5095_v39 = vmul.f32 0.25, %v5079_v18  ;;  %v5394_v24 = vmax.f32 %v5378_v6, 0.0  ;;  %v13186_v20 = vmov 3   ;;  %v11691_v7 = vsub.f32 %v11546_v50, %v4900_v2 }
 0x9ec   : > { %v4889_v1 = vadd.f32 %v4873_v57, %v11521_v53  ;;  %13304 = vst [vmem:[#allocation26_spill] sm:$0xff] %v11676_v29  ;;  %v11679_v43 = vsub.f32 %v11398_v4, %v4898_v46  ;;  %v11685_v49 = vsub.f32 %v4588_v12, %v4898_v46  ;;  %v5886_v4 = vadd.f32 %v11637_v0, %v5863_v56 }
 0x9ed   : > { %13307 = vst [vmem:[#allocation29_spill] sm:$0xff] %v11691_v7  ;;  %v5111_v57 = vadd.f32 1e-05, %v5095_v39  ;;  %v5165_v58 = vmul.f32 %v11618_v9, %v5142_v10  ;;  %8350 = vrsqrt.f32 %v5112_v19  ;;  %v11696_v52 = vsub.f32 %v11590_v16, %v4900_v2  ;;  %5444 = vperm.xlu1 %8236, %v5394_v24  }
 0x9ee   : > { %13305 = vst [vmem:[#allocation27_spill] sm:$0xff] %v11679_v43  ;;  %13306 = vst [vmem:[#allocation28_spill] sm:$0xff] %v11685_v49  ;;  %v4905_v23 = vmul.f32 0.25, %v4889_v1  ;;  %8237 = vset.pattern.permute.xlu0 %v13186_v20  ;;  %v4848_v12 = vadd.f32 %v11611_v60, %v11389_v27  ;;  %v4932_v50 = vmul.f32 %v11676_v29, %v11676_v29 }
 0x9ef   : > { %v11688_v11 = vpop.xlane.xlu0 %4805  ;;  %13308 = vst [vmem:[#allocation30_spill] sm:$0xff] %v11696_v52  ;;  %v11703_v5 = vpop.eup %8346  ;;  %v11708_v56 = vsub.f32 %v11613_v41, %v4900_v2  ;;  %v4930_v18 = vmul.f32 %v11679_v43, %v11679_v43  ;;  %8352 = vrsqrt.f32 %v5111_v57  ;;  %v4962_v1 = vmul.f32 %v11685_v49, %v11685_v49 }
 0x9f0   : > { %v11701_v6 = vsub.f32 %v11407_v36, %v4905_v23  ;;  %v11712_v16 = vsub.f32 %v4609_v31, %v4905_v23  ;;  %v11719_v10 = vsub.f32 %v11512_v48, %v4905_v23  ;;  %v11721_v39 = vpop.eup %8348  ;;  %v11726_v2 = vsub.f32 %v11521_v53, %v4905_v23 }
 0x9f1   : > { %13310 = vst [vmem:[#allocation32_spill] sm:$0xff] %v11708_v56  ;;  %v5902_v31 = vmax.f32 %v5886_v4, 0.0  ;;  %v5188_v24 = vadd.f32 %v11637_v0, %v5165_v58  ;;  %v4964_v57 = vmul.f32 %v11691_v7, %v11691_v7  ;;  %v11732_v20 = vsub.f32 %v11510_v21, %v4898_v46 }
 0x9f2   : > { %13309 = vst [vmem:[#allocation31_spill] sm:$0xff] %v11701_v6  ;;  %v4937_v36 = vmul.f32 %v11701_v6, %v11701_v6  ;;  %13311 = vst [vmem:[#allocation33_spill] sm:$0xff] %v11719_v10  ;;  %v4969_v41 = vmul.f32 %v11712_v16, %v11712_v16  ;;  %v13314_v48 = vmov 0   ;;  %v4864_v29 = vadd.f32 %v4848_v12, %v11506_v54 }
 0x9f3   : > { %v4803_v19 = vpop.xlane.xlu0 %4802  ;;  %13312 = vst [vmem:[#allocation34_spill] sm:$0xff] %v11726_v2  ;;  %13313 = vst [vmem:[#allocation35_spill] sm:$0xff] %v11732_v20  ;;  %8238 = vset.pattern.permute.xlu1 %v13314_v48  ;;  %v11738_v6 = vmul.f32 %v11696_v52, %v11696_v52  ;;  %v5017_v23 = vmul.f32 %v11719_v10, %v11719_v10  ;;  %5952 = vperm.xlu0 %8237, %v5902_v31   ;;  %v5204_v4 = vmax.f32 %v5188_v24, 0.0 }
 0x9f4   : > { %v4879_v49 = vadd.f32 %v4863_v35, %v4803_v19  ;;  %v4985_v53 = vadd.f32 %v4969_v41, %v4937_v36  ;;  %v4978_v58 = vadd.f32 %v4962_v1, %v4930_v18  ;;  %v4880_v7 = vadd.f32 %v4864_v29, %v11688_v11 }
 0x9f5   : > { %v5324_v56 = vmul.f32 %v11721_v39, %v11564_v62  ;;  %v5336_v35 = vmul.f32 %v11703_v5, %v11553_v59  ;;  %v11748_v12 = vsub.f32 %v11516_v30, %v4898_v46  ;;  %v5065_v41 = vmul.f32 %v11726_v2, %v11726_v2  ;;  %5254 = vperm.xlu1 %8238, %v5204_v4  }
 0x9f6   : > { %v4895_v21 = vmul.f32 0.25, %v4879_v49  ;;  %v5033_v36 = vadd.f32 %v5017_v23, %v4985_v53  ;;  %v11752_v31 = vadd.f32 %v4964_v57, %v4932_v50  ;;  %v5010_v29 = vmul.f32 %v11732_v20, %v11732_v20 }
 0x9f7   : > { %v4727_v43 = vpop.xlane.xlu0 %4726  ;;  %13315 = vst [vmem:[#allocation36_spill] sm:$0xff] %v11748_v12  ;;  %v4896_v49 = vmul.f32 0.25, %v4880_v7  ;;  %v11761_v59 = vmul.f32 %v11721_v39, %v11579_v26  ;;  %v4859_v62 = vadd.f32 %v11665_v14, %v11492_v45  ;;  %v13317_v50 = vmov 1  }
 0x9f8   : > { %v11757_v18 = vsub.f32 %v11486_v15, %v4895_v21  ;;  %v5081_v30 = vadd.f32 %v5065_v41, %v5033_v36  ;;  %v11766_v46 = vsub.f32 %v11504_v33, %v4895_v21  ;;  %8239 = vset.pattern.permute.xlu0 %v13317_v50  ;;  %v5026_v1 = vadd.f32 %v5010_v29, %v4978_v58 }
 0x9f9   : > { %v11770_v24 = vsub.f32 %v11389_v27, %v4896_v49  ;;  %v11773_v15 = vsub.f32 %v11611_v60, %v4896_v49  ;;  %v5347_v7 = vmul.f32 %v11618_v9, %v5324_v56  ;;  %v11777_v57 = vmul.f32 %v11618_v9, %v5336_v35  ;;  %8240 = vset.pattern.permute.xlu1 %v13317_v50 }
 0x9fa   : > { %13316 = vst [vmem:[#allocation37_spill] sm:$0xff] %v11757_v18  ;;  %v5058_v53 = vmul.f32 %v11748_v12, %v11748_v12  ;;  %v5097_v33 = vmul.f32 0.25, %v5081_v30  ;;  %v11782_v23 = vsub.f32 %v11508_v28, %v4895_v21  ;;  %v11790_v56 = vsub.f32 %v11506_v54, %v4896_v49  ;;  %v11794_v58 = vpop.eup %8350 }
 0x9fb   : > { %v4839_v26 = vpop.xlane.xlu0 %4838  ;;  %v4928_v27 = vmul.f32 %v11770_v24, %v11770_v24  ;;  %v4960_v60 = vmul.f32 %v11773_v15, %v11773_v15  ;;  %v4927_v4 = vmul.f32 %v11757_v18, %v11757_v18  ;;  %v4959_v28 = vmul.f32 %v11766_v46, %v11766_v46 }
 0x9fc   : > { %v5113_v35 = vadd.f32 1e-05, %v5097_v33  ;;  %v11798_v36 = vsub.f32 %v4803_v19, %v4895_v21  ;;  %v4875_v41 = vadd.f32 %v4859_v62, %v4727_v43  ;;  %v11800_v29 = vadd.f32 %v5058_v53, %v5026_v1  ;;  %v11806_v52 = vpop.eup %8352 }
 0x9fd   : > { %v4976_v30 = vadd.f32 %v4960_v60, %v4928_v27  ;;  %v11803_v2 = vsub.f32 %v11688_v11, %v4896_v49  ;;  %v5370_v54 = vadd.f32 %v11637_v0, %v5347_v7  ;;  %v4975_v18 = vadd.f32 %v4959_v28, %v4927_v4 }
 0x9fe   : > { %8354 = vrsqrt.f32 %v5113_v35  ;;  %v5007_v33 = vmul.f32 %v11782_v23, %v11782_v23  ;;  %v4891_v10 = vadd.f32 %v4875_v41, %v4839_v26  ;;  %v5008_v19 = vmul.f32 %v11790_v56, %v11790_v56 }
 0x9ff   : > { %13318 = vst [vmem:[#allocation38_spill] sm:$0xff] %v11803_v2  ;;  %v4842_v12 = vpop.xlane.xlu0 %4841  ;;  %v5386_v21 = vmax.f32 %v5370_v54, 0.0  ;;  %v5588_v11 = vmul.f32 %v11794_v58, %v11601_v63  ;;  %v5055_v1 = vmul.f32 %v11798_v36, %v11798_v36  ;;  %v5578_v53 = vmul.f32 %v11721_v39, %v11566_v22 }
 0xa00   : > { %v4892_v62 = vadd.f32 %v11673_v3, %v4842_v12  ;;  %v5023_v49 = vadd.f32 %v5007_v33, %v4975_v18  ;;  %v4907_v7 = vmul.f32 0.25, %v4891_v10  ;;  %v5841_v27 = vmul.f32 %v11806_v52, %v11646_v8 }
 0xa01   : > { %v5024_v60 = vadd.f32 %v5008_v19, %v4976_v30  ;;  %v5056_v4 = vmul.f32 %v11803_v2, %v11803_v2  ;;  %5404 = vperm.xlu0 %8239, %v5386_v21   ;;  %v5611_v41 = vmul.f32 %v11618_v9, %v5588_v11  ;;  %v5334_v30 = vmul.f32 %v11794_v58, %v11598_v37 }
 0xa02   : > { %v4908_v3 = vmul.f32 0.25, %v4892_v62  ;;  %v5071_v63 = vadd.f32 %v5055_v1, %v5023_v49  ;;  %v11826_v18 = vsub.f32 %v11492_v45, %v4907_v7  ;;  %v11829_v10 = vsub.f32 %v11665_v14, %v4907_v7 }
 0xa03   : > { %v11823_v35 = vpop.xlane.xlu0 %4584  ;;  %v11831_v28 = vsub.f32 %v4727_v43, %v4907_v7  ;;  %v11846_v43 = vsub.f32 %v4839_v26, %v4907_v7  ;;  %v13320_v33 = vmov 2   ;;  %v5587_v19 = vmul.f32 %v11806_v52, %v11640_v44 }
 0xa04   : > { %13319 = vst [vmem:[#allocation39_spill] sm:$0xff] %v11829_v10  ;;  %v11834_v22 = vsub.f32 %v11417_v32, %v4908_v3  ;;  %v11837_v8 = vsub.f32 %v11514_v13, %v4908_v3  ;;  %v5087_v54 = vmul.f32 0.25, %v5071_v63  ;;  %v4939_v45 = vmul.f32 %v11826_v18, %v11826_v18 }
 0xa05   : > { %v4971_v14 = vmul.f32 %v11829_v10, %v11829_v10  ;;  %v5019_v32 = vmul.f32 %v11831_v28, %v11831_v28  ;;  %8243 = vset.pattern.permute.xlu0 %v13320_v33  ;;  %v11858_v26 = vsub.f32 %v11523_v40, %v4908_v3  ;;  %v11860_v49 = vsub.f32 %v4842_v12, %v4908_v3 }
 0xa06   : > { %v4940_v13 = vmul.f32 %v11834_v22, %v11834_v22  ;;  %v4972_v37 = vmul.f32 %v11837_v8, %v11837_v8  ;;  %v5103_v62 = vadd.f32 1e-05, %v5087_v54  ;;  %v5072_v1 = vadd.f32 %v5056_v4, %v5024_v60 }
 0xa07   : > { %v4697_v21 = vpop.xlane.xlu0 %4696  ;;  %v4987_v11 = vadd.f32 %v4971_v14, %v4939_v45  ;;  %v5634_v63 = vadd.f32 %v11637_v0, %v5611_v41  ;;  %v5357_v2 = vmul.f32 %v11618_v9, %v5334_v30  ;;  %v5067_v10 = vmul.f32 %v11846_v43, %v11846_v43 }
 0xa08   : > { %v4988_v7 = vadd.f32 %v4972_v37, %v4940_v13  ;;  %8356 = vrsqrt.f32 %v5103_v62  ;;  %v5020_v44 = vmul.f32 %v11858_v26, %v11858_v26  ;;  %v5864_v54 = vmul.f32 %v11618_v9, %v5841_v27 }
 0xa09   : > { %v5035_v20 = vadd.f32 %v5019_v32, %v4987_v11  ;;  %v5650_v40 = vmax.f32 %v5634_v63, 0.0  ;;  %v5380_v12 = vadd.f32 %v11637_v0, %v5357_v2  ;;  %v4849_v60 = vadd.f32 %v11823_v35, %v11456_v61 }
 0xa0a   : > { %v5036_v41 = vadd.f32 %v5020_v44, %v4988_v7  ;;  %v5068_v30 = vmul.f32 %v11860_v49, %v11860_v49  ;;  %v5610_v45 = vmul.f32 %v11618_v9, %v5587_v19  ;;  %v5601_v27 = vmul.f32 %v11618_v9, %v5578_v53 }
 0xa0b   : > { %v11872_v4 = vpop.xlane.xlu0 %4702  ;;  %v5083_v3 = vadd.f32 %v5067_v10, %v5035_v20  ;;  %v11877_v14 = vpop.eup %8354  ;;  %5708 = vperm.xlu0 %8243, %v5650_v40   ;;  %v5396_v32 = vmax.f32 %v5380_v12, 0.0  ;;  %v4865_v13 = vadd.f32 %v4849_v60, %v4697_v21  ;;  %v5146_v2 = vmul.f32 %v11703_v5, %v11551_v47 }
 0xa0c   : > { %v5088_v37 = vmul.f32 0.25, %v5072_v1  ;;  %v5084_v11 = vadd.f32 %v5068_v30, %v5036_v41  ;;  %v5633_v20 = vadd.f32 %v11637_v0, %v5610_v45  ;;  %v5624_v10 = vadd.f32 %v11637_v0, %v5601_v27 }
 0xa0d   : > { %v5099_v62 = vmul.f32 0.25, %v5083_v3  ;;  %5454 = vperm.xlu1 %8240, %v5396_v32   ;;  %v4881_v19 = vadd.f32 %v4865_v13, %v11557_v51  ;;  %v5887_v7 = vadd.f32 %v11637_v0, %v5864_v54  ;;  %v5333_v63 = vmul.f32 %v11806_v52, %v11632_v42 }
 0xa0e   : > { %v5855_v47 = vmul.f32 %v11618_v9, %v11761_v59  ;;  %v5335_v1 = vmul.f32 %v11877_v14, %v11712_v16  ;;  %v5100_v44 = vmul.f32 0.25, %v5084_v11  ;;  %v5649_v40 = vmax.f32 %v5633_v20, 0.0 }
 0xa0f   : > { %v11888_v53 = vpop.xlane.xlu0 %4620  ;;  %v5090_v12 = vmul.f32 0.25, %v11800_v29  ;;  %v5115_v60 = vadd.f32 1e-05, %v5099_v62  ;;  %v4897_v3 = vmul.f32 0.25, %v4881_v19  ;;  %v5356_v41 = vmul.f32 %v11618_v9, %v5333_v63 }
 0xa10   : > { %v5104_v54 = vadd.f32 1e-05, %v5088_v37  ;;  %v5116_v30 = vadd.f32 1e-05, %v5100_v44  ;;  %5703 = vperm.xlu0 %8243, %v5649_v40   ;;  %v5640_v42 = vmax.f32 %v5624_v10, 0.0  ;;  %v5169_v45 = vmul.f32 %v11618_v9, %v5146_v2 }
 0xa11   : > { %8241 = vset.pattern.permute.xlu1 %v13320_v33  ;;  %v11899_v59 = vsub.f32 %v11456_v61, %v4897_v3  ;;  %v11902_v16 = vsub.f32 %v11823_v35, %v4897_v3  ;;  %v11904_v32 = vsub.f32 %v4697_v21, %v4897_v3  ;;  %v5903_v29 = vmax.f32 %v5887_v7, 0.0 }
 0xa12   : > { %v5358_v13 = vmul.f32 %v11618_v9, %v5335_v1  ;;  %8358 = vrsqrt.f32 %v5116_v30  ;;  %5658 = vperm.xlu1 %8241, %v5640_v42   ;;  %v5379_v37 = vadd.f32 %v11637_v0, %v5356_v41  ;;  %v4867_v2 = vadd.f32 %v11683_v17, %v11872_v4 }
 0xa13   : > { %v4815_v27 = vpop.xlane.xlu0 %4814  ;;  %8360 = vrsqrt.f32 %v5115_v60  ;;  %v4929_v61 = vmul.f32 %v11899_v59, %v11899_v59  ;;  %v4961_v35 = vmul.f32 %v11902_v16, %v11902_v16  ;;  %v11915_v21 = vsub.f32 %v11557_v51, %v4897_v3  ;;  %v11935_v3 = vpop.xlane.xlu1 %4844 }
 0xa14   : > { %v5106_v62 = vadd.f32 1e-05, %v5090_v12  ;;  %v13321_v11 = vmov 3   ;;  %v5192_v20 = vadd.f32 %v11637_v0, %v5169_v45  ;;  %v5382_v10 = vadd.f32 %v11637_v0, %v11777_v57 }
 0xa15   : > { %8247 = vset.pattern.permute.xlu0 %v13321_v11  ;;  %v4861_v17 = vadd.f32 %v11888_v53, %v11471_v25  ;;  %v11923_v19 = vpop.eup %8356  ;;  %v4977_v7 = vadd.f32 %v4961_v35, %v4929_v61  ;;  %v5009_v63 = vmul.f32 %v11904_v32, %v11904_v32  ;;  %v5395_v51 = vmax.f32 %v5379_v37, 0.0 }
 0xa16   : > { %5957 = vperm.xlu0 %8247, %v5903_v29   ;;  %v4883_v1 = vadd.f32 %v4867_v2, %v4815_v27  ;;  %v11929_v40 = vmul.f32 %v11923_v19, %v11798_v36  ;;  %8242 = vset.pattern.permute.xlu1 %v13317_v50  ;;  %v5381_v57 = vadd.f32 %v11637_v0, %v5358_v13  ;;  %8362 = vrsqrt.f32 %v5104_v54 }
 0xa17   : > { %v4733_v44 = vpop.xlane.xlu0 %4732  ;;  %v5590_v60 = vmul.f32 %v11703_v5, %v11555_v34  ;;  %v5025_v41 = vadd.f32 %v5009_v63, %v4977_v7  ;;  %v5057_v30 = vmul.f32 %v11915_v21, %v11915_v21  ;;  %5449 = vperm.xlu1 %8242, %v5395_v51   ;;  %v5208_v45 = vmax.f32 %v5192_v20, 0.0 }
 0xa18   : > { %v4877_v12 = vadd.f32 %v4861_v17, %v4733_v44  ;;  %v4899_v42 = vmul.f32 0.25, %v4883_v1  ;;  %v5398_v36 = vmax.f32 %v5382_v10, 0.0  ;;  %v5878_v29 = vadd.f32 %v11637_v0, %v5855_v47 }
 0xa19   : > { %v5073_v13 = vadd.f32 %v5057_v30, %v5025_v41  ;;  %v5397_v35 = vmax.f32 %v5381_v57, 0.0  ;;  %v5613_v47 = vmul.f32 %v11618_v9, %v5590_v60  ;;  %8364 = vrsqrt.f32 %v5106_v62 }
 0xa1a   : > { %v4893_v37 = vadd.f32 %v4877_v12, %v11935_v3  ;;  %8249 = vset.pattern.permute.xlu0 %v13314_v48  ;;  %v11943_v34 = vsub.f32 %v11461_v38, %v4899_v42  ;;  %v11946_v54 = vsub.f32 %v11540_v55, %v4899_v42  ;;  %v11949_v2 = vsub.f32 %v11872_v4, %v4899_v42  ;;  %v13322_v4 = vld [vmem:[#allocation24_spill] sm:$0xff] }
 0xa1b   : > { %5274 = vperm.xlu0 %8249, %v5208_v45   ;;  %v11951_v61 = vsub.f32 %v4815_v27, %v4899_v42  ;;  %v5089_v10 = vmul.f32 0.25, %v5073_v13  ;;  %5464 = vperm.xlu1 %8242, %v5398_v36   ;;  %v5579_v55 = vmul.f32 %v11923_v19, %v11782_v23  ;;  %v5842_v7 = vmul.f32 %v11794_v58, %v13322_v4  ;;  %v13323_v45 = vld [vmem:[#allocation32_spill] sm:$0xff] }
 0xa1c   : > { %v4909_v20 = vmul.f32 0.25, %v4893_v37  ;;  %v4931_v17 = vmul.f32 %v11943_v34, %v11943_v34  ;;  %v4963_v38 = vmul.f32 %v11946_v54, %v11946_v54  ;;  %v5028_v51 = vadd.f32 %v11738_v6, %v11752_v31 }
 0xa1d   : > { %v5105_v1 = vadd.f32 1e-05, %v5089_v10  ;;  %v5011_v12 = vmul.f32 %v11949_v2, %v11949_v2  ;;  %v5894_v23 = vmax.f32 %v5878_v29, 0.0  ;;  %v5059_v62 = vmul.f32 %v11951_v61, %v11951_v61 }
 0xa1e   : > { %v11963_v27 = vsub.f32 %v11471_v25, %v4909_v20  ;;  %v11966_v63 = vsub.f32 %v11888_v53, %v4909_v20  ;;  %v4979_v57 = vadd.f32 %v4963_v38, %v4931_v17  ;;  %v5636_v53 = vadd.f32 %v11637_v0, %v5613_v47  ;;  %v13324_v47 = vld [vmem:[#allocation22_spill] sm:$0xff] }
 0xa1f   : > { %8251 = vset.pattern.permute.xlu0 %v13317_v50  ;;  %v11978_v60 = vpop.eup %8358  ;;  %8366 = vrsqrt.f32 %v5105_v1  ;;  %8244 = vset.pattern.permute.xlu1 %v13321_v11  ;;  %v5602_v41 = vmul.f32 %v11618_v9, %v5579_v55  ;;  %v5865_v42 = vmul.f32 %v11618_v9, %v5842_v7  ;;  %v5060_v36 = vmul.f32 %v13323_v45, %v13323_v45 }
 0xa20   : > { %v4941_v25 = vmul.f32 %v11963_v27, %v11963_v27  ;;  %v5027_v6 = vadd.f32 %v5011_v12, %v4979_v57  ;;  %5459 = vperm.xlu0 %8251, %v5397_v35   ;;  %v4973_v31 = vmul.f32 %v11966_v63, %v11966_v63  ;;  %v11984_v30 = vpop.eup %8360  ;;  %v11991_v29 = vmul.f32 %v11978_v60, %v11860_v49 }
 0xa21   : > { %5912 = vperm.xlu1 %8244, %v5894_v23   ;;  %v11993_v13 = vsub.f32 %v4733_v44, %v4909_v20  ;;  %v5625_v35 = vadd.f32 %v11637_v0, %v5602_v41  ;;  %v5844_v10 = vmul.f32 %v11703_v5, %v13324_v47  ;;  %v5076_v17 = vadd.f32 %v5060_v36, %v5028_v51  ;;  %v13325_v23 = vld [vmem:[#allocation21_spill] sm:$0xff] }
 0xa22   : > { %v5075_v37 = vadd.f32 %v5059_v62, %v5027_v6  ;;  %v5652_v38 = vmax.f32 %v5636_v53, 0.0  ;;  %v5845_v55 = vmul.f32 %v11984_v30, %v11846_v43  ;;  %v4989_v7 = vadd.f32 %v4973_v31, %v4941_v25 }
 0xa23   : > { %v5641_v49 = vmax.f32 %v5625_v35, 0.0  ;;  %v12001_v1 = vpop.eup %8362  ;;  %v5888_v44 = vadd.f32 %v11637_v0, %v5865_v42  ;;  %v5867_v57 = vmul.f32 %v11618_v9, %v5844_v10  ;;  %v5592_v5 = vmul.f32 %v11978_v60, %v11858_v26  ;;  %v13326_v42 = vld [vmem:[#allocation23_spill] sm:$0xff] }
 0xa24   : > { %v5091_v4 = vmul.f32 0.25, %v5075_v37  ;;  %8253 = vset.pattern.permute.xlu0 %v13320_v33  ;;  %v5021_v43 = vmul.f32 %v11993_v13, %v11993_v13  ;;  %v12011_v12 = vsub.f32 %v11935_v3, %v4909_v20  ;;  %v5134_v62 = vmul.f32 %v11721_v39, %v13325_v23 }
 0xa25   : > { %8245 = vset.pattern.permute.xlu1 %v13320_v33  ;;  %5663 = vperm.xlu0 %8253, %v5641_v49   ;;  %v5092_v25 = vmul.f32 0.25, %v5076_v17  ;;  %v5615_v53 = vmul.f32 %v11618_v9, %v5592_v5  ;;  %v5868_v6 = vmul.f32 %v11618_v9, %v5845_v55  ;;  %v5904_v26 = vmax.f32 %v5888_v44, 0.0  ;;  %v13328_v44 = vld [vmem:[#allocation27_spill] sm:$0xff] }
 0xa26   : > { %v5107_v51 = vadd.f32 1e-05, %v5091_v4  ;;  %5718 = vperm.xlu1 %8245, %v5652_v38   ;;  %v5037_v31 = vadd.f32 %v5021_v43, %v4989_v7  ;;  %v5890_v41 = vadd.f32 %v11637_v0, %v5867_v57  ;;  %v5144_v36 = vmul.f32 %v11794_v58, %v13326_v42  ;;  %v12020_v3 = vpop.eup %8364  ;;  %v13327_v7 = vld [vmem:[#allocation25_spill] sm:$0xff] }
 0xa27   : > { %v5069_v20 = vmul.f32 %v12011_v12, %v12011_v12  ;;  %v5157_v39 = vmul.f32 %v11618_v9, %v5134_v62  ;;  %v5638_v37 = vadd.f32 %v11637_v0, %v5615_v53  ;;  %v5108_v35 = vadd.f32 1e-05, %v5092_v25 }
 0xa28   : > { %8368 = vrsqrt.f32 %v5107_v51  ;;  %v5891_v17 = vadd.f32 %v11637_v0, %v5868_v6  ;;  %v5136_v58 = vmul.f32 %v12001_v1, %v11770_v24  ;;  %v5906_v55 = vmax.f32 %v5890_v41, 0.0  ;;  %v13329_v6 = vld [vmem:[#allocation31_spill] sm:$0xff] }
 0xa29   : > { %v5085_v47 = vadd.f32 %v5069_v20, %v5037_v31  ;;  %v5654_v10 = vmax.f32 %v5638_v37, 0.0  ;;  %v5167_v4 = vmul.f32 %v11618_v9, %v5144_v36  ;;  %v5143_v49 = vmul.f32 %v11806_v52, %v13327_v7 }
 0xa2a   : > { %8246 = vset.pattern.permute.xlu1 %v13321_v11  ;;  %v5138_v57 = vmul.f32 %v12020_v3, %v13328_v44  ;;  %v5180_v51 = vadd.f32 %v11637_v0, %v5157_v39  ;;  %v5159_v24 = vmul.f32 %v11618_v9, %v5136_v58  ;;  %8370 = vrsqrt.f32 %v5108_v35 }
 0xa2b   : > { %5962 = vperm.xlu1 %8246, %v5904_v26   ;;  %5728 = vperm.xlu0 %8253, %v5654_v10   ;;  %v5101_v43 = vmul.f32 0.25, %v5085_v47  ;;  %v5190_v23 = vadd.f32 %v11637_v0, %v5167_v4  ;;  %v5907_v62 = vmax.f32 %v5891_v17, 0.0  ;;  %v5166_v52 = vmul.f32 %v11618_v9, %v5143_v49 }
 0xa2c   : > { %v12030_v38 = vpop.eup %8366  ;;  %v5161_v25 = vmul.f32 %v11618_v9, %v5138_v57  ;;  %v5196_v53 = vmax.f32 %v5180_v51, 0.0  ;;  %v5145_v31 = vmul.f32 %v11877_v14, %v13329_v6  ;;  %v5326_v26 = vmul.f32 %v12001_v1, %v11773_v15 }
 0xa2d   : > { %v12039_v5 = vmul.f32 %v12030_v38, %v11904_v32  ;;  %v5182_v32 = vadd.f32 %v11637_v0, %v5159_v24  ;;  %v5117_v42 = vadd.f32 1e-05, %v5101_v43  ;;  %v5206_v36 = vmax.f32 %v5190_v23, 0.0 }
 0xa2e   : > { %v5189_v20 = vadd.f32 %v11637_v0, %v5166_v52  ;;  %v5184_v39 = vadd.f32 %v11637_v0, %v5161_v25  ;;  %v5168_v47 = vmul.f32 %v11618_v9, %v5145_v31  ;;  %v5147_v10 = vmul.f32 %v11984_v30, %v11826_v18  ;;  %v13330_v18 = vld [vmem:[#allocation28_spill] sm:$0xff]  ;;  %v13331_v25 = vld [vmem:[#allocation29_spill] sm:$0xff] }
 0xa2f   : > { %5972 = vperm.xlu1 %8246, %v5906_v55   ;;  %8261 = vset.pattern.permute.xlu0 %v13321_v11  ;;  %v5198_v35 = vmax.f32 %v5182_v32, 0.0  ;;  %v5349_v15 = vmul.f32 %v11618_v9, %v5326_v26  ;;  %v5325_v17 = vmul.f32 %v11923_v19, %v11766_v46  ;;  %8372 = vrsqrt.f32 %v5117_v42 }
 0xa30   : > { %5977 = vperm.xlu0 %8261, %v5907_v62   ;;  %v5205_v58 = vmax.f32 %v5189_v20, 0.0  ;;  %v5200_v55 = vmax.f32 %v5184_v39, 0.0  ;;  %v5170_v4 = vmul.f32 %v11618_v9, %v5147_v10  ;;  %v5148_v7 = vmul.f32 %v11978_v60, %v11834_v22 }
 0xa31   : > { %v5328_v49 = vmul.f32 %v12020_v3, %v13330_v18  ;;  %v5372_v44 = vadd.f32 %v11637_v0, %v5349_v15  ;;  %v5348_v57 = vmul.f32 %v11618_v9, %v5325_v17  ;;  %v12080_v51 = vmul.f32 %v11978_v60, %v11837_v8 }
 0xa32   : > { %v5193_v43 = vadd.f32 %v11637_v0, %v5170_v4  ;;  %v5171_v22 = vmul.f32 %v11618_v9, %v5148_v7  ;;  %v5580_v8 = vmul.f32 %v12001_v1, %v11790_v56  ;;  %v12094_v6 = vmul.f32 %v11984_v30, %v11831_v28  ;;  %v13332_v56 = vld [vmem:[#allocation39_spill] sm:$0xff] }
 0xa33   : > { %8248 = vset.pattern.permute.xlu1 %v13314_v48  ;;  %v5351_v23 = vmul.f32 %v11618_v9, %v5328_v49  ;;  %v5388_v62 = vmax.f32 %v5372_v44, 0.0  ;;  %v5371_v52 = vadd.f32 %v11637_v0, %v5348_v57  ;;  %v5337_v39 = vmul.f32 %v11984_v30, %v13332_v56  ;;  %v13333_v30 = vld [vmem:[#allocation35_spill] sm:$0xff]  ;;  %v13334_v57 = vld [vmem:[#allocation33_spill] sm:$0xff] }
 0xa34   : > { %5214 = vperm.xlu1 %8248, %v5196_v53   ;;  %8262 = vset.pattern.permute.xlu0 %v13314_v48  ;;  %v5209_v60 = vmax.f32 %v5193_v43, 0.0  ;;  %v5194_v32 = vadd.f32 %v11637_v0, %v5171_v22  ;;  %v13335_v43 = vld [vmem:[#allocation30_spill] sm:$0xff] }
 0xa35   : > { %v12053_v41 = vpop.eup %8368  ;;  %5224 = vperm.xlu0 %8262, %v5198_v35   ;;  %v5387_v31 = vmax.f32 %v5371_v52, 0.0  ;;  %v5374_v26 = vadd.f32 %v11637_v0, %v5351_v23 }
 0xa36   : > { %v12059_v37 = vmul.f32 %v12053_v41, %v11951_v61  ;;  %v5191_v61 = vadd.f32 %v11637_v0, %v5168_v47  ;;  %v5583_v20 = vmul.f32 %v12053_v41, %v11949_v2  ;;  %v5210_v47 = vmax.f32 %v5194_v32, 0.0 }
 0xa37   : > { %v12076_v46 = vpop.eup %8370  ;;  %v5390_v10 = vmax.f32 %v5374_v26, 0.0  ;;  %v5835_v2 = vmul.f32 %v12030_v38, %v11915_v21  ;;  %v12125_v44 = vmul.f32 %v12053_v41, %v11943_v34 }
 0xa38   : > { %5264 = vperm.xlu1 %8248, %v5206_v36   ;;  %v5207_v24 = vmax.f32 %v5191_v61, 0.0  ;;  %v5330_v53 = vmul.f32 %v12076_v46, %v13331_v25  ;;  %v5603_v36 = vmul.f32 %v11618_v9, %v5580_v8  ;;  %v5606_v17 = vmul.f32 %v11618_v9, %v5583_v20 }
 0xa39   : > { %5234 = vperm.xlu0 %8262, %v5200_v55   ;;  %v12111_v55 = vmul.f32 %v12053_v41, %v11946_v54  ;;  %v5582_v61 = vmul.f32 %v12020_v3, %v13333_v30  ;;  %v5858_v54 = vmul.f32 %v11618_v9, %v5835_v2  ;;  %v5584_v22 = vmul.f32 %v12076_v46, %v13335_v43 }
 0xa3a   : > { %v5353_v42 = vmul.f32 %v11618_v9, %v5330_v53  ;;  %v5626_v15 = vadd.f32 %v11637_v0, %v5603_v36  ;;  %v5629_v49 = vadd.f32 %v11637_v0, %v5606_v17 }
 0xa3b   : > { %v5881_v34 = vadd.f32 %v11637_v0, %v5858_v54  ;;  %v5607_v8 = vmul.f32 %v11618_v9, %v5584_v22  ;;  %v4821_v54 = vpop.xlane.xlu1 %4820 }
 0xa3c   : > { %5259 = vperm.xlu1 %8248, %v5205_v58   ;;  %v8373_v35 = vpop.eup %8372  ;;  %v5376_v28 = vadd.f32 %v11637_v0, %v5353_v42  ;;  %v5360_v58 = vmul.f32 %v11618_v9, %v5337_v39  ;;  %v5642_v18 = vmax.f32 %v5626_v15, 0.0  ;;  %v5137_v15 = vmul.f32 %v12030_v38, %v11899_v59 }
 0xa3d   : > { %5269 = vperm.xlu0 %8262, %v5207_v24   ;;  %v12116_v4 = vmul.f32 %v8373_v35, %v11966_v63  ;;  %v5605_v63 = vmul.f32 %v11618_v9, %v5582_v61  ;;  %v5589_v24 = vmul.f32 %v11877_v14, %v13334_v57  ;;  %v12133_v23 = vmul.f32 %v8373_v35, %v11963_v27  ;;  %v13338_v57 = vld [vmem:[#allocation20_spill] sm:$0xff] }
 0xa3e   : > { %v5392_v7 = vmax.f32 %v5376_v28, 0.0  ;;  %v5383_v21 = vadd.f32 %v11637_v0, %v5360_v58  ;;  %v5593_v52 = vmul.f32 %v8373_v35, %v11993_v13  ;;  %v5897_v32 = vmax.f32 %v5881_v34, 0.0  ;;  %v4597_v58 = vpop.xlane.xlu0 %4596  ;;  %v13339_v34 = vld [vmem:[#allocation34_spill] sm:$0xff] }
 0xa3f   : > { %v5628_v41 = vadd.f32 %v11637_v0, %v5605_v63  ;;  %v5612_v53 = vmul.f32 %v11618_v9, %v5589_v24  ;;  %v5630_v42 = vadd.f32 %v11637_v0, %v5607_v8  ;;  %v5847_v20 = vmul.f32 %v8373_v35, %v12011_v12  ;;  %v13337_v63 = vld [vmem:[#allocation36_spill] sm:$0xff] }
 0xa40   : > { %8250 = vset.pattern.permute.xlu1 %v13317_v50  ;;  %v5399_v25 = vmax.f32 %v5383_v21, 0.0  ;;  %v5616_v13 = vmul.f32 %v11618_v9, %v5593_v52  ;;  %v5361_v28 = vmul.f32 %v11618_v9, %v12080_v51  ;;  %v5160_v30 = vmul.f32 %v11618_v9, %v5137_v15 }
 0xa41   : > { %5414 = vperm.xlu1 %8250, %v5388_v62   ;;  %5279 = vperm.xlu0 %8262, %v5209_v60   ;;  %v5645_v62 = vmax.f32 %v5629_v49, 0.0  ;;  %v13336_v60 = vld [vmem:[#allocation38_spill] sm:$0xff]  ;;  %v5635_v26 = vadd.f32 %v11637_v0, %v5612_v53  ;;  %v5646_v56 = vmax.f32 %v5630_v42, 0.0  ;;  %v5856_v61 = vmul.f32 %v11618_v9, %v11929_v40  ;;  %v13340_v53 = vld [vmem:[#allocation7_spill] sm:$0xff] }
 0xa42   : > { %v5834_v27 = vmul.f32 %v12001_v1, %v13336_v60  ;;  %v5639_v39 = vadd.f32 %v11637_v0, %v5616_v13  ;;  %v5384_v2 = vadd.f32 %v11637_v0, %v5361_v28  ;;  %v5183_v59 = vadd.f32 %v11637_v0, %v5160_v30  ;;  %v4709_v49 = vpop.xlane.xlu0 %4708 }
 0xa43   : > { %v5651_v1 = vmax.f32 %v5635_v26, 0.0  ;;  %v5614_v21 = vmul.f32 %v11618_v9, %v12094_v6  ;;  %v5836_v40 = vmul.f32 %v12020_v3, %v13337_v63  ;;  %v4853_v24 = vadd.f32 %v4597_v58, %v13338_v57  ;;  %v12182_v3 = vld [vmem:[%s13091_s14] ss:$0 sm:$0xff] }
 0xa44   : > { %v5857_v36 = vmul.f32 %v11618_v9, %v5834_v27  ;;  %v5655_v12 = vmax.f32 %v5639_v39, 0.0  ;;  %v5199_v43 = vmax.f32 %v5183_v59, 0.0  ;;  %v5327_v15 = vmul.f32 %v12030_v38, %v11902_v16 }
 0xa45   : > { %5409 = vperm.xlu1 %8250, %v5387_v31   ;;  %5284 = vperm.xlu0 %8262, %v5210_v47   ;;  %v5644_v31 = vmax.f32 %v5628_v41, 0.0  ;;  %v5637_v52 = vadd.f32 %v11637_v0, %v5614_v21  ;;  %v5859_v6 = vmul.f32 %v12182_v3, %v5836_v40  ;;  %v5843_v41 = vmul.f32 %v11877_v14, %v13339_v34 }
 0xa46   : > { %v5880_v47 = vadd.f32 %v11637_v0, %v5857_v36  ;;  %v5869_v14 = vmul.f32 %v12182_v3, %v11991_v29  ;;  %v5350_v30 = vmul.f32 %v12182_v3, %v5327_v15 }
 0xa47   : > { %v5653_v27 = vmax.f32 %v5637_v52, 0.0  ;;  %v5866_v13 = vmul.f32 %v12182_v3, %v5843_v41 }
 0xa48   : > { %v5896_v35 = vmax.f32 %v5880_v47, 0.0 }
 0xa49   : > { %5424 = vperm.xlu1 %8250, %v5390_v10   ;;  %8266 = vset.pattern.permute.xlu0 %v13317_v50  ;;  %v5870_v10 = vmul.f32 %v11618_v9, %v5847_v20  ;;  %v12199_v20 = vld [vmem:[%s13092_s15] ss:$0 sm:$0xff] }
 0xa4a   : > { %5434 = vperm.xlu0 %8266, %v5392_v7   ;;  %v5400_v7 = vmax.f32 %v5384_v2, 0.0 }
 0xa4b   : > { %v5893_v17 = vadd.f32 %v11637_v0, %v5870_v10  ;;  %v5892_v10 = vadd.f32 %v12199_v20, %v5869_v14 }
 0xa4d   : > { %8252 = vset.pattern.permute.xlu1 %v13320_v33  ;;  %v5909_v51 = vmax.f32 %v5893_v17, 0.0 }
 0xa4e   : > { %5668 = vperm.xlu1 %8252, %v5642_v18   ;;  %8267 = vset.pattern.permute.xlu0 %v13320_v33  ;;  %v5879_v18 = vadd.f32 %v11637_v0, %v5856_v61 }
 0xa4f   : > { %5683 = vperm.xlu0 %8267, %v5645_v62   ;;  %v4869_v62 = vadd.f32 %v4853_v24, %v4709_v49  ;;  %v5604_v24 = vmul.f32 %v12182_v3, %v12039_v5 }
 0xa50   : > { %v5895_v22 = vmax.f32 %v5879_v18, 0.0  ;;  %v5373_v18 = vadd.f32 %v12199_v20, %v5350_v30 }
 0xa51   : > { %v4885_v60 = vadd.f32 %v4869_v62, %v4821_v54  ;;  %v5627_v52 = vadd.f32 %v12199_v20, %v5604_v24 }
 0xa52   : > { %8254 = vset.pattern.permute.xlu1 %v13317_v50 }
 0xa53   : > { %5469 = vperm.xlu1 %8254, %v5399_v25   ;;  %8268 = vset.pattern.permute.xlu0 %v13321_v11  ;;  %v4901_v42 = vmul.f32 0.25, %v4885_v60  ;;  %v5643_v41 = vmax.f32 %v5627_v52, 0.0  ;;  %v5838_v60 = vmul.f32 %v12076_v46, %v13323_v45 }
 0xa54   : > { %5927 = vperm.xlu0 %8268, %v5897_v32   ;;  %v5882_v32 = vadd.f32 %v11637_v0, %v5859_v6  ;;  %v5889_v0 = vadd.f32 %v12199_v20, %v5866_v13 }
 0xa55   : > { %v12207_v39 = vsub.f32 %v13338_v57, %v4901_v42  ;;  %v12209_v29 = vsub.f32 %v4597_v58, %v4901_v42  ;;  %v12219_v17 = vsub.f32 %v4709_v49, %v4901_v42  ;;  %v12226_v38 = vsub.f32 %v4821_v54, %v4901_v42 }
 0xa56   : > { %v5898_v36 = vmax.f32 %v5882_v32, 0.0  ;;  %v5905_v47 = vmax.f32 %v5889_v0, 0.0  ;;  %v5352_v49 = vmul.f32 %v12182_v3, %v12111_v55  ;;  %v5389_v57 = vmax.f32 %v5373_v18, 0.0 }
 0xa57   : > { %8255 = vset.pattern.permute.xlu1 %v13320_v33  ;;  %v5013_v16 = vmul.f32 %v12219_v17, %v12219_v17  ;;  %v5061_v63 = vmul.f32 %v12226_v38, %v12226_v38  ;;  %v5861_v13 = vmul.f32 %v12182_v3, %v5838_v60 }
 0xa58   : > { %5678 = vperm.xlu1 %8255, %v5644_v31   ;;  %8270 = vset.pattern.permute.xlu0 %v13320_v33  ;;  %v5375_v54 = vadd.f32 %v12199_v20, %v5352_v49 }
 0xa59   : > { %5688 = vperm.xlu0 %8270, %v5646_v56  }
 0xa5a   : > { %v5391_v55 = vmax.f32 %v5375_v54, 0.0 }
 0xa5c   : > { %5713 = vperm.xlu1 %8255, %v5651_v1   ;;  %v13341_v1 = vld [vmem:[#allocation37_spill] sm:$0xff] }
 0xa5d   : > { %5733 = vperm.xlu0 %8270, %v5655_v12   ;;  %v5135_v56 = vmul.f32 %v11923_v19, %v13341_v1  ;;  %v4933_v12 = vmul.f32 %v12207_v39, %v12207_v39  ;;  %v4965_v19 = vmul.f32 %v12209_v29, %v12209_v29  ;;  %v5884_v1 = vadd.f32 %v12199_v20, %v5861_v13 }
 0xa5f   : > { %v5158_v28 = vmul.f32 %v12182_v3, %v5135_v56  ;;  %v4981_v61 = vadd.f32 %v4965_v19, %v4933_v12  ;;  %v5162_v56 = vmul.f32 %v12182_v3, %v12125_v44  ;;  %v5900_v15 = vmax.f32 %v5884_v1, 0.0 }
 0xa60   : > { %8256 = vset.pattern.permute.xlu1 %v13321_v11 }
 0xa61   : > { %5922 = vperm.xlu1 %8256, %v5896_v35   ;;  %8272 = vset.pattern.permute.xlu0 %v13321_v11  ;;  %v5908_v35 = vmax.f32 %v5892_v10, 0.0  ;;  %v5181_v58 = vadd.f32 %v12199_v20, %v5158_v28  ;;  %v5029_v21 = vadd.f32 %v5013_v16, %v4981_v61  ;;  %v5185_v19 = vadd.f32 %v12199_v20, %v5162_v56  ;;  %v13346_v61 = vld [vmem:[#allocation5_spill] sm:$0xff] }
 0xa62   : > { %5987 = vperm.xlu0 %8272, %v5909_v51   ;;  %v13342_v51 = vld [vmem:[#allocation12_spill] sm:$0xff]  ;;  %v13349_v56 = vld [vmem:[#allocation17_spill] sm:$0xff] }
 0xa63   : > { %v5197_v59 = vmax.f32 %v5181_v58, 0.0  ;;  %v5201_v30 = vmax.f32 %v5185_v19, 0.0  ;;  %v13350_v19 = vld [vmem:[#allocation18_spill] sm:$0xff] }
 0xa65   : > { %8257 = vset.pattern.permute.xlu1 %v13317_v50  ;;  %v12177_v25 = vpop.permute.xlu0 %5698 }
 0xa66   : > { %5474 = vperm.xlu1 %8257, %v5400_v7   ;;  %8273 = vset.pattern.permute.xlu0 %v13314_v48 }
 0xa67   : > { %5229 = vperm.xlu0 %8273, %v5199_v43   ;;  %v5077_v43 = vadd.f32 %v5061_v63, %v5029_v21 }
 0xa68   : > { %v5445_v9 = vpop.permute.xlu1 %5444 }
 0xa69   : > { %v5490_v8 = vmul.f32 %v5445_v9, %v13340_v53  ;;  %v5093_v62 = vmul.f32 0.25, %v5077_v43  ;;  %v5362_v9 = vmul.f32 %v12182_v3, %v12116_v4 }
 0xa6a   : > { %8258 = vset.pattern.permute.xlu1 %v13321_v11 }
 0xa6b   : > { %5917 = vperm.xlu1 %8258, %v5895_v22   ;;  %5530 = vrot.lane.b32.xlu0 %v5490_v8, %s8432_s21  ;;  %v5109_v6 = vadd.f32 1e-05, %v5093_v62  ;;  %v5385_v5 = vadd.f32 %v12199_v20, %v5362_v9 }
 0xa6c   : > { %8279 = vset.pattern.permute.xlu0 %v13321_v11 }
 0xa6d   : > { %8374 = vrsqrt.f32 %v5109_v6  ;;  %v5401_v32 = vmax.f32 %v5385_v5, 0.0 }
 0xa6e   : > { %v5953_v31 = vpop.permute.xlu0 %5952 }
 0xa6f   : > { %8259 = vset.pattern.permute.xlu1 %v13320_v33  ;;  %v5998_v26 = vmul.f32 %v5953_v31, %v13340_v53  ;;  %v13343_v31 = vld [vmem:[#allocation6_spill] sm:$0xff] }
 0xa70   : > { %5723 = vperm.xlu1 %8259, %v5653_v27   ;;  %v12235_v40 = vpop.permute.xlu1 %5254  ;;  %v5860_v27 = vmul.f32 %v12182_v3, %v12059_v37  ;;  %v13344_v37 = vld [vmem:[#allocation9_spill] sm:$0xff] }
 0xa71   : > { %6038 = vrot.lane.b32.xlu0 %v5998_v26, %s8434_s25 }
 0xa72   : > { %v5883_v42 = vadd.f32 %v12199_v20, %v5860_v27 }
 0xa74   : > { %8260 = vset.pattern.permute.xlu1 %v13321_v11  ;;  %v5899_v0 = vmax.f32 %v5883_v42, 0.0 }
 0xa75   : > { %5932 = vperm.xlu1 %8260, %v5898_v36  }
 0xa79   : > { %5967 = vperm.xlu1 %8260, %v5905_v47   ;;  %v13345_v47 = vld [vmem:[#allocation26_spill] sm:$0xff] }
 0xa7a   : > { %v5140_v10 = vmul.f32 %v12076_v46, %v13345_v47  ;;  %v8375_v58 = vpop.eup %8374  ;;  %v5172_v46 = vmul.f32 %v12182_v3, %v12133_v23 }
 0xa7b   : > { %v5331_v16 = vmul.f32 %v8375_v58, %v12209_v29  ;;  %v5585_v23 = vmul.f32 %v8375_v58, %v12219_v17  ;;  %v5141_v6 = vmul.f32 %v8375_v58, %v12207_v39 }
 0xa7c   : > { %v5405_v2 = vpop.permute.xlu0 %5404  ;;  %v5195_v49 = vadd.f32 %v12199_v20, %v5172_v46 }
 0xa7d   : > { %5982 = vperm.xlu1 %8260, %v5908_v35   ;;  %v5482_v7 = vmul.f32 %v5405_v2, %v13342_v51  ;;  %v5163_v35 = vmul.f32 %v12182_v3, %v5140_v10  ;;  %v5608_v43 = vmul.f32 %v12182_v3, %v5585_v23  ;;  %v13352_v23 = vld [vmem:[#allocation11_spill] sm:$0xff] }
 0xa7e   : > { %v5211_v54 = vmax.f32 %v5195_v49, 0.0 }
 0xa7f   : > { %5514 = vrot.lane.b32.xlu0 %v5482_v7, %s8432_s21  ;;  %v5186_v44 = vadd.f32 %v12199_v20, %v5163_v35  ;;  %v5631_v9 = vadd.f32 %v12199_v20, %v5608_v43 }
 0xa81   : > { %8263 = vset.pattern.permute.xlu1 %v13314_v48  ;;  %v5202_v18 = vmax.f32 %v5186_v44, 0.0 }
 0xa82   : > { %5219 = vperm.xlu1 %8263, %v5197_v59  }
 0xa86   : > { %8264 = vset.pattern.permute.xlu1 %v13317_v50  ;;  %v5709_v14 = vpop.permute.xlu0 %5708 }
 0xa87   : > { %5419 = vperm.xlu1 %8264, %v5389_v57   ;;  %v5746_v36 = vmul.f32 %v5709_v14, %v13344_v37  ;;  %v5354_v57 = vmul.f32 %v12182_v3, %v5331_v16  ;;  %v13351_v16 = vld [vmem:[#allocation19_spill] sm:$0xff] }
 0xa88   : > { %v12241_v22 = vpop.permute.xlu1 %5454 }
 0xa89   : > { %v5377_v29 = vadd.f32 %v12199_v20, %v5354_v57 }
 0xa8b   : > { %5429 = vperm.xlu1 %8264, %v5391_v55   ;;  %v12271_v12 = vpop.permute.xlu0 %5703  ;;  %v5839_v55 = vmul.f32 %v8375_v58, %v12226_v38  ;;  %v5393_v62 = vmax.f32 %v5377_v29, 0.0  ;;  %v5164_v38 = vmul.f32 %v12182_v3, %v5141_v6 }
 0xa8d   : > { %v5659_v34 = vpop.permute.xlu1 %5658  ;;  %v5862_v17 = vmul.f32 %v12182_v3, %v5839_v55  ;;  %v5187_v60 = vadd.f32 %v12199_v20, %v5164_v38 }
 0xa8e   : > { %v5736_v8 = vmul.f32 %v5659_v34, %v13342_v51 }
 0xa8f   : > { %8265 = vset.pattern.permute.xlu1 %v13320_v33  ;;  %v5203_v39 = vmax.f32 %v5187_v60, 0.0 }
 0xa90   : > { %5673 = vperm.xlu1 %8265, %v5643_v41   ;;  %5768 = vrot.lane.b32.xlu0 %v5736_v8, %s8433_s2  ;;  %v5647_v41 = vmax.f32 %v5631_v9, 0.0  ;;  %v5885_v8 = vadd.f32 %v12199_v20, %v5862_v17 }
 0xa91   : > { %v5958_v59 = vpop.permute.xlu0 %5957 }
 0xa92   : > { %v5450_v4 = vpop.permute.xlu1 %5449  ;;  %v5999_v21 = vmul.f32 %v5958_v59, %v13343_v31 }
 0xa93   : > { %v5491_v26 = vmul.f32 %v5450_v4, %v13343_v31 }
 0xa94   : > { %8269 = vset.pattern.permute.xlu1 %v13317_v50 }
 0xa95   : > { %5479 = vperm.xlu1 %8269, %v5401_v32   ;;  %5532 = vrot.lane.b32.xlu0 %v5491_v26, %s8432_s21  ;;  %v13347_v26 = vld [vmem:[#allocation15_spill] sm:$0xff] }
 0xa96   : > { %v12259_v45 = vpop.permute.xlu1 %5464  ;;  %v12308_v32 = vpop.permute.xlu0 %5274 }
 0xa97   : > { %v5494_v20 = vmul.f32 %v12259_v45, %v13346_v61  ;;  %v5745_v45 = vmul.f32 %v12271_v12, %v13343_v31 }
 0xa99   : > { %8271 = vset.pattern.permute.xlu1 %v13321_v11  ;;  %5788 = vrot.lane.b32.xlu0 %v5746_v36, %s8433_s2  ;;  %v13348_v36 = vld [vmem:[#allocation16_spill] sm:$0xff] }
 0xa9a   : > { %5937 = vperm.xlu1 %8271, %v5899_v0  }
 0xa9b   : > { %v5460_v13 = vpop.permute.xlu0 %5459 }
 0xa9c   : > { %v12269_v28 = vpop.permute.xlu1 %5912 }
 0xa9e   : > { %5942 = vperm.xlu1 %8271, %v5900_v15  }
 0xaa0   : > { %v5664_v14 = vpop.permute.xlu0 %5663 }
 0xaa1   : > { %v5719_v2 = vpop.permute.xlu1 %5718  ;;  %v5737_v0 = vmul.f32 %v5664_v14, %v13348_v36 }
 0xaa2   : > { %v5748_v7 = vmul.f32 %v5719_v2, %v13346_v61  ;;  %8274 = vset.pattern.permute.xlu1 %v13314_v48 }
 0xaa3   : > { %5239 = vperm.xlu1 %8274, %v5201_v30  }
 0xaa4   : > { %5792 = vrot.lane.b32.xlu0 %v5748_v7, %s8433_s2 }
 0xaa6   : > { %v5963_v63 = vpop.permute.xlu1 %5962  ;;  %v5729_v15 = vpop.permute.xlu0 %5728 }
 0xaa7   : > { %5244 = vperm.xlu1 %8274, %v5202_v18   ;;  %v6000_v10 = vmul.f32 %v5963_v63, %v13344_v37  ;;  %v5493_v63 = vmul.f32 %v5460_v13, %v13350_v19 }
 0xaa8   : > { %6040 = vrot.lane.b32.xlu0 %v5999_v21, %s8434_s25 }
 0xaaa   : > { %v5973_v24 = vpop.permute.xlu1 %5972 }
 0xaab   : > { %5289 = vperm.xlu1 %8274, %v5211_v54   ;;  %v6002_v58 = vmul.f32 %v5973_v24, %v13346_v61  ;;  %v5978_v12 = vpop.permute.xlu0 %5977 }
 0xaac   : > { %v6003_v43 = vmul.f32 %v5978_v12, %v13352_v23 }
 0xaaf   : > { %v12290_v52 = vpop.permute.xlu1 %5214  ;;  %8275 = vset.pattern.permute.xlu1 %v13317_v50  ;;  %v5901_v50 = vmax.f32 %v5885_v8, 0.0 }
 0xab0   : > { %5439 = vperm.xlu1 %8275, %v5393_v62   ;;  %v12337_v44 = vpop.permute.xlu0 %5224 }
 0xab3   : > { %v12296_v34 = vpop.permute.xlu1 %5264 }
 0xab4   : > { %8276 = vset.pattern.permute.xlu1 %v13320_v33  ;;  %v5744_v33 = vmul.f32 %v12177_v25, %v13340_v53  ;;  %v5990_v25 = vmul.f32 %v12269_v28, %v13342_v51  ;;  %v12344_v21 = vpop.permute.xlu0 %5234 }
 0xab5   : > { %5693 = vperm.xlu1 %8276, %v5647_v41  }
 0xab7   : > { %v12301_v5 = vpop.permute.xlu1 %5259 }
 0xab8   : > { %v12350_v24 = vpop.permute.xlu0 %5269 }
 0xab9   : > { %8277 = vset.pattern.permute.xlu1 %v13321_v11  ;;  %v5492_v11 = vmul.f32 %v12241_v22, %v13344_v37 }
 0xaba   : > { %5947 = vperm.xlu1 %8277, %v5901_v50  }
 0xabc   : > { %v5415_v27 = vpop.permute.xlu1 %5414  ;;  %v12358_v9 = vpop.permute.xlu0 %5279 }
 0xabd   : > { %v5484_v30 = vmul.f32 %v5415_v27, %v13347_v26 }
 0xabe   : > { %8278 = vset.pattern.permute.xlu1 %v13314_v48 }
 0xabf   : > { %5249 = vperm.xlu1 %8278, %v5203_v39   ;;  %v5750_v39 = vmul.f32 %v5729_v15, %v13351_v16  ;;  %v13356_v15 = vld [vmem:[#allocation14_spill] sm:$0xff] }
 0xac0   : > { %v5410_v4 = vpop.permute.xlu1 %5409  ;;  %v12363_v8 = vpop.permute.xlu0 %5284 }
 0xac1   : > { %v5483_v46 = vmul.f32 %v5410_v4, %v13348_v36 }
 0xac3   : > { %5784 = vrot.lane.b32.xlu1 %v5744_v33, %s8433_s2  ;;  %v13353_v33 = vld [vmem:[#allocation8_spill] sm:$0xff] }
 0xac4   : > { %v5425_v3 = vpop.permute.xlu1 %5424 }
 0xac5   : > { %v5486_v18 = vmul.f32 %v5425_v3, %v13349_v56  ;;  %v5435_v27 = vpop.permute.xlu0 %5434 }
 0xac7   : > { %5534 = vrot.lane.b32.xlu1 %v5492_v11, %s8432_s21 }
 0xac9   : > { %v5669_v48 = vpop.permute.xlu1 %5668 }
 0xaca   : > { %v5738_v42 = vmul.f32 %v5669_v48, %v13347_v26  ;;  %v5684_v11 = vpop.permute.xlu0 %5683 }
 0xacb   : > { %5538 = vrot.lane.b32.xlu1 %v5494_v20, %s8432_s21  ;;  %v13354_v20 = vld [vmem:[#allocation10_spill] sm:$0xff] }
 0xacc   : > { %5772 = vrot.lane.b32.xlu0 %v5738_v42, %s8433_s2  ;;  %v13355_v42 = vld [vmem:[#allocation13_spill] sm:$0xff] }
 0xacd   : > { %v5488_v14 = vmul.f32 %v5435_v27, %v13355_v42 }
 0xace   : > { %v5470_v22 = vpop.permute.xlu1 %5469 }
 0xacf   : > { %6022 = vrot.lane.b32.xlu1 %v5990_v25, %s8434_s25  ;;  %v5495_v29 = vmul.f32 %v5470_v22, %v13352_v23  ;;  %v5928_v25 = vpop.permute.xlu0 %5927 }
 0xad0   : > { %5770 = vrot.lane.b32.xlu0 %v5737_v0, %s8433_s2 }
 0xad3   : > { %v5679_v1 = vpop.permute.xlu1 %5678  ;;  %5786 = vrot.lane.b32.xlu1 %v5745_v45, %s8433_s2  ;;  %v5993_v45 = vmul.f32 %v5928_v25, %v13353_v33 }
 0xad4   : > { %v5740_v47 = vmul.f32 %v5679_v1, %v13349_v56  ;;  %v5741_v1 = vmul.f32 %v5684_v11, %v13354_v20  ;;  %v5300_v11 = vmul.f32 %v12235_v40, %v13340_v53 }
 0xad6   : > { %5776 = vrot.lane.b32.xlu0 %v5740_v47, %s8433_s2 }
 0xad7   : > { %v5714_v28 = vpop.permute.xlu1 %5713  ;;  %6042 = vrot.lane.b32.xlu1 %v6000_v10, %s8434_s25  ;;  %v5689_v10 = vpop.permute.xlu0 %5688 }
 0xad8   : > { %v5747_v35 = vmul.f32 %v5714_v28, %v13350_v19 }
 0xada   : > { %5790 = vrot.lane.b32.xlu0 %v5747_v35, %s8433_s2  ;;  %v5742_v35 = vmul.f32 %v5689_v10, %v13355_v42 }
 0xadb   : > { %6046 = vrot.lane.b32.xlu1 %v6002_v58, %s8434_s25 }
 0xadc   : > { %v5923_v2 = vpop.permute.xlu1 %5922 }
 0xadd   : > { %v5992_v62 = vmul.f32 %v5923_v2, %v13347_v26  ;;  %v5734_v2 = vpop.permute.xlu0 %5733 }
 0xadf   : > { %5518 = vrot.lane.b32.xlu1 %v5484_v30, %s8432_s21 }
 0xae1   : > { %v5475_v7 = vpop.permute.xlu1 %5474 }
 0xae2   : > { %v5496_v59 = vmul.f32 %v5475_v7, %v13351_v16  ;;  %v5751_v7 = vmul.f32 %v5734_v2, %v13356_v15 }
 0xae3   : > { %5516 = vrot.lane.b32.xlu1 %v5483_v46, %s8432_s21 }
 0xae4   : > { %5542 = vrot.lane.b32.xlu0 %v5496_v59, %s8432_s21 }
 0xae6   : > { %v5918_v49 = vpop.permute.xlu1 %5917 }
 0xae7   : > { %5522 = vrot.lane.b32.xlu1 %v5486_v18, %s8432_s21  ;;  %v5991_v6 = vmul.f32 %v5918_v49, %v13348_v36  ;;  %v5988_v18 = vpop.permute.xlu0 %5987 }
 0xaeb   : > { %v5724_v57 = vpop.permute.xlu1 %5723  ;;  %5536 = vrot.lane.b32.xlu1 %v5493_v63, %s8432_s21  ;;  %v12399_v63 = vpop.permute.xlu0 %5229 }
 0xaec   : > { %v5749_v54 = vmul.f32 %v5724_v57, %v13352_v23 }
 0xaee   : > { %5794 = vrot.lane.b32.xlu0 %v5749_v54, %s8433_s2 }
 0xaef   : > { %5540 = vrot.lane.b32.xlu1 %v5495_v29, %s8432_s21  ;;  %v5531_v54 = vpop.permute.xlu0 %5530 }
 0xaf0   : > { %v5933_v55 = vpop.permute.xlu1 %5932 }
 0xaf1   : > { %v5994_v38 = vmul.f32 %v5933_v55, %v13349_v56 }
 0xaf2   : > { %6048 = vrot.lane.b32.xlu0 %v6003_v43, %s8434_s25  ;;  %v13357_v43 = vld [vmem:[#allocation4_spill] sm:$0xff] }
 0xaf3   : > { %6026 = vrot.lane.b32.xlu1 %v5992_v62, %s8434_s25 }
 0xaf4   : > { %v5968_v17 = vpop.permute.xlu1 %5967 }
 0xaf5   : > { %v6001_v50 = vmul.f32 %v5968_v17, %v13350_v19  ;;  %v6039_v17 = vpop.permute.xlu0 %6038 }
 0xaf7   : > { %6024 = vrot.lane.b32.xlu1 %v5991_v6, %s8434_s25 }
 0xaf8   : > { %v5983_v41 = vpop.permute.xlu1 %5982 }
 0xafb   : > { %6030 = vrot.lane.b32.xlu1 %v5994_v38, %s8434_s25  ;;  %v6004_v38 = vmul.f32 %v5983_v41, %v13351_v16 }
 0xafd   : > { %v12368_v60 = vpop.permute.xlu1 %5219 }
 0xaff   : > { %6044 = vrot.lane.b32.xlu1 %v6001_v50, %s8434_s25 }
 0xb02   : > { %v5420_v4 = vpop.permute.xlu1 %5419 }
 0xb03   : > { %v5485_v3 = vmul.f32 %v5420_v4, %v13353_v33  ;;  %5796 = vrot.lane.b32.xlu1 %v5750_v39, %s8433_s2  ;;  %v5515_v39 = vpop.permute.xlu0 %5514  ;;  %v6005_v4 = vmul.f32 %v5988_v18, %v13356_v15 }
 0xb05   : > { %5520 = vrot.lane.b32.xlu0 %v5485_v3, %s8432_s21 }
 0xb06   : > { %v5430_v13 = vpop.permute.xlu1 %5429 }
 0xb07   : > { %v5487_v48 = vmul.f32 %v5430_v13, %v13354_v20  ;;  %v5769_v13 = vpop.permute.xlu0 %5768 }
 0xb09   : > { %5524 = vrot.lane.b32.xlu0 %v5487_v48, %s8432_s21  ;;  %v5570_v48 = vadd.f32 %v5531_v54, %v5300_v11 }
 0xb0b   : > { %v5674_v0 = vpop.permute.xlu1 %5673  ;;  %v5533_v25 = vpop.permute.xlu0 %5532 }
 0xb0c   : > { %v5739_v22 = vmul.f32 %v5674_v0, %v13353_v33 }
 0xb0d   : > { %5526 = vrot.lane.b32.xlu0 %v5488_v14, %s8432_s21 }
 0xb0e   : > { %5774 = vrot.lane.b32.xlu1 %v5739_v22, %s8433_s2 }
 0xb0f   : > { %v5789_v53 = vpop.permute.xlu0 %5788 }
 0xb10   : > { %v5480_v47 = vpop.permute.xlu1 %5479 }
 0xb11   : > { %6028 = vrot.lane.b32.xlu0 %v5993_v45, %s8434_s25  ;;  %v5497_v28 = vmul.f32 %v5480_v47, %v13356_v15  ;;  %v5292_v45 = vmul.f32 %v12290_v52, %v13342_v51  ;;  %v5301_v51 = vmul.f32 %v12301_v5, %v13343_v31 }
 0xb12   : > { %5778 = vrot.lane.b32.xlu1 %v5741_v1, %s8433_s2 }
 0xb13   : > { %v5562_v47 = vadd.f32 %v5515_v39, %v5292_v45  ;;  %v5571_v52 = vadd.f32 %v5533_v25, %v5301_v51  ;;  %v5294_v39 = vmul.f32 %v12337_v44, %v13347_v26  ;;  %v5296_v45 = vmul.f32 %v12344_v21, %v13349_v56 }
 0xb15   : > { %v5938_v58 = vpop.permute.xlu1 %5937  ;;  %5544 = vrot.lane.b32.xlu0 %v5497_v28, %s8432_s21  ;;  %v5816_v40 = vadd.f32 %v5769_v13, %v5562_v47  ;;  %v5302_v28 = vmul.f32 %v12296_v34, %v13344_v37 }
 0xb16   : > { %v5995_v12 = vmul.f32 %v5938_v58, %v13354_v20  ;;  %5780 = vrot.lane.b32.xlu1 %v5742_v35, %s8433_s2  ;;  %v5793_v35 = vpop.permute.xlu0 %5792 }
 0xb19   : > { %v5943_v30 = vpop.permute.xlu1 %5942  ;;  %6032 = vrot.lane.b32.xlu0 %v5995_v12, %s8434_s25 }
 0xb1a   : > { %v5996_v46 = vmul.f32 %v5943_v30, %v13355_v42  ;;  %v5304_v30 = vmul.f32 %v12308_v32, %v13346_v61 }
 0xb1c   : > { %6034 = vrot.lane.b32.xlu1 %v5996_v46, %s8434_s25  ;;  %v6041_v46 = vpop.permute.xlu0 %6040 }
 0xb1d   : > { %5798 = vrot.lane.b32.xlu0 %v5751_v7, %s8433_s2 }
 0xb1e   : > { %v12395_v59 = vpop.permute.xlu1 %5239 }
 0xb22   : > { %v12397_v49 = vpop.permute.xlu1 %5244 }
 0xb26   : > { %v12401_v57 = vpop.permute.xlu1 %5289 }
 0xb2b   : > { %v5440_v29 = vpop.permute.xlu1 %5439 }
 0xb2c   : > { %v5489_v55 = vmul.f32 %v5440_v29, %v13357_v43 }
 0xb2e   : > { %5528 = vrot.lane.b32.xlu1 %v5489_v55, %s8432_s21  ;;  %s8436_s21 = smov 64  }
 0xb30   : > { %v5694_v62 = vpop.permute.xlu1 %5693 }
 0xb31   : > { %v5743_v6 = vmul.f32 %v5694_v62, %v13357_v43 }
 0xb33   : > { %5782 = vrot.lane.b32.xlu0 %v5743_v6, %s8433_s2 }
 0xb35   : > { %v5948_v50 = vpop.permute.xlu1 %5947 }
 0xb36   : > { %v5997_v27 = vmul.f32 %v5948_v50, %v13357_v43 }
 0xb37   : > { %6050 = vrot.lane.b32.xlu0 %v6004_v38, %s8434_s25 }
 0xb38   : > { %6036 = vrot.lane.b32.xlu1 %v5997_v27, %s8434_s25 }
 0xb3a   : > { %v12412_v3 = vpop.permute.xlu1 %5249 }
 0xb3c   : > { %6052 = vrot.lane.b32.xlu1 %v6005_v4, %s8434_s25  ;;  %s7525_s25 = sshll.u32 %s13363_s24, 3 }
 0xb3d   : > { %s653_s26 = scalar_lea.vmem %s13097_s20, %s7525_s25 }
 0xb3e   : > { %v5785_v41 = vpop.permute.xlu1 %5784  ;;  %v5773_v29 = vpop.permute.xlu0 %5772 }
 0xb3f   : > { %v5824_v14 = vadd.f32 %v5785_v41, %v5570_v48  ;;  %v5293_v48 = vmul.f32 %v12368_v60, %v13348_v36  ;;  %v5305_v60 = vmul.f32 %v12358_v9, %v13352_v23  ;;  %v5295_v9 = vmul.f32 %v12399_v63, %v13353_v33 }
 0xb41   : > { %v12417_v0 = vadd.f32 %v6039_v17, %v5824_v14 }
 0xb42   : > { %v5535_v22 = vpop.permute.xlu1 %5534  ;;  %v5771_v5 = vpop.permute.xlu0 %5770 }
 0xb43   : > { %6118 = vrot.lane.b32.xlu0 %v12417_v0, %s8436_s21  ;;  %v5572_v12 = vadd.f32 %v5535_v22, %v5302_v28 }
 0xb45   : > { %v5826_v18 = vadd.f32 %v5789_v53, %v5572_v12  ;;  %v5303_v53 = vmul.f32 %v12350_v24, %v13350_v19 }
 0xb46   : > { %v5539_v1 = vpop.permute.xlu1 %5538 }
 0xb47   : > { %v5574_v7 = vadd.f32 %v5539_v1, %v5304_v30 }
 0xb48   : > { %v5777_v6 = vpop.permute.xlu0 %5776 }
 0xb49   : > { %v5828_v55 = vadd.f32 %v5793_v35, %v5574_v7 }
 0xb4a   : > { %v6023_v10 = vpop.permute.xlu1 %6022 }
 0xb4b   : > { %v12425_v58 = vadd.f32 %v6023_v10, %v5816_v40 }
 0xb4c   : > { %v5791_v50 = vpop.permute.xlu0 %5790 }
 0xb4d   : > { %6102 = vrot.lane.b32.xlu0 %v12425_v58, %s8436_s21 }
 0xb4e   : > { %v5787_v2 = vpop.permute.xlu1 %5786 }
 0xb4f   : > { %v5825_v37 = vadd.f32 %v5787_v2, %v5571_v52 }
 0xb51   : > { %v12437_v17 = vadd.f32 %v6041_v46, %v5825_v37 }
 0xb52   : > { %v6043_v54 = vpop.permute.xlu1 %6042 }
 0xb53   : > { %v12433_v34 = vadd.f32 %v6043_v54, %v5826_v18 }
 0xb55   : > { %6122 = vrot.lane.b32.xlu1 %v12433_v34, %s8436_s21 }
 0xb56   : > { %v6047_v62 = vpop.permute.xlu1 %6046  ;;  %v12447_v4 = vpop.permute.xlu0 %5542 }
 0xb57   : > { %v12439_v61 = vadd.f32 %v6047_v62, %v5828_v55  ;;  %v5297_v55 = vmul.f32 %v12395_v59, %v13354_v20 }
 0xb59   : > { %6126 = vrot.lane.b32.xlu0 %v12439_v61, %s8436_s21  ;;  %6120 = vrot.lane.b32.xlu1 %v12437_v17, %s8436_s21 }
 0xb5a   : > { %v5519_v31 = vpop.permute.xlu1 %5518 }
 0xb5b   : > { %v5564_v11 = vadd.f32 %v5519_v31, %v5294_v39  ;;  %v5298_v31 = vmul.f32 %v12397_v49, %v13355_v42  ;;  %v5306_v42 = vmul.f32 %v12363_v8, %v13351_v16 }
 0xb5d   : > { %v5818_v25 = vadd.f32 %v5773_v29, %v5564_v11  ;;  %v5299_v11 = vmul.f32 %v12412_v3, %v13357_v43 }
 0xb5e   : > { %v5517_v32 = vpop.permute.xlu1 %5516 }
 0xb5f   : > { %v5563_v41 = vadd.f32 %v5517_v32, %v5293_v48  ;;  %v5576_v48 = vadd.f32 %v12447_v4, %v5306_v42 }
 0xb60   : > { %v5795_v14 = vpop.permute.xlu0 %5794 }
 0xb61   : > { %v5817_v26 = vadd.f32 %v5771_v5, %v5563_v41 }
 0xb62   : > { %v5523_v38 = vpop.permute.xlu1 %5522 }
 0xb63   : > { %v5566_v47 = vadd.f32 %v5523_v38, %v5296_v45 }
 0xb64   : > { %v6049_v40 = vpop.permute.xlu0 %6048 }
 0xb65   : > { %v5820_v56 = vadd.f32 %v5777_v6, %v5566_v47 }
 0xb66   : > { %v5537_v27 = vpop.permute.xlu1 %5536 }
 0xb67   : > { %v5573_v10 = vadd.f32 %v5537_v27, %v5303_v53 }
 0xb69   : > { %v5827_v19 = vadd.f32 %v5791_v50, %v5573_v10 }
 0xb6a   : > { %v5541_v13 = vpop.permute.xlu1 %5540 }
 0xb6b   : > { %v5575_v28 = vadd.f32 %v5541_v13, %v5305_v60 }
 0xb6d   : > { %v5829_v2 = vadd.f32 %v5795_v14, %v5575_v28 }
 0xb6e   : > { %v6027_v22 = vpop.permute.xlu1 %6026 }
 0xb6f   : > { %v12453_v1 = vadd.f32 %v6027_v22, %v5818_v25  ;;  %v12475_v52 = vadd.f32 %v6049_v40, %v5829_v2  ;;  %v5307_v25 = vmul.f32 %v12401_v57, %v13356_v15 }
 0xb71   : > { %6106 = vrot.lane.b32.xlu1 %v12453_v1, %s8436_s21 }
 0xb72   : > { %v6025_v44 = vpop.permute.xlu1 %6024 }
 0xb73   : > { %v12459_v36 = vadd.f32 %v6025_v44, %v5817_v26 }
 0xb75   : > { %6104 = vrot.lane.b32.xlu1 %v12459_v36, %s8436_s21 }
 0xb76   : > { %v6031_v21 = vpop.permute.xlu1 %6030 }
 0xb77   : > { %v12465_v35 = vadd.f32 %v6031_v21, %v5820_v56  ;;  %v5521_v12 = vpop.permute.xlu0 %5520 }
 0xb78   : > { %v5565_v7 = vadd.f32 %v5521_v12, %v5295_v9 }
 0xb79   : > { %6110 = vrot.lane.b32.xlu0 %v12465_v35, %s8436_s21 }
 0xb7a   : > { %v6045_v24 = vpop.permute.xlu1 %6044 }
 0xb7b   : > { %v12469_v30 = vadd.f32 %v6045_v24, %v5827_v19  ;;  %v5525_v51 = vpop.permute.xlu0 %5524 }
 0xb7c   : > { %v5567_v63 = vadd.f32 %v5525_v51, %v5297_v55 }
 0xb7d   : > { %6124 = vrot.lane.b32.xlu0 %v12469_v30, %s8436_s21 }
 0xb7e   : > { %v5797_v23 = vpop.permute.xlu1 %5796 }
 0xb7f   : > { %v5527_v46 = vpop.permute.xlu0 %5526  ;;  %v5830_v14 = vadd.f32 %v5797_v23, %v5576_v48 }
 0xb80   : > { %v5568_v6 = vadd.f32 %v5527_v46, %v5298_v31 }
 0xb81   : > { %6128 = vrot.lane.b32.xlu0 %v12475_v52, %s8436_s21 }
 0xb82   : > { %v5775_v18 = vpop.permute.xlu1 %5774 }
 0xb83   : > { %v5819_v54 = vadd.f32 %v5775_v18, %v5565_v7  ;;  %v6029_v37 = vpop.permute.xlu0 %6028 }
 0xb85   : > { %v12479_v29 = vadd.f32 %v6029_v37, %v5819_v54 }
 0xb86   : > { %v5779_v62 = vpop.permute.xlu1 %5778 }
 0xb87   : > { %6108 = vrot.lane.b32.xlu0 %v12479_v29, %s8436_s21  ;;  %v5545_v33 = vpop.permute.xlu0 %5544  ;;  %v5821_v5 = vadd.f32 %v5779_v62, %v5567_v63 }
 0xb88   : > { %v5577_v44 = vadd.f32 %v5545_v33, %v5307_v25 }
 0xb8a   : > { %v5781_v32 = vpop.permute.xlu1 %5780 }
 0xb8b   : > { %v6033_v38 = vpop.permute.xlu0 %6032  ;;  %v5822_v27 = vadd.f32 %v5781_v32, %v5568_v6 }
 0xb8c   : > { %v12487_v50 = vadd.f32 %v6033_v38, %v5821_v5 }
 0xb8e   : > { %v6035_v39 = vpop.permute.xlu1 %6034  ;;  %6112 = vrot.lane.b32.xlu1 %v12487_v50, %s8436_s21 }
 0xb8f   : > { %v12491_v20 = vadd.f32 %v6035_v39, %v5822_v27  ;;  %v5799_v59 = vpop.permute.xlu0 %5798 }
 0xb90   : > { %v5831_v16 = vadd.f32 %v5799_v59, %v5577_v44 }
 0xb92   : > { %6114 = vrot.lane.b32.xlu1 %v12491_v20, %s8436_s21 }
 0xba0   : > { %v5529_v49 = vpop.permute.xlu1 %5528 }
 0xba1   : > { %v5569_v41 = vadd.f32 %v5529_v49, %v5299_v11 }
 0xba5   : > { %v5783_v13 = vpop.permute.xlu0 %5782 }
 0xba6   : > { %v5823_v22 = vadd.f32 %v5783_v13, %v5569_v41 }
 0xba9   : > { %v6051_v45 = vpop.permute.xlu0 %6050 }
 0xbaa   : > { %v12502_v47 = vadd.f32 %v6051_v45, %v5830_v14  ;;  %v6037_v26 = vpop.permute.xlu1 %6036 }
 0xbab   : > { %v12504_v53 = vadd.f32 %v6037_v26, %v5823_v22 }
 0xbac   : > { %6130 = vrot.lane.b32.xlu0 %v12502_v47, %s8436_s21 }
 0xbad   : > { %6116 = vrot.lane.b32.xlu1 %v12504_v53, %s8436_s21 }
 0xbae   : > { %v6053_v8 = vpop.permute.xlu1 %6052 }
 0xbaf   : > { %v12510_v43 = vadd.f32 %v6053_v8, %v5831_v16 }
 0xbb1   : > { %6132 = vrot.lane.b32.xlu1 %v12510_v43, %s8436_s21 }
 0xbb5   : > { %v6119_v15 = vpop.permute.xlu0 %6118 }
 0xbb6   : > { %v6174_v57 = vsel %vm3127_vm2, %v6119_v15, 0.0 }
 0xbbf   : > { %v6103_v3 = vpop.permute.xlu0 %6102 }
 0xbc0   : > { %v6150_v4 = vsel %vm3127_vm2, %v6103_v3, 0.0 }
 0xbc7   : > { %v6123_v40 = vpop.permute.xlu1 %6122 }
 0xbc8   : > { %v6180_v56 = vsel %vm3127_vm2, %v6123_v40, 0.0 }
 0xbcb   : > { %6175 = vadd.xlane.f32.xlu0 %v6174_v57  ;;  %v6127_v60 = vpop.permute.xlu0 %6126  ;;  %v6121_v21 = vpop.permute.xlu1 %6120 }
 0xbcc   : > { %v6186_v10 = vsel %vm3127_vm2, %v6127_v60, 0.0  ;;  %v6177_v28 = vsel %vm3127_vm2, %v6121_v21, 0.0 }
 0xbcf   : > { %6151 = vadd.xlane.f32.xlu0 %v6150_v4 }
 0xbd3   : > { %6187 = vadd.xlane.f32.xlu0 %v6186_v10 }
 0xbd5   : > { %6181 = vadd.xlane.f32.xlu1 %v6180_v56 }
 0xbd9   : > { %6178 = vadd.xlane.f32.xlu1 %v6177_v28 }
 0xbe3   : > { %v6107_v12 = vpop.permute.xlu1 %6106 }
 0xbe4   : > { %v6156_v19 = vsel %vm3127_vm2, %v6107_v12, 0.0 }
 0xbe5   : > { %6157 = vadd.xlane.f32.xlu1 %v6156_v19 }
 0xbe7   : > { %v6105_v24 = vpop.permute.xlu1 %6104 }
 0xbe8   : > { %v6153_v2 = vsel %vm3127_vm2, %v6105_v24, 0.0 }
 0xbe9   : > { %6154 = vadd.xlane.f32.xlu0 %v6153_v2 }
 0xbeb   : > { %v6111_v51 = vpop.permute.xlu0 %6110 }
 0xbec   : > { %v6162_v23 = vsel %vm3127_vm2, %v6111_v51, 0.0 }
 0xbed   : > { %6163 = vadd.xlane.f32.xlu0 %v6162_v23 }
 0xbef   : > { %v6125_v9 = vpop.permute.xlu0 %6124 }
 0xbf0   : > { %v6183_v46 = vsel %vm3127_vm2, %v6125_v9, 0.0 }
 0xbf1   : > { %6184 = vadd.xlane.f32.xlu0 %v6183_v46 }
 0xbf3   : > { %v6129_v7 = vpop.permute.xlu0 %6128 }
 0xbf4   : > { %v6189_v18 = vsel %vm3127_vm2, %v6129_v7, 0.0 }
 0xbf5   : > { %6190 = vadd.xlane.f32.xlu0 %v6189_v18 }
 0xbf9   : > { %v6109_v54 = vpop.permute.xlu0 %6108 }
 0xbfa   : > { %v6159_v37 = vsel %vm3127_vm2, %v6109_v54, 0.0 }
 0xbfb   : > { %6160 = vadd.xlane.f32.xlu0 %v6159_v37 }
 0xc00   : > { %v6113_v55 = vpop.permute.xlu1 %6112 }
 0xc01   : > { %v6165_v62 = vsel %vm3127_vm2, %v6113_v55, 0.0 }
 0xc02   : > { %6166 = vadd.xlane.f32.xlu1 %v6165_v62 }
 0xc04   : > { %v6115_v33 = vpop.permute.xlu1 %6114 }
 0xc05   : > { %v6168_v63 = vsel %vm3127_vm2, %v6115_v33, 0.0 }
 0xc06   : > { %6169 = vadd.xlane.f32.xlu1 %v6168_v63 }
 0xc1e   : > { %v6131_v31 = vpop.permute.xlu0 %6130 }
 0xc1f   : > { %v6192_v5 = vsel %vm3127_vm2, %v6131_v31, 0.0  ;;  %v6117_v32 = vpop.permute.xlu1 %6116 }
 0xc20   : > { %v6171_v6 = vsel %vm3127_vm2, %v6117_v32, 0.0  ;;  %6193 = vadd.xlane.f32.xlu0 %v6192_v5 }
 0xc21   : > { %6172 = vadd.xlane.f32.xlu1 %v6171_v6 }
 0xc23   : > { %v6133_v38 = vpop.permute.xlu1 %6132 }
 0xc24   : > { %v6195_v27 = vsel %vm3127_vm2, %v6133_v38, 0.0 }
 0xc25   : > { %6196 = vadd.xlane.f32.xlu1 %v6195_v27 }
 0xc54   : > { %v6176_v39 = vpop.xlane.xlu0 %6175 }
 0xc55   : > { %v6207_v59 = vmul.f32 0.0625, %v6176_v39 }
 0xc57   : > { %v12531_v42 = vsub.f32 %v12417_v0, %v6207_v59 }
 0xc58   : > { %v6152_v49 = vpop.xlane.xlu0 %6151 }
 0xc59   : > { %v6239_v11 = vmul.f32 %v12531_v42, %v12531_v42  ;;  %v6199_v13 = vmul.f32 0.0625, %v6152_v49 }
 0xc5b   : > { %v12536_v48 = vsub.f32 %v12425_v58, %v6199_v13  ;;  %6279 = vrot.lane.b32.xlu1 %v6239_v11, %s8436_s21 }
 0xc5c   : > { %v6188_v41 = vpop.xlane.xlu0 %6187 }
 0xc5d   : > { %v6231_v14 = vmul.f32 %v12536_v48, %v12536_v48  ;;  %v6211_v25 = vmul.f32 0.0625, %v6188_v41 }
 0xc5e   : > { %v6182_v22 = vpop.xlane.xlu1 %6181 }
 0xc5f   : > { %v12542_v45 = vsub.f32 %v12439_v61, %v6211_v25  ;;  %v6209_v0 = vmul.f32 0.0625, %v6182_v22  ;;  %6263 = vrot.lane.b32.xlu0 %v6231_v14, %s8436_s21 }
 0xc61   : > { %v6243_v26 = vmul.f32 %v12542_v45, %v12542_v45  ;;  %v12548_v58 = vsub.f32 %v12433_v34, %v6209_v0 }
 0xc62   : > { %v6179_v44 = vpop.xlane.xlu1 %6178 }
 0xc63   : > { %v6241_v16 = vmul.f32 %v12548_v58, %v12548_v58  ;;  %v6208_v8 = vmul.f32 0.0625, %v6179_v44  ;;  %6287 = vrot.lane.b32.xlu0 %v6243_v26, %s8436_s21 }
 0xc65   : > { %v12554_v15 = vsub.f32 %v12437_v17, %v6208_v8  ;;  %6283 = vrot.lane.b32.xlu1 %v6241_v16, %s8436_s21 }
 0xc67   : > { %v6240_v61 = vmul.f32 %v12554_v15, %v12554_v15 }
 0xc69   : > { %6281 = vrot.lane.b32.xlu1 %v6240_v61, %s8436_s21 }
 0xc6e   : > { %v6158_v57 = vpop.xlane.xlu1 %6157 }
 0xc6f   : > { %v6201_v34 = vmul.f32 0.0625, %v6158_v57 }
 0xc71   : > { %v12561_v3 = vsub.f32 %v12453_v1, %v6201_v34 }
 0xc72   : > { %v6155_v4 = vpop.xlane.xlu0 %6154 }
 0xc73   : > { %v6233_v40 = vmul.f32 %v12561_v3, %v12561_v3  ;;  %v6200_v60 = vmul.f32 0.0625, %v6155_v4 }
 0xc75   : > { %v12566_v17 = vsub.f32 %v12459_v36, %v6200_v60  ;;  %6267 = vrot.lane.b32.xlu1 %v6233_v40, %s8436_s21 }
 0xc76   : > { %v6164_v10 = vpop.xlane.xlu0 %6163 }
 0xc77   : > { %v6232_v56 = vmul.f32 %v12566_v17, %v12566_v17  ;;  %v6203_v21 = vmul.f32 0.0625, %v6164_v10 }
 0xc79   : > { %v12572_v28 = vsub.f32 %v12465_v35, %v6203_v21  ;;  %6265 = vrot.lane.b32.xlu1 %v6232_v56, %s8436_s21 }
 0xc7a   : > { %v6185_v1 = vpop.xlane.xlu0 %6184 }
 0xc7b   : > { %v6235_v12 = vmul.f32 %v12572_v28, %v12572_v28  ;;  %v6210_v19 = vmul.f32 0.0625, %v6185_v1 }
 0xc7d   : > { %v12578_v36 = vsub.f32 %v12469_v30, %v6210_v19  ;;  %6271 = vrot.lane.b32.xlu0 %v6235_v12, %s8436_s21 }
 0xc7e   : > { %v6191_v24 = vpop.xlane.xlu0 %6190 }
 0xc7f   : > { %v6242_v2 = vmul.f32 %v12578_v36, %v12578_v36  ;;  %v6212_v51 = vmul.f32 0.0625, %v6191_v24 }
 0xc81   : > { %v12584_v35 = vsub.f32 %v12475_v52, %v6212_v51  ;;  %6285 = vrot.lane.b32.xlu0 %v6242_v2, %s8436_s21 }
 0xc83   : > { %v6244_v23 = vmul.f32 %v12584_v35, %v12584_v35 }
 0xc84   : > { %v6161_v9 = vpop.xlane.xlu0 %6160 }
 0xc85   : > { %v6202_v46 = vmul.f32 0.0625, %v6161_v9  ;;  %6289 = vrot.lane.b32.xlu0 %v6244_v23, %s8436_s21 }
 0xc87   : > { %v12591_v30 = vsub.f32 %v12479_v29, %v6202_v46 }
 0xc89   : > { %v6234_v7 = vmul.f32 %v12591_v30, %v12591_v30 }
 0xc8b   : > { %v6167_v18 = vpop.xlane.xlu1 %6166  ;;  %6269 = vrot.lane.b32.xlu0 %v6234_v7, %s8436_s21  ;;  %v7714_v7 = vld [vmem:[%s13093_s16] ss:$0 sm:$0xff] }
 0xc8c   : > { %v6204_v52 = vmul.f32 0.0625, %v6167_v18  ;;  %v7715_v18 = vld [vmem:[%s13094_s17] ss:$0 sm:$0xff] }
 0xc8e   : > { %v12597_v54 = vsub.f32 %v12487_v50, %v6204_v52 }
 0xc8f   : > { %v6170_v37 = vpop.xlane.xlu1 %6169 }
 0xc90   : > { %v6236_v55 = vmul.f32 %v12597_v54, %v12597_v54  ;;  %v6205_v62 = vmul.f32 0.0625, %v6170_v37 }
 0xc92   : > { %v12602_v33 = vsub.f32 %v12491_v20, %v6205_v62  ;;  %6273 = vrot.lane.b32.xlu1 %v6236_v55, %s8436_s21  ;;  %v7717_v55 = vld [vmem:[%s13095_s18 + $0x18] sm:$0xff] }
 0xc93   : > { %8065 = vmatprep.subr.mxu0 %v7717_v55 }
 0xc94   : > { %v6237_v29 = vmul.f32 %v12602_v33, %v12602_v33  ;;  %8066 = vmatpush3.msra.mxu0 %v7717_v55 }
 0xc96   : > { %6275 = vrot.lane.b32.xlu1 %v6237_v29, %s8436_s21 }
 0xca9   : > { %v6194_v63 = vpop.xlane.xlu0 %6193 }
 0xcaa   : > { %v6213_v31 = vmul.f32 0.0625, %v6194_v63  ;;  %v6173_v5 = vpop.xlane.xlu1 %6172 }
 0xcab   : > { %v6206_v50 = vmul.f32 0.0625, %v6173_v5 }
 0xcac   : > { %v12609_v32 = vsub.f32 %v12502_v47, %v6213_v31 }
 0xcad   : > { %v12612_v6 = vsub.f32 %v12504_v53, %v6206_v50 }
 0xcae   : > { %v6245_v20 = vmul.f32 %v12609_v32, %v12609_v32  ;;  %v6197_v38 = vpop.xlane.xlu1 %6196 }
 0xcaf   : > { %v6238_v27 = vmul.f32 %v12612_v6, %v12612_v6  ;;  %v6214_v39 = vmul.f32 0.0625, %v6197_v38 }
 0xcb0   : > { %6291 = vrot.lane.b32.xlu0 %v6245_v20, %s8436_s21 }
 0xcb1   : > { %v12620_v59 = vsub.f32 %v12510_v43, %v6214_v39  ;;  %6277 = vrot.lane.b32.xlu1 %v6238_v27, %s8436_s21 }
 0xcb3   : > { %v6246_v47 = vmul.f32 %v12620_v59, %v12620_v59 }
 0xcb5   : > { %6293 = vrot.lane.b32.xlu1 %v6246_v47, %s8436_s21 }
 0xccd   : > { %v6280_v53 = vpop.permute.xlu1 %6279 }
 0xcce   : > { %v6335_v49 = vsel %vm3127_vm2, %v6280_v53, 0.0 }
 0xccf   : > { %6336 = vadd.xlane.f32.xlu0 %v6335_v49 }
 0xcd1   : > { %v6264_v11 = vpop.permute.xlu0 %6263 }
 0xcd2   : > { %v6311_v13 = vsel %vm3127_vm2, %v6264_v11, 0.0 }
 0xcd3   : > { %6312 = vadd.xlane.f32.xlu0 %v6311_v13 }
 0xcd5   : > { %v6288_v41 = vpop.permute.xlu0 %6287 }
 0xcd6   : > { %v6347_v14 = vsel %vm3127_vm2, %v6288_v41, 0.0 }
 0xcd7   : > { %v6284_v43 = vpop.permute.xlu1 %6283  ;;  %6348 = vadd.xlane.f32.xlu0 %v6347_v14 }
 0xcd8   : > { %v6341_v25 = vsel %vm3127_vm2, %v6284_v43, 0.0 }
 0xcd9   : > { %6342 = vadd.xlane.f32.xlu1 %v6341_v25 }
 0xcdb   : > { %v6282_v22 = vpop.permute.xlu1 %6281 }
 0xcdc   : > { %v6338_v0 = vsel %vm3127_vm2, %v6282_v22, 0.0 }
 0xcdd   : > { %6339 = vadd.xlane.f32.xlu1 %v6338_v0 }
 0xce7   : > { %v6268_v26 = vpop.permute.xlu1 %6267 }
 0xce8   : > { %v6317_v44 = vsel %vm3127_vm2, %v6268_v26, 0.0 }
 0xce9   : > { %6318 = vadd.xlane.f32.xlu1 %v6317_v44 }
 0xceb   : > { %v6266_v16 = vpop.permute.xlu1 %6265 }
 0xcec   : > { %v6314_v8 = vsel %vm3127_vm2, %v6266_v16, 0.0 }
 0xced   : > { %6315 = vadd.xlane.f32.xlu0 %v6314_v8 }
 0xcef   : > { %v6272_v61 = vpop.permute.xlu0 %6271 }
 0xcf0   : > { %v6323_v57 = vsel %vm3127_vm2, %v6272_v61, 0.0 }
 0xcf1   : > { %6324 = vadd.xlane.f32.xlu0 %v6323_v57 }
 0xcf3   : > { %v6286_v34 = vpop.permute.xlu0 %6285 }
 0xcf4   : > { %v6344_v4 = vsel %vm3127_vm2, %v6286_v34, 0.0 }
 0xcf5   : > { %6345 = vadd.xlane.f32.xlu0 %v6344_v4 }
 0xcf7   : > { %v6290_v40 = vpop.permute.xlu0 %6289 }
 0xcf8   : > { %v6350_v60 = vsel %vm3127_vm2, %v6290_v40, 0.0 }
 0xcf9   : > { %6351 = vadd.xlane.f32.xlu0 %v6350_v60 }
 0xcfd   : > { %v6270_v12 = vpop.permute.xlu0 %6269 }
 0xcfe   : > { %v6320_v51 = vsel %vm3127_vm2, %v6270_v12, 0.0 }
 0xd04   : > { %v6274_v10 = vpop.permute.xlu1 %6273 }
 0xd05   : > { %v6326_v56 = vsel %vm3127_vm2, %v6274_v10, 0.0 }
 0xd06   : > { %6327 = vadd.xlane.f32.xlu1 %v6326_v56 }
 0xd08   : > { %v6276_v21 = vpop.permute.xlu1 %6275 }
 0xd09   : > { %v6329_v1 = vsel %vm3127_vm2, %v6276_v21, 0.0 }
 0xd0a   : > { %6330 = vadd.xlane.f32.xlu1 %v6329_v1 }
 0xd22   : > { %v6292_v19 = vpop.permute.xlu0 %6291 }
 0xd23   : > { %v6353_v24 = vsel %vm3127_vm2, %v6292_v19, 0.0  ;;  %v6278_v2 = vpop.permute.xlu1 %6277 }
 0xd24   : > { %6354 = vadd.xlane.f32.xlu0 %v6353_v24  ;;  %v6332_v46 = vsel %vm3127_vm2, %v6278_v2, 0.0 }
 0xd27   : > { %v6294_v23 = vpop.permute.xlu1 %6293 }
 0xd28   : > { %v6356_v9 = vsel %vm3127_vm2, %v6294_v23, 0.0  ;;  %6321 = vadd.xlane.f32.xlu0 %v6320_v51 }
 0xd29   : > { %6357 = vadd.xlane.f32.xlu1 %v6356_v9 }
 0xd2d   : > { %6333 = vadd.xlane.f32.xlu1 %v6332_v46 }
 0xd3e   : > { %6429 = vrot.lane.b32.xlu0 %v7714_v7, %s8436_s21  ;;  %6454 = vrot.lane.b32.xlu1 %v7715_v18, %s8436_s21 }
 0xd58   : > { %v6337_v52 = vpop.xlane.xlu0 %6336 }
 0xd59   : > { %v6367_v20 = vmul.f32 0.0625, %v6337_v52 }
 0xd5b   : > { %v6383_v49 = vadd.f32 1e-05, %v6367_v20 }
 0xd5c   : > { %v6313_v37 = vpop.xlane.xlu0 %6312 }
 0xd5d   : > { %v6359_v27 = vmul.f32 0.0625, %v6313_v37  ;;  %8376 = vrsqrt.f32 %v6383_v49 }
 0xd5f   : > { %v6375_v13 = vadd.f32 1e-05, %v6359_v27 }
 0xd60   : > { %v6349_v62 = vpop.xlane.xlu0 %6348 }
 0xd61   : > { %v6371_v39 = vmul.f32 0.0625, %v6349_v62  ;;  %8378 = vrsqrt.f32 %v6375_v13 }
 0xd62   : > { %v6343_v29 = vpop.xlane.xlu1 %6342 }
 0xd63   : > { %v6369_v53 = vmul.f32 0.0625, %v6343_v29  ;;  %v6387_v14 = vadd.f32 1e-05, %v6371_v39 }
 0xd65   : > { %v6385_v22 = vadd.f32 1e-05, %v6369_v53  ;;  %8380 = vrsqrt.f32 %v6387_v14 }
 0xd66   : > { %v6340_v31 = vpop.xlane.xlu1 %6339 }
 0xd67   : > { %v6368_v11 = vmul.f32 0.0625, %v6340_v31  ;;  %8382 = vrsqrt.f32 %v6385_v22 }
 0xd69   : > { %v6384_v26 = vadd.f32 1e-05, %v6368_v11 }
 0xd6a   : > { %v8377_v1 = vpop.eup %8376 }
 0xd6b   : > { %8384 = vrsqrt.f32 %v6384_v26  ;;  %v6415_v31 = vmul.f32 %v8377_v1, %v12531_v42 }
 0xd6e   : > { %v8379_v12 = vpop.eup %8378 }
 0xd72   : > { %v6319_v50 = vpop.xlane.xlu1 %6318  ;;  %v8381_v19 = vpop.eup %8380 }
 0xd73   : > { %v6361_v41 = vmul.f32 0.0625, %v6319_v50 }
 0xd74   : > { %v8383_v24 = vpop.eup %8382 }
 0xd75   : > { %v6377_v8 = vadd.f32 1e-05, %v6361_v41  ;;  %v6417_v27 = vmul.f32 %v8383_v24, %v12548_v58 }
 0xd76   : > { %v6316_v63 = vpop.xlane.xlu0 %6315 }
 0xd77   : > { %v6360_v43 = vmul.f32 0.0625, %v6316_v63  ;;  %8386 = vrsqrt.f32 %v6377_v8 }
 0xd78   : > { %v8385_v2 = vpop.eup %8384 }
 0xd79   : > { %v6376_v57 = vadd.f32 1e-05, %v6360_v43  ;;  %v6416_v39 = vmul.f32 %v8385_v2, %v12554_v15 }
 0xd7a   : > { %v6325_v5 = vpop.xlane.xlu0 %6324 }
 0xd7b   : > { %v6363_v0 = vmul.f32 0.0625, %v6325_v5  ;;  %8388 = vrsqrt.f32 %v6376_v57  ;;  %v6407_v5 = vmul.f32 %v8379_v12, %v12536_v48 }
 0xd7d   : > { %v6379_v4 = vadd.f32 1e-05, %v6363_v0 }
 0xd7e   : > { %v6346_v38 = vpop.xlane.xlu0 %6345 }
 0xd7f   : > { %v6370_v44 = vmul.f32 0.0625, %v6346_v38  ;;  %8390 = vrsqrt.f32 %v6379_v4  ;;  %v6419_v38 = vmul.f32 %v8381_v19, %v12542_v45 }
 0xd81   : > { %v6386_v60 = vadd.f32 1e-05, %v6370_v44 }
 0xd82   : > { %v6352_v25 = vpop.xlane.xlu0 %6351 }
 0xd83   : > { %v6372_v61 = vmul.f32 0.0625, %v6352_v25  ;;  %8392 = vrsqrt.f32 %v6386_v60 }
 0xd84   : > { %v8387_v23 = vpop.eup %8386 }
 0xd85   : > { %v6388_v10 = vadd.f32 1e-05, %v6372_v61  ;;  %v6409_v53 = vmul.f32 %v8387_v23, %v12561_v3 }
 0xd87   : > { %8394 = vrsqrt.f32 %v6388_v10 }
 0xd88   : > { %v8389_v46 = vpop.eup %8388 }
 0xd89   : > { %v6408_v49 = vmul.f32 %v8389_v46, %v12566_v17 }
 0xd8c   : > { %v8391_v7 = vpop.eup %8390 }
 0xd8d   : > { %v6411_v11 = vmul.f32 %v8391_v7, %v12572_v28 }
 0xd8f   : > { %v6328_v47 = vpop.xlane.xlu1 %6327 }
 0xd90   : > { %v6364_v34 = vmul.f32 0.0625, %v6328_v47  ;;  %v8393_v52 = vpop.eup %8392 }
 0xd91   : > { %v6418_v42 = vmul.f32 %v8393_v52, %v12578_v36 }
 0xd92   : > { %v6380_v56 = vadd.f32 1e-05, %v6364_v34 }
 0xd93   : > { %v6331_v16 = vpop.xlane.xlu1 %6330 }
 0xd94   : > { %v6365_v40 = vmul.f32 0.0625, %v6331_v16  ;;  %8396 = vrsqrt.f32 %v6380_v56  ;;  %v8395_v55 = vpop.eup %8394 }
 0xd95   : > { %v6420_v48 = vmul.f32 %v8395_v55, %v12584_v35 }
 0xd96   : > { %v6381_v21 = vadd.f32 1e-05, %v6365_v40 }
 0xd98   : > { %8398 = vrsqrt.f32 %v6381_v21 }
 0xda1   : > { %v8397_v63 = vpop.eup %8396 }
 0xda2   : > { %v6412_v45 = vmul.f32 %v8397_v63, %v12597_v54 }
 0xda5   : > { %v8399_v20 = vpop.eup %8398 }
 0xda6   : > { %v6413_v15 = vmul.f32 %v8399_v20, %v12602_v33 }
 0xdad   : > { %v6355_v51 = vpop.xlane.xlu0 %6354 }
 0xdae   : > { %v6373_v9 = vmul.f32 0.0625, %v6355_v51 }
 0xdb0   : > { %v6389_v18 = vadd.f32 1e-05, %v6373_v9 }
 0xdb1   : > { %v6322_v37 = vpop.xlane.xlu0 %6321 }
 0xdb2   : > { %8400 = vrsqrt.f32 %v6389_v18  ;;  %v6362_v62 = vmul.f32 0.0625, %v6322_v37  ;;  %v6358_v29 = vpop.xlane.xlu1 %6357 }
 0xdb3   : > { %v6374_v50 = vmul.f32 0.0625, %v6358_v29 }
 0xdb4   : > { %v6378_v47 = vadd.f32 1e-05, %v6362_v62 }
 0xdb5   : > { %v6390_v13 = vadd.f32 1e-05, %v6374_v50  ;;  %v12661_v41 = vpop.permute.xlu0 %6429 }
 0xdb6   : > { %8402 = vrsqrt.f32 %v6378_v47  ;;  %v6334_v58 = vpop.xlane.xlu1 %6333  ;;  %v6440_v3 = vmul.f32 %v12661_v41, %v6415_v31  ;;  %v6441_v17 = vmul.f32 %v12661_v41, %v6416_v39  ;;  %v6442_v28 = vmul.f32 %v12661_v41, %v6417_v27  ;;  %v6490_v27 = vld [vmem:[%s13095_s18 + $0x8] sm:$0xff] }
 0xdb7   : > { %8404 = vrsqrt.f32 %v6390_v13  ;;  %v6366_v14 = vmul.f32 0.0625, %v6334_v58  ;;  %v6443_v43 = vmul.f32 %v12661_v41, %v6418_v42  ;;  %v6444_v36 = vmul.f32 %v12661_v41, %v6419_v38  ;;  %v7716_v38 = vld [vmem:[%s13095_s18 + $0x10] sm:$0xff]  ;;  %8072 = vmatprep.subr.mxu1 %v6490_v27 }
 0xdb8   : > { %v6445_v35 = vmul.f32 %v12661_v41, %v6420_v48  ;;  %v6432_v54 = vmul.f32 %v12661_v41, %v6407_v5  ;;  %v6433_v22 = vmul.f32 %v12661_v41, %v6408_v49  ;;  %v6434_v0 = vmul.f32 %v12661_v41, %v6409_v53  ;;  %8067 = vmatprep.subr.mxu0 %v7716_v38 }
 0xdb9   : > { %v6382_v25 = vadd.f32 1e-05, %v6366_v14  ;;  %v6436_v26 = vmul.f32 %v12661_v41, %v6411_v11  ;;  %v6437_v44 = vmul.f32 %v12661_v41, %v6412_v45  ;;  %v6438_v16 = vmul.f32 %v12661_v41, %v6413_v15  ;;  %v6489_v15 = vld [vmem:[%s13095_s18] sm:$0xff]  ;;  %8068 = vmatpush3.msra.mxu0 %v7716_v38  ;;  %8073 = vmatpush3.msra.mxu1 %v6490_v27 }
 0xdba   : > { %v12675_v33 = vpop.permute.xlu1 %6454  ;;  %8074 = vmatprep.subr.mxu1 %v6489_v15 }
 0xdbb   : > { %8406 = vrsqrt.f32 %v6382_v25  ;;  %v6465_v8 = vadd.f32 %v12675_v33, %v6440_v3  ;;  %v6466_v61 = vadd.f32 %v12675_v33, %v6441_v17  ;;  %v6467_v57 = vadd.f32 %v12675_v33, %v6442_v28  ;;  %8075 = vmatpush3.msra.mxu1 %v6489_v15 }
 0xdbc   : > { %v6468_v34 = vadd.f32 %v12675_v33, %v6443_v43  ;;  %v6469_v4 = vadd.f32 %v12675_v33, %v6444_v36  ;;  %v6470_v40 = vadd.f32 %v12675_v33, %v6445_v35  ;;  %v6457_v60 = vadd.f32 %v12675_v33, %v6432_v54 }
 0xdbd   : > { %v12688_v10 = vmax.f32 %v6465_v8, 0.0  ;;  %v12690_v56 = vmax.f32 %v6466_v61, 0.0  ;;  %v12692_v21 = vmax.f32 %v6467_v57, 0.0  ;;  %v6458_v1 = vadd.f32 %v12675_v33, %v6433_v22 }
 0xdbe   : > { %v12695_v12 = vmax.f32 %v6468_v34, 0.0  ;;  %v12697_v19 = vmax.f32 %v6469_v4, 0.0  ;;  %v12699_v24 = vmax.f32 %v6470_v40, 0.0  ;;  %v6459_v2 = vadd.f32 %v12675_v33, %v6434_v0 }
 0xdbf   : > { %v8401_v51 = vpop.eup %8400  ;;  %v6524_v23 = vrot.slane %v12688_v10, 1  ;;  %v6526_v9 = vrot.slane %v12692_v21, 7  ;;  %v6635_v46 = vrot.slane %v12690_v56, 7  ;;  %v6637_v7 = vrot.slane %v12692_v21, 6 }
 0xdc0   : > { %v6421_v18 = vmul.f32 %v8401_v51, %v12609_v32  ;;  %v6528_v52 = vrot.slane %v12695_v12, 6  ;;  %v6530_v37 = vrot.slane %v12697_v19, 5  ;;  %v6532_v55 = vrot.slane %v12699_v24, 4 }
 0xdc1   : > { %v6525_v62 = vsel %vm4164_vm13, %v12690_v56, %v6524_v23  ;;  %v6636_v29 = vsel %vm4164_vm13, %v6635_v46, %v12688_v10  ;;  %v6639_v63 = vrot.slane %v12695_v12, 5  ;;  %v6641_v31 = vrot.slane %v12697_v19, 4 }
 0xdc2   : > { %v6446_v5 = vmul.f32 %v12661_v41, %v6421_v18  ;;  %v6527_v32 = vsel %vm4166_vm4, %v6526_v9, %v6525_v62  ;;  %v6638_v50 = vsel %vm4166_vm4, %v6637_v7, %v6636_v29  ;;  %v6643_v20 = vrot.slane %v12699_v24, 3  ;;  %v12786_v29 = vld [vmem:[%s13095_s18 + $0x38] sm:$0xff] }
 0xdc3   : > { %v8403_v39 = vpop.eup %8402  ;;  %v6529_v47 = vsel %vm4168_vm7, %v6528_v52, %v6527_v32  ;;  %v6640_v53 = vsel %vm4168_vm7, %v6639_v63, %v6638_v50  ;;  %v6461_v49 = vadd.f32 %v12675_v33, %v6436_v26  ;;  %v6462_v11 = vadd.f32 %v12675_v33, %v6437_v44  ;;  %8086 = vmatprep.subr.mxu1 %v12786_v29 }
 0xdc4   : > { %v8405_v13 = vpop.eup %8404  ;;  %v6410_v42 = vmul.f32 %v8403_v39, %v12591_v30  ;;  %v6471_v48 = vadd.f32 %v12675_v33, %v6446_v5  ;;  %v6531_v45 = vsel %vm4170_vm0, %v6530_v37, %v6529_v47  ;;  %v6642_v58 = vsel %vm4170_vm0, %v6641_v31, %v6640_v53 }
 0xdc5   : > { %v6422_v14 = vmul.f32 %v8405_v13, %v12620_v59  ;;  %v6533_v3 = vsel %vm4172_vm1, %v6532_v55, %v6531_v45  ;;  %v6644_v17 = vsel %vm4172_vm1, %v6643_v20, %v6642_v58  ;;  %v6463_v28 = vadd.f32 %v12675_v33, %v6438_v16 }
 0xdc6   : > { %v12741_v30 = vmax.f32 %v6471_v48, 0.0  ;;  %v6435_v43 = vmul.f32 %v12661_v41, %v6410_v42  ;;  %v12744_v36 = vmax.f32 %v6457_v60, 0.0  ;;  %v12746_v25 = vmax.f32 %v6458_v1, 0.0 }
 0xdc7   : > { %v6447_v35 = vmul.f32 %v12661_v41, %v6422_v14  ;;  %v12749_v54 = vmax.f32 %v6459_v2, 0.0  ;;  %v12751_v59 = vmax.f32 %v6461_v49, 0.0  ;;  %v12753_v22 = vmax.f32 %v6462_v11, 0.0 }
 0xdc8   : > { %v8407_v0 = vpop.eup %8406  ;;  %v6534_v26 = vrot.slane %v12741_v30, 3  ;;  %v6645_v44 = vrot.slane %v12741_v30, 2  ;;  %v6460_v16 = vadd.f32 %v12675_v33, %v6435_v43  ;;  %v12758_v8 = vmax.f32 %v6463_v28, 0.0 }
 0xdc9   : > { %v6414_v61 = vmul.f32 %v8407_v0, %v12612_v6  ;;  %v6472_v57 = vadd.f32 %v12675_v33, %v6447_v35  ;;  %v6621_v34 = vrot.slane %v12746_v25, 7  ;;  %v6623_v4 = vrot.slane %v12749_v54, 6 }
 0xdca   : > { %v6535_v40 = vsel %vm4174_vm9, %v6534_v26, %v6533_v3  ;;  %v6646_v60 = vsel %vm4174_vm9, %v6645_v44, %v6644_v17  ;;  %v12766_v1 = vmax.f32 %v6460_v16, 0.0  ;;  %v6627_v2 = vrot.slane %v12751_v59, 4 }
 0xdcb   : > { %v6439_v51 = vmul.f32 %v12661_v41, %v6414_v61  ;;  %v12770_v23 = vmax.f32 %v6472_v57, 0.0  ;;  %v6622_v6 = vsel %vm4164_vm13, %v6621_v34, %v12744_v36  ;;  %v6629_v9 = vrot.slane %v12753_v22, 3 }
 0xdcc   : > { %v6624_v46 = vsel %vm4166_vm4, %v6623_v4, %v6622_v6  ;;  %v6625_v7 = vrot.slane %v12766_v1, 5  ;;  %v6631_v18 = vrot.slane %v12758_v8, 2  ;;  %v6749_v52 = vrot.slane %v12688_v10, 2 }
 0xdcd   : > { %v6536_v37 = vrot.slane %v12770_v23, 2  ;;  %v6647_v55 = vrot.slane %v12770_v23, 1  ;;  %v6464_v41 = vadd.f32 %v12675_v33, %v6439_v51  ;;  %v6750_v62 = vrot.slane %v12690_v56, 1 }
 0xdce   : > { %v6626_v63 = vsel %vm4168_vm7, %v6625_v7, %v6624_v46  ;;  %v6753_v31 = vrot.slane %v12695_v12, 7  ;;  %v6755_v5 = vrot.slane %v12697_v19, 6  ;;  %v6757_v32 = vrot.slane %v12699_v24, 5 }
 0xdcf   : > { %v6537_v50 = vsel %vm4176_vm10, %v6536_v37, %v6535_v40  ;;  %v6648_v33 = vsel %vm4176_vm10, %v6647_v55, %v6646_v60  ;;  %v12795_v20 = vmax.f32 %v6464_v41, 0.0  ;;  %v6628_v38 = vsel %vm4170_vm0, %v6627_v2, %v6626_v63 }
 0xdd0   : > { %6540 = vrot.lane.b32.xlu1 %v6537_v50, %s8436_s21  ;;  %v6630_v27 = vsel %vm4172_vm1, %v6629_v9, %v6628_v38  ;;  %v6751_v39 = vsel %vm4164_vm13, %v6750_v62, %v6749_v52  ;;  %v6759_v47 = vrot.slane %v12741_v30, 4  ;;  %v6761_v53 = vrot.slane %v12770_v23, 3 }
 0xdd1   : > { %v6632_v49 = vsel %vm4174_vm9, %v6631_v18, %v6630_v27  ;;  %v6633_v11 = vrot.slane %v12795_v20, 1  ;;  %v6752_v13 = vsel %vm4166_vm4, %v12692_v21, %v6751_v39  ;;  %v6735_v42 = vrot.slane %v12744_v36, 2 }
 0xdd2   : > { %v6754_v48 = vsel %vm4168_vm7, %v6753_v31, %v6752_v13  ;;  %v6736_v45 = vrot.slane %v12746_v25, 1  ;;  %v6739_v58 = vrot.slane %v12766_v1, 7  ;;  %v6741_v15 = vrot.slane %v12751_v59, 6 }
 0xdd3   : > { %v6634_v14 = vsel %vm4176_vm10, %v6633_v11, %v6632_v49  ;;  %v6756_v3 = vsel %vm4170_vm0, %v6755_v5, %v6754_v48  ;;  %v6743_v17 = vrot.slane %v12753_v22, 5  ;;  %v6745_v28 = vrot.slane %v12758_v8, 4  ;;  %v12862_v11 = vld [vmem:[%s13095_s18 + $0x28] sm:$0xff] }
 0xdd4   : > { %6651 = vrot.lane.b32.xlu1 %v6648_v33, %s8436_s21  ;;  %6649 = vrot.lane.b32.xlu0 %v6634_v14, %s8436_s21  ;;  %v6758_v43 = vsel %vm4172_vm1, %v6757_v32, %v6756_v3  ;;  %v6737_v35 = vsel %vm4164_vm13, %v6736_v45, %v6735_v42  ;;  %v6747_v0 = vrot.slane %v12795_v20, 3  ;;  %v6865_v26 = vrot.slane %v12688_v10, 3 }
 0xdd5   : > { %v6760_v44 = vsel %vm4174_vm9, %v6759_v47, %v6758_v43  ;;  %v6738_v16 = vsel %vm4166_vm4, %v12749_v54, %v6737_v35  ;;  %v6866_v61 = vrot.slane %v12690_v56, 2  ;;  %v6868_v57 = vrot.slane %v12692_v21, 1  ;;  %8079 = vmatprep.subr.mxu0 %v12862_v11 }
 0xdd6   : > { %v6762_v34 = vsel %vm4176_vm10, %v6761_v53, %v6760_v44  ;;  %v6740_v4 = vsel %vm4168_vm7, %v6739_v58, %v6738_v16  ;;  %v6871_v40 = vrot.slane %v12697_v19, 7  ;;  %v6873_v60 = vrot.slane %v12699_v24, 6 }
 0xdd7   : > { %v6742_v2 = vsel %vm4170_vm0, %v6741_v15, %v6740_v4  ;;  %v6867_v51 = vsel %vm4164_vm13, %v6866_v61, %v6865_v26  ;;  %v6875_v6 = vrot.slane %v12741_v30, 5  ;;  %v6877_v9 = vrot.slane %v12770_v23, 4 }
 0xdd8   : > { %6765 = vrot.lane.b32.xlu1 %v6762_v34, %s8436_s21  ;;  %v6744_v46 = vsel %vm4172_vm1, %v6743_v17, %v6742_v2  ;;  %v6869_v7 = vsel %vm4166_vm4, %v6868_v57, %v6867_v51  ;;  %v6851_v18 = vrot.slane %v12744_v36, 3  ;;  %v6852_v52 = vrot.slane %v12746_v25, 2 }
 0xdd9   : > { %v6746_v37 = vsel %vm4174_vm9, %v6745_v28, %v6744_v46  ;;  %v6870_v55 = vsel %vm4168_vm7, %v12695_v12, %v6869_v7  ;;  %v6854_v41 = vrot.slane %v12749_v54, 1  ;;  %v6857_v62 = vrot.slane %v12751_v59, 7 }
 0xdda   : > { %v6748_v63 = vsel %vm4176_vm10, %v6747_v0, %v6746_v37  ;;  %v6872_v31 = vsel %vm4170_vm0, %v6871_v40, %v6870_v55  ;;  %v6853_v5 = vsel %vm4164_vm13, %v6852_v52, %v6851_v18  ;;  %v6859_v32 = vrot.slane %v12753_v22, 6 }
 0xddb   : > { %6763 = vrot.lane.b32.xlu0 %v6748_v63, %s8436_s21  ;;  %v6874_v50 = vsel %vm4172_vm1, %v6873_v60, %v6872_v31  ;;  %v6855_v33 = vsel %vm4166_vm4, %v6854_v41, %v6853_v5  ;;  %v6861_v38 = vrot.slane %v12758_v8, 5  ;;  %v6863_v27 = vrot.slane %v12795_v20, 4 }
 0xddc   : > { %v6876_v39 = vsel %vm4174_vm9, %v6875_v6, %v6874_v50  ;;  %v6856_v47 = vsel %vm4168_vm7, %v12766_v1, %v6855_v33  ;;  %v6967_v53 = vrot.slane %v12744_v36, 4  ;;  %v6968_v49 = vrot.slane %v12746_v25, 3 }
 0xddd   : > { %v6878_v13 = vsel %vm4176_vm10, %v6877_v9, %v6876_v39  ;;  %v6858_v42 = vsel %vm4170_vm0, %v6857_v62, %v6856_v47  ;;  %v6970_v48 = vrot.slane %v12749_v54, 2  ;;  %v6972_v45 = vrot.slane %v12766_v1, 1 }
 0xdde   : > { %6881 = vrot.lane.b32.xlu1 %v6878_v13, %s8436_s21  ;;  %v6860_v58 = vsel %vm4172_vm1, %v6859_v32, %v6858_v42  ;;  %v6969_v15 = vsel %vm4164_vm13, %v6968_v49, %v6967_v53  ;;  %v6975_v14 = vrot.slane %v12753_v22, 7  ;;  %v6977_v3 = vrot.slane %v12758_v8, 6 }
 0xddf   : > { %v6862_v17 = vsel %vm4174_vm9, %v6861_v38, %v6860_v58  ;;  %v6971_v28 = vsel %vm4166_vm4, %v6970_v48, %v6969_v15  ;;  %v6979_v43 = vrot.slane %v12795_v20, 5  ;;  %v6510_v35 = vrot.slane %v12744_v36, 1 }
 0xde0   : > { %v6864_v0 = vsel %vm4176_vm10, %v6863_v27, %v6862_v17  ;;  %v6973_v26 = vsel %vm4168_vm7, %v6972_v45, %v6971_v28  ;;  %v6512_v44 = vrot.slane %v12749_v54, 7  ;;  %v6514_v16 = vrot.slane %v12766_v1, 6 }
 0xde1   : > { %6879 = vrot.lane.b32.xlu0 %v6864_v0, %s8436_s21  ;;  %v6974_v61 = vsel %vm4170_vm0, %v12751_v59, %v6973_v26  ;;  %v6511_v57 = vsel %vm4164_vm13, %v12746_v25, %v6510_v35  ;;  %v6516_v34 = vrot.slane %v12751_v59, 5  ;;  %v6518_v4 = vrot.slane %v12753_v22, 4 }
 0xde2   : > { %v6976_v40 = vsel %vm4172_vm1, %v6975_v14, %v6974_v61  ;;  %v6513_v60 = vsel %vm4166_vm4, %v6512_v44, %v6511_v57  ;;  %v6520_v2 = vrot.slane %v12758_v8, 3  ;;  %v6522_v51 = vrot.slane %v12795_v20, 2 }
 0xde3   : > { %v6978_v6 = vsel %vm4174_vm9, %v6977_v3, %v6976_v40  ;;  %v6515_v9 = vsel %vm4168_vm7, %v6514_v16, %v6513_v60  ;;  %v7083_v46 = vrot.slane %v12744_v36, 5  ;;  %v7084_v7 = vrot.slane %v12746_v25, 4 }
 0xde4   : > { %v6980_v18 = vsel %vm4176_vm10, %v6979_v43, %v6978_v6  ;;  %v6517_v52 = vsel %vm4170_vm0, %v6516_v34, %v6515_v9  ;;  %v7086_v37 = vrot.slane %v12749_v54, 3  ;;  %v7088_v55 = vrot.slane %v12766_v1, 2 }
 0xde5   : > { %6995 = vrot.lane.b32.xlu0 %v6980_v18, %s8436_s21  ;;  %v6519_v41 = vsel %vm4172_vm1, %v6518_v4, %v6517_v52  ;;  %v7085_v62 = vsel %vm4164_vm13, %v7084_v7, %v7083_v46  ;;  %v7090_v63 = vrot.slane %v12751_v59, 1  ;;  %v7093_v31 = vrot.slane %v12758_v8, 7 }
 0xde6   : > { %v6521_v5 = vsel %vm4174_vm9, %v6520_v2, %v6519_v41  ;;  %v7087_v32 = vsel %vm4166_vm4, %v7086_v37, %v7085_v62  ;;  %v7095_v50 = vrot.slane %v12795_v20, 6  ;;  %v6981_v33 = vrot.slane %v12688_v10, 4 }
 0xde7   : > { %v6523_v38 = vsel %vm4176_vm10, %v6522_v51, %v6521_v5  ;;  %v7089_v27 = vsel %vm4168_vm7, %v7088_v55, %v7087_v32  ;;  %v6982_v39 = vrot.slane %v12690_v56, 3  ;;  %v6984_v47 = vrot.slane %v12692_v21, 2 }
 0xde8   : > { %6538 = vrot.lane.b32.xlu1 %v6523_v38, %s8436_s21  ;;  %v7091_v53 = vsel %vm4170_vm0, %v7090_v63, %v7089_v27  ;;  %v6986_v49 = vrot.slane %v12695_v12, 1  ;;  %v6989_v13 = vrot.slane %v12699_v24, 7  ;;  %v6991_v42 = vrot.slane %v12741_v30, 6 }
 0xde9   : > { %v7092_v48 = vsel %vm4172_vm1, %v12753_v22, %v7091_v53  ;;  %v6983_v45 = vsel %vm4164_vm13, %v6982_v39, %v6981_v33  ;;  %v6993_v58 = vrot.slane %v12770_v23, 5  ;;  %v7199_v15 = vrot.slane %v12744_v36, 6 }
 0xdea   : > { %v7094_v14 = vsel %vm4174_vm9, %v7093_v31, %v7092_v48  ;;  %v6985_v3 = vsel %vm4166_vm4, %v6984_v47, %v6983_v45  ;;  %v7200_v17 = vrot.slane %v12746_v25, 5  ;;  %v7202_v28 = vrot.slane %v12749_v54, 4 }
 0xdeb   : > { %v7096_v43 = vsel %vm4176_vm10, %v7095_v50, %v7094_v14  ;;  %v6987_v35 = vsel %vm4168_vm7, %v6986_v49, %v6985_v3  ;;  %v7204_v0 = vrot.slane %v12766_v1, 3  ;;  %v7206_v26 = vrot.slane %v12751_v59, 2 }
 0xdec   : > { %7111 = vrot.lane.b32.xlu0 %v7096_v43, %s8436_s21  ;;  %v6988_v44 = vsel %vm4170_vm0, %v12697_v19, %v6987_v35  ;;  %v7201_v16 = vsel %vm4164_vm13, %v7200_v17, %v7199_v15  ;;  %v7208_v61 = vrot.slane %v12753_v22, 1  ;;  %v7211_v57 = vrot.slane %v12795_v20, 7 }
 0xded   : > { %v6990_v34 = vsel %vm4172_vm1, %v6989_v13, %v6988_v44  ;;  %v7203_v4 = vsel %vm4166_vm4, %v7202_v28, %v7201_v16  ;;  %v7097_v40 = vrot.slane %v12688_v10, 5  ;;  %v7098_v60 = vrot.slane %v12690_v56, 4 }
 0xdee   : > { %v6992_v2 = vsel %vm4174_vm9, %v6991_v42, %v6990_v34  ;;  %v7205_v51 = vsel %vm4168_vm7, %v7204_v0, %v7203_v4  ;;  %v7100_v6 = vrot.slane %v12692_v21, 3  ;;  %v7102_v9 = vrot.slane %v12695_v12, 2 }
 0xdef   : > { %v6994_v46 = vsel %vm4176_vm10, %v6993_v58, %v6992_v2  ;;  %v7207_v7 = vsel %vm4170_vm0, %v7206_v26, %v7205_v51  ;;  %v7099_v18 = vsel %vm4164_vm13, %v7098_v60, %v7097_v40  ;;  %v7104_v52 = vrot.slane %v12697_v19, 1 }
 0xdf0   : > { %6997 = vrot.lane.b32.xlu1 %v6994_v46, %s8436_s21  ;;  %v7209_v37 = vsel %vm4172_vm1, %v7208_v61, %v7207_v7  ;;  %v7101_v55 = vsel %vm4166_vm4, %v7100_v6, %v7099_v18  ;;  %v7107_v41 = vrot.slane %v12741_v30, 7  ;;  %v7109_v62 = vrot.slane %v12770_v23, 6  ;;  %v7735_v46 = vld [vmem:[%s13095_s18 + $0x58] sm:$0xff] }
 0xdf1   : > { %v7210_v63 = vsel %vm4174_vm9, %v12758_v8, %v7209_v37  ;;  %v7103_v31 = vsel %vm4168_vm7, %v7102_v9, %v7101_v55  ;;  %v7315_v5 = vrot.slane %v12744_v36, 7  ;;  %v7316_v32 = vrot.slane %v12746_v25, 6  ;;  %v7734_v37 = vld [vmem:[%s13095_s18 + $0x50] sm:$0xff] }
 0xdf2   : > { %v7212_v50 = vsel %vm4176_vm10, %v7211_v57, %v7210_v63  ;;  %v7105_v33 = vsel %vm4170_vm0, %v7104_v52, %v7103_v31  ;;  %v7318_v38 = vrot.slane %v12749_v54, 5  ;;  %v7320_v27 = vrot.slane %v12766_v1, 4  ;;  %v7731_v63 = vld [vmem:[%s13095_s18 + $0x48] sm:$0xff] }
 0xdf3   : > { %7227 = vrot.lane.b32.xlu0 %v7212_v50, %s8436_s21  ;;  %v7106_v39 = vsel %vm4172_vm1, %v12699_v24, %v7105_v33  ;;  %v7317_v47 = vsel %vm4164_vm13, %v7316_v32, %v7315_v5  ;;  %v7322_v53 = vrot.slane %v12751_v59, 3  ;;  %v7324_v49 = vrot.slane %v12753_v22, 2  ;;  %v7730_v5 = vld [vmem:[%s13095_s18 + $0x40] sm:$0xff] }
 0xdf4   : > { %v7108_v36 = vsel %vm4174_vm9, %v7107_v41, %v7106_v39  ;;  %v7319_v25 = vsel %vm4166_vm4, %v7318_v38, %v7317_v47  ;;  %v7213_v13 = vrot.slane %v12688_v10, 6  ;;  %v7214_v42 = vrot.slane %v12690_v56, 5  ;;  %v7738_v50 = vld [vmem:[%s13095_s18 + $0x60] sm:$0xff] }
 0xdf5   : > { %v7110_v54 = vsel %vm4176_vm10, %v7109_v62, %v7108_v36  ;;  %v7321_v1 = vsel %vm4168_vm7, %v7320_v27, %v7319_v25  ;;  %v7216_v48 = vrot.slane %v12692_v21, 4  ;;  %v7326_v45 = vrot.slane %v12758_v8, 1  ;;  %v7722_v62 = vld [vmem:[%s13095_s18 + $0x20] sm:$0xff]  ;;  %v7742_v27 = vld [vmem:[%s13095_s18 + $0x70] sm:$0xff] }
 0xdf6   : > { %7113 = vrot.lane.b32.xlu1 %v7110_v54, %s8436_s21  ;;  %v7323_v59 = vsel %vm4170_vm0, %v7322_v53, %v7321_v1  ;;  %v7218_v58 = vrot.slane %v12695_v12, 3  ;;  %v7215_v15 = vsel %vm4164_vm13, %v7214_v42, %v7213_v13  ;;  %v7220_v14 = vrot.slane %v12697_v19, 2 }
 0xdf7   : > { %v7325_v22 = vsel %vm4172_vm1, %v7324_v49, %v7323_v59  ;;  %v7329_v3 = vrot.slane %v12688_v10, 7  ;;  %v7217_v28 = vsel %vm4166_vm4, %v7216_v48, %v7215_v15  ;;  %v7330_v43 = vrot.slane %v12690_v56, 6 }
 0xdf8   : > { %v7327_v17 = vsel %vm4174_vm9, %v7326_v45, %v7325_v22  ;;  %v7332_v35 = vrot.slane %v12692_v21, 5  ;;  %v7219_v0 = vsel %vm4168_vm7, %v7218_v58, %v7217_v28  ;;  %v7222_v26 = vrot.slane %v12699_v24, 1 }
 0xdf9   : > { %v7328_v8 = vsel %vm4176_vm10, %v12795_v20, %v7327_v17  ;;  %v7225_v44 = vrot.slane %v12770_v23, 7  ;;  %v7221_v10 = vsel %vm4170_vm0, %v7220_v14, %v7219_v0  ;;  %v7331_v16 = vsel %vm4164_vm13, %v7330_v43, %v7329_v3 }
 0xdfa   : > { %7343 = vrot.lane.b32.xlu0 %v7328_v8, %s8436_s21  ;;  %v7334_v61 = vrot.slane %v12695_v12, 4  ;;  %v7223_v56 = vsel %vm4172_vm1, %v7222_v26, %v7221_v10  ;;  %v7333_v21 = vsel %vm4166_vm4, %v7332_v35, %v7331_v16  ;;  %v7336_v20 = vrot.slane %v12697_v19, 3 }
 0xdfb   : > { %v7224_v57 = vsel %vm4174_vm9, %v12741_v30, %v7223_v56  ;;  %v7340_v4 = vrot.slane %v12741_v30, 1  ;;  %v7338_v2 = vrot.slane %v12699_v24, 2  ;;  %v7726_v24 = vld [vmem:[%s13095_s18 + $0x30] sm:$0xff] }
 0xdfc   : > { %v7335_v34 = vsel %vm4168_vm7, %v7334_v61, %v7333_v21  ;;  %v7226_v40 = vsel %vm4176_vm10, %v7225_v44, %v7224_v57  ;;  %v7746_v21 = vld [vmem:[%s13096_s19] ss:$0 sm:$0xff] }
 0xdfd   : > { %v7337_v60 = vsel %vm4170_vm0, %v7336_v20, %v7335_v34  ;;  %7229 = vrot.lane.b32.xlu1 %v7226_v40, %s8436_s21 }
 0xdfe   : > { %v7339_v12 = vsel %vm4172_vm1, %v7338_v2, %v7337_v60 }
 0xdff   : > { %v7341_v51 = vsel %vm4174_vm9, %v7340_v4, %v7339_v12  ;;  %v13358_v12 = vld [vmem:[#allocation3_spill] sm:$0xff] }
 0xe00   : > { %v7342_v19 = vsel %vm4176_vm10, %v12770_v23, %v7341_v51 }
 0xe01   : > { %7345 = vrot.lane.b32.xlu1 %v7342_v19, %s8436_s21  ;;  %v13359_v19 = vld [vmem:[#allocation2_spill] sm:$0xff] }
 0xe42   : > { %v6541_v6 = vpop.permute.xlu1 %6540 }
 0xe46   : > { %v6652_v9 = vpop.permute.xlu1 %6651  ;;  %v6650_v30 = vpop.permute.xlu0 %6649 }
 0xe47   : > { %8076 = vmatprep.mubr.msk.f32.mxu1 %vm3127_vm2, %v6650_v30 }
 0xe48   : > { %8077 = vmatmul.mubr.msk.f32.vlgmr.msra.gmra.mxu1 %vm3127_vm2, %v6652_v9 }
 0xe49   : > { %8087 = vmatpush3.msra.mxu1 %v12786_v29  ;;  %v7743_v29 = vld [vmem:[%s13095_s18 + $0x78] sm:$0xff] }
 0xe4a   : > { %8088 = vmatprep.subr.mxu1 %v7726_v24  ;;  %v6766_v23 = vpop.permute.xlu1 %6765 }
 0xe4b   : > { %8089 = vmatpush3.msra.mxu1 %v7726_v24 }
 0xe4c   : > { %8100 = vmatprep.subr.mxu1 %v7735_v46 }
 0xe4d   : > { %v6764_v7 = vpop.permute.xlu0 %6763 }
 0xe50   : > { %v6882_v18 = vpop.permute.xlu1 %6881 }
 0xe53   : > { %v6880_v52 = vpop.permute.xlu0 %6879 }
 0xe54   : > { %8090 = vmatprep.mubr.msk.f32.mxu1 %vm3127_vm2, %v6880_v52 }
 0xe55   : > { %8091 = vmatmul.mubr.msk.f32.vlgmr.msra.gmra.mxu1 %vm3127_vm2, %v6882_v18 }
 0xe56   : > { %8101 = vmatpush3.msra.mxu1 %v7735_v46 }
 0xe57   : > { %8102 = vmatprep.subr.mxu1 %v7734_v37  ;;  %v6996_v55 = vpop.permute.xlu0 %6995 }
 0xe58   : > { %8103 = vmatpush3.msra.mxu1 %v7734_v37 }
 0xe59   : > { %8114 = vmatprep.subr.mxu1 %v7743_v29 }
 0xe5a   : > { %v6539_v41 = vpop.permute.xlu1 %6538 }
 0xe5b   : > { %8069 = vmatprep.mubr.msk.f32.mxu0 %vm3127_vm2, %v6539_v41 }
 0xe5c   : > { %8070 = vmatmul.mubr.msk.f32.vlgmr.msra.gmra.mxu0 %vm3127_vm2, %v6541_v6 }
 0xe5d   : > { %8080 = vmatpush3.msra.mxu0 %v12862_v11  ;;  %8083 = vmatprep.mubr.msk.f32.mxu0 %vm3127_vm2, %v6764_v7  ;;  %v7739_v11 = vld [vmem:[%s13095_s18 + $0x68] sm:$0xff] }
 0xe5e   : > { %v7112_v31 = vpop.permute.xlu0 %7111  ;;  %8081 = vmatprep.subr.mxu0 %v7722_v62 }
 0xe5f   : > { %8082 = vmatpush3.msra.mxu0 %v7722_v62  ;;  %8104 = vmatprep.mubr.msk.f32.mxu1 %vm3127_vm2, %v7112_v31 }
 0xe60   : > { %8084 = vmatmul.mubr.msk.f32.vlgmr.msra.gmra.mxu0 %vm3127_vm2, %v6766_v23  ;;  %8093 = vmatprep.subr.mxu0 %v7731_v63 }
 0xe61   : > { %8094 = vmatpush3.msra.mxu0 %v7731_v63  ;;  %8097 = vmatprep.mubr.msk.f32.mxu0 %vm3127_vm2, %v6996_v55 }
 0xe62   : > { %v6998_v32 = vpop.permute.xlu1 %6997  ;;  %8095 = vmatprep.subr.mxu0 %v7730_v5 }
 0xe63   : > { %8096 = vmatpush3.msra.mxu0 %v7730_v5 }
 0xe64   : > { %8098 = vmatmul.mubr.msk.f32.vlgmr.msra.gmra.mxu0 %vm3127_vm2, %v6998_v32  ;;  %8107 = vmatprep.subr.mxu0 %v7739_v11 }
 0xe65   : > { %v7228_v33 = vpop.permute.xlu0 %7227  ;;  %8108 = vmatpush3.msra.mxu0 %v7739_v11 }
 0xe66   : > { %8111 = vmatprep.mubr.msk.f32.mxu0 %vm3127_vm2, %v7228_v33  ;;  %8109 = vmatprep.subr.mxu0 %v7738_v50 }
 0xe67   : > { %8110 = vmatpush3.msra.mxu0 %v7738_v50 }
 0xe68   : > { %v7114_v38 = vpop.permute.xlu1 %7113 }
 0xe69   : > { %8105 = vmatmul.mubr.msk.f32.vlgmr.msra.gmra.mxu1 %vm3127_vm2, %v7114_v38 }
 0xe6a   : > { %8115 = vmatpush3.msra.mxu1 %v7743_v29 }
 0xe6b   : > { %8116 = vmatprep.subr.mxu1 %v7742_v27 }
 0xe6c   : > { %v7344_v39 = vpop.permute.xlu0 %7343  ;;  %8117 = vmatpush3.msra.mxu1 %v7742_v27 }
 0xe6d   : > { %8118 = vmatprep.mubr.msk.f32.mxu1 %vm3127_vm2, %v7344_v39 }
 0xe6f   : > { %v7230_v47 = vpop.permute.xlu1 %7229 }
 0xe70   : > { %8112 = vmatmul.mubr.msk.f32.vlgmr.msra.gmra.mxu0 %vm3127_vm2, %v7230_v47 }
 0xe73   : > { %v7346_v53 = vpop.permute.xlu1 %7345 }
 0xe74   : > { %8119 = vmatmul.mubr.msk.f32.vlgmr.msra.gmra.mxu1 %vm3127_vm2, %v7346_v53 }
 0xf08   : > { %v8078_v25 = vpop.f32.mrf.mxu1 }
 0xf0a   : > { %v6723_v1 = vpop.f32.mrf.mxu1 }
 0xf15   : > { %v8092_v45 = vpop.f32.mrf.mxu1 }
 0xf17   : > { %v6953_v14 = vpop.f32.mrf.mxu1 }
 0xf1c   : > { %v8071_v36 = vpop.f32.mrf.mxu0 }
 0xf1d   : > { %v6729_v13 = vadd.f32 %v8078_v25, %v8071_v36 }
 0xf1e   : > { %v6612_v49 = vpop.f32.mrf.mxu0 }
 0xf1f   : > { %v6724_v42 = vadd.f32 %v6723_v1, %v6612_v49 }
 0xf20   : > { %v8085_v54 = vpop.f32.mrf.mxu0 }
 0xf21   : > { %v6847_v48 = vadd.f32 %v8085_v54, %v6729_v13 }
 0xf22   : > { %v6837_v59 = vpop.f32.mrf.mxu0 }
 0xf23   : > { %v6846_v58 = vadd.f32 %v6837_v59, %v6724_v42  ;;  %v6963_v15 = vadd.f32 %v8092_v45, %v6847_v48 }
 0xf24   : > { %v8099_v22 = vpop.f32.mrf.mxu0 }
 0xf25   : > { %v6962_v3 = vadd.f32 %v6953_v14, %v6846_v58  ;;  %v7079_v28 = vadd.f32 %v8099_v22, %v6963_v15 }
 0xf26   : > { %v7069_v17 = vpop.f32.mrf.mxu0 }
 0xf27   : > { %v7078_v35 = vadd.f32 %v7069_v17, %v6962_v3 }
 0xf29   : > { %v8106_v43 = vpop.f32.mrf.mxu1 }
 0xf2a   : > { %v7195_v8 = vadd.f32 %v8106_v43, %v7079_v28 }
 0xf2b   : > { %v7185_v0 = vpop.f32.mrf.mxu1 }
 0xf2c   : > { %v7194_v26 = vadd.f32 %v7185_v0, %v7078_v35 }
 0xf30   : > { %v8113_v44 = vpop.f32.mrf.mxu0 }
 0xf31   : > { %v7311_v10 = vadd.f32 %v8113_v44, %v7195_v8 }
 0xf32   : > { %v7301_v16 = vpop.f32.mrf.mxu0 }
 0xf33   : > { %v7310_v61 = vadd.f32 %v7301_v16, %v7194_v26 }
 0xf34   : > { %v8120_v56 = vpop.f32.mrf.mxu1 }
 0xf35   : > { %v7427_v20 = vadd.f32 %v8120_v56, %v7311_v10 }
 0xf36   : > { %v7417_v57 = vpop.f32.mrf.mxu1 }
 0xf37   : > { %v7436_v34 = vadd.f32 %v7746_v21, %v7427_v20  ;;  %v7426_v4 = vadd.f32 %v7417_v57, %v7310_v61 }
 0xf39   : > { %v7438_v40 = vmax.f32 %v7436_v34, 0.0  ;;  %v7435_v60 = vadd.f32 %v7746_v21, %v7426_v4 }
 0xf3b   : > { %v7437_v2 = vmax.f32 %v7435_v60, 0.0  ;;  %v7442_v51 = vadd.f32 %v7438_v40, %v13358_v12 }
 0xf3d   : > { %v7441_v6 = vadd.f32 %v7437_v2, %v13359_v19  ;;  %v7444_v30 = vmax.f32 %v7442_v51, 0.0 }
 0xf3f   : > { %v7443_v9 = vmax.f32 %v7441_v6, 0.0  ;;  %7446 = vst.msk [vmem:[%s653_s26 + $0x8] sm:$0xff] %vm3127_vm2, %v7444_v30 }
 0xf41   : > { %7445 = vst.msk [vmem:[%s653_s26] sm:$0xff] %vm3127_vm2, %v7443_v9 }
 0xf42 PF: > { %s30_s1 = sadd.s32 1, %s8420_s1  }
 0xf43   : > { %p27_p5 = scmp.ge.s32.totalorder %s30_s1, 4  }
 0xf45   :  { %29 = sbr.rel (!%p27_p5) target bundleno = 6 (0x6), region = 144 }

</bundles_post_ra>
